<compile_context>
chip_gen: v7x
topology: tpu7x:2x2x1
jax: 0.10.0
libtpu: 0.0.40
codegen_flags: <defaults>
</compile_context>

<pallas_src>
import functools

import jax
import jax.numpy as jnp
from jax import lax
from jax.experimental import pallas as pl
from jax.experimental.pallas import tpu as pltpu


def _round_up(x, m):
    return ((x + m - 1) // m) * m


def _make_fused_kernel(H, W, Cp, cout_real, use_pixelnorm):
    """Fused ConvBlock kernel for one batch element (grid axis = batch).

    Activation layout inside the kernel: flat rows of the zero-padded image,
    row r = i*(W+2) + j  <->  x_pad[i, j], channels (padded to Cp) on lanes.
    """
    Q = W + 2                    # padded image width
    HQ = H * Q                   # flat rows of the conv output (incl. 2 garbage cols/row)
    inv_cout = 1.0 / float(cout_real)

    def kernel(x_ref, w1_ref, b1_ref, w2_ref, b2_ref, w3_ref, b3_ref,
               o_ref, xp_ref, patch_ref):
        # Bring the pre-padded image into the f32 activation scratch.  The wrapper baked
        # the zero halo into x, so no separate buffer zeroing is needed (multicore-safe).
        xp_ref[...] = x_ref[0].astype(jnp.float32)

        # Column index of each flat row: r -> w = r % Q.  Columns w >= W are conv
        # wrap-around garbage; they land exactly on halo cells and must carry zeros.
        col = lax.broadcasted_iota(jnp.int32, (HQ, Cp), 0) % Q
        keep = col < W

        def conv_layer(w_ref, b_ref):
            # im2col staging (bf16): tap (dy,dx) of output row r is x_pad flat row
            # r + dy*Q + dx, i.e. a plain row-offset slice of the flat activation.
            for dy in range(3):
                for dx in range(3):
                    k = dy * 3 + dx
                    patch_ref[:, k * Cp:(k + 1) * Cp] = (
                        xp_ref[pl.ds(dy * Q + dx, HQ), :].astype(jnp.bfloat16))

            # Single MXU contraction, K = 9*Cp (tap accumulation stays inside the MXU),
            # bf16 x bf16 -> f32 accumulate.
            y = jnp.dot(patch_ref[...], w_ref[...],
                        preferred_element_type=jnp.float32)
            y = y + b_ref[...]                       # bias (1, Cp) broadcast, f32
            y = jnp.maximum(y, 0.2 * y)              # LeakyReLU(0.2): single vmax
            if use_pixelnorm:
                # PixelNorm over channels; padded lanes are exactly zero so the sum
                # is exact; divide by the REAL channel count.
                ss = jnp.sum(y * y, axis=-1, keepdims=True)
                y = y * lax.rsqrt(ss * inv_cout + 1e-8)
            return y

        def write_back(y):
            # Flat row r=(h,w) of y belongs at x_pad[h+1, w+1] = flat row r + Q + 1.
            # Garbage columns (w >= W) map exactly onto halo cells -> store zeros there,
            # which keeps the halo invariant for the next layer.
            xp_ref[pl.ds(Q + 1, HQ), :] = jnp.where(keep, y, 0.0)

        write_back(conv_layer(w1_ref, b1_ref))       # layer 1 (stays in VMEM)
        write_back(conv_layer(w2_ref, b2_ref))       # layer 2 (stays in VMEM)
        y = conv_layer(w3_ref, b3_ref)               # layer 3
        o_ref[0] = y.astype(o_ref.dtype)             # lane-dense flat store; wrapper
                                                     # strips the 2 garbage cols per row.

    return kernel


def _fold_weight(w_oihw, scale, cp):
    """(Cout, Cin, 3, 3) PyTorch weight -> WSConv2d-scaled, zero-padded (9*cp, cp) bf16
    matrix whose K order matches the kernel's im2col order (dy, dx, cin)."""
    cout, cin, kh, kw = w_oihw.shape
    w = w_oihw.astype(jnp.float32) * scale                 # WSConv2d scale folded here
    w = jnp.transpose(w, (2, 3, 1, 0))                     # (kh, kw, Cin, Cout)
    w = jnp.pad(w, ((0, 0), (0, 0), (0, cp - cin), (0, cp - cout)))
    return w.reshape(kh * kw * cp, cp).astype(jnp.bfloat16)


def _fold_bias(b, cp):
    return jnp.pad(b.astype(jnp.float32), (0, cp - b.shape[0])).reshape(1, cp)


def init_conv_block_params(key, in_channels, out_channels):
    """Matches ConvBlock.__init__: conv weights ~ N(0,1) (OIHW), biases = 0,
    scale = sqrt(gain / (Cin * k^2)) with gain=2, k=3."""
    k1, k2, k3 = jax.random.split(key, 3)

    def scale(cin):
        return float((2.0 / (cin * 9)) ** 0.5)

    return {
        "w1": jax.random.normal(k1, (out_channels, in_channels, 3, 3), jnp.float32),
        "b1": jnp.zeros((out_channels,), jnp.float32),
        "s1": scale(in_channels),
        "w2": jax.random.normal(k2, (out_channels, out_channels, 3, 3), jnp.float32),
        "b2": jnp.zeros((out_channels,), jnp.float32),
        "s2": scale(out_channels),
        "w3": jax.random.normal(k3, (out_channels, out_channels, 3, 3), jnp.float32),
        "b3": jnp.zeros((out_channels,), jnp.float32),
        "s3": scale(out_channels),
    }


@functools.partial(jax.jit, static_argnames=("use_pixelnorm",))
def conv_block_forward(x_nchw, params, use_pixelnorm=True):
    """ConvBlock forward.  Input/output in NCHW (PyTorch convention)."""
    N, Cin, H, W = x_nchw.shape
    Cout = params["w1"].shape[0]
    assert H % 8 == 0 and W % 8 == 0, "H and W must be multiples of 8"
    Cp = _round_up(max(Cin, Cout), 128)      # lane-dense channel width

    P = H + 3                                # 1 top halo + H rows + 1 bottom halo + 1 slack
    Q = W + 2
    HQ = H * Q
    PQr = _round_up(P * Q, 8)                # flat padded rows, rounded to sublane multiple

    # One fused XLA segment: NCHW -> NHWC, zero halo + channel pad, flatten rows, bf16.
    x = jnp.transpose(x_nchw, (0, 2, 3, 1)).astype(jnp.float32)
    x = jnp.pad(x, ((0, 0), (1, 2), (1, 1), (0, Cp - Cin)))        # (N, P, Q, Cp)
    x = x.reshape(N, P * Q, Cp)
    if PQr != P * Q:
        x = jnp.pad(x, ((0, 0), (0, PQr - P * Q), (0, 0)))
    x = x.astype(jnp.bfloat16)

    w1 = _fold_weight(params["w1"], params["s1"], Cp)
    b1 = _fold_bias(params["b1"], Cp)
    w2 = _fold_weight(params["w2"], params["s2"], Cp)
    b2 = _fold_bias(params["b2"], Cp)
    w3 = _fold_weight(params["w3"], params["s3"], Cp)
    b3 = _fold_bias(params["b3"], Cp)

    kernel = _make_fused_kernel(H, W, Cp, Cout, use_pixelnorm)

    # Explicit VMEM budget: patch (bf16) + xp (f32) + double-buffered in/out +
    # single-buffered weights/biases, plus headroom for compiler temps.
    bytes_patch = HQ * 9 * Cp * 2
    bytes_xp = PQr * Cp * 4
    bytes_in = 2 * PQr * Cp * 2
    bytes_out = 2 * HQ * Cp * 4
    bytes_w = 3 * (9 * Cp * Cp * 2 + Cp * 4)
    footprint = bytes_patch + bytes_xp + bytes_in + bytes_out + bytes_w
    vmem_limit = int(min(footprint * 3 // 2 + (4 << 20), 96 << 20))

    const_spec = dict(pipeline_mode=pl.Buffered(buffer_count=1))   # grid-invariant args

    out = pl.pallas_call(
        kernel,
        out_shape=jax.ShapeDtypeStruct((N, HQ, Cp), jnp.float32),
        grid_spec=pltpu.PrefetchScalarGridSpec(
            num_scalar_prefetch=0,
            grid=(N,),
            in_specs=[
                pl.BlockSpec((1, PQr, Cp), lambda n: (n, 0, 0)),                 # x
                pl.BlockSpec((9 * Cp, Cp), lambda n: (0, 0), **const_spec),      # w1
                pl.BlockSpec((1, Cp), lambda n: (0, 0), **const_spec),           # b1
                pl.BlockSpec((9 * Cp, Cp), lambda n: (0, 0), **const_spec),      # w2
                pl.BlockSpec((1, Cp), lambda n: (0, 0), **const_spec),           # b2
                pl.BlockSpec((9 * Cp, Cp), lambda n: (0, 0), **const_spec),      # w3
                pl.BlockSpec((1, Cp), lambda n: (0, 0), **const_spec),           # b3
            ],
            out_specs=pl.BlockSpec((1, HQ, Cp), lambda n: (n, 0, 0)),
            scratch_shapes=[
                pltpu.VMEM((PQr, Cp), jnp.float32),       # flat padded activation (f32)
                pltpu.VMEM((HQ, 9 * Cp), jnp.bfloat16),   # im2col patch matrix (bf16)
            ],
        ),
        compiler_params=pltpu.CompilerParams(
            dimension_semantics=("parallel",),
            vmem_limit_bytes=vmem_limit,
        ),
    )(x, w1, b1, w2, b2, w3, b3)

    # Strip the per-row garbage columns and channel padding, back to NCHW.
    out = out.reshape(N, H, Q, Cp)[:, :, :W, :Cout]
    return jnp.transpose(out, (0, 3, 1, 2))


def _reference_forward(x_nchw, params, use_pixelnorm=True):
    """Pure-JAX f32 reference matching the PyTorch module (NCHW / OIHW)."""
    def layer(x, w, b, s):
        y = lax.conv_general_dilated(
            x * s, w, window_strides=(1, 1), padding=((1, 1), (1, 1)),
            dimension_numbers=("NCHW", "OIHW", "NCHW"),
            precision=lax.Precision.HIGHEST)
        y = y + b[None, :, None, None]
        y = jnp.where(y > 0, y, 0.2 * y)
        if use_pixelnorm:
            y = y / jnp.sqrt(jnp.mean(y * y, axis=1, keepdims=True) + 1e-8)
        return y

    x = layer(x_nchw, params["w1"], params["b1"], params["s1"])
    x = layer(x, params["w2"], params["b2"], params["s2"])
    x = layer(x, params["w3"], params["b3"], params["s3"])
    return x


if __name__ == "__main__":
    key = jax.random.PRNGKey(0)
    k_x, k_p = jax.random.split(key)

    N, C_in, C_out, HW = 2, 4, 8, 16
    x = jax.random.normal(k_x, (N, C_in, HW, HW), jnp.float32)   # NCHW, like PyTorch
    params = init_conv_block_params(k_p, C_in, C_out)

    out = jax.block_until_ready(conv_block_forward(x, params, use_pixelnorm=True))

    ref = _reference_forward(x, params, use_pixelnorm=True)
    assert out.shape == (N, C_out, HW, HW)
    err = float(jnp.max(jnp.abs(out - ref)))
    # bf16 matmul operands / bf16 weights vs. an f32 HIGHEST reference -> loosened tol.
    assert jnp.allclose(out, ref, atol=5e-2, rtol=5e-2), f"max abs err = {err}"

    print("KERNEL_OK")
</pallas_src>

<mosaic_0001>
module attributes {stable_mosaic.version = 11 : i64} {
  func.func @kernel(%arg0: i32, %arg1: memref<1x344x128xbf16, #tpu.memory_space<vmem>>, %arg2: memref<1152x128xbf16, #tpu.memory_space<vmem>>, %arg3: memref<1x128xf32, #tpu.memory_space<vmem>>, %arg4: memref<1152x128xbf16, #tpu.memory_space<vmem>>, %arg5: memref<1x128xf32, #tpu.memory_space<vmem>>, %arg6: memref<1152x128xbf16, #tpu.memory_space<vmem>>, %arg7: memref<1x128xf32, #tpu.memory_space<vmem>>, %arg8: memref<1x288x128xf32, #tpu.memory_space<vmem>>, %arg9: memref<344x128xf32, #tpu.memory_space<vmem>>, %arg10: memref<288x1152xbf16, #tpu.memory_space<vmem>>) attributes {dimension_semantics = [#tpu.dimension_semantics<parallel>], iteration_bounds = array<i64: 2>, scalar_prefetch = 0 : i64, scratch_operands = 2 : i64, tpu.core_type = #tpu.core_type<tc>, window_params = [{transform_indices = @transform_0, window_bounds = array<i64: 1, 344, 128>}, {pipeline_mode = #tpu.pipeline_mode<synchronous>, transform_indices = @transform_1, window_bounds = array<i64: 1152, 128>}, {pipeline_mode = #tpu.pipeline_mode<synchronous>, transform_indices = @transform_2, window_bounds = array<i64: 1, 128>}, {pipeline_mode = #tpu.pipeline_mode<synchronous>, transform_indices = @transform_3, window_bounds = array<i64: 1152, 128>}, {pipeline_mode = #tpu.pipeline_mode<synchronous>, transform_indices = @transform_4, window_bounds = array<i64: 1, 128>}, {pipeline_mode = #tpu.pipeline_mode<synchronous>, transform_indices = @transform_5, window_bounds = array<i64: 1152, 128>}, {pipeline_mode = #tpu.pipeline_mode<synchronous>, transform_indices = @transform_6, window_bounds = array<i64: 1, 128>}, {transform_indices = @transform_7, window_bounds = array<i64: 1, 288, 128>}]} {
    %c0 = arith.constant 0 : index
    %c0_0 = arith.constant 0 : index
    %c0_1 = arith.constant 0 : index
    %0 = vector.load %arg1[%c0, %c0_0, %c0_1] : memref<1x344x128xbf16, #tpu.memory_space<vmem>>, vector<1x344x128xbf16>
    %1 = vector.shape_cast %0 : vector<1x344x128xbf16> to vector<344x128xbf16>
    %2 = arith.extf %1 : vector<344x128xbf16> to vector<344x128xf32>
    %c0_2 = arith.constant 0 : index
    %c0_3 = arith.constant 0 : index
    %3 = vector.load %arg9[%c0_2, %c0_3] : memref<344x128xf32, #tpu.memory_space<vmem>>, vector<344x128xf32>
    tpu.vector_store %arg9[%c0_2, %c0_3], %2 {strides = array<i32>} : memref<344x128xf32, #tpu.memory_space<vmem>>, vector<344x128xf32>,
    %4 = tpu.iota {dimensions = array<i32: 0>} : vector<288x128xi32>
    %c18_i32 = arith.constant 18 : i32
    %c0_i32 = arith.constant 0 : i32
    %5 = arith.cmpi eq, %c18_i32, %c0_i32 : i32
    %c1_i32 = arith.constant 1 : i32
    %6 = arith.select %5, %c1_i32, %c18_i32 : i32
    %7 = vector.broadcast %6 : i32 to vector<288x128xi32>
    %8 = arith.remsi %4, %7 : vector<288x128xi32>
    %c0_i32_4 = arith.constant 0 : i32
    %9 = vector.broadcast %c0_i32_4 : i32 to vector<288x128xi32>
    %10 = arith.cmpi ne, %8, %9 : vector<288x128xi32>
    %c0_i32_5 = arith.constant 0 : i32
    %11 = vector.broadcast %c0_i32_5 : i32 to vector<288x128xi32>
    %12 = arith.cmpi slt, %8, %11 : vector<288x128xi32>
    %c0_i32_6 = arith.constant 0 : i32
    %13 = arith.cmpi slt, %6, %c0_i32_6 : i32
    %14 = vector.broadcast %13 : i1 to vector<288x128xi1>
    %15 = vector.broadcast %14 : vector<288x128xi1> to vector<288x128xi1>
    %16 = arith.xori %12, %15 : vector<288x128xi1>
    %17 = arith.andi %16, %10 : vector<288x128xi1>
    %18 = vector.broadcast %6 : i32 to vector<288x128xi32>
    %19 = arith.addi %8, %18 : vector<288x128xi32>
    %20 = arith.select %17, %19, %8 : vector<288x128xi1>, vector<288x128xi32>
    %c16_i32 = arith.constant 16 : i32
    %21 = vector.broadcast %c16_i32 : i32 to vector<288x128xi32>
    %22 = arith.cmpi slt, %20, %21 : vector<288x128xi32>
    %c0_7 = arith.constant 0 : index
    %c0_8 = arith.constant 0 : index
    %23 = vector.load %arg9[%c0_7, %c0_8] : memref<344x128xf32, #tpu.memory_space<vmem>>, vector<288x128xf32>
    %24 = arith.truncf %23 : vector<288x128xf32> to vector<288x128xbf16>
    %c0_9 = arith.constant 0 : index
    %c0_10 = arith.constant 0 : index
    %25 = vector.load %arg10[%c0_9, %c0_10] : memref<288x1152xbf16, #tpu.memory_space<vmem>>, vector<288x128xbf16>
    tpu.vector_store %arg10[%c0_9, %c0_10], %24 {strides = array<i32>} : memref<288x1152xbf16, #tpu.memory_space<vmem>>, vector<288x128xbf16>,
    %c1 = arith.constant 1 : index
    %c0_11 = arith.constant 0 : index
    %26 = vector.load %arg9[%c1, %c0_11] : memref<344x128xf32, #tpu.memory_space<vmem>>, vector<288x128xf32>
    %27 = arith.truncf %26 : vector<288x128xf32> to vector<288x128xbf16>
    %c0_12 = arith.constant 0 : index
    %c128 = arith.constant 128 : index
    %28 = vector.load %arg10[%c0_12, %c128] : memref<288x1152xbf16, #tpu.memory_space<vmem>>, vector<288x128xbf16>
    tpu.vector_store %arg10[%c0_12, %c128], %27 {strides = array<i32>} : memref<288x1152xbf16, #tpu.memory_space<vmem>>, vector<288x128xbf16>,
    %c2 = arith.constant 2 : index
    %c0_13 = arith.constant 0 : index
    %29 = vector.load %arg9[%c2, %c0_13] : memref<344x128xf32, #tpu.memory_space<vmem>>, vector<288x128xf32>
    %30 = arith.truncf %29 : vector<288x128xf32> to vector<288x128xbf16>
    %c0_14 = arith.constant 0 : index
    %c256 = arith.constant 256 : index
    %31 = vector.load %arg10[%c0_14, %c256] : memref<288x1152xbf16, #tpu.memory_space<vmem>>, vector<288x128xbf16>
    tpu.vector_store %arg10[%c0_14, %c256], %30 {strides = array<i32>} : memref<288x1152xbf16, #tpu.memory_space<vmem>>, vector<288x128xbf16>,
    %c18 = arith.constant 18 : index
    %c0_15 = arith.constant 0 : index
    %32 = vector.load %arg9[%c18, %c0_15] : memref<344x128xf32, #tpu.memory_space<vmem>>, vector<288x128xf32>
    %33 = arith.truncf %32 : vector<288x128xf32> to vector<288x128xbf16>
    %c0_16 = arith.constant 0 : index
    %c384 = arith.constant 384 : index
    %34 = vector.load %arg10[%c0_16, %c384] : memref<288x1152xbf16, #tpu.memory_space<vmem>>, vector<288x128xbf16>
    tpu.vector_store %arg10[%c0_16, %c384], %33 {strides = array<i32>} : memref<288x1152xbf16, #tpu.memory_space<vmem>>, vector<288x128xbf16>,
    %c19 = arith.constant 19 : index
    %c0_17 = arith.constant 0 : index
    %35 = vector.load %arg9[%c19, %c0_17] : memref<344x128xf32, #tpu.memory_space<vmem>>, vector<288x128xf32>
    %36 = arith.truncf %35 : vector<288x128xf32> to vector<288x128xbf16>
    %c0_18 = arith.constant 0 : index
    %c512 = arith.constant 512 : index
    %37 = vector.load %arg10[%c0_18, %c512] : memref<288x1152xbf16, #tpu.memory_space<vmem>>, vector<288x128xbf16>
    tpu.vector_store %arg10[%c0_18, %c512], %36 {strides = array<i32>} : memref<288x1152xbf16, #tpu.memory_space<vmem>>, vector<288x128xbf16>,
    %c20 = arith.constant 20 : index
    %c0_19 = arith.constant 0 : index
    %38 = vector.load %arg9[%c20, %c0_19] : memref<344x128xf32, #tpu.memory_space<vmem>>, vector<288x128xf32>
    %39 = arith.truncf %38 : vector<288x128xf32> to vector<288x128xbf16>
    %c0_20 = arith.constant 0 : index
    %c640 = arith.constant 640 : index
    %40 = vector.load %arg10[%c0_20, %c640] : memref<288x1152xbf16, #tpu.memory_space<vmem>>, vector<288x128xbf16>
    tpu.vector_store %arg10[%c0_20, %c640], %39 {strides = array<i32>} : memref<288x1152xbf16, #tpu.memory_space<vmem>>, vector<288x128xbf16>,
    %c36 = arith.constant 36 : index
    %c0_21 = arith.constant 0 : index
    %41 = vector.load %arg9[%c36, %c0_21] : memref<344x128xf32, #tpu.memory_space<vmem>>, vector<288x128xf32>
    %42 = arith.truncf %41 : vector<288x128xf32> to vector<288x128xbf16>
    %c0_22 = arith.constant 0 : index
    %c768 = arith.constant 768 : index
    %43 = vector.load %arg10[%c0_22, %c768] : memref<288x1152xbf16, #tpu.memory_space<vmem>>, vector<288x128xbf16>
    tpu.vector_store %arg10[%c0_22, %c768], %42 {strides = array<i32>} : memref<288x1152xbf16, #tpu.memory_space<vmem>>, vector<288x128xbf16>,
    %c37 = arith.constant 37 : index
    %c0_23 = arith.constant 0 : index
    %44 = vector.load %arg9[%c37, %c0_23] : memref<344x128xf32, #tpu.memory_space<vmem>>, vector<288x128xf32>
    %45 = arith.truncf %44 : vector<288x128xf32> to vector<288x128xbf16>
    %c0_24 = arith.constant 0 : index
    %c896 = arith.constant 896 : index
    %46 = vector.load %arg10[%c0_24, %c896] : memref<288x1152xbf16, #tpu.memory_space<vmem>>, vector<288x128xbf16>
    tpu.vector_store %arg10[%c0_24, %c896], %45 {strides = array<i32>} : memref<288x1152xbf16, #tpu.memory_space<vmem>>, vector<288x128xbf16>,
    %c38 = arith.constant 38 : index
    %c0_25 = arith.constant 0 : index
    %47 = vector.load %arg9[%c38, %c0_25] : memref<344x128xf32, #tpu.memory_space<vmem>>, vector<288x128xf32>
    %48 = arith.truncf %47 : vector<288x128xf32> to vector<288x128xbf16>
    %c0_26 = arith.constant 0 : index
    %c1024 = arith.constant 1024 : index
    %49 = vector.load %arg10[%c0_26, %c1024] : memref<288x1152xbf16, #tpu.memory_space<vmem>>, vector<288x128xbf16>
    tpu.vector_store %arg10[%c0_26, %c1024], %48 {strides = array<i32>} : memref<288x1152xbf16, #tpu.memory_space<vmem>>, vector<288x128xbf16>,
    %c0_27 = arith.constant 0 : index
    %c0_28 = arith.constant 0 : index
    %50 = vector.load %arg10[%c0_27, %c0_28] : memref<288x1152xbf16, #tpu.memory_space<vmem>>, vector<288x1152xbf16>
    %c0_29 = arith.constant 0 : index
    %c0_30 = arith.constant 0 : index
    %51 = vector.load %arg2[%c0_29, %c0_30] : memref<1152x128xbf16, #tpu.memory_space<vmem>>, vector<1152x128xbf16>
    %cst = arith.constant dense<0.000000e+00> : vector<288x128xf32>
    %52 = tpu.matmul %50, %51, %cst {dimension_numbers = #tpu.dot_dimension_numbers<[1], [0], [0], [1], [0, 0, 1, 1], [], []>} : vector<288x1152xbf16>, vector<1152x128xbf16>, vector<288x128xf32> -> vector<288x128xf32>
    %c0_31 = arith.constant 0 : index
    %c0_32 = arith.constant 0 : index
    %53 = vector.load %arg3[%c0_31, %c0_32] : memref<1x128xf32, #tpu.memory_space<vmem>>, vector<1x128xf32>
    %54 = vector.broadcast %53 : vector<1x128xf32> to vector<288x128xf32>
    %55 = arith.addf %52, %54 : vector<288x128xf32>
    %cst_33 = arith.constant 2.000000e-01 : f32
    %56 = vector.broadcast %cst_33 : f32 to vector<288x128xf32>
    %57 = arith.mulf %56, %55 : vector<288x128xf32>
    %58 = arith.maximumf %55, %57 : vector<288x128xf32>
    %59 = arith.mulf %58, %58 : vector<288x128xf32>
    %cst_34 = arith.constant dense<0.000000e+00> : vector<288xf32>
    %60 = vector.multi_reduction <add>, %59, %cst_34 [1] : vector<288x128xf32> to vector<288xf32>
    %61 = vector.shape_cast %60 : vector<288xf32> to vector<288x1xf32>
    %cst_35 = arith.constant 1.250000e-01 : f32
    %62 = vector.broadcast %cst_35 : f32 to vector<288x1xf32>
    %63 = arith.mulf %61, %62 : vector<288x1xf32>
    %cst_36 = arith.constant 9.99999993E-9 : f32
    %64 = vector.broadcast %cst_36 : f32 to vector<288x1xf32>
    %65 = arith.addf %63, %64 : vector<288x1xf32>
    %66 = math.rsqrt %65 : vector<288x1xf32>
    %67 = vector.broadcast %66 : vector<288x1xf32> to vector<288x128xf32>
    %68 = arith.mulf %58, %67 : vector<288x128xf32>
    %cst_37 = arith.constant 0.000000e+00 : f32
    %69 = vector.broadcast %cst_37 : f32 to vector<288x128xf32>
    %70 = arith.select %22, %68, %69 : vector<288x128xi1>, vector<288x128xf32>
    %c19_38 = arith.constant 19 : index
    %c0_39 = arith.constant 0 : index
    %71 = vector.load %arg9[%c19_38, %c0_39] : memref<344x128xf32, #tpu.memory_space<vmem>>, vector<288x128xf32>
    tpu.vector_store %arg9[%c19_38, %c0_39], %70 {strides = array<i32>} : memref<344x128xf32, #tpu.memory_space<vmem>>, vector<288x128xf32>,
    %c0_40 = arith.constant 0 : index
    %c0_41 = arith.constant 0 : index
    %72 = vector.load %arg9[%c0_40, %c0_41] : memref<344x128xf32, #tpu.memory_space<vmem>>, vector<288x128xf32>
    %73 = arith.truncf %72 : vector<288x128xf32> to vector<288x128xbf16>
    %c0_42 = arith.constant 0 : index
    %c0_43 = arith.constant 0 : index
    %74 = vector.load %arg10[%c0_42, %c0_43] : memref<288x1152xbf16, #tpu.memory_space<vmem>>, vector<288x128xbf16>
    tpu.vector_store %arg10[%c0_42, %c0_43], %73 {strides = array<i32>} : memref<288x1152xbf16, #tpu.memory_space<vmem>>, vector<288x128xbf16>,
    %c1_44 = arith.constant 1 : index
    %c0_45 = arith.constant 0 : index
    %75 = vector.load %arg9[%c1_44, %c0_45] : memref<344x128xf32, #tpu.memory_space<vmem>>, vector<288x128xf32>
    %76 = arith.truncf %75 : vector<288x128xf32> to vector<288x128xbf16>
    %c0_46 = arith.constant 0 : index
    %c128_47 = arith.constant 128 : index
    %77 = vector.load %arg10[%c0_46, %c128_47] : memref<288x1152xbf16, #tpu.memory_space<vmem>>, vector<288x128xbf16>
    tpu.vector_store %arg10[%c0_46, %c128_47], %76 {strides = array<i32>} : memref<288x1152xbf16, #tpu.memory_space<vmem>>, vector<288x128xbf16>,
    %c2_48 = arith.constant 2 : index
    %c0_49 = arith.constant 0 : index
    %78 = vector.load %arg9[%c2_48, %c0_49] : memref<344x128xf32, #tpu.memory_space<vmem>>, vector<288x128xf32>
    %79 = arith.truncf %78 : vector<288x128xf32> to vector<288x128xbf16>
    %c0_50 = arith.constant 0 : index
    %c256_51 = arith.constant 256 : index
    %80 = vector.load %arg10[%c0_50, %c256_51] : memref<288x1152xbf16, #tpu.memory_space<vmem>>, vector<288x128xbf16>
    tpu.vector_store %arg10[%c0_50, %c256_51], %79 {strides = array<i32>} : memref<288x1152xbf16, #tpu.memory_space<vmem>>, vector<288x128xbf16>,
    %c18_52 = arith.constant 18 : index
    %c0_53 = arith.constant 0 : index
    %81 = vector.load %arg9[%c18_52, %c0_53] : memref<344x128xf32, #tpu.memory_space<vmem>>, vector<288x128xf32>
    %82 = arith.truncf %81 : vector<288x128xf32> to vector<288x128xbf16>
    %c0_54 = arith.constant 0 : index
    %c384_55 = arith.constant 384 : index
    %83 = vector.load %arg10[%c0_54, %c384_55] : memref<288x1152xbf16, #tpu.memory_space<vmem>>, vector<288x128xbf16>
    tpu.vector_store %arg10[%c0_54, %c384_55], %82 {strides = array<i32>} : memref<288x1152xbf16, #tpu.memory_space<vmem>>, vector<288x128xbf16>,
    %c19_56 = arith.constant 19 : index
    %c0_57 = arith.constant 0 : index
    %84 = vector.load %arg9[%c19_56, %c0_57] : memref<344x128xf32, #tpu.memory_space<vmem>>, vector<288x128xf32>
    %85 = arith.truncf %84 : vector<288x128xf32> to vector<288x128xbf16>
    %c0_58 = arith.constant 0 : index
    %c512_59 = arith.constant 512 : index
    %86 = vector.load %arg10[%c0_58, %c512_59] : memref<288x1152xbf16, #tpu.memory_space<vmem>>, vector<288x128xbf16>
    tpu.vector_store %arg10[%c0_58, %c512_59], %85 {strides = array<i32>} : memref<288x1152xbf16, #tpu.memory_space<vmem>>, vector<288x128xbf16>,
    %c20_60 = arith.constant 20 : index
    %c0_61 = arith.constant 0 : index
    %87 = vector.load %arg9[%c20_60, %c0_61] : memref<344x128xf32, #tpu.memory_space<vmem>>, vector<288x128xf32>
    %88 = arith.truncf %87 : vector<288x128xf32> to vector<288x128xbf16>
    %c0_62 = arith.constant 0 : index
    %c640_63 = arith.constant 640 : index
    %89 = vector.load %arg10[%c0_62, %c640_63] : memref<288x1152xbf16, #tpu.memory_space<vmem>>, vector<288x128xbf16>
    tpu.vector_store %arg10[%c0_62, %c640_63], %88 {strides = array<i32>} : memref<288x1152xbf16, #tpu.memory_space<vmem>>, vector<288x128xbf16>,
    %c36_64 = arith.constant 36 : index
    %c0_65 = arith.constant 0 : index
    %90 = vector.load %arg9[%c36_64, %c0_65] : memref<344x128xf32, #tpu.memory_space<vmem>>, vector<288x128xf32>
    %91 = arith.truncf %90 : vector<288x128xf32> to vector<288x128xbf16>
    %c0_66 = arith.constant 0 : index
    %c768_67 = arith.constant 768 : index
    %92 = vector.load %arg10[%c0_66, %c768_67] : memref<288x1152xbf16, #tpu.memory_space<vmem>>, vector<288x128xbf16>
    tpu.vector_store %arg10[%c0_66, %c768_67], %91 {strides = array<i32>} : memref<288x1152xbf16, #tpu.memory_space<vmem>>, vector<288x128xbf16>,
    %c37_68 = arith.constant 37 : index
    %c0_69 = arith.constant 0 : index
    %93 = vector.load %arg9[%c37_68, %c0_69] : memref<344x128xf32, #tpu.memory_space<vmem>>, vector<288x128xf32>
    %94 = arith.truncf %93 : vector<288x128xf32> to vector<288x128xbf16>
    %c0_70 = arith.constant 0 : index
    %c896_71 = arith.constant 896 : index
    %95 = vector.load %arg10[%c0_70, %c896_71] : memref<288x1152xbf16, #tpu.memory_space<vmem>>, vector<288x128xbf16>
    tpu.vector_store %arg10[%c0_70, %c896_71], %94 {strides = array<i32>} : memref<288x1152xbf16, #tpu.memory_space<vmem>>, vector<288x128xbf16>,
    %c38_72 = arith.constant 38 : index
    %c0_73 = arith.constant 0 : index
    %96 = vector.load %arg9[%c38_72, %c0_73] : memref<344x128xf32, #tpu.memory_space<vmem>>, vector<288x128xf32>
    %97 = arith.truncf %96 : vector<288x128xf32> to vector<288x128xbf16>
    %c0_74 = arith.constant 0 : index
    %c1024_75 = arith.constant 1024 : index
    %98 = vector.load %arg10[%c0_74, %c1024_75] : memref<288x1152xbf16, #tpu.memory_space<vmem>>, vector<288x128xbf16>
    tpu.vector_store %arg10[%c0_74, %c1024_75], %97 {strides = array<i32>} : memref<288x1152xbf16, #tpu.memory_space<vmem>>, vector<288x128xbf16>,
    %c0_76 = arith.constant 0 : index
    %c0_77 = arith.constant 0 : index
    %99 = vector.load %arg10[%c0_76, %c0_77] : memref<288x1152xbf16, #tpu.memory_space<vmem>>, vector<288x1152xbf16>
    %c0_78 = arith.constant 0 : index
    %c0_79 = arith.constant 0 : index
    %100 = vector.load %arg4[%c0_78, %c0_79] : memref<1152x128xbf16, #tpu.memory_space<vmem>>, vector<1152x128xbf16>
    %cst_80 = arith.constant dense<0.000000e+00> : vector<288x128xf32>
    %101 = tpu.matmul %99, %100, %cst_80 {dimension_numbers = #tpu.dot_dimension_numbers<[1], [0], [0], [1], [0, 0, 1, 1], [], []>} : vector<288x1152xbf16>, vector<1152x128xbf16>, vector<288x128xf32> -> vector<288x128xf32>
    %c0_81 = arith.constant 0 : index
    %c0_82 = arith.constant 0 : index
    %102 = vector.load %arg5[%c0_81, %c0_82] : memref<1x128xf32, #tpu.memory_space<vmem>>, vector<1x128xf32>
    %103 = vector.broadcast %102 : vector<1x128xf32> to vector<288x128xf32>
    %104 = arith.addf %101, %103 : vector<288x128xf32>
    %cst_83 = arith.constant 2.000000e-01 : f32
    %105 = vector.broadcast %cst_83 : f32 to vector<288x128xf32>
    %106 = arith.mulf %105, %104 : vector<288x128xf32>
    %107 = arith.maximumf %104, %106 : vector<288x128xf32>
    %108 = arith.mulf %107, %107 : vector<288x128xf32>
    %cst_84 = arith.constant dense<0.000000e+00> : vector<288xf32>
    %109 = vector.multi_reduction <add>, %108, %cst_84 [1] : vector<288x128xf32> to vector<288xf32>
    %110 = vector.shape_cast %109 : vector<288xf32> to vector<288x1xf32>
    %cst_85 = arith.constant 1.250000e-01 : f32
    %111 = vector.broadcast %cst_85 : f32 to vector<288x1xf32>
    %112 = arith.mulf %110, %111 : vector<288x1xf32>
    %cst_86 = arith.constant 9.99999993E-9 : f32
    %113 = vector.broadcast %cst_86 : f32 to vector<288x1xf32>
    %114 = arith.addf %112, %113 : vector<288x1xf32>
    %115 = math.rsqrt %114 : vector<288x1xf32>
    %116 = vector.broadcast %115 : vector<288x1xf32> to vector<288x128xf32>
    %117 = arith.mulf %107, %116 : vector<288x128xf32>
    %cst_87 = arith.constant 0.000000e+00 : f32
    %118 = vector.broadcast %cst_87 : f32 to vector<288x128xf32>
    %119 = arith.select %22, %117, %118 : vector<288x128xi1>, vector<288x128xf32>
    %c19_88 = arith.constant 19 : index
    %c0_89 = arith.constant 0 : index
    %120 = vector.load %arg9[%c19_88, %c0_89] : memref<344x128xf32, #tpu.memory_space<vmem>>, vector<288x128xf32>
    tpu.vector_store %arg9[%c19_88, %c0_89], %119 {strides = array<i32>} : memref<344x128xf32, #tpu.memory_space<vmem>>, vector<288x128xf32>,
    %c0_90 = arith.constant 0 : index
    %c0_91 = arith.constant 0 : index
    %121 = vector.load %arg9[%c0_90, %c0_91] : memref<344x128xf32, #tpu.memory_space<vmem>>, vector<288x128xf32>
    %122 = arith.truncf %121 : vector<288x128xf32> to vector<288x128xbf16>
    %c0_92 = arith.constant 0 : index
    %c0_93 = arith.constant 0 : index
    %123 = vector.load %arg10[%c0_92, %c0_93] : memref<288x1152xbf16, #tpu.memory_space<vmem>>, vector<288x128xbf16>
    tpu.vector_store %arg10[%c0_92, %c0_93], %122 {strides = array<i32>} : memref<288x1152xbf16, #tpu.memory_space<vmem>>, vector<288x128xbf16>,
    %c1_94 = arith.constant 1 : index
    %c0_95 = arith.constant 0 : index
    %124 = vector.load %arg9[%c1_94, %c0_95] : memref<344x128xf32, #tpu.memory_space<vmem>>, vector<288x128xf32>
    %125 = arith.truncf %124 : vector<288x128xf32> to vector<288x128xbf16>
    %c0_96 = arith.constant 0 : index
    %c128_97 = arith.constant 128 : index
    %126 = vector.load %arg10[%c0_96, %c128_97] : memref<288x1152xbf16, #tpu.memory_space<vmem>>, vector<288x128xbf16>
    tpu.vector_store %arg10[%c0_96, %c128_97], %125 {strides = array<i32>} : memref<288x1152xbf16, #tpu.memory_space<vmem>>, vector<288x128xbf16>,
    %c2_98 = arith.constant 2 : index
    %c0_99 = arith.constant 0 : index
    %127 = vector.load %arg9[%c2_98, %c0_99] : memref<344x128xf32, #tpu.memory_space<vmem>>, vector<288x128xf32>
    %128 = arith.truncf %127 : vector<288x128xf32> to vector<288x128xbf16>
    %c0_100 = arith.constant 0 : index
    %c256_101 = arith.constant 256 : index
    %129 = vector.load %arg10[%c0_100, %c256_101] : memref<288x1152xbf16, #tpu.memory_space<vmem>>, vector<288x128xbf16>
    tpu.vector_store %arg10[%c0_100, %c256_101], %128 {strides = array<i32>} : memref<288x1152xbf16, #tpu.memory_space<vmem>>, vector<288x128xbf16>,
    %c18_102 = arith.constant 18 : index
    %c0_103 = arith.constant 0 : index
    %130 = vector.load %arg9[%c18_102, %c0_103] : memref<344x128xf32, #tpu.memory_space<vmem>>, vector<288x128xf32>
    %131 = arith.truncf %130 : vector<288x128xf32> to vector<288x128xbf16>
    %c0_104 = arith.constant 0 : index
    %c384_105 = arith.constant 384 : index
    %132 = vector.load %arg10[%c0_104, %c384_105] : memref<288x1152xbf16, #tpu.memory_space<vmem>>, vector<288x128xbf16>
    tpu.vector_store %arg10[%c0_104, %c384_105], %131 {strides = array<i32>} : memref<288x1152xbf16, #tpu.memory_space<vmem>>, vector<288x128xbf16>,
    %c19_106 = arith.constant 19 : index
    %c0_107 = arith.constant 0 : index
    %133 = vector.load %arg9[%c19_106, %c0_107] : memref<344x128xf32, #tpu.memory_space<vmem>>, vector<288x128xf32>
    %134 = arith.truncf %133 : vector<288x128xf32> to vector<288x128xbf16>
    %c0_108 = arith.constant 0 : index
    %c512_109 = arith.constant 512 : index
    %135 = vector.load %arg10[%c0_108, %c512_109] : memref<288x1152xbf16, #tpu.memory_space<vmem>>, vector<288x128xbf16>
    tpu.vector_store %arg10[%c0_108, %c512_109], %134 {strides = array<i32>} : memref<288x1152xbf16, #tpu.memory_space<vmem>>, vector<288x128xbf16>,
    %c20_110 = arith.constant 20 : index
    %c0_111 = arith.constant 0 : index
    %136 = vector.load %arg9[%c20_110, %c0_111] : memref<344x128xf32, #tpu.memory_space<vmem>>, vector<288x128xf32>
    %137 = arith.truncf %136 : vector<288x128xf32> to vector<288x128xbf16>
    %c0_112 = arith.constant 0 : index
    %c640_113 = arith.constant 640 : index
    %138 = vector.load %arg10[%c0_112, %c640_113] : memref<288x1152xbf16, #tpu.memory_space<vmem>>, vector<288x128xbf16>
    tpu.vector_store %arg10[%c0_112, %c640_113], %137 {strides = array<i32>} : memref<288x1152xbf16, #tpu.memory_space<vmem>>, vector<288x128xbf16>,
    %c36_114 = arith.constant 36 : index
    %c0_115 = arith.constant 0 : index
    %139 = vector.load %arg9[%c36_114, %c0_115] : memref<344x128xf32, #tpu.memory_space<vmem>>, vector<288x128xf32>
    %140 = arith.truncf %139 : vector<288x128xf32> to vector<288x128xbf16>
    %c0_116 = arith.constant 0 : index
    %c768_117 = arith.constant 768 : index
    %141 = vector.load %arg10[%c0_116, %c768_117] : memref<288x1152xbf16, #tpu.memory_space<vmem>>, vector<288x128xbf16>
    tpu.vector_store %arg10[%c0_116, %c768_117], %140 {strides = array<i32>} : memref<288x1152xbf16, #tpu.memory_space<vmem>>, vector<288x128xbf16>,
    %c37_118 = arith.constant 37 : index
    %c0_119 = arith.constant 0 : index
    %142 = vector.load %arg9[%c37_118, %c0_119] : memref<344x128xf32, #tpu.memory_space<vmem>>, vector<288x128xf32>
    %143 = arith.truncf %142 : vector<288x128xf32> to vector<288x128xbf16>
    %c0_120 = arith.constant 0 : index
    %c896_121 = arith.constant 896 : index
    %144 = vector.load %arg10[%c0_120, %c896_121] : memref<288x1152xbf16, #tpu.memory_space<vmem>>, vector<288x128xbf16>
    tpu.vector_store %arg10[%c0_120, %c896_121], %143 {strides = array<i32>} : memref<288x1152xbf16, #tpu.memory_space<vmem>>, vector<288x128xbf16>,
    %c38_122 = arith.constant 38 : index
    %c0_123 = arith.constant 0 : index
    %145 = vector.load %arg9[%c38_122, %c0_123] : memref<344x128xf32, #tpu.memory_space<vmem>>, vector<288x128xf32>
    %146 = arith.truncf %145 : vector<288x128xf32> to vector<288x128xbf16>
    %c0_124 = arith.constant 0 : index
    %c1024_125 = arith.constant 1024 : index
    %147 = vector.load %arg10[%c0_124, %c1024_125] : memref<288x1152xbf16, #tpu.memory_space<vmem>>, vector<288x128xbf16>
    tpu.vector_store %arg10[%c0_124, %c1024_125], %146 {strides = array<i32>} : memref<288x1152xbf16, #tpu.memory_space<vmem>>, vector<288x128xbf16>,
    %c0_126 = arith.constant 0 : index
    %c0_127 = arith.constant 0 : index
    %148 = vector.load %arg10[%c0_126, %c0_127] : memref<288x1152xbf16, #tpu.memory_space<vmem>>, vector<288x1152xbf16>
    %c0_128 = arith.constant 0 : index
    %c0_129 = arith.constant 0 : index
    %149 = vector.load %arg6[%c0_128, %c0_129] : memref<1152x128xbf16, #tpu.memory_space<vmem>>, vector<1152x128xbf16>
    %cst_130 = arith.constant dense<0.000000e+00> : vector<288x128xf32>
    %150 = tpu.matmul %148, %149, %cst_130 {dimension_numbers = #tpu.dot_dimension_numbers<[1], [0], [0], [1], [0, 0, 1, 1], [], []>} : vector<288x1152xbf16>, vector<1152x128xbf16>, vector<288x128xf32> -> vector<288x128xf32>
    %c0_131 = arith.constant 0 : index
    %c0_132 = arith.constant 0 : index
    %151 = vector.load %arg7[%c0_131, %c0_132] : memref<1x128xf32, #tpu.memory_space<vmem>>, vector<1x128xf32>
    %152 = vector.broadcast %151 : vector<1x128xf32> to vector<288x128xf32>
    %153 = arith.addf %150, %152 : vector<288x128xf32>
    %cst_133 = arith.constant 2.000000e-01 : f32
    %154 = vector.broadcast %cst_133 : f32 to vector<288x128xf32>
    %155 = arith.mulf %154, %153 : vector<288x128xf32>
    %156 = arith.maximumf %153, %155 : vector<288x128xf32>
    %157 = arith.mulf %156, %156 : vector<288x128xf32>
    %cst_134 = arith.constant dense<0.000000e+00> : vector<288xf32>
    %158 = vector.multi_reduction <add>, %157, %cst_134 [1] : vector<288x128xf32> to vector<288xf32>
    %159 = vector.shape_cast %158 : vector<288xf32> to vector<288x1xf32>
    %cst_135 = arith.constant 1.250000e-01 : f32
    %160 = vector.broadcast %cst_135 : f32 to vector<288x1xf32>
    %161 = arith.mulf %159, %160 : vector<288x1xf32>
    %cst_136 = arith.constant 9.99999993E-9 : f32
    %162 = vector.broadcast %cst_136 : f32 to vector<288x1xf32>
    %163 = arith.addf %161, %162 : vector<288x1xf32>
    %164 = math.rsqrt %163 : vector<288x1xf32>
    %165 = vector.broadcast %164 : vector<288x1xf32> to vector<288x128xf32>
    %166 = arith.mulf %156, %165 : vector<288x128xf32>
    %c0_137 = arith.constant 0 : index
    %c0_138 = arith.constant 0 : index
    %c0_139 = arith.constant 0 : index
    %167 = vector.load %arg8[%c0_137, %c0_138, %c0_139] : memref<1x288x128xf32, #tpu.memory_space<vmem>>, vector<1x288x128xf32>
    %168 = vector.shape_cast %167 : vector<1x288x128xf32> to vector<288x128xf32>
    %169 = vector.shape_cast %166 : vector<288x128xf32> to vector<1x288x128xf32>
    tpu.vector_store %arg8[%c0_137, %c0_138, %c0_139], %169 {strides = array<i32>} : memref<1x288x128xf32, #tpu.memory_space<vmem>>, vector<1x288x128xf32>,
    return
  }
  func.func @transform_0(%arg0: i32) -> (i32, i32, i32) {
    %c0_i32 = arith.constant 0 : i32
    %c0_i32_0 = arith.constant 0 : i32
    %c0_i32_1 = arith.constant 0 : i32
    return %arg0, %c0_i32, %c0_i32_0 : i32, i32, i32
  }
  func.func @transform_1(%arg0: i32) -> (i32, i32) {
    %c0_i32 = arith.constant 0 : i32
    %c0_i32_0 = arith.constant 0 : i32
    %c0_i32_1 = arith.constant 0 : i32
    return %c0_i32, %c0_i32_0 : i32, i32
  }
  func.func @transform_2(%arg0: i32) -> (i32, i32) {
    %c0_i32 = arith.constant 0 : i32
    %c0_i32_0 = arith.constant 0 : i32
    %c0_i32_1 = arith.constant 0 : i32
    return %c0_i32, %c0_i32_0 : i32, i32
  }
  func.func @transform_3(%arg0: i32) -> (i32, i32) {
    %c0_i32 = arith.constant 0 : i32
    %c0_i32_0 = arith.constant 0 : i32
    %c0_i32_1 = arith.constant 0 : i32
    return %c0_i32, %c0_i32_0 : i32, i32
  }
  func.func @transform_4(%arg0: i32) -> (i32, i32) {
    %c0_i32 = arith.constant 0 : i32
    %c0_i32_0 = arith.constant 0 : i32
    %c0_i32_1 = arith.constant 0 : i32
    return %c0_i32, %c0_i32_0 : i32, i32
  }
  func.func @transform_5(%arg0: i32) -> (i32, i32) {
    %c0_i32 = arith.constant 0 : i32
    %c0_i32_0 = arith.constant 0 : i32
    %c0_i32_1 = arith.constant 0 : i32
    return %c0_i32, %c0_i32_0 : i32, i32
  }
  func.func @transform_6(%arg0: i32) -> (i32, i32) {
    %c0_i32 = arith.constant 0 : i32
    %c0_i32_0 = arith.constant 0 : i32
    %c0_i32_1 = arith.constant 0 : i32
    return %c0_i32, %c0_i32_0 : i32, i32
  }
  func.func @transform_7(%arg0: i32) -> (i32, i32, i32) {
    %c0_i32 = arith.constant 0 : i32
    %c0_i32_0 = arith.constant 0 : i32
    %c0_i32_1 = arith.constant 0 : i32
    return %arg0, %c0_i32, %c0_i32_0 : i32, i32, i32
  }
}

</mosaic_0001>

<bundles_post_ra>
// kernel: conv_block_forward.1
= control target key start
LH: loop header
LB: loop body
LE: loop exit
PB: predicated region body
PF: predicated region fallthrough
CT: control target
= control target key end

     0   :  { %s10997_s24 = smov 0   ;;  %s14584_s0 = inlined_call_operand.vmem [shape: bf16[2,344,128], index: 0, kind: input, shape index: {}]   ;;  %s14585_s1 = inlined_call_operand.vmem [shape: bf16[1152,128], index: 1, kind: input, shape index: {}]   ;;  %s14586_s2 = inlined_call_operand.vmem [shape: f32[1,128], index: 2, kind: input, shape index: {}]   ;;  %s14587_s3 = inlined_call_operand.vmem [shape: bf16[1152,128], index: 3, kind: input, shape index: {}]   ;;  %s14588_s4 = inlined_call_operand.vmem [shape: f32[1,128], index: 4, kind: input, shape index: {}]   ;;  %s14589_s5 = inlined_call_operand.vmem [shape: bf16[1152,128], index: 5, kind: input, shape index: {}]   ;;  %s14590_s6 = inlined_call_operand.vmem [shape: f32[1,128], index: 6, kind: input, shape index: {}]   ;;  %s14591_s7 = inlined_call_operand.vmem [shape: f32[2,288,128], index: 7, kind: output, shape index: {}]  }
   0x1 LB: > { %s9099_s25 = sadd.s32 4294967295, %s10954_s24   ;;  %p9103_p0 = scmp.ge.s32.totalorder %s10954_s24, 1  ;;  %s10954_s24 = sphi %s10997_s24, %s17_s24  }
   0x2   : > { %p237_p1 = scmp.lt.s32.totalorder %s10954_s24, 3 }
   0x4   : > { %p238_p2 = pnand %p9103_p0, %p237_p1 }
   0x6   : > { %241 = sbr.rel (%p238_p2) target bundleno = 2458 (0x99a), region = 48 }
   0xd   : > { %v10478_v0 = vld [vmem:[%s14585_s1] sm:$0xff]   ;;  %v14592_v1 = vmov 0   ;;  %p269_p3 = scmp.lt.s32.totalorder %s9099_s25, 1  ;;  %v10479_v2 = vld [vmem:[%s14585_s1 + $0x8] sm:$0xff]   ;;  %v10480_v3 = vld [vmem:[%s14585_s1 + $0x10] sm:$0xff]  }
   0xe   : > { %2451 = vmatprep.subr.bf16.mxu0 %v14592_v1  ;;  %v10481_v4 = vld [vmem:[%s14585_s1 + $0x18] sm:$0xff]   ;;  %v10482_v5 = vld [vmem:[%s14585_s1 + $0x20] sm:$0xff]   ;;  %v10483_v12 = vld [vmem:[%s14585_s1 + $0x28] sm:$0xff]  }
   0xf   : > { %2452 = vmatpush1.bf16.msra.mxu0 %v10478_v0  ;;  %s15011_s25 = smov (!%p269_p3, %s9099_s25), 1  ;;  %v10484_v20 = vld [vmem:[%s14585_s1 + $0x30] sm:$0xff]   ;;  %v10485_v27 = vld [vmem:[%s14585_s1 + $0x38] sm:$0xff]   ;;  %v10486_v37 = vld [vmem:[%s14585_s1 + $0x40] sm:$0xff]  }
  0x10   : > { %2453 = vmatprep.subr.bf16.mxu0 %v14592_v1  ;;  %s10395_s9 = smul.u32 172, %s15011_s25  ;;  %v10487_v43 = vld [vmem:[%s14585_s1 + $0x48] sm:$0xff]   ;;  %v10488_v50 = vld [vmem:[%s14585_s1 + $0x50] sm:$0xff]   ;;  %v10489_v55 = vld [vmem:[%s14585_s1 + $0x58] sm:$0xff]  }
  0x11   : > { %v10490_v61 = vld [vmem:[%s14585_s1 + $0x60] sm:$0xff]   ;;  %s10396_s21 = smul.u32 288, %s15011_s25 }
  0x12   : > { %s11027_s14 = scalar_lea.vmem %s14584_s0, %s10395_s9 }
  0x13   : > { %2454 = vmatpush1.bf16.msra.mxu0 %v10479_v2  ;;  %v9328_v6 = vld [vmem:[%s11027_s14] sm:$0xff]   ;;  %v9411_v7 = vld [vmem:[%s11027_s14 + $0x8] sm:$0xff]   ;;  %v9412_v13 = vld [vmem:[%s11027_s14 + $0x10] sm:$0xff]   ;;  %s14453_s26 = scalar_lea.vmem %s14591_s7, %s10396_s21 }
  0x14   : > { %2455 = vmatprep.subr.bf16.mxu0 %v14592_v1  ;;  %v9329_v8 = vunpack.c.l.bf16 %v9328_v6  ;;  %v9330_v9 = vunpack.c.h.bf16 %v9328_v6  ;;  %v9333_v10 = vunpack.c.l.bf16 %v9411_v7  ;;  %v9334_v11 = vunpack.c.h.bf16 %v9411_v7  ;;  %v9413_v16 = vld [vmem:[%s11027_s14 + $0x18] sm:$0xff]   ;;  %v9414_v19 = vld [vmem:[%s11027_s14 + $0x20] sm:$0xff]   ;;  %v9415_v23 = vld [vmem:[%s11027_s14 + $0x28] sm:$0xff]  }
  0x15   : > { %v9337_v14 = vunpack.c.l.bf16 %v9412_v13  ;;  %v9338_v15 = vunpack.c.h.bf16 %v9412_v13  ;;  %v9341_v17 = vunpack.c.l.bf16 %v9413_v16  ;;  %v9342_v18 = vunpack.c.h.bf16 %v9413_v16  ;;  %v9416_v26 = vld [vmem:[%s11027_s14 + $0x30] sm:$0xff]   ;;  %v9417_v33 = vld [vmem:[%s11027_s14 + $0x38] sm:$0xff]   ;;  %v9418_v36 = vld [vmem:[%s11027_s14 + $0x40] sm:$0xff]  }
  0x16   : > { %366 = vst [vmem:[#allocation2] sm:$0xff] %v9329_v8  ;;  %367 = vst [vmem:[#allocation2 + $0x8] sm:$0xff] %v9330_v9  ;;  %v9345_v21 = vunpack.c.l.bf16 %v9414_v19  ;;  %v9346_v22 = vunpack.c.h.bf16 %v9414_v19  ;;  %v9349_v24 = vunpack.c.l.bf16 %v9415_v23  ;;  %v9350_v25 = vunpack.c.h.bf16 %v9415_v23  ;;  %v9419_v40 = vld [vmem:[%s11027_s14 + $0x48] sm:$0xff]   ;;  %v9420_v44 = vld [vmem:[%s11027_s14 + $0x50] sm:$0xff]  }
  0x17   : > { %2456 = vmatpush1.bf16.msra.mxu0 %v10480_v3  ;;  %368 = vst [vmem:[#allocation2 + $0x10] sm:$0xff] %v9333_v10  ;;  %369 = vst [vmem:[#allocation2 + $0x18] sm:$0xff] %v9334_v11  ;;  %v9353_v30 = vunpack.c.l.bf16 %v9416_v26  ;;  %v9354_v31 = vunpack.c.h.bf16 %v9416_v26  ;;  %v9357_v34 = vunpack.c.l.bf16 %v9417_v33  ;;  %v9358_v35 = vunpack.c.h.bf16 %v9417_v33  ;;  %v9421_v47 = vld [vmem:[%s11027_s14 + $0x58] sm:$0xff]   ;;  %v9422_v51 = vld [vmem:[%s11027_s14 + $0x60] sm:$0xff]  }
  0x18   : > { %2457 = vmatprep.subr.bf16.mxu0 %v14592_v1  ;;  %370 = vst [vmem:[#allocation2 + $0x20] sm:$0xff] %v9337_v14  ;;  %371 = vst [vmem:[#allocation2 + $0x28] sm:$0xff] %v9338_v15  ;;  %v9361_v38 = vunpack.c.l.bf16 %v9418_v36  ;;  %v9362_v39 = vunpack.c.h.bf16 %v9418_v36  ;;  %v9365_v41 = vunpack.c.l.bf16 %v9419_v40  ;;  %v9366_v42 = vunpack.c.h.bf16 %v9419_v40  ;;  %v9423_v54 = vld [vmem:[%s11027_s14 + $0x68] sm:$0xff]   ;;  %v9424_v58 = vld [vmem:[%s11027_s14 + $0x70] sm:$0xff]  }
  0x19   : > { %372 = vst [vmem:[#allocation2 + $0x30] sm:$0xff] %v9341_v17  ;;  %373 = vst [vmem:[#allocation2 + $0x38] sm:$0xff] %v9342_v18  ;;  %v9369_v45 = vunpack.c.l.bf16 %v9420_v44  ;;  %v9370_v46 = vunpack.c.h.bf16 %v9420_v44  ;;  %v9373_v48 = vunpack.c.l.bf16 %v9421_v47  ;;  %v9374_v49 = vunpack.c.h.bf16 %v9421_v47  ;;  %v9425_v62 = vld [vmem:[%s11027_s14 + $0x78] sm:$0xff]   ;;  %v9426_v2 = vld [vmem:[%s11027_s14 + $0x80] sm:$0xff]  }
  0x1a   : > { %374 = vst [vmem:[#allocation2 + $0x40] sm:$0xff] %v9345_v21  ;;  %375 = vst [vmem:[#allocation2 + $0x48] sm:$0xff] %v9346_v22  ;;  %v9377_v52 = vunpack.c.l.bf16 %v9422_v51  ;;  %v9378_v53 = vunpack.c.h.bf16 %v9422_v51  ;;  %v9381_v56 = vunpack.c.l.bf16 %v9423_v54  ;;  %v9382_v57 = vunpack.c.h.bf16 %v9423_v54  ;;  %v10492_v8 = vld [vmem:[%s14585_s1 + $0x70] sm:$0xff]   ;;  %v10493_v9 = vld [vmem:[%s14585_s1 + $0x78] sm:$0xff]  }
  0x1b   : > { %2458 = vmatpush1.bf16.msra.mxu0 %v10481_v4  ;;  %376 = vst [vmem:[#allocation2 + $0x50] sm:$0xff] %v9349_v24  ;;  %377 = vst [vmem:[#allocation2 + $0x58] sm:$0xff] %v9350_v25  ;;  %v9385_v59 = vunpack.c.l.bf16 %v9424_v58  ;;  %v9386_v60 = vunpack.c.h.bf16 %v9424_v58  ;;  %v9389_v63 = vunpack.c.l.bf16 %v9425_v62  ;;  %v9390_v0 = vunpack.c.h.bf16 %v9425_v62  ;;  %v10491_v4 = vld [vmem:[%s14585_s1 + $0x68] sm:$0xff]   ;;  %v10494_v15 = vld [vmem:[%s11027_s14] sm:$0xff] }
  0x1c   : > { %2459 = vmatprep.subr.bf16.mxu0 %v14592_v1  ;;  %378 = vst [vmem:[#allocation2 + $0x60] sm:$0xff] %v9353_v30  ;;  %379 = vst [vmem:[#allocation2 + $0x68] sm:$0xff] %v9354_v31  ;;  %v9393_v3 = vunpack.c.l.bf16 %v9426_v2  ;;  %v9394_v6 = vunpack.c.h.bf16 %v9426_v2  ;;  %v10495_v16 = vld [vmem:[%s14585_s1 + $0x80] sm:$0xff]   ;;  %v10497_v18 = vld [vmem:[%s14585_s1 + $0x88] sm:$0xff]  }
  0x1d   : > { %v1130_v28 = vld [vmem:[#allocation2 + $0x1] sm:$0xff]  ;;  %380 = vst [vmem:[#allocation2 + $0x70] sm:$0xff] %v9357_v34  ;;  %381 = vst [vmem:[#allocation2 + $0x78] sm:$0xff] %v9358_v35  ;;  %v10499_v22 = vld [vmem:[%s14585_s1 + $0x90] sm:$0xff]  }
  0x1e   : > { %v1131_v29 = vld [vmem:[#allocation2 + $0x9] sm:$0xff]  ;;  %382 = vst [vmem:[#allocation2 + $0x80] sm:$0xff] %v9361_v38  ;;  %383 = vst [vmem:[#allocation2 + $0x88] sm:$0xff] %v9362_v39  ;;  %v1132_v10 = vld [vmem:[#allocation2 + $0x11] sm:$0xff] }
  0x1f   : > { %2460 = vmatpush1.bf16.msra.mxu0 %v10482_v5  ;;  %v1166_v32 = vpack.c.bf16 %v1131_v29, %v1130_v28  ;;  %384 = vst [vmem:[#allocation2 + $0x90] sm:$0xff] %v9365_v41  ;;  %385 = vst [vmem:[#allocation2 + $0x98] sm:$0xff] %v9366_v42  ;;  %v9427_v5 = vld [vmem:[%s11027_s14 + $0x88] sm:$0xff]   ;;  %v1133_v11 = vld [vmem:[#allocation2 + $0x19] sm:$0xff] }
  0x20   : > { %2461 = vmatprep.subr.bf16.mxu0 %v14592_v1  ;;  %386 = vst [vmem:[#allocation2 + $0xa0] sm:$0xff] %v9369_v45  ;;  %387 = vst [vmem:[#allocation2 + $0xa8] sm:$0xff] %v9370_v46  ;;  %v9397_v7 = vunpack.c.l.bf16 %v9427_v5  ;;  %v9398_v13 = vunpack.c.h.bf16 %v9427_v5  ;;  %v1167_v17 = vpack.c.bf16 %v1133_v11, %v1132_v10  ;;  %v1134_v19 = vld [vmem:[#allocation2 + $0x21] sm:$0xff]  ;;  %v10501_v24 = vld [vmem:[%s14585_s1 + $0x98] sm:$0xff]  }
  0x21   : > { %2483 = vmatprep.mubr.bf16.mxu0 %v1166_v32  ;;  %388 = vst [vmem:[#allocation2 + $0xb0] sm:$0xff] %v9373_v48  ;;  %389 = vst [vmem:[#allocation2 + $0xb8] sm:$0xff] %v9374_v49  ;;  %v10496_v21 = vld [vmem:[%s11027_s14 + $0x8] sm:$0xff]  ;;  %v1136_v25 = vld [vmem:[#allocation2 + $0x31] sm:$0xff] }
  0x22   : > { %390 = vst [vmem:[#allocation2 + $0xc0] sm:$0xff] %v9377_v52  ;;  %391 = vst [vmem:[#allocation2 + $0xc8] sm:$0xff] %v9378_v53  ;;  %v1137_v26 = vld [vmem:[#allocation2 + $0x39] sm:$0xff]  ;;  %v10505_v30 = vld [vmem:[%s14585_s1 + $0xa8] sm:$0xff]  }
  0x23   : > { %2462 = vmatpush1.bf16.msra.mxu0 %v10483_v12  ;;  %392 = vst [vmem:[#allocation2 + $0xd0] sm:$0xff] %v9381_v56  ;;  %393 = vst [vmem:[#allocation2 + $0xd8] sm:$0xff] %v9382_v57  ;;  %v9428_v12 = vld [vmem:[%s11027_s14 + $0x90] sm:$0xff]   ;;  %v10503_v28 = vld [vmem:[%s14585_s1 + $0xa0] sm:$0xff]   ;;  %v1169_v29 = vpack.c.bf16 %v1137_v26, %v1136_v25 }
  0x24   : > { %2463 = vmatprep.subr.bf16.mxu0 %v14592_v1  ;;  %394 = vst [vmem:[#allocation2 + $0xe0] sm:$0xff] %v9385_v59  ;;  %395 = vst [vmem:[#allocation2 + $0xe8] sm:$0xff] %v9386_v60  ;;  %v9401_v14 = vunpack.c.l.bf16 %v9428_v12  ;;  %v1138_v31 = vld [vmem:[#allocation2 + $0x41] sm:$0xff]  ;;  %v1139_v32 = vld [vmem:[#allocation2 + $0x49] sm:$0xff] }
  0x25   : > { %396 = vst [vmem:[#allocation2 + $0xf0] sm:$0xff] %v9389_v63  ;;  %397 = vst [vmem:[#allocation2 + $0xf8] sm:$0xff] %v9390_v0  ;;  %v10500_v33 = vld [vmem:[%s11027_s14 + $0x18] sm:$0xff]  ;;  %v10507_v34 = vld [vmem:[%s14585_s1 + $0xb0] sm:$0xff]   ;;  %v1170_v35 = vpack.c.bf16 %v1139_v32, %v1138_v31 }
  0x26   : > { %398 = vst [vmem:[#allocation2 + $0x100] sm:$0xff] %v9393_v3  ;;  %399 = vst [vmem:[#allocation2 + $0x108] sm:$0xff] %v9394_v6  ;;  %v1140_v36 = vld [vmem:[#allocation2 + $0x51] sm:$0xff]  ;;  %v10502_v39 = vld [vmem:[%s11027_s14 + $0x20] sm:$0xff] }
  0x27   : > { %2464 = vmatpush1.bf16.msra.mxu0 %v10484_v20  ;;  %400 = vst [vmem:[#allocation2 + $0x110] sm:$0xff] %v9397_v7  ;;  %401 = vst [vmem:[#allocation2 + $0x118] sm:$0xff] %v9398_v13  ;;  %v1135_v20 = vld [vmem:[#allocation2 + $0x29] sm:$0xff]  ;;  %v10510_v38 = vld [vmem:[%s14585_s1 + $0xb8] sm:$0xff]  }
  0x28   : > { %2465 = vmatprep.subr.bf16.mxu0 %v14592_v1  ;;  %402 = vst [vmem:[#allocation2 + $0x120] sm:$0xff] %v9401_v14  ;;  %v1168_v23 = vpack.c.bf16 %v1135_v20, %v1134_v19  ;;  %v10512_v40 = vld [vmem:[%s14585_s1 + $0xc0] sm:$0xff]   ;;  %v10514_v44 = vld [vmem:[%s14585_s1 + $0xc8] sm:$0xff]   ;;  %v10516_v46 = vld [vmem:[%s14585_s1 + $0xd0] sm:$0xff]  }
  0x29   : > { %v1142_v42 = vld [vmem:[#allocation2 + $0x61] sm:$0xff]  ;;  %v1144_v48 = vld [vmem:[#allocation2 + $0x71] sm:$0xff]  ;;  %v1145_v49 = vld [vmem:[#allocation2 + $0x79] sm:$0xff] }
  0x2a   : > { %v10504_v45 = vld [vmem:[%s11027_s14 + $0x28] sm:$0xff]  ;;  %v10506_v51 = vld [vmem:[%s11027_s14 + $0x30] sm:$0xff]  ;;  %v10520_v52 = vld [vmem:[%s14585_s1 + $0xe0] sm:$0xff]   ;;  %v1173_v53 = vpack.c.bf16 %v1145_v49, %v1144_v48 }
  0x2b   : > { %2466 = vmatpush1.bf16.msra.mxu0 %v10485_v27  ;;  %v10498_v27 = vld [vmem:[%s11027_s14 + $0x10] sm:$0xff]  ;;  %v1146_v54 = vld [vmem:[#allocation2 + $0x81] sm:$0xff]  ;;  %v10508_v57 = vld [vmem:[%s11027_s14 + $0x38] sm:$0xff] }
  0x2c   : > { %2467 = vmatprep.subr.bf16.mxu0 %v14592_v1  ;;  %v10522_v56 = vld [vmem:[%s14585_s1 + $0xe8] sm:$0xff]   ;;  %v10524_v58 = vld [vmem:[%s14585_s1 + $0xf0] sm:$0xff]   ;;  %v10527_v62 = vld [vmem:[%s14585_s1 + $0xf8] sm:$0xff]  }
  0x2d   : > { %v1148_v60 = vld [vmem:[#allocation2 + $0x91] sm:$0xff]  ;;  %v10509_v63 = vld [vmem:[%s11027_s14 + $0x40] sm:$0xff]  ;;  %v1151_v3 = vld [vmem:[#allocation2 + $0xa9] sm:$0xff] }
  0x2e   : > { %v1150_v2 = vld [vmem:[#allocation2 + $0xa1] sm:$0xff]  ;;  %v1152_v6 = vld [vmem:[#allocation2 + $0xb1] sm:$0xff]  ;;  %v1153_v7 = vld [vmem:[#allocation2 + $0xb9] sm:$0xff] }
  0x2f   : > { %2468 = vmatpush1.bf16.msra.mxu0 %v10486_v37  ;;  %v1141_v37 = vld [vmem:[#allocation2 + $0x59] sm:$0xff]  ;;  %v1176_v5 = vpack.c.bf16 %v1151_v3, %v1150_v2  ;;  %v1154_v10 = vld [vmem:[#allocation2 + $0xc1] sm:$0xff]  ;;  %v1155_v11 = vld [vmem:[#allocation2 + $0xc9] sm:$0xff] }
  0x30   : > { %2469 = vmatprep.subr.bf16.mxu0 %v14592_v1  ;;  %v1171_v41 = vpack.c.bf16 %v1141_v37, %v1140_v36  ;;  %v10515_v12 = vld [vmem:[%s11027_s14 + $0x58] sm:$0xff]  ;;  %v1178_v13 = vpack.c.bf16 %v1155_v11, %v1154_v10  ;;  %v1159_v19 = vld [vmem:[#allocation2 + $0xe9] sm:$0xff]  ;;  %v1162_v26 = vld [vmem:[#allocation2 + $0x101] sm:$0xff] }
  0x31   : > { %v1156_v14 = vld [vmem:[#allocation2 + $0xd1] sm:$0xff]  ;;  %v10519_v20 = vld [vmem:[%s11027_s14 + $0x68] sm:$0xff]  ;;  %v1165_v31 = vld [vmem:[#allocation2 + $0x119] sm:$0xff] }
  0x32   : > { %v10525_v32 = vld [vmem:[%s11027_s14 + $0x80] sm:$0xff]  ;;  %v10526_v36 = vld [vmem:[%s11027_s14 + $0x88] sm:$0xff]  ;;  %v10538_v10 = vld [vmem:[%s14585_s1 + $0x150] sm:$0xff]  }
  0x33   : > { %2470 = vmatpush1.bf16.msra.mxu0 %v10487_v43  ;;  %v1143_v43 = vld [vmem:[#allocation2 + $0x69] sm:$0xff]  ;;  %v10539_v11 = vld [vmem:[%s14585_s1 + $0x158] sm:$0xff]  }
  0x34   : > { %2471 = vmatprep.subr.bf16.mxu0 %v14592_v1  ;;  %v1172_v47 = vpack.c.bf16 %v1143_v43, %v1142_v42  ;;  %v11180_v42 = vld [vmem:[%s11027_s14 + $0x98] sm:$0xff]   ;;  %v10928_v43 = vld [vmem:[%s11027_s14 + $0x90] sm:$0xff]   ;;  %v10529_v49 = vld [vmem:[%s14585_s1 + $0x108] sm:$0xff]  }
  0x35   : > { %v1284_v2 = vld [vmem:[#allocation2 + $0x62] sm:$0xff]  ;;  %v1285_v3 = vld [vmem:[#allocation2 + $0x6a] sm:$0xff] }
  0x37   : > { %2472 = vmatpush1.bf16.msra.mxu0 %v10488_v50  ;;  %v10518_v50 = vld [vmem:[%s14585_s1 + $0xd8] sm:$0xff]  }
  0x38   : > { %2473 = vmatprep.subr.bf16.mxu0 %v14592_v1 }
  0x3b   : > { %2474 = vmatpush1.bf16.msra.mxu0 %v10489_v55  ;;  %v1147_v55 = vld [vmem:[#allocation2 + $0x89] sm:$0xff] }
  0x3c   : > { %2475 = vmatprep.subr.bf16.mxu0 %v14592_v1  ;;  %v1174_v59 = vpack.c.bf16 %v1147_v55, %v1146_v54  ;;  %v10531_v54 = vld [vmem:[%s14585_s1 + $0x118] sm:$0xff]   ;;  %v1280_v55 = vld [vmem:[#allocation2 + $0x42] sm:$0xff] }
  0x3f   : > { %2476 = vmatpush1.bf16.msra.mxu0 %v10490_v61  ;;  %v1149_v61 = vld [vmem:[#allocation2 + $0x99] sm:$0xff] }
  0x40   : > { %2477 = vmatprep.subr.bf16.mxu0 %v14592_v1  ;;  %v1175_v0 = vpack.c.bf16 %v1149_v61, %v1148_v60  ;;  %v1282_v60 = vld [vmem:[#allocation2 + $0x52] sm:$0xff]  ;;  %v1283_v61 = vld [vmem:[#allocation2 + $0x5a] sm:$0xff] }
  0x43   : > { %2478 = vmatpush1.bf16.msra.mxu0 %v10491_v4  ;;  %v10511_v4 = vld [vmem:[%s11027_s14 + $0x48] sm:$0xff] }
  0x44   : > { %2479 = vmatprep.subr.bf16.mxu0 %v14592_v1 }
  0x47   : > { %2480 = vmatpush1.bf16.msra.mxu0 %v10492_v8  ;;  %v10513_v8 = vld [vmem:[%s11027_s14 + $0x50] sm:$0xff] }
  0x48   : > { %2481 = vmatprep.subr.bf16.mxu0 %v14592_v1 }
  0x4b   : > { %2482 = vmatpush1.bf16.msra.mxu0 %v10493_v9  ;;  %v1177_v9 = vpack.c.bf16 %v1153_v7, %v1152_v6  ;;  %v10537_v6 = vld [vmem:[%s14585_s1 + $0x148] sm:$0xff]   ;;  %v1286_v7 = vld [vmem:[#allocation2 + $0x72] sm:$0xff] }
  0x4c   : > { %2628 = vmatprep.subr.bf16.mxu0 %v14592_v1 }
  0x4e   : > { %2484 = vmatmul.mubr.bf16.vlgmr.msra.gmra.mrb[0].mxu0 %v10494_v15  ;;  %v1157_v15 = vld [vmem:[#allocation2 + $0xd9] sm:$0xff] }
  0x4f   : > { %2629 = vmatpush1.bf16.msra.mxu0 %v10495_v16  ;;  %2491 = vmatprep.mubr.bf16.mxu0 %v1167_v17  ;;  %v10517_v16 = vld [vmem:[%s11027_s14 + $0x60] sm:$0xff]  ;;  %v1179_v17 = vpack.c.bf16 %v1157_v15, %v1156_v14 }
  0x50   : > { %2630 = vmatprep.subr.bf16.mxu0 %v14592_v1  ;;  %v10540_v15 = vld [vmem:[%s14585_s1 + $0x160] sm:$0xff]  }
  0x53   : > { %2631 = vmatpush1.bf16.msra.mxu0 %v10497_v18  ;;  %v1158_v18 = vld [vmem:[#allocation2 + $0xe1] sm:$0xff] }
  0x54   : > { %2632 = vmatprep.subr.bf16.mxu0 %v14592_v1 }
  0x56   : > { %2492 = vmatmul.mubr.bf16.gmra.mrb[4].mxu0 %v10496_v21  ;;  %v1180_v21 = vpack.c.bf16 %v1159_v19, %v1158_v18  ;;  %v1291_v18 = vld [vmem:[#allocation2 + $0x9a] sm:$0xff] }
  0x57   : > { %2499 = vmatprep.mubr.bf16.mxu0 %v1168_v23  ;;  %2633 = vmatpush1.bf16.msra.mxu0 %v10499_v22  ;;  %v1160_v22 = vld [vmem:[#allocation2 + $0xf1] sm:$0xff]  ;;  %v1161_v23 = vld [vmem:[#allocation2 + $0xf9] sm:$0xff] }
  0x58   : > { %2634 = vmatprep.subr.bf16.mxu0 %v14592_v1  ;;  %v1181_v25 = vpack.c.bf16 %v1161_v23, %v1160_v22  ;;  %v1292_v22 = vld [vmem:[#allocation2 + $0xa2] sm:$0xff]  ;;  %v1293_v23 = vld [vmem:[#allocation2 + $0xaa] sm:$0xff] }
  0x5b   : > { %2635 = vmatpush1.bf16.msra.mxu0 %v10501_v24  ;;  %v10521_v24 = vld [vmem:[%s11027_s14 + $0x70] sm:$0xff] }
  0x5c   : > { %2636 = vmatprep.subr.bf16.mxu0 %v14592_v1 }
  0x5e   : > { %2500 = vmatmul.mubr.bf16.gmra.mrb[8].mxu0 %v10498_v27  ;;  %v1163_v27 = vld [vmem:[#allocation2 + $0x109] sm:$0xff] }
  0x5f   : > { %2507 = vmatprep.mubr.bf16.mxu0 %v1169_v29  ;;  %2637 = vmatpush1.bf16.msra.mxu0 %v10503_v28  ;;  %v10523_v28 = vld [vmem:[%s11027_s14 + $0x78] sm:$0xff]  ;;  %v1182_v29 = vpack.c.bf16 %v1163_v27, %v1162_v26 }
  0x60   : > { %2638 = vmatprep.subr.bf16.mxu0 %v14592_v1  ;;  %v1295_v26 = vld [vmem:[#allocation2 + $0xba] sm:$0xff] }
  0x63   : > { %2639 = vmatpush1.bf16.msra.mxu0 %v10505_v30  ;;  %v1164_v30 = vld [vmem:[#allocation2 + $0x111] sm:$0xff] }
  0x64   : > { %2640 = vmatprep.subr.bf16.mxu0 %v14592_v1 }
  0x66   : > { %2508 = vmatmul.mubr.bf16.gmra.mrb[12].mxu0 %v10500_v33  ;;  %v1183_v33 = vpack.c.bf16 %v1165_v31, %v1164_v30  ;;  %v1298_v31 = vld [vmem:[#allocation2 + $0xd2] sm:$0xff] }
  0x67   : > { %2515 = vmatprep.mubr.bf16.mxu0 %v1170_v35  ;;  %2641 = vmatpush1.bf16.msra.mxu0 %v10507_v34  ;;  %v1274_v34 = vld [vmem:[#allocation2 + $0x12] sm:$0xff]  ;;  %v1275_v35 = vld [vmem:[#allocation2 + $0x1a] sm:$0xff] }
  0x68   : > { %2642 = vmatprep.subr.bf16.mxu0 %v14592_v1  ;;  %v1310_v37 = vpack.c.bf16 %v1275_v35, %v1274_v34  ;;  %v1300_v34 = vld [vmem:[#allocation2 + $0xe2] sm:$0xff]  ;;  %v1301_v35 = vld [vmem:[#allocation2 + $0xea] sm:$0xff] }
  0x6b   : > { %2643 = vmatpush1.bf16.msra.mxu0 %v10510_v38  ;;  %v1202_v38 = vld [vmem:[#allocation2 + $0x2] sm:$0xff] }
  0x6c   : > { %2644 = vmatprep.subr.bf16.mxu0 %v14592_v1 }
  0x6e   : > { %2516 = vmatmul.mubr.bf16.gmra.mrb[16].mxu0 %v10502_v39  ;;  %v1203_v39 = vld [vmem:[#allocation2 + $0xa] sm:$0xff] }
  0x6f   : > { %2523 = vmatprep.mubr.bf16.mxu0 %v1171_v41  ;;  %2645 = vmatpush1.bf16.msra.mxu0 %v10512_v40  ;;  %v1276_v40 = vld [vmem:[#allocation2 + $0x22] sm:$0xff]  ;;  %v1277_v41 = vld [vmem:[#allocation2 + $0x2a] sm:$0xff] }
  0x70   : > { %2646 = vmatprep.subr.bf16.mxu0 %v14592_v1  ;;  %v1311_v48 = vpack.c.bf16 %v1277_v41, %v1276_v40  ;;  %v1304_v40 = vld [vmem:[#allocation2 + $0x102] sm:$0xff]  ;;  %v1305_v41 = vld [vmem:[#allocation2 + $0x10a] sm:$0xff] }
  0x73   : > { %2647 = vmatpush1.bf16.msra.mxu0 %v10514_v44  ;;  %v9402_v44 = vunpack.c.h.bf16 %v10928_v43  ;;  %v1325_v43 = vpack.c.bf16 %v1305_v41, %v1304_v40  ;;  %v1638_v41 = vld [vmem:[#allocation2 + $0x46] sm:$0xff] }
  0x74   : > { %2648 = vmatprep.subr.bf16.mxu0 %v14592_v1 }
  0x75   : > { %403 = vst [vmem:[#allocation2 + $0x128] sm:$0xff] %v9402_v44  ;;  %v1306_v44 = vld [vmem:[#allocation2 + $0x112] sm:$0xff] }
  0x76   : > { %2524 = vmatmul.mubr.bf16.gmra.mrb[20].mxu0 %v10504_v45  ;;  %v9405_v45 = vunpack.c.l.bf16 %v11180_v42 }
  0x77   : > { %2531 = vmatprep.mubr.bf16.mxu0 %v1172_v47  ;;  %2649 = vmatpush1.bf16.msra.mxu0 %v10516_v46  ;;  %v1238_v46 = vpack.c.bf16 %v1203_v39, %v1202_v38  ;;  %v10528_v47 = vld [vmem:[%s14585_s1 + $0x100] sm:$0xff]  }
  0x78   : > { %2650 = vmatprep.subr.bf16.mxu0 %v14592_v1  ;;  %404 = vst [vmem:[#allocation2 + $0x130] sm:$0xff] %v9405_v45  ;;  %v1303_v38 = vld [vmem:[#allocation2 + $0xfa] sm:$0xff] }
  0x79   : > { %v1307_v45 = vld [vmem:[#allocation2 + $0x11a] sm:$0xff] }
  0x7b   : > { %2651 = vmatpush1.bf16.msra.mxu0 %v10518_v50  ;;  %v1278_v50 = vld [vmem:[#allocation2 + $0x32] sm:$0xff] }
  0x7c   : > { %2652 = vmatprep.subr.bf16.mxu0 %v14592_v1 }
  0x7e   : > { %2532 = vmatmul.mubr.bf16.gmra.mrb[24].mxu0 %v10506_v51  ;;  %v1279_v51 = vld [vmem:[#allocation2 + $0x3a] sm:$0xff] }
  0x7f   : > { %2539 = vmatprep.mubr.bf16.mxu0 %v1173_v53  ;;  %2653 = vmatpush1.bf16.msra.mxu0 %v10520_v52  ;;  %v1312_v52 = vpack.c.bf16 %v1279_v51, %v1278_v50  ;;  %v10530_v53 = vld [vmem:[%s14585_s1 + $0x110] sm:$0xff]   ;;  %v10558_v51 = vld [vmem:[%s14585_s1 + $0x208] sm:$0xff]  }
  0x80   : > { %2654 = vmatprep.subr.bf16.mxu0 %v14592_v1 }
  0x83   : > { %2655 = vmatpush1.bf16.msra.mxu0 %v10522_v56  ;;  %v1281_v56 = vld [vmem:[#allocation2 + $0x4a] sm:$0xff] }
  0x84   : > { %2656 = vmatprep.subr.bf16.mxu0 %v14592_v1 }
  0x86   : > { %2540 = vmatmul.mubr.bf16.gmra.mrb[28].mxu0 %v10508_v57  ;;  %v1313_v57 = vpack.c.bf16 %v1281_v56, %v1280_v55  ;;  %v10561_v56 = vld [vmem:[%s14585_s1 + $0x218] sm:$0xff]  }
  0x87   : > { %2547 = vmatprep.mubr.bf16.mxu0 %v1174_v59  ;;  %2657 = vmatpush1.bf16.msra.mxu0 %v10524_v58  ;;  %v10532_v58 = vld [vmem:[%s14585_s1 + $0x120] sm:$0xff]   ;;  %v10533_v59 = vld [vmem:[%s14585_s1 + $0x128] sm:$0xff]  }
  0x88   : > { %2658 = vmatprep.subr.bf16.mxu0 %v14592_v1 }
  0x8b   : > { %2659 = vmatpush1.bf16.msra.mxu0 %v10527_v62  ;;  %v1314_v62 = vpack.c.bf16 %v1283_v61, %v1282_v60  ;;  %v1420_v60 = vld [vmem:[#allocation2 + $0x24] sm:$0xff]  ;;  %v1421_v61 = vld [vmem:[#allocation2 + $0x2c] sm:$0xff] }
  0x8c   : > { %2805 = vmatprep.subr.bf16.mxu0 %v14592_v1 }
  0x8e   : > { %2548 = vmatmul.mubr.bf16.gmra.mrb[32].mxu0 %v10509_v63  ;;  %v10534_v63 = vld [vmem:[%s14585_s1 + $0x130] sm:$0xff]  }
  0x8f   : > { %2555 = vmatprep.mubr.bf16.mxu0 %v1175_v0  ;;  %v10535_v0 = vld [vmem:[%s14585_s1 + $0x138] sm:$0xff]  }
  0x96   : > { %2556 = vmatmul.mubr.bf16.gmra.mrb[36].mxu0 %v10511_v4  ;;  %v1315_v4 = vpack.c.bf16 %v1285_v3, %v1284_v2  ;;  %v1348_v2 = vld [vmem:[#allocation2 + $0x23] sm:$0xff] }
  0x97   : > { %2563 = vmatprep.mubr.bf16.mxu0 %v1176_v5  ;;  %v10536_v5 = vld [vmem:[%s14585_s1 + $0x140] sm:$0xff]   ;;  %v10564_v3 = vld [vmem:[%s14585_s1 + $0x228] sm:$0xff]  }
  0x9e   : > { %2564 = vmatmul.mubr.bf16.gmra.mrb[40].mxu0 %v10513_v8  ;;  %v1287_v8 = vld [vmem:[#allocation2 + $0x7a] sm:$0xff] }
  0x9f   : > { %2571 = vmatprep.mubr.bf16.mxu0 %v1177_v9  ;;  %v1316_v9 = vpack.c.bf16 %v1287_v8, %v1286_v7  ;;  %v1422_v7 = vld [vmem:[#allocation2 + $0x34] sm:$0xff]  ;;  %v1423_v8 = vld [vmem:[#allocation2 + $0x3c] sm:$0xff] }
  0xa6   : > { %2572 = vmatmul.mubr.bf16.gmra.mrb[44].mxu0 %v10515_v12  ;;  %v1288_v12 = vld [vmem:[#allocation2 + $0x82] sm:$0xff] }
  0xa7   : > { %2579 = vmatprep.mubr.bf16.mxu0 %v1178_v13  ;;  %v1289_v13 = vld [vmem:[#allocation2 + $0x8a] sm:$0xff] }
  0xa8   : > { %v1317_v14 = vpack.c.bf16 %v1289_v13, %v1288_v12  ;;  %v1350_v12 = vld [vmem:[#allocation2 + $0x33] sm:$0xff]  ;;  %v1351_v13 = vld [vmem:[#allocation2 + $0x3b] sm:$0xff] }
  0xae   : > { %2580 = vmatmul.mubr.bf16.gmra.mrb[48].mxu0 %v10517_v16  ;;  %v10541_v16 = vld [vmem:[%s14585_s1 + $0x168] sm:$0xff]  }
  0xaf   : > { %2587 = vmatprep.mubr.bf16.mxu0 %v1179_v17  ;;  %v1290_v17 = vld [vmem:[#allocation2 + $0x92] sm:$0xff] }
  0xb0   : > { %v1318_v19 = vpack.c.bf16 %v1291_v18, %v1290_v17  ;;  %v10547_v17 = vld [vmem:[%s14585_s1 + $0x198] sm:$0xff]   ;;  %v1635_v18 = vld [vmem:[#allocation2 + $0x2e] sm:$0xff] }
  0xb6   : > { %2588 = vmatmul.mubr.bf16.gmra.mrb[52].mxu0 %v10519_v20  ;;  %v10542_v20 = vld [vmem:[%s14585_s1 + $0x170] sm:$0xff]  }
  0xb7   : > { %2595 = vmatprep.mubr.bf16.mxu0 %v1180_v21  ;;  %v10543_v21 = vld [vmem:[%s14585_s1 + $0x178] sm:$0xff]  }
  0xbe   : > { %2596 = vmatmul.mubr.bf16.gmra.mrb[56].mxu0 %v10521_v24  ;;  %v1319_v24 = vpack.c.bf16 %v1293_v23, %v1292_v22  ;;  %v1637_v22 = vld [vmem:[#allocation2 + $0x3e] sm:$0xff] }
  0xbf   : > { %2603 = vmatprep.mubr.bf16.mxu0 %v1181_v25  ;;  %v1294_v25 = vld [vmem:[#allocation2 + $0xb2] sm:$0xff] }
  0xc0   : > { %v1320_v27 = vpack.c.bf16 %v1295_v26, %v1294_v25  ;;  %v10548_v26 = vld [vmem:[%s14585_s1 + $0x1a0] sm:$0xff]  }
  0xc6   : > { %2604 = vmatmul.mubr.bf16.gmra.mrb[60].mxu0 %v10523_v28  ;;  %v1296_v28 = vld [vmem:[#allocation2 + $0xc2] sm:$0xff] }
  0xc7   : > { %2611 = vmatprep.mubr.bf16.mxu0 %v1182_v29  ;;  %v1297_v29 = vld [vmem:[#allocation2 + $0xca] sm:$0xff] }
  0xc8   : > { %v1321_v30 = vpack.c.bf16 %v1297_v29, %v1296_v28  ;;  %v1353_v28 = vld [vmem:[#allocation2 + $0x4b] sm:$0xff] }
  0xc9   : > { %v10549_v29 = vld [vmem:[%s14585_s1 + $0x1a8] sm:$0xff]  }
  0xce   : > { %2612 = vmatmul.mubr.bf16.gmra.mrb[64].mxu0 %v10525_v32  ;;  %v1299_v32 = vld [vmem:[#allocation2 + $0xda] sm:$0xff] }
  0xcf   : > { %2619 = vmatprep.mubr.bf16.mxu0 %v1183_v33  ;;  %v1322_v33 = vpack.c.bf16 %v1299_v32, %v1298_v31  ;;  %v1427_v31 = vld [vmem:[#allocation2 + $0x5c] sm:$0xff] }
  0xd6   : > { %2620 = vmatmul.mubr.bf16.gmra.mrb[68].mxu0 %v10526_v36  ;;  %v1323_v36 = vpack.c.bf16 %v1301_v35, %v1300_v34  ;;  %v10550_v34 = vld [vmem:[%s14585_s1 + $0x1b0] sm:$0xff]  }
  0xd7   : > { %2660 = vmatprep.mubr.bf16.mxu0 %v1310_v37  ;;  %v1354_v35 = vld [vmem:[#allocation2 + $0x53] sm:$0xff] }
  0xde   : > { %2661 = vmatmul.mubr.bf16.vlgmr.msra.gmra.mrb[0].mxu0 %v1238_v46  ;;  %v1326_v46 = vpack.c.bf16 %v1307_v45, %v1306_v44  ;;  %v10552_v45 = vld [vmem:[%s14585_s1 + $0x1c0] sm:$0xff]  }
  0xdf   : > { %2806 = vmatpush1.bf16.msra.mxu0 %v10528_v47  ;;  %2668 = vmatprep.mubr.bf16.mxu0 %v1311_v48  ;;  %v10557_v47 = vld [vmem:[%s14585_s1 + $0x200] sm:$0xff]  }
  0xe0   : > { %2807 = vmatprep.subr.bf16.mxu0 %v14592_v1  ;;  %9509 = vmatprep.subr.bf16.mxu1 %v10557_v47 }
  0xe1   : > { %9510 = vmatpush3.bf16.msra.mxu1 %v10557_v47  ;;  %v1640_v47 = vld [vmem:[#allocation2 + $0x56] sm:$0xff] }
  0xe2   : > { %9511 = vmatprep.subr.bf16.mxu1 %v10558_v51 }
  0xe3   : > { %2808 = vmatpush1.bf16.msra.mxu0 %v10529_v49  ;;  %v1309_v49 = vld [vmem:[#allocation2 + $0x12a] sm:$0xff] }
  0xe4   : > { %2809 = vmatprep.subr.bf16.mxu0 %v14592_v1 }
  0xe5   : > { %9512 = vmatpush3.bf16.msra.mxu1 %v10558_v51  ;;  %v1357_v51 = vld [vmem:[#allocation2 + $0x6b] sm:$0xff] }
  0xe6   : > { %2669 = vmatmul.mubr.bf16.gmra.mrb[4].mxu0 %v1310_v37  ;;  %v1302_v37 = vld [vmem:[#allocation2 + $0xf2] sm:$0xff] }
  0xe7   : > { %2676 = vmatprep.mubr.bf16.mxu0 %v1312_v52  ;;  %2810 = vmatpush1.bf16.msra.mxu0 %v10530_v53  ;;  %v1324_v39 = vpack.c.bf16 %v1303_v38, %v1302_v37  ;;  %v1418_v53 = vld [vmem:[#allocation2 + $0x14] sm:$0xff]  ;;  %v1428_v38 = vld [vmem:[#allocation2 + $0x64] sm:$0xff] }
  0xe8   : > { %2811 = vmatprep.subr.bf16.mxu0 %v14592_v1  ;;  %v10551_v37 = vld [vmem:[%s14585_s1 + $0x1b8] sm:$0xff]  }
  0xeb   : > { %2812 = vmatpush1.bf16.msra.mxu0 %v10531_v54  ;;  %v1419_v54 = vld [vmem:[#allocation2 + $0x1c] sm:$0xff] }
  0xec   : > { %2813 = vmatprep.subr.bf16.mxu0 %v14592_v1  ;;  %v1454_v55 = vpack.c.bf16 %v1419_v54, %v1418_v53  ;;  %v1430_v53 = vld [vmem:[#allocation2 + $0x74] sm:$0xff]  ;;  %v1431_v54 = vld [vmem:[#allocation2 + $0x7c] sm:$0xff] }
  0xee   : > { %2677 = vmatmul.mubr.bf16.gmra.mrb[8].mxu0 %v1311_v48  ;;  %v1308_v48 = vld [vmem:[#allocation2 + $0x122] sm:$0xff] }
  0xef   : > { %2684 = vmatprep.mubr.bf16.mxu0 %v1313_v57  ;;  %2814 = vmatpush1.bf16.msra.mxu0 %v10532_v58  ;;  %v1327_v50 = vpack.c.bf16 %v1309_v49, %v1308_v48  ;;  %v1347_v58 = vld [vmem:[#allocation2 + $0x1b] sm:$0xff] }
  0xf0   : > { %2815 = vmatprep.subr.bf16.mxu0 %v14592_v1  ;;  %v1641_v48 = vld [vmem:[#allocation2 + $0x5e] sm:$0xff] }
  0xf1   : > { %v1673_v49 = vpack.c.bf16 %v1641_v48, %v1640_v47  ;;  %v1650_v47 = vld [vmem:[#allocation2 + $0xa6] sm:$0xff]  ;;  %v1651_v48 = vld [vmem:[#allocation2 + $0xae] sm:$0xff] }
  0xf3   : > { %2816 = vmatpush1.bf16.msra.mxu0 %v10533_v59  ;;  %v10563_v59 = vld [vmem:[%s14585_s1 + $0x220] sm:$0xff]  }
  0xf4   : > { %2817 = vmatprep.subr.bf16.mxu0 %v14592_v1 }
  0xf6   : > { %2685 = vmatmul.mubr.bf16.gmra.mrb[12].mxu0 %v1312_v52  ;;  %v10560_v52 = vld [vmem:[%s14585_s1 + $0x210] sm:$0xff]  }
  0xf7   : > { %2692 = vmatprep.mubr.bf16.mxu0 %v1314_v62  ;;  %2818 = vmatpush1.bf16.msra.mxu0 %v10534_v63  ;;  %v10544_v63 = vld [vmem:[%s14585_s1 + $0x180] sm:$0xff]  }
  0xf8   : > { %2819 = vmatprep.subr.bf16.mxu0 %v14592_v1  ;;  %9513 = vmatprep.subr.bf16.mxu1 %v10560_v52 }
  0xf9   : > { %9514 = vmatpush3.bf16.msra.mxu1 %v10560_v52  ;;  %v10553_v52 = vld [vmem:[%s14585_s1 + $0x1c8] sm:$0xff]  }
  0xfa   : > { %9515 = vmatprep.subr.bf16.mxu1 %v10561_v56 }
  0xfb   : > { %2820 = vmatpush1.bf16.msra.mxu0 %v10535_v0  ;;  %v11266_v0 = vpack.c.bf16 %v1421_v61, %v1420_v60  ;;  %v10555_v60 = vld [vmem:[%s14585_s1 + $0x1d8] sm:$0xff]   ;;  %v1432_v61 = vld [vmem:[#allocation2 + $0x84] sm:$0xff] }
  0xfc   : > { %2821 = vmatprep.subr.bf16.mxu0 %v14592_v1 }
  0xfd   : > { %9516 = vmatpush3.bf16.msra.mxu1 %v10561_v56  ;;  %v11327_v56 = vpack.c.bf16 %v1431_v54, %v1430_v53  ;;  %v1368_v54 = vld [vmem:[#allocation2 + $0xc3] sm:$0xff] }
  0xfe   : > { %2693 = vmatmul.mubr.bf16.gmra.mrb[16].mxu0 %v1313_v57  ;;  %v1346_v57 = vld [vmem:[#allocation2 + $0x13] sm:$0xff]  ;;  %9517 = vmatprep.subr.bf16.mxu1 %v10563_v59 }
  0xff   : > { %2700 = vmatprep.mubr.bf16.mxu0 %v1315_v4  ;;  %2822 = vmatpush1.bf16.msra.mxu0 %v10536_v5  ;;  %v10545_v5 = vld [vmem:[%s14585_s1 + $0x188] sm:$0xff]  }
 0x100   : > { %2823 = vmatprep.subr.bf16.mxu0 %v14592_v1 }
 0x101   : > { %9518 = vmatpush3.bf16.msra.mxu1 %v10563_v59  ;;  %v1359_v59 = vld [vmem:[#allocation2 + $0x7b] sm:$0xff] }
 0x102   : > { %9519 = vmatprep.subr.bf16.mxu1 %v10564_v3 }
 0x103   : > { %2824 = vmatpush1.bf16.msra.mxu0 %v10537_v6  ;;  %v10565_v6 = vld [vmem:[%s14585_s1 + $0x230] sm:$0xff]  }
 0x104   : > { %2825 = vmatprep.subr.bf16.mxu0 %v14592_v1 }
 0x105   : > { %9520 = vmatpush3.bf16.msra.mxu1 %v10564_v3  ;;  %v1643_v3 = vld [vmem:[#allocation2 + $0x6e] sm:$0xff] }
 0x106   : > { %2701 = vmatmul.mubr.bf16.gmra.mrb[20].mxu0 %v1314_v62  ;;  %v1382_v62 = vpack.c.bf16 %v1347_v58, %v1346_v57  ;;  %9521 = vmatprep.subr.bf16.mxu1 %v10565_v6  ;;  %v10554_v57 = vld [vmem:[%s14585_s1 + $0x1d0] sm:$0xff]  }
 0x107   : > { %2708 = vmatprep.mubr.bf16.mxu0 %v1316_v9  ;;  %2826 = vmatpush1.bf16.msra.mxu0 %v10538_v10  ;;  %v11279_v10 = vpack.c.bf16 %v1423_v8, %v1422_v7  ;;  %v1358_v58 = vld [vmem:[#allocation2 + $0x73] sm:$0xff]  ;;  %v1645_v8 = vld [vmem:[#allocation2 + $0x7e] sm:$0xff] }
 0x108   : > { %2827 = vmatprep.subr.bf16.mxu0 %v14592_v1  ;;  %v1644_v7 = vld [vmem:[#allocation2 + $0x76] sm:$0xff] }
 0x109   : > { %9522 = vmatpush3.bf16.msra.mxu1 %v10565_v6 }
 0x10b   : > { %2828 = vmatpush1.bf16.msra.mxu0 %v10539_v11  ;;  %v10546_v11 = vld [vmem:[%s14585_s1 + $0x190] sm:$0xff]  }
 0x10c   : > { %2829 = vmatprep.subr.bf16.mxu0 %v14592_v1 }
 0x10e   : > { %2709 = vmatmul.mubr.bf16.gmra.mrb[24].mxu0 %v1315_v4  ;;  %v1349_v4 = vld [vmem:[#allocation2 + $0x2b] sm:$0xff] }
 0x10f   : > { %2716 = vmatprep.mubr.bf16.mxu0 %v1317_v14  ;;  %2830 = vmatpush1.bf16.msra.mxu0 %v10540_v15  ;;  %v1634_v15 = vld [vmem:[#allocation2 + $0x26] sm:$0xff] }
 0x110   : > { %2831 = vmatprep.subr.bf16.mxu0 %v14592_v1 }
 0x113   : > { %2832 = vmatpush1.bf16.msra.mxu0 %v10541_v16  ;;  %v1424_v16 = vld [vmem:[#allocation2 + $0x44] sm:$0xff] }
 0x114   : > { %2833 = vmatprep.subr.bf16.mxu0 %v14592_v1 }
 0x116   : > { %2717 = vmatmul.mubr.bf16.gmra.mrb[28].mxu0 %v1316_v9  ;;  %v1383_v9 = vpack.c.bf16 %v1349_v4, %v1348_v2  ;;  %v1642_v2 = vld [vmem:[#allocation2 + $0x66] sm:$0xff] }
 0x117   : > { %2724 = vmatprep.mubr.bf16.mxu0 %v1318_v19  ;;  %2834 = vmatpush1.bf16.msra.mxu0 %v10542_v20  ;;  %v1670_v20 = vpack.c.bf16 %v1635_v18, %v1634_v15  ;;  %v1674_v6 = vpack.c.bf16 %v1643_v3, %v1642_v2  ;;  %v1435_v15 = vld [vmem:[#allocation2 + $0x9c] sm:$0xff]  ;;  %v10562_v18 = vld [vmem:[%s14585_s1 + $0x1f0] sm:$0xff]  }
 0x118   : > { %2835 = vmatprep.subr.bf16.mxu0 %v14592_v1  ;;  %v1445_v2 = vld [vmem:[#allocation2 + $0xec] sm:$0xff] }
 0x119   : > { %9525 = vmatprep.mubr.bf16.mxu1 %v1670_v20  ;;  %v1363_v20 = vld [vmem:[#allocation2 + $0x9b] sm:$0xff] }
 0x11b   : > { %2836 = vmatpush1.bf16.msra.mxu0 %v10543_v21  ;;  %v1636_v21 = vld [vmem:[#allocation2 + $0x36] sm:$0xff] }
 0x11c   : > { %2982 = vmatprep.subr.bf16.mxu0 %v14592_v1  ;;  %v1671_v23 = vpack.c.bf16 %v1637_v22, %v1636_v21  ;;  %v10566_v21 = vld [vmem:[%s14585_s1 + $0x1f8] sm:$0xff]   ;;  %v1436_v22 = vld [vmem:[#allocation2 + $0xa4] sm:$0xff] }
 0x11e   : > { %2725 = vmatmul.mubr.bf16.gmra.mrb[32].mxu0 %v1317_v14  ;;  %v10567_v14 = vld [vmem:[%s14585_s1 + $0x238] sm:$0xff]  }
 0x11f   : > { %2732 = vmatprep.mubr.bf16.mxu0 %v1319_v24  ;;  %9523 = vmatprep.subr.bf16.mxu1 %v10567_v14 }
 0x120   : > { %9524 = vmatpush3.bf16.msra.mxu1 %v10567_v14  ;;  %v1434_v14 = vld [vmem:[#allocation2 + $0x94] sm:$0xff] }
 0x121   : > { %5302 = vmatprep.subr.bf16.mxu1 %v14592_v1 }
 0x123   : > { %9526 = vmatmul.mubr.bf16.vlgmr.msra.gmra.mrb[0].mxu1 %v1671_v23  ;;  %v1437_v23 = vld [vmem:[#allocation2 + $0xac] sm:$0xff] }
 0x126   : > { %2733 = vmatmul.mubr.bf16.gmra.mrb[36].mxu0 %v1318_v19  ;;  %v1425_v19 = vld [vmem:[#allocation2 + $0x4c] sm:$0xff] }
 0x127   : > { %2740 = vmatprep.mubr.bf16.mxu0 %v1320_v27  ;;  %v11294_v25 = vpack.c.bf16 %v1425_v19, %v1424_v16  ;;  %v1362_v19 = vld [vmem:[#allocation2 + $0x93] sm:$0xff] }
 0x12e   : > { %2741 = vmatmul.mubr.bf16.gmra.mrb[40].mxu0 %v1319_v24  ;;  %v1384_v24 = vpack.c.bf16 %v1351_v13, %v1350_v12  ;;  %v1361_v12 = vld [vmem:[#allocation2 + $0x8b] sm:$0xff] }
 0x12f   : > { %2748 = vmatprep.mubr.bf16.mxu0 %v1321_v30  ;;  %v10559_v13 = vld [vmem:[%s14585_s1 + $0x1e8] sm:$0xff]  }
 0x136   : > { %2749 = vmatmul.mubr.bf16.gmra.mrb[44].mxu0 %v1320_v27  ;;  %v1352_v27 = vld [vmem:[#allocation2 + $0x43] sm:$0xff] }
 0x137   : > { %2756 = vmatprep.mubr.bf16.mxu0 %v1322_v33  ;;  %v1385_v32 = vpack.c.bf16 %v1353_v28, %v1352_v27  ;;  %v1647_v27 = vld [vmem:[#allocation2 + $0x8e] sm:$0xff]  ;;  %v11360_v28 = vpack.c.bf16 %v1437_v23, %v1436_v22  ;;  %v1448_v22 = vld [vmem:[#allocation2 + $0x104] sm:$0xff] }
 0x138   : > { %v1449_v23 = vld [vmem:[#allocation2 + $0x10c] sm:$0xff] }
 0x13e   : > { %2757 = vmatmul.mubr.bf16.gmra.mrb[48].mxu0 %v1321_v30  ;;  %v1426_v30 = vld [vmem:[#allocation2 + $0x54] sm:$0xff] }
 0x13f   : > { %2764 = vmatprep.mubr.bf16.mxu0 %v1323_v36 }
 0x146   : > { %2765 = vmatmul.mubr.bf16.gmra.mrb[52].mxu0 %v1322_v33  ;;  %v11305_v33 = vpack.c.bf16 %v1427_v31, %v1426_v30  ;;  %v1648_v30 = vld [vmem:[#allocation2 + $0x96] sm:$0xff]  ;;  %v1649_v31 = vld [vmem:[#allocation2 + $0x9e] sm:$0xff] }
 0x147   : > { %2772 = vmatprep.mubr.bf16.mxu0 %v1324_v39 }
 0x14e   : > { %2773 = vmatmul.mubr.bf16.gmra.mrb[56].mxu0 %v1323_v36  ;;  %v1355_v36 = vld [vmem:[#allocation2 + $0x5b] sm:$0xff] }
 0x14f   : > { %2780 = vmatprep.mubr.bf16.mxu0 %v1325_v43  ;;  %v1386_v40 = vpack.c.bf16 %v1355_v36, %v1354_v35  ;;  %v1365_v35 = vld [vmem:[#allocation2 + $0xab] sm:$0xff]  ;;  %v1438_v36 = vld [vmem:[#allocation2 + $0xb4] sm:$0xff] }
 0x156   : > { %2781 = vmatmul.mubr.bf16.gmra.mrb[60].mxu0 %v1324_v39  ;;  %v1429_v39 = vld [vmem:[#allocation2 + $0x6c] sm:$0xff] }
 0x157   : > { %2788 = vmatprep.mubr.bf16.mxu0 %v1326_v46  ;;  %v11316_v44 = vpack.c.bf16 %v1429_v39, %v1428_v38 }
 0x15e   : > { %2789 = vmatmul.mubr.bf16.gmra.mrb[64].mxu0 %v1325_v43  ;;  %v1639_v43 = vld [vmem:[#allocation2 + $0x4e] sm:$0xff] }
 0x15f   : > { %2796 = vmatprep.mubr.bf16.mxu0 %v1327_v50  ;;  %v1356_v50 = vld [vmem:[#allocation2 + $0x63] sm:$0xff] }
 0x166   : > { %2797 = vmatmul.mubr.bf16.gmra.mrb[68].mxu0 %v1326_v46  ;;  %v1672_v46 = vpack.c.bf16 %v1639_v43, %v1638_v41  ;;  %v1367_v41 = vld [vmem:[#allocation2 + $0xbb] sm:$0xff]  ;;  %v1440_v43 = vld [vmem:[#allocation2 + $0xc4] sm:$0xff] }
 0x167   : > { %2837 = vmatprep.mubr.bf16.mxu0 %v1454_v55  ;;  %v1387_v55 = vpack.c.bf16 %v1357_v51, %v1356_v50  ;;  %v1678_v50 = vpack.c.bf16 %v1651_v48, %v1650_v47  ;;  %v1652_v51 = vld [vmem:[#allocation2 + $0xb6] sm:$0xff]  ;;  %v1453_v47 = vld [vmem:[#allocation2 + $0x12c] sm:$0xff] }
 0x168   : > { %9529 = vmatprep.mubr.bf16.mxu1 %v1672_v46 }
 0x169   : > { %9530 = vmatmul.mubr.bf16.gmra.mrb[4].mxu1 %v1673_v49 }
 0x16a   : > { %9533 = vmatprep.mubr.bf16.mxu1 %v1674_v6  ;;  %v1655_v6 = vld [vmem:[#allocation2 + $0xce] sm:$0xff] }
 0x16e   : > { %2838 = vmatmul.mubr.bf16.vlgmr.msra.gmra.mrb[0].mxu0 %v1382_v62  ;;  %v1433_v62 = vld [vmem:[#allocation2 + $0x8c] sm:$0xff] }
 0x16f   : > { %2983 = vmatpush1.bf16.msra.mxu0 %v10544_v63  ;;  %2845 = vmatprep.mubr.bf16.mxu0 %v11266_v0  ;;  %v1388_v63 = vpack.c.bf16 %v1359_v59, %v1358_v58  ;;  %v11338_v4 = vpack.c.bf16 %v1433_v62, %v1432_v61  ;;  %v1443_v58 = vld [vmem:[#allocation2 + $0xdc] sm:$0xff]  ;;  %v1370_v61 = vld [vmem:[#allocation2 + $0xd3] sm:$0xff] }
 0x170   : > { %2984 = vmatprep.subr.bf16.mxu0 %v14592_v1  ;;  %v1371_v62 = vld [vmem:[#allocation2 + $0xdb] sm:$0xff] }
 0x171   : > { %v1394_v3 = vpack.c.bf16 %v1371_v62, %v1370_v61  ;;  %v1562_v61 = vld [vmem:[#allocation2 + $0x25] sm:$0xff]  ;;  %v1563_v62 = vld [vmem:[#allocation2 + $0x2d] sm:$0xff] }
 0x173   : > { %2985 = vmatpush1.bf16.msra.mxu0 %v10545_v5  ;;  %v10556_v5 = vld [vmem:[%s14585_s1 + $0x1e0] sm:$0xff]  }
 0x174   : > { %2986 = vmatprep.subr.bf16.mxu0 %v14592_v1 }
 0x176   : > { %2846 = vmatmul.mubr.bf16.gmra.mrb[4].mxu0 %v1383_v9  ;;  %v1675_v9 = vpack.c.bf16 %v1645_v8, %v1644_v7 }
 0x177   : > { %2853 = vmatprep.mubr.bf16.mxu0 %v11279_v10  ;;  %2987 = vmatpush1.bf16.msra.mxu0 %v10546_v11  ;;  %v1360_v11 = vld [vmem:[#allocation2 + $0x83] sm:$0xff] }
 0x178   : > { %2988 = vmatprep.subr.bf16.mxu0 %v14592_v1  ;;  %9534 = vmatmul.mubr.bf16.gmra.mrb[8].mxu1 %v1675_v9  ;;  %v1389_v16 = vpack.c.bf16 %v1361_v12, %v1360_v11  ;;  %v1656_v9 = vld [vmem:[#allocation2 + $0xd6] sm:$0xff]  ;;  %v1657_v11 = vld [vmem:[#allocation2 + $0xde] sm:$0xff] }
 0x179   : > { %v1681_v12 = vpack.c.bf16 %v1657_v11, %v1656_v9  ;;  %v1565_v9 = vld [vmem:[#allocation2 + $0x3d] sm:$0xff]  ;;  %v1666_v11 = vld [vmem:[#allocation2 + $0x126] sm:$0xff] }
 0x17b   : > { %2989 = vmatpush1.bf16.msra.mxu0 %v10547_v17  ;;  %v11349_v17 = vpack.c.bf16 %v1435_v15, %v1434_v14  ;;  %v1373_v14 = vld [vmem:[#allocation2 + $0xeb] sm:$0xff]  ;;  %v1446_v15 = vld [vmem:[#allocation2 + $0xf4] sm:$0xff] }
 0x17c   : > { %2990 = vmatprep.subr.bf16.mxu0 %v14592_v1 }
 0x17e   : > { %2854 = vmatmul.mubr.bf16.gmra.mrb[8].mxu0 %v1384_v24  ;;  %v1390_v24 = vpack.c.bf16 %v1363_v20, %v1362_v19  ;;  %v1374_v20 = vld [vmem:[#allocation2 + $0xf3] sm:$0xff] }
 0x17f   : > { %2861 = vmatprep.mubr.bf16.mxu0 %v11294_v25  ;;  %2991 = vmatpush1.bf16.msra.mxu0 %v10548_v26  ;;  %v1646_v26 = vld [vmem:[#allocation2 + $0x86] sm:$0xff] }
 0x180   : > { %2992 = vmatprep.subr.bf16.mxu0 %v14592_v1 }
 0x183   : > { %2993 = vmatpush1.bf16.msra.mxu0 %v10549_v29  ;;  %v1676_v29 = vpack.c.bf16 %v1647_v27, %v1646_v26  ;;  %v1658_v26 = vld [vmem:[#allocation2 + $0xe6] sm:$0xff]  ;;  %v1659_v27 = vld [vmem:[#allocation2 + $0xee] sm:$0xff] }
 0x184   : > { %2994 = vmatprep.subr.bf16.mxu0 %v14592_v1 }
 0x185   : > { %9537 = vmatprep.mubr.bf16.mxu1 %v1676_v29  ;;  %v11379_v29 = vpack.c.bf16 %v1449_v23, %v1448_v22  ;;  %v1568_v22 = vld [vmem:[#allocation2 + $0x55] sm:$0xff]  ;;  %v1569_v23 = vld [vmem:[#allocation2 + $0x5d] sm:$0xff] }
 0x186   : > { %2862 = vmatmul.mubr.bf16.gmra.mrb[12].mxu0 %v1385_v32  ;;  %v1677_v32 = vpack.c.bf16 %v1649_v31, %v1648_v30  ;;  %v1682_v30 = vpack.c.bf16 %v1659_v27, %v1658_v26  ;;  %v1660_v31 = vld [vmem:[#allocation2 + $0xf6] sm:$0xff]  ;;  %v1570_v26 = vld [vmem:[#allocation2 + $0x65] sm:$0xff]  ;;  %v1571_v27 = vld [vmem:[#allocation2 + $0x6d] sm:$0xff] }
 0x187   : > { %2869 = vmatprep.mubr.bf16.mxu0 %v11305_v33  ;;  %2995 = vmatpush1.bf16.msra.mxu0 %v10550_v34  ;;  %v1364_v34 = vld [vmem:[#allocation2 + $0xa3] sm:$0xff] }
 0x188   : > { %2996 = vmatprep.subr.bf16.mxu0 %v14592_v1  ;;  %9538 = vmatmul.mubr.bf16.gmra.mrb[12].mxu1 %v1677_v32  ;;  %v1391_v38 = vpack.c.bf16 %v1365_v35, %v1364_v34  ;;  %v1661_v32 = vld [vmem:[#allocation2 + $0xfe] sm:$0xff] }
 0x189   : > { %9541 = vmatprep.mubr.bf16.mxu1 %v1678_v50  ;;  %v1683_v34 = vpack.c.bf16 %v1661_v32, %v1660_v31  ;;  %v1376_v35 = vld [vmem:[#allocation2 + $0x103] sm:$0xff] }
 0x18a   : > { %v1662_v50 = vld [vmem:[#allocation2 + $0x106] sm:$0xff]  ;;  %v1573_v31 = vld [vmem:[#allocation2 + $0x7d] sm:$0xff] }
 0x18b   : > { %2997 = vmatpush1.bf16.msra.mxu0 %v10551_v37  ;;  %v1439_v37 = vld [vmem:[#allocation2 + $0xbc] sm:$0xff] }
 0x18c   : > { %2998 = vmatprep.subr.bf16.mxu0 %v14592_v1  ;;  %v11364_v39 = vpack.c.bf16 %v1439_v37, %v1438_v36  ;;  %v1377_v36 = vld [vmem:[#allocation2 + $0x10b] sm:$0xff]  ;;  %v1450_v37 = vld [vmem:[#allocation2 + $0x114] sm:$0xff] }
 0x18e   : > { %2870 = vmatmul.mubr.bf16.gmra.mrb[16].mxu0 %v1386_v40  ;;  %v1366_v40 = vld [vmem:[#allocation2 + $0xb3] sm:$0xff] }
 0x18f   : > { %2877 = vmatprep.mubr.bf16.mxu0 %v11316_v44  ;;  %2999 = vmatpush1.bf16.msra.mxu0 %v10552_v45  ;;  %v1441_v45 = vld [vmem:[#allocation2 + $0xcc] sm:$0xff]  ;;  %v1392_v46 = vpack.c.bf16 %v1367_v41, %v1366_v40  ;;  %v1397_v40 = vpack.c.bf16 %v1377_v36, %v1376_v35  ;;  %v1577_v36 = vld [vmem:[#allocation2 + $0x9d] sm:$0xff] }
 0x190   : > { %3000 = vmatprep.subr.bf16.mxu0 %v14592_v1  ;;  %v11367_v49 = vpack.c.bf16 %v1441_v45, %v1440_v43  ;;  %v1378_v43 = vld [vmem:[#allocation2 + $0x113] sm:$0xff]  ;;  %v1379_v45 = vld [vmem:[#allocation2 + $0x11b] sm:$0xff] }
 0x191   : > { %v1398_v48 = vpack.c.bf16 %v1379_v45, %v1378_v43  ;;  %v1581_v43 = vld [vmem:[#allocation2 + $0xbd] sm:$0xff] }
 0x193   : > { %3001 = vmatpush1.bf16.msra.mxu0 %v10553_v52  ;;  %v1653_v52 = vld [vmem:[#allocation2 + $0xbe] sm:$0xff] }
 0x194   : > { %3002 = vmatprep.subr.bf16.mxu0 %v14592_v1  ;;  %v1679_v53 = vpack.c.bf16 %v1653_v52, %v1652_v51  ;;  %v1663_v51 = vld [vmem:[#allocation2 + $0x10e] sm:$0xff] }
 0x196   : > { %2878 = vmatmul.mubr.bf16.gmra.mrb[20].mxu0 %v1387_v55  ;;  %9542 = vmatmul.mubr.bf16.gmra.mrb[16].mxu1 %v1679_v53  ;;  %v1369_v55 = vld [vmem:[#allocation2 + $0xcb] sm:$0xff]  ;;  %v1684_v53 = vpack.c.bf16 %v1663_v51, %v1662_v50 }
 0x197   : > { %2885 = vmatprep.mubr.bf16.mxu0 %v11327_v56  ;;  %3003 = vmatpush1.bf16.msra.mxu0 %v10554_v57  ;;  %v1442_v57 = vld [vmem:[#allocation2 + $0xd4] sm:$0xff]  ;;  %v1393_v59 = vpack.c.bf16 %v1369_v55, %v1368_v54  ;;  %v1665_v55 = vld [vmem:[#allocation2 + $0x11e] sm:$0xff] }
 0x198   : > { %3004 = vmatprep.subr.bf16.mxu0 %v14592_v1  ;;  %v1664_v54 = vld [vmem:[#allocation2 + $0x116] sm:$0xff]  ;;  %v1586_v51 = vld [vmem:[#allocation2 + $0xe5] sm:$0xff] }
 0x19b   : > { %3005 = vmatpush1.bf16.msra.mxu0 %v10555_v60  ;;  %v11370_v60 = vpack.c.bf16 %v1443_v58, %v1442_v57  ;;  %v1685_v57 = vpack.c.bf16 %v1665_v55, %v1664_v54  ;;  %v1380_v58 = vld [vmem:[#allocation2 + $0x123] sm:$0xff] }
 0x19c   : > { %3006 = vmatprep.subr.bf16.mxu0 %v14592_v1 }
 0x19e   : > { %2886 = vmatmul.mubr.bf16.gmra.mrb[24].mxu0 %v1388_v63  ;;  %v1444_v63 = vld [vmem:[#allocation2 + $0xe4] sm:$0xff] }
 0x19f   : > { %2893 = vmatprep.mubr.bf16.mxu0 %v11338_v4  ;;  %3007 = vmatpush1.bf16.msra.mxu0 %v10556_v5  ;;  %v1654_v5 = vld [vmem:[#allocation2 + $0xc6] sm:$0xff]  ;;  %v11373_v7 = vpack.c.bf16 %v1445_v2, %v1444_v63 }
 0x1a0   : > { %3008 = vmatprep.subr.bf16.mxu0 %v14592_v1  ;;  %v1680_v8 = vpack.c.bf16 %v1655_v6, %v1654_v5  ;;  %v9430_v63 = vld [vmem:[%s11027_s14 + $0xa0] sm:$0xff]   ;;  %v1598_v6 = vpack.c.bf16 %v1563_v62, %v1562_v61  ;;  %v1591_v61 = vld [vmem:[#allocation2 + $0x10d] sm:$0xff] }
 0x1a1   : > { %v9409_v5 = vunpack.c.l.bf16 %v9430_v63 }
 0x1a2   : > { %9545 = vmatprep.mubr.bf16.mxu1 %v1680_v8  ;;  %v1564_v8 = vld [vmem:[#allocation2 + $0x35] sm:$0xff] }
 0x1a3   : > { %3009 = vmatpush1.bf16.msra.mxu0 %v10559_v13  ;;  %9546 = vmatmul.mubr.bf16.gmra.mrb[20].mxu1 %v1681_v12  ;;  %v1372_v13 = vld [vmem:[#allocation2 + $0xe3] sm:$0xff]  ;;  %406 = vst [vmem:[#allocation2 + $0x140] sm:$0xff] %v9409_v5  ;;  %v1667_v12 = vld [vmem:[#allocation2 + $0x12e] sm:$0xff] }
 0x1a4   : > { %3010 = vmatprep.subr.bf16.mxu0 %v14592_v1  ;;  %9549 = vmatprep.mubr.bf16.mxu1 %v1682_v30  ;;  %v1602_v30 = vpack.c.bf16 %v1571_v27, %v1570_v26 }
 0x1a6   : > { %2894 = vmatmul.mubr.bf16.gmra.mrb[28].mxu0 %v1389_v16  ;;  %v1447_v16 = vld [vmem:[#allocation2 + $0xfc] sm:$0xff] }
 0x1a7   : > { %2901 = vmatprep.mubr.bf16.mxu0 %v11349_v17  ;;  %3011 = vmatpush1.bf16.msra.mxu0 %v10562_v18  ;;  %v1395_v18 = vpack.c.bf16 %v1373_v14, %v1372_v13  ;;  %v11376_v19 = vpack.c.bf16 %v1447_v16, %v1446_v15  ;;  %v1599_v13 = vpack.c.bf16 %v1565_v9, %v1564_v8  ;;  %v1595_v9 = vld [vmem:[#allocation2 + $0x12d] sm:$0xff] }
 0x1a8   : > { %3012 = vmatprep.subr.bf16.mxu0 %v14592_v1  ;;  %v1686_v14 = vpack.c.bf16 %v1667_v12, %v1666_v11 }
 0x1ab   : > { %3013 = vmatpush1.bf16.msra.mxu0 %v10566_v21  ;;  %v1375_v21 = vld [vmem:[#allocation2 + $0xfb] sm:$0xff]  ;;  %9550 = vmatmul.mubr.bf16.gmra.mrb[24].mxu1 %v1683_v34  ;;  %v1575_v34 = vld [vmem:[#allocation2 + $0x8d] sm:$0xff] }
 0x1ac   : > { %5125 = vmatprep.subr.bf16.mxu0 %v14592_v1  ;;  %9553 = vmatprep.mubr.bf16.mxu1 %v1684_v53  ;;  %v1587_v53 = vld [vmem:[#allocation2 + $0xed] sm:$0xff] }
 0x1ae   : > { %2902 = vmatmul.mubr.bf16.gmra.mrb[32].mxu0 %v1390_v24  ;;  %v1396_v24 = vpack.c.bf16 %v1375_v21, %v1374_v20  ;;  %v1567_v20 = vld [vmem:[#allocation2 + $0x4d] sm:$0xff] }
 0x1af   : > { %2909 = vmatprep.mubr.bf16.mxu0 %v11360_v28 }
 0x1b3   : > { %9554 = vmatmul.mubr.bf16.gmra.mrb[28].mxu1 %v1685_v57  ;;  %v1610_v57 = vpack.c.bf16 %v1587_v53, %v1586_v51 }
 0x1b4   : > { %9557 = vmatprep.mubr.bf16.mxu1 %v1686_v14 }
 0x1b6   : > { %2910 = vmatmul.mubr.bf16.gmra.mrb[36].mxu0 %v1391_v38  ;;  %v1451_v38 = vld [vmem:[#allocation2 + $0x11c] sm:$0xff] }
 0x1b7   : > { %2917 = vmatprep.mubr.bf16.mxu0 %v11364_v39  ;;  %v11382_v41 = vpack.c.bf16 %v1451_v38, %v1450_v37  ;;  %v1579_v38 = vld [vmem:[#allocation2 + $0xad] sm:$0xff] }
 0x1be   : > { %2918 = vmatmul.mubr.bf16.gmra.mrb[40].mxu0 %v1392_v46  ;;  %v1452_v46 = vld [vmem:[#allocation2 + $0x124] sm:$0xff] }
 0x1bf   : > { %2925 = vmatprep.mubr.bf16.mxu0 %v11367_v49  ;;  %v11385_v52 = vpack.c.bf16 %v1453_v47, %v1452_v46  ;;  %v1583_v46 = vld [vmem:[#allocation2 + $0xcd] sm:$0xff] }
 0x1c6   : > { %2926 = vmatmul.mubr.bf16.gmra.mrb[44].mxu0 %v1393_v59  ;;  %v1381_v59 = vld [vmem:[#allocation2 + $0x12b] sm:$0xff] }
 0x1c7   : > { %2933 = vmatprep.mubr.bf16.mxu0 %v11370_v60  ;;  %v1399_v2 = vpack.c.bf16 %v1381_v59, %v1380_v58  ;;  %v1589_v58 = vld [vmem:[#allocation2 + $0xfd] sm:$0xff] }
 0x1ce   : > { %2934 = vmatmul.mubr.bf16.gmra.mrb[48].mxu0 %v1394_v3  ;;  %v9406_v3 = vunpack.c.h.bf16 %v11180_v42  ;;  %v1566_v42 = vld [vmem:[#allocation2 + $0x45] sm:$0xff] }
 0x1cf   : > { %2941 = vmatprep.mubr.bf16.mxu0 %v11373_v7  ;;  %v1600_v21 = vpack.c.bf16 %v1567_v20, %v1566_v42 }
 0x1d0   : > { %405 = vst [vmem:[#allocation2 + $0x138] sm:$0xff] %v9406_v3 }
 0x1d6   : > { %2942 = vmatmul.mubr.bf16.gmra.mrb[52].mxu0 %v1395_v18 }
 0x1d7   : > { %2949 = vmatprep.mubr.bf16.mxu0 %v11376_v19  ;;  %v1668_v15 = vld [vmem:[#allocation2 + $0x136] sm:$0xff]  ;;  %v1669_v16 = vld [vmem:[#allocation2 + $0x13e] sm:$0xff] }
 0x1d8   : > { %v1687_v18 = vpack.c.bf16 %v1669_v16, %v1668_v15  ;;  %v1597_v16 = vld [vmem:[#allocation2 + $0x13d] sm:$0xff] }
 0x1d9   : > { %v1525_v42 = vld [vmem:[#allocation2 + $0x13c] sm:$0xff] }
 0x1da   : > { %9558 = vmatmul.mubr.bf16.gmra.mrb[32].mxu1 %v1687_v18 }
 0x1de   : > { %2950 = vmatmul.mubr.bf16.gmra.mrb[56].mxu0 %v1396_v24  ;;  %v1601_v24 = vpack.c.bf16 %v1569_v23, %v1568_v22 }
 0x1df   : > { %2957 = vmatprep.mubr.bf16.mxu0 %v11379_v29 }
 0x1e6   : > { %2958 = vmatmul.mubr.bf16.gmra.mrb[60].mxu0 %v1397_v40 }
 0x1e7   : > { %2965 = vmatprep.mubr.bf16.mxu0 %v11382_v41 }
 0x1ee   : > { %2966 = vmatmul.mubr.bf16.gmra.mrb[64].mxu0 %v1398_v48  ;;  %v1585_v48 = vld [vmem:[#allocation2 + $0xdd] sm:$0xff] }
 0x1ef   : > { %2973 = vmatprep.mubr.bf16.mxu0 %v11385_v52 }
 0x1f6   : > { %2974 = vmatmul.mubr.bf16.gmra.mrb[68].mxu0 %v1399_v2 }
 0x1f7   : > { %3014 = vmatprep.mubr.bf16.mxu0 %v1598_v6  ;;  %v1593_v6 = vld [vmem:[#allocation2 + $0x11d] sm:$0xff] }
 0x1fe   : > { %3015 = vmatmul.mubr.bf16.vlgmr.msra.gmra.mrb[0].mxu0 %v11266_v0  ;;  %v1572_v0 = vld [vmem:[#allocation2 + $0x75] sm:$0xff] }
 0x1ff   : > { %3022 = vmatprep.mubr.bf16.mxu0 %v1599_v13  ;;  %v1603_v32 = vpack.c.bf16 %v1573_v31, %v1572_v0 }
 0x206   : > { %3023 = vmatmul.mubr.bf16.gmra.mrb[4].mxu0 %v11279_v10  ;;  %v1574_v10 = vld [vmem:[#allocation2 + $0x85] sm:$0xff] }
 0x207   : > { %3030 = vmatprep.mubr.bf16.mxu0 %v1600_v21  ;;  %v1604_v35 = vpack.c.bf16 %v1575_v34, %v1574_v10 }
 0x20e   : > { %3031 = vmatmul.mubr.bf16.gmra.mrb[8].mxu0 %v11294_v25  ;;  %v1576_v25 = vld [vmem:[#allocation2 + $0x95] sm:$0xff] }
 0x20f   : > { %3038 = vmatprep.mubr.bf16.mxu0 %v1601_v24  ;;  %v1605_v37 = vpack.c.bf16 %v1577_v36, %v1576_v25 }
 0x216   : > { %3039 = vmatmul.mubr.bf16.gmra.mrb[12].mxu0 %v11305_v33  ;;  %v1578_v33 = vld [vmem:[#allocation2 + $0xa5] sm:$0xff] }
 0x217   : > { %3046 = vmatprep.mubr.bf16.mxu0 %v1602_v30  ;;  %v1606_v40 = vpack.c.bf16 %v1579_v38, %v1578_v33  ;;  %v10568_v33 = vld [vmem:[%s14587_s3] sm:$0xff]  }
 0x218   : > { %5126 = vmatpush1.bf16.msra.mxu0 %v10568_v33 }
 0x219   : > { %5127 = vmatprep.subr.bf16.mxu0 %v14592_v1 }
 0x21e   : > { %3047 = vmatmul.mubr.bf16.gmra.mrb[16].mxu0 %v11316_v44  ;;  %v1580_v44 = vld [vmem:[#allocation2 + $0xb5] sm:$0xff] }
 0x21f   : > { %3054 = vmatprep.mubr.bf16.mxu0 %v1603_v32  ;;  %v1607_v45 = vpack.c.bf16 %v1581_v43, %v1580_v44  ;;  %v10570_v44 = vld [vmem:[%s14587_s3 + $0x8] sm:$0xff]   ;;  %v10569_v43 = vld [vmem:[%s14587_s3 + $0x80] sm:$0xff]  }
 0x220   : > { %5128 = vmatpush1.bf16.msra.mxu0 %v10570_v44  ;;  %5303 = vmatpush1.bf16.msra.mxu1 %v10569_v43 }
 0x221   : > { %5129 = vmatprep.subr.bf16.mxu0 %v14592_v1  ;;  %5304 = vmatprep.subr.bf16.mxu1 %v14592_v1 }
 0x226   : > { %3055 = vmatmul.mubr.bf16.gmra.mrb[20].mxu0 %v11327_v56  ;;  %v1582_v56 = vld [vmem:[#allocation2 + $0xc5] sm:$0xff] }
 0x227   : > { %3062 = vmatprep.mubr.bf16.mxu0 %v1604_v35  ;;  %v1608_v47 = vpack.c.bf16 %v1583_v46, %v1582_v56  ;;  %v10571_v56 = vld [vmem:[%s14587_s3 + $0x88] sm:$0xff]   ;;  %v10574_v46 = vld [vmem:[%s14587_s3 + $0x18] sm:$0xff]  }
 0x228   : > { %5305 = vmatpush1.bf16.msra.mxu1 %v10571_v56 }
 0x229   : > { %5306 = vmatprep.subr.bf16.mxu1 %v14592_v1 }
 0x22e   : > { %3063 = vmatmul.mubr.bf16.gmra.mrb[24].mxu0 %v11338_v4  ;;  %v1584_v4 = vld [vmem:[#allocation2 + $0xd5] sm:$0xff] }
 0x22f   : > { %3070 = vmatprep.mubr.bf16.mxu0 %v1605_v37  ;;  %v1609_v50 = vpack.c.bf16 %v1585_v48, %v1584_v4  ;;  %v10573_v4 = vld [vmem:[%s14587_s3 + $0x90] sm:$0xff]  }
 0x230   : > { %5307 = vmatpush1.bf16.msra.mxu1 %v10573_v4 }
 0x231   : > { %5308 = vmatprep.subr.bf16.mxu1 %v14592_v1 }
 0x236   : > { %3071 = vmatmul.mubr.bf16.gmra.mrb[28].mxu0 %v11349_v17  ;;  %v11401_v17 = vpop.f32.mrb[0].mxu1 }
 0x237   : > { %3078 = vmatprep.mubr.bf16.mxu0 %v1606_v40  ;;  %v11403_v54 = vpop.f32.mrb[1].mxu1 }
 0x23e   : > { %3079 = vmatmul.mubr.bf16.gmra.mrb[32].mxu0 %v11360_v28  ;;  %v11405_v28 = vpop.f32.mrb[2].mxu1 }
 0x23f   : > { %3086 = vmatprep.mubr.bf16.mxu0 %v1607_v45  ;;  %v11407_v55 = vpop.f32.mrb[3].mxu1  ;;  %v10572_v45 = vld [vmem:[%s14587_s3 + $0x10] sm:$0xff]  }
 0x240   : > { %v11411_v62 = vpop.f32.mrb[4].mxu1  ;;  %5130 = vmatpush1.bf16.msra.mxu0 %v10572_v45 }
 0x241   : > { %v11413_v63 = vpop.f32.mrb[5].mxu1  ;;  %5131 = vmatprep.subr.bf16.mxu0 %v14592_v1 }
 0x242   : > { %v11415_v3 = vpop.f32.mrb[6].mxu1 }
 0x243   : > { %v11417_v5 = vpop.f32.mrb[7].mxu1 }
 0x244   : > { %5132 = vmatpush1.bf16.msra.mxu0 %v10574_v46 }
 0x245   : > { %5133 = vmatprep.subr.bf16.mxu0 %v14592_v1 }
 0x246   : > { %3087 = vmatmul.mubr.bf16.gmra.mrb[36].mxu0 %v11364_v39  ;;  %v1588_v39 = vld [vmem:[#allocation2 + $0xf5] sm:$0xff] }
 0x247   : > { %3094 = vmatprep.mubr.bf16.mxu0 %v1608_v47  ;;  %v1611_v59 = vpack.c.bf16 %v1589_v58, %v1588_v39  ;;  %v11496_v47 = vld [vmem:[%s14586_s2] ss:$0 sm:$0xff] }
 0x248   : > { %v10576_v39 = vld [vmem:[%s14587_s3 + $0x20] sm:$0xff]  }
 0x249   : > { %5134 = vmatpush1.bf16.msra.mxu0 %v10576_v39 }
 0x24a   : > { %5135 = vmatprep.subr.bf16.mxu0 %v14592_v1 }
 0x24b   : > { %v11421_v11 = vpop.f32.mrb[8].mxu1 }
 0x24c   : > { %v11423_v12 = vpop.f32.mrb[9].mxu1 }
 0x24d   : > { %v11425_v14 = vpop.f32.mrb[10].mxu1 }
 0x24e   : > { %3095 = vmatmul.mubr.bf16.gmra.mrb[40].mxu0 %v11367_v49  ;;  %v1590_v49 = vld [vmem:[#allocation2 + $0x105] sm:$0xff]  ;;  %v11427_v15 = vpop.f32.mrb[11].mxu1 }
 0x24f   : > { %3102 = vmatprep.mubr.bf16.mxu0 %v1609_v50  ;;  %v1612_v2 = vpack.c.bf16 %v1591_v61, %v1590_v49 }
 0x256   : > { %3103 = vmatmul.mubr.bf16.gmra.mrb[44].mxu0 %v11370_v60  ;;  %v1592_v60 = vld [vmem:[#allocation2 + $0x115] sm:$0xff] }
 0x257   : > { %3110 = vmatprep.mubr.bf16.mxu0 %v1610_v57  ;;  %v1613_v8 = vpack.c.bf16 %v1593_v6, %v1592_v60  ;;  %v10575_v60 = vld [vmem:[%s14587_s3 + $0x98] sm:$0xff]  }
 0x258   : > { %5309 = vmatpush1.bf16.msra.mxu1 %v10575_v60 }
 0x259   : > { %5310 = vmatprep.subr.bf16.mxu1 %v14592_v1 }
 0x25b   : > { %v11431_v20 = vpop.f32.mrb[12].mxu1 }
 0x25c   : > { %v11433_v22 = vpop.f32.mrb[13].mxu1 }
 0x25d   : > { %v11435_v23 = vpop.f32.mrb[14].mxu1 }
 0x25e   : > { %3111 = vmatmul.mubr.bf16.gmra.mrb[48].mxu0 %v11373_v7  ;;  %v1594_v7 = vld [vmem:[#allocation2 + $0x125] sm:$0xff]  ;;  %v11437_v24 = vpop.f32.mrb[15].mxu1 }
 0x25f   : > { %3118 = vmatprep.mubr.bf16.mxu0 %v1611_v59  ;;  %v1614_v13 = vpack.c.bf16 %v1595_v9, %v1594_v7 }
 0x266   : > { %3119 = vmatmul.mubr.bf16.gmra.mrb[52].mxu0 %v11376_v19  ;;  %v1596_v19 = vld [vmem:[#allocation2 + $0x135] sm:$0xff] }
 0x267   : > { %3126 = vmatprep.mubr.bf16.mxu0 %v1612_v2  ;;  %v1615_v18 = vpack.c.bf16 %v1597_v16, %v1596_v19 }
 0x26e   : > { %3127 = vmatmul.mubr.bf16.gmra.mrb[56].mxu0 %v11379_v29  ;;  %v1524_v29 = vld [vmem:[#allocation2 + $0x134] sm:$0xff] }
 0x26f   : > { %3134 = vmatprep.mubr.bf16.mxu0 %v1613_v8  ;;  %v1543_v21 = vpack.c.bf16 %v1525_v42, %v1524_v29  ;;  %v10577_v42 = vld [vmem:[%s14587_s3 + $0xa0] sm:$0xff]  }
 0x270   : > { %5311 = vmatpush1.bf16.msra.mxu1 %v10577_v42 }
 0x271   : > { %5312 = vmatprep.subr.bf16.mxu1 %v14592_v1 }
 0x276   : > { %3135 = vmatmul.mubr.bf16.gmra.mrb[60].mxu0 %v11382_v41  ;;  %v11439_v41 = vpop.f32.mrb[16].mxu1 }
 0x277   : > { %3142 = vmatprep.mubr.bf16.mxu0 %v1614_v13  ;;  %v11441_v26 = vpop.f32.mrb[17].mxu1 }
 0x278   : > { %v11443_v27 = vpop.f32.mrb[18].mxu1 }
 0x27e   : > { %3143 = vmatmul.mubr.bf16.gmra.mrb[64].mxu0 %v11385_v52  ;;  %v11445_v52 = vpop.f32.mrb[19].mxu1 }
 0x27f   : > { %3150 = vmatprep.mubr.bf16.mxu0 %v1615_v18  ;;  %v11447_v30 = vpop.f32.mrb[20].mxu1 }
 0x280   : > { %v11449_v0 = vpop.f32.mrb[21].mxu1 }
 0x281   : > { %v11451_v31 = vpop.f32.mrb[22].mxu1 }
 0x282   : > { %v11453_v32 = vpop.f32.mrb[23].mxu1 }
 0x283   : > { %v11455_v10 = vpop.f32.mrb[24].mxu1 }
 0x284   : > { %v11457_v34 = vpop.f32.mrb[25].mxu1 }
 0x285   : > { %v11459_v35 = vpop.f32.mrb[26].mxu1 }
 0x286   : > { %3151 = vmatmul.mubr.bf16.gmra.mrb[68].mxu0 %v1543_v21  ;;  %v11461_v25 = vpop.f32.mrb[27].mxu1  ;;  %v10580_v21 = vld [vmem:[%s14587_s3 + $0x30] sm:$0xff]  }
 0x287   : > { %v11463_v36 = vpop.f32.mrb[28].mxu1 }
 0x288   : > { %v11465_v37 = vpop.f32.mrb[29].mxu1 }
 0x289   : > { %v11470_v38 = vpop.f32.mrb[30].mxu1 }
 0x28a   : > { %v11472_v40 = vpop.f32.mrb[31].mxu1 }
 0x2ad   : > { %v11502_v50 = vpop.f32.mrb[32].mxu1 }
 0x2ae   : > { %v11506_v57 = vpop.f32.mrb[33].mxu1 }
 0x2af   : > { %v11511_v59 = vpop.f32.mrb[34].mxu1 }
 0x2b0   : > { %v11518_v6 = vpop.f32.mrb[35].mxu1 }
 0x2d1   : > { %v3016_v48 = vpop.f32.mrb[0].mxu0 }
 0x2d2   : > { %v9697_v51 = vadd.f32 %v11496_v47, %v3016_v48  ;;  %v3018_v53 = vpop.f32.mrb[1].mxu0  ;;  %v10579_v48 = vld [vmem:[%s14587_s3 + $0xa8] sm:$0xff]  }
 0x2d3   : > { %v3019_v58 = vpop.f32.mrb[2].mxu0  ;;  %5313 = vmatpush1.bf16.msra.mxu1 %v10579_v48 }
 0x2d4   : > { %v3194_v49 = vadd.f32 %v9697_v51, %v11403_v54  ;;  %v9698_v61 = vadd.f32 %v11496_v47, %v3019_v58  ;;  %v3021_v2 = vpop.f32.mrb[3].mxu0  ;;  %v10578_v54 = vld [vmem:[%s14587_s3 + $0x28] sm:$0xff]   ;;  %5314 = vmatprep.subr.bf16.mxu1 %v14592_v1  ;;  %v10583_v58 = vld [vmem:[%s14587_s3 + $0x40] sm:$0xff]  }
 0x2d5   : > { %5136 = vmatpush1.bf16.msra.mxu0 %v10578_v54 }
 0x2d6   : > { %v3336_v8 = vmul.f32 0.2, %v3194_v49  ;;  %v3197_v7 = vadd.f32 %v9698_v61, %v11407_v55  ;;  %5137 = vmatprep.subr.bf16.mxu0 %v14592_v1 }
 0x2d8   : > { %v3337_v9 = vmul.f32 0.2, %v3197_v7  ;;  %v11526_v13 = vmax.f32 %v3194_v49, %v3336_v8 }
 0x2d9   : > { %v3024_v19 = vpop.f32.mrb[4].mxu0  ;;  %5138 = vmatpush1.bf16.msra.mxu0 %v10580_v21 }
 0x2da   : > { %v11530_v16 = vmax.f32 %v3197_v7, %v3337_v9  ;;  %v9699_v18 = vadd.f32 %v11496_v47, %v3024_v19  ;;  %v3026_v29 = vpop.f32.mrb[5].mxu0  ;;  %v3408_v55 = vmul.f32 %v11526_v13, %v11526_v13  ;;  %5139 = vmatprep.subr.bf16.mxu0 %v14592_v1  ;;  %v10584_v19 = vld [vmem:[%s14587_s3 + $0xb8] sm:$0xff]  }
 0x2db   : > { %v3027_v33 = vpop.f32.mrb[6].mxu0 }
 0x2dc   : > { %v3202_v44 = vadd.f32 %v9699_v18, %v11401_v17  ;;  %v9700_v43 = vadd.f32 %v11496_v47, %v3027_v33  ;;  %v3029_v45 = vpop.f32.mrb[7].mxu0  ;;  %3444 = vadd.xlane.f32.xlu0 %v3408_v55  ;;  %v3409_v46 = vmul.f32 %v11530_v16, %v11530_v16  ;;  %v10582_v17 = vld [vmem:[%s14587_s3 + $0x38] sm:$0xff]   ;;  %v10586_v33 = vld [vmem:[%s14587_s3 + $0xc0] sm:$0xff]  }
 0x2dd   : > { %5140 = vmatpush1.bf16.msra.mxu0 %v10582_v17 }
 0x2de   : > { %v3205_v56 = vadd.f32 %v9700_v43, %v11405_v28  ;;  %v3338_v4 = vmul.f32 0.2, %v3202_v44  ;;  %v10581_v28 = vld [vmem:[%s14587_s3 + $0xb0] sm:$0xff]   ;;  %5141 = vmatprep.subr.bf16.mxu0 %v14592_v1 }
 0x2df   : > { %5315 = vmatpush1.bf16.msra.mxu1 %v10581_v28 }
 0x2e0   : > { %v3339_v51 = vmul.f32 0.2, %v3205_v56  ;;  %3446 = vadd.xlane.f32.xlu0 %v3409_v46  ;;  %v11554_v53 = vmax.f32 %v3202_v44, %v3338_v4  ;;  %5316 = vmatprep.subr.bf16.mxu1 %v14592_v1  ;;  %v10587_v46 = vld [vmem:[%s14587_s3 + $0x50] sm:$0xff]  }
 0x2e1   : > { %v3032_v39 = vpop.f32.mrb[8].mxu0  ;;  %5142 = vmatpush1.bf16.msra.mxu0 %v10583_v58 }
 0x2e2   : > { %v9701_v49 = vadd.f32 %v11496_v47, %v3032_v39  ;;  %v3034_v61 = vpop.f32.mrb[9].mxu0  ;;  %v3410_v2 = vmul.f32 %v11554_v53, %v11554_v53  ;;  %v11566_v60 = vmax.f32 %v3205_v56, %v3339_v51  ;;  %5143 = vmatprep.subr.bf16.mxu0 %v14592_v1 }
 0x2e3   : > { %v3035_v8 = vpop.f32.mrb[10].mxu0  ;;  %5317 = vmatpush1.bf16.msra.mxu1 %v10584_v19  ;;  %v10590_v19 = vld [vmem:[%s14587_s3 + $0xd0] sm:$0xff]  }
 0x2e4   : > { %v9702_v7 = vadd.f32 %v11496_v47, %v3035_v8  ;;  %v3210_v54 = vadd.f32 %v9701_v49, %v11413_v63  ;;  %v3037_v9 = vpop.f32.mrb[11].mxu0  ;;  %3448 = vadd.xlane.f32.xlu1 %v3410_v2  ;;  %v3411_v55 = vmul.f32 %v11566_v60, %v11566_v60  ;;  %v10585_v63 = vld [vmem:[%s14587_s3 + $0x48] sm:$0xff]   ;;  %5318 = vmatprep.subr.bf16.mxu1 %v14592_v1 }
 0x2e5   : > { %5144 = vmatpush1.bf16.msra.mxu0 %v10585_v63  ;;  %v10588_v49 = vld [vmem:[%s14587_s3 + $0xc8] sm:$0xff]  }
 0x2e6   : > { %v3340_v18 = vmul.f32 0.2, %v3210_v54  ;;  %v3213_v29 = vadd.f32 %v9702_v7, %v11417_v5  ;;  %5145 = vmatprep.subr.bf16.mxu0 %v14592_v1 }
 0x2e7   : > { %5319 = vmatpush1.bf16.msra.mxu1 %v10586_v33 }
 0x2e8   : > { %v11582_v42 = vmax.f32 %v3210_v54, %v3340_v18  ;;  %v3341_v21 = vmul.f32 0.2, %v3213_v29  ;;  %3450 = vadd.xlane.f32.xlu1 %v3411_v55  ;;  %5320 = vmatprep.subr.bf16.mxu1 %v14592_v1  ;;  %v10591_v18 = vld [vmem:[%s14587_s3 + $0x60] sm:$0xff]  }
 0x2e9   : > { %v3040_v44 = vpop.f32.mrb[12].mxu0  ;;  %5146 = vmatpush1.bf16.msra.mxu0 %v10587_v46 }
 0x2ea   : > { %v11588_v5 = vmax.f32 %v3213_v29, %v3341_v21  ;;  %v9703_v43 = vadd.f32 %v11496_v47, %v3040_v44  ;;  %v3042_v45 = vpop.f32.mrb[13].mxu0  ;;  %v3412_v56 = vmul.f32 %v11582_v42, %v11582_v42  ;;  %5147 = vmatprep.subr.bf16.mxu0 %v14592_v1 }
 0x2eb   : > { %v3043_v4 = vpop.f32.mrb[14].mxu0  ;;  %5321 = vmatpush1.bf16.msra.mxu1 %v10588_v49  ;;  %v10592_v45 = vld [vmem:[%s14587_s3 + $0xd8] sm:$0xff]  }
 0x2ec   : > { %v3218_v48 = vadd.f32 %v9703_v43, %v11411_v62  ;;  %v9704_v17 = vadd.f32 %v11496_v47, %v3043_v4  ;;  %v3045_v51 = vpop.f32.mrb[15].mxu0  ;;  %3452 = vadd.xlane.f32.xlu0 %v3412_v56  ;;  %v3413_v28 = vmul.f32 %v11588_v5, %v11588_v5  ;;  %v10589_v62 = vld [vmem:[%s14587_s3 + $0x58] sm:$0xff]   ;;  %5322 = vmatprep.subr.bf16.mxu1 %v14592_v1 }
 0x2ed   : > { %5148 = vmatpush1.bf16.msra.mxu0 %v10589_v62 }
 0x2ee   : > { %v3342_v39 = vmul.f32 0.2, %v3218_v48  ;;  %v3221_v58 = vadd.f32 %v9704_v17, %v11415_v3  ;;  %3454 = vadd.xlane.f32.xlu1 %v3413_v28  ;;  %5149 = vmatprep.subr.bf16.mxu0 %v14592_v1  ;;  %v10594_v28 = vld [vmem:[%s14587_s3 + $0xe0] sm:$0xff]  }
 0x2ef   : > { %5323 = vmatpush1.bf16.msra.mxu1 %v10590_v19  ;;  %v3804_v19 = vld [vmem:[#allocation2 + $0x1] sm:$0xff] }
 0x2f0   : > { %v3343_v61 = vmul.f32 0.2, %v3221_v58  ;;  %v11610_v2 = vmax.f32 %v3218_v48, %v3342_v39  ;;  %5324 = vmatprep.subr.bf16.mxu1 %v14592_v1  ;;  %v10595_v39 = vld [vmem:[%s14587_s3 + $0x70] sm:$0xff]  }
 0x2f1   : > { %v3048_v8 = vpop.f32.mrb[16].mxu0  ;;  %5150 = vmatpush1.bf16.msra.mxu0 %v10591_v18  ;;  %v3805_v18 = vld [vmem:[#allocation2 + $0x9] sm:$0xff] }
 0x2f2   : > { %v9705_v3 = vadd.f32 %v11496_v47, %v3048_v8  ;;  %v3050_v7 = vpop.f32.mrb[17].mxu0  ;;  %v3414_v54 = vmul.f32 %v11610_v2, %v11610_v2  ;;  %v11616_v9 = vmax.f32 %v3221_v58, %v3343_v61  ;;  %5151 = vmatprep.subr.bf16.mxu0 %v14592_v1 }
 0x2f3   : > { %v3051_v29 = vpop.f32.mrb[18].mxu0  ;;  %5325 = vmatpush1.bf16.msra.mxu1 %v10592_v45 }
 0x2f4   : > { %v9706_v55 = vadd.f32 %v11496_v47, %v3051_v29  ;;  %v3226_v63 = vadd.f32 %v9705_v3, %v11423_v12  ;;  %v3053_v21 = vpop.f32.mrb[19].mxu0  ;;  %3456 = vadd.xlane.f32.xlu0 %v3414_v54  ;;  %v3415_v33 = vmul.f32 %v11616_v9, %v11616_v9  ;;  %v10593_v12 = vld [vmem:[%s14587_s3 + $0x68] sm:$0xff]   ;;  %5326 = vmatprep.subr.bf16.mxu1 %v14592_v1  ;;  %v10597_v54 = vld [vmem:[%s14587_s3 + $0x78] sm:$0xff]  }
 0x2f5   : > { %5152 = vmatpush1.bf16.msra.mxu0 %v10593_v12  ;;  %v3733_v21 = vld [vmem:[#allocation2 + $0x8] sm:$0xff] }
 0x2f6   : > { %v3344_v44 = vmul.f32 0.2, %v3226_v63  ;;  %v3229_v43 = vadd.f32 %v9706_v55, %v11427_v15  ;;  %3458 = vadd.xlane.f32.xlu1 %v3415_v33  ;;  %5153 = vmatprep.subr.bf16.mxu0 %v14592_v1  ;;  %v3840_v33 = vpack.c.bf16 %v3805_v18, %v3804_v19 }
 0x2f7   : > { %5327 = vmatpush1.bf16.msra.mxu1 %v10594_v28 }
 0x2f8   : > { %v11638_v56 = vmax.f32 %v3226_v63, %v3344_v44  ;;  %v3345_v46 = vmul.f32 0.2, %v3229_v43  ;;  %5328 = vmatprep.subr.bf16.mxu1 %v14592_v1  ;;  %v3732_v63 = vld [vmem:[#allocation2] sm:$0xff]  ;;  %5157 = vmatprep.mubr.bf16.mxu0 %v3840_v33 }
 0x2f9   : > { %v3056_v4 = vpop.f32.mrb[20].mxu0  ;;  %5154 = vmatpush1.bf16.msra.mxu0 %v10595_v39 }
 0x2fa   : > { %v11641_v15 = vmax.f32 %v3229_v43, %v3345_v46  ;;  %v9707_v48 = vadd.f32 %v11496_v47, %v3056_v4  ;;  %v3058_v17 = vpop.f32.mrb[21].mxu0  ;;  %v3416_v51 = vmul.f32 %v11638_v56, %v11638_v56  ;;  %5155 = vmatprep.subr.bf16.mxu0 %v14592_v1  ;;  %v3768_v46 = vpack.c.bf16 %v3733_v21, %v3732_v63  ;;  %v10598_v4 = vld [vmem:[%s14587_s3 + $0xf0] sm:$0xff]  }
 0x2fb   : > { %v3059_v58 = vpop.f32.mrb[22].mxu0 }
 0x2fc   : > { %v3234_v49 = vadd.f32 %v9707_v48, %v11421_v11  ;;  %v9708_v62 = vadd.f32 %v11496_v47, %v3059_v58  ;;  %v3061_v61 = vpop.f32.mrb[23].mxu0  ;;  %3460 = vadd.xlane.f32.xlu0 %v3416_v51  ;;  %v3417_v8 = vmul.f32 %v11641_v15, %v11641_v15  ;;  %v10596_v11 = vld [vmem:[%s14587_s3 + $0xe8] sm:$0xff]  }
 0x2fd   : > { %5329 = vmatpush1.bf16.msra.mxu1 %v10596_v11  ;;  %5156 = vmatpush1.bf16.msra.mxu0 %v10597_v54 }
 0x2fe   : > { %v3346_v3 = vmul.f32 0.2, %v3234_v49  ;;  %v3237_v7 = vadd.f32 %v9708_v62, %v11425_v14  ;;  %3462 = vadd.xlane.f32.xlu1 %v3417_v8  ;;  %5330 = vmatprep.subr.bf16.mxu1 %v14592_v1  ;;  %v10599_v62 = vld [vmem:[%s14587_s3 + $0xf8] sm:$0xff]  }
 0x300   : > { %v3347_v29 = vmul.f32 0.2, %v3237_v7  ;;  %v11666_v55 = vmax.f32 %v3234_v49, %v3346_v3  ;;  %5158 = vmatmul.mubr.bf16.vlgmr.msra.gmra.mrb[72].mxu0 %v3768_v46 }
 0x301   : > { %v3064_v14 = vpop.f32.mrb[24].mxu0  ;;  %5331 = vmatpush1.bf16.msra.mxu1 %v10598_v4 }
 0x302   : > { %v9709_v44 = vadd.f32 %v11496_v47, %v3064_v14  ;;  %v3066_v43 = vpop.f32.mrb[25].mxu0  ;;  %v3418_v45 = vmul.f32 %v11666_v55, %v11666_v55  ;;  %v11672_v12 = vmax.f32 %v3237_v7, %v3347_v29  ;;  %5332 = vmatprep.subr.bf16.mxu1 %v14592_v1 }
 0x303   : > { %v3067_v48 = vpop.f32.mrb[26].mxu0 }
 0x304   : > { %v9710_v17 = vadd.f32 %v11496_v47, %v3067_v48  ;;  %v3242_v51 = vadd.f32 %v9709_v44, %v11433_v22  ;;  %v3069_v28 = vpop.f32.mrb[27].mxu0  ;;  %3464 = vadd.xlane.f32.xlu0 %v3418_v45  ;;  %v3419_v39 = vmul.f32 %v11672_v12, %v11672_v12 }
 0x305   : > { %5333 = vmatpush1.bf16.msra.mxu1 %v10599_v62 }
 0x306   : > { %v3348_v58 = vmul.f32 0.2, %v3242_v51  ;;  %v3245_v49 = vadd.f32 %v9710_v17, %v11437_v24  ;;  %3466 = vadd.xlane.f32.xlu1 %v3419_v39  ;;  %5479 = vmatprep.subr.bf16.mxu1 %v14592_v1 }
 0x308   : > { %v11686_v61 = vmax.f32 %v3242_v51, %v3348_v58  ;;  %v3349_v22 = vmul.f32 0.2, %v3245_v49 }
 0x309   : > { %v3072_v8 = vpop.f32.mrb[28].mxu0 }
 0x30a   : > { %v11688_v3 = vmax.f32 %v3245_v49, %v3349_v22  ;;  %v9711_v7 = vadd.f32 %v11496_v47, %v3072_v8  ;;  %v3074_v11 = vpop.f32.mrb[29].mxu0  ;;  %v3420_v24 = vmul.f32 %v11686_v61, %v11686_v61 }
 0x30b   : > { %v3075_v54 = vpop.f32.mrb[30].mxu0 }
 0x30c   : > { %v3250_v19 = vadd.f32 %v9711_v7, %v11431_v20  ;;  %v9712_v18 = vadd.f32 %v11496_v47, %v3075_v54  ;;  %v3077_v29 = vpop.f32.mrb[31].mxu0  ;;  %3468 = vadd.xlane.f32.xlu0 %v3420_v24  ;;  %v3421_v63 = vmul.f32 %v11688_v3, %v11688_v3 }
 0x30e   : > { %v3350_v21 = vmul.f32 0.2, %v3250_v19  ;;  %v3253_v14 = vadd.f32 %v9712_v18, %v11435_v23  ;;  %3470 = vadd.xlane.f32.xlu1 %v3421_v63 }
 0x310   : > { %v3351_v33 = vmul.f32 0.2, %v3253_v14  ;;  %v11699_v44 = vmax.f32 %v3250_v19, %v3350_v21 }
 0x311   : > { %v3080_v43 = vpop.f32.mrb[32].mxu0 }
 0x312   : > { %v9713_v45 = vadd.f32 %v11496_v47, %v3080_v43  ;;  %v3082_v46 = vpop.f32.mrb[33].mxu0  ;;  %v3422_v20 = vmul.f32 %v11699_v44, %v11699_v44  ;;  %v11704_v4 = vmax.f32 %v3253_v14, %v3351_v33 }
 0x313   : > { %v3083_v48 = vpop.f32.mrb[34].mxu0 }
 0x314   : > { %v9714_v17 = vadd.f32 %v11496_v47, %v3083_v48  ;;  %v3258_v51 = vadd.f32 %v9713_v45, %v11441_v26  ;;  %v3085_v28 = vpop.f32.mrb[35].mxu0  ;;  %3472 = vadd.xlane.f32.xlu0 %v3422_v20  ;;  %v3423_v23 = vmul.f32 %v11704_v4, %v11704_v4 }
 0x316   : > { %v3352_v39 = vmul.f32 0.2, %v3258_v51  ;;  %v3261_v58 = vadd.f32 %v9714_v17, %v11445_v52  ;;  %3474 = vadd.xlane.f32.xlu1 %v3423_v23 }
 0x318   : > { %v11711_v49 = vmax.f32 %v3258_v51, %v3352_v39  ;;  %v3353_v62 = vmul.f32 0.2, %v3261_v58 }
 0x319   : > { %v3088_v22 = vpop.f32.mrb[36].mxu0 }
 0x31a   : > { %v11713_v8 = vmax.f32 %v3261_v58, %v3353_v62  ;;  %v9715_v7 = vadd.f32 %v11496_v47, %v3088_v22  ;;  %v3090_v11 = vpop.f32.mrb[37].mxu0  ;;  %v3424_v26 = vmul.f32 %v11711_v49, %v11711_v49 }
 0x31b   : > { %v3091_v24 = vpop.f32.mrb[38].mxu0 }
 0x31c   : > { %v3266_v54 = vadd.f32 %v9715_v7, %v11439_v41  ;;  %v9716_v19 = vadd.f32 %v11496_v47, %v3091_v24  ;;  %v3093_v18 = vpop.f32.mrb[39].mxu0  ;;  %3476 = vadd.xlane.f32.xlu0 %v3424_v26  ;;  %v3425_v52 = vmul.f32 %v11713_v8, %v11713_v8 }
 0x31e   : > { %v3354_v29 = vmul.f32 0.2, %v3266_v54  ;;  %v3269_v63 = vadd.f32 %v9716_v19, %v11443_v27  ;;  %3478 = vadd.xlane.f32.xlu1 %v3425_v52 }
 0x320   : > { %v3355_v21 = vmul.f32 0.2, %v3269_v63  ;;  %v11723_v14 = vmax.f32 %v3266_v54, %v3354_v29 }
 0x321   : > { %v3096_v33 = vpop.f32.mrb[40].mxu0 }
 0x322   : > { %v9717_v43 = vadd.f32 %v11496_v47, %v3096_v33  ;;  %v3098_v45 = vpop.f32.mrb[41].mxu0  ;;  %v3426_v41 = vmul.f32 %v11723_v14, %v11723_v14  ;;  %v11728_v46 = vmax.f32 %v3269_v63, %v3355_v21 }
 0x323   : > { %v3099_v20 = vpop.f32.mrb[42].mxu0 }
 0x324   : > { %v9718_v48 = vadd.f32 %v11496_v47, %v3099_v20  ;;  %v3274_v17 = vadd.f32 %v9717_v43, %v11449_v0  ;;  %v3101_v51 = vpop.f32.mrb[43].mxu0  ;;  %3480 = vadd.xlane.f32.xlu0 %v3426_v41  ;;  %v3427_v27 = vmul.f32 %v11728_v46, %v11728_v46 }
 0x326   : > { %v3356_v28 = vmul.f32 0.2, %v3274_v17  ;;  %v3277_v23 = vadd.f32 %v9718_v48, %v11453_v32  ;;  %3482 = vadd.xlane.f32.xlu1 %v3427_v27 }
 0x328   : > { %v11735_v39 = vmax.f32 %v3274_v17, %v3356_v28  ;;  %v3357_v58 = vmul.f32 0.2, %v3277_v23 }
 0x329   : > { %v3104_v62 = vpop.f32.mrb[44].mxu0 }
 0x32a   : > { %v11737_v22 = vmax.f32 %v3277_v23, %v3357_v58  ;;  %v9719_v7 = vadd.f32 %v11496_v47, %v3104_v62  ;;  %v3106_v11 = vpop.f32.mrb[45].mxu0  ;;  %v3428_v0 = vmul.f32 %v11735_v39, %v11735_v39 }
 0x32b   : > { %v3107_v26 = vpop.f32.mrb[46].mxu0 }
 0x32c   : > { %v3282_v24 = vadd.f32 %v9719_v7, %v11447_v30  ;;  %v9720_v54 = vadd.f32 %v11496_v47, %v3107_v26  ;;  %v3109_v19 = vpop.f32.mrb[47].mxu0  ;;  %3484 = vadd.xlane.f32.xlu0 %v3428_v0  ;;  %v3429_v32 = vmul.f32 %v11737_v22, %v11737_v22 }
 0x32e   : > { %v3358_v18 = vmul.f32 0.2, %v3282_v24  ;;  %v3285_v52 = vadd.f32 %v9720_v54, %v11451_v31  ;;  %3486 = vadd.xlane.f32.xlu1 %v3429_v32 }
 0x330   : > { %v3359_v29 = vmul.f32 0.2, %v3285_v52  ;;  %v11747_v63 = vmax.f32 %v3282_v24, %v3358_v18 }
 0x331   : > { %v3112_v21 = vpop.f32.mrb[48].mxu0 }
 0x332   : > { %v9721_v33 = vadd.f32 %v11496_v47, %v3112_v21  ;;  %v3114_v43 = vpop.f32.mrb[49].mxu0  ;;  %v3430_v30 = vmul.f32 %v11747_v63, %v11747_v63  ;;  %v11752_v45 = vmax.f32 %v3285_v52, %v3359_v29 }
 0x333   : > { %v3115_v41 = vpop.f32.mrb[50].mxu0 }
 0x334   : > { %v9722_v20 = vadd.f32 %v11496_v47, %v3115_v41  ;;  %v3290_v48 = vadd.f32 %v9721_v33, %v11457_v34  ;;  %v3117_v17 = vpop.f32.mrb[51].mxu0  ;;  %3488 = vadd.xlane.f32.xlu0 %v3430_v30  ;;  %v3431_v31 = vmul.f32 %v11752_v45, %v11752_v45 }
 0x336   : > { %v3360_v51 = vmul.f32 0.2, %v3290_v48  ;;  %v3293_v27 = vadd.f32 %v9722_v20, %v11461_v25  ;;  %3490 = vadd.xlane.f32.xlu1 %v3431_v31 }
 0x338   : > { %v11759_v28 = vmax.f32 %v3290_v48, %v3360_v51  ;;  %v3361_v23 = vmul.f32 0.2, %v3293_v27  ;;  %v409_v51 = vlaneseq }
 0x339   : > { %v3120_v58 = vpop.f32.mrb[52].mxu0 }
 0x33a   : > { %v11761_v62 = vmax.f32 %v3293_v27, %v3361_v23  ;;  %v9723_v7 = vadd.f32 %v11496_v47, %v3120_v58  ;;  %v3122_v11 = vpop.f32.mrb[53].mxu0  ;;  %v3432_v34 = vmul.f32 %v11759_v28, %v11759_v28 }
 0x33b   : > { %v3123_v0 = vpop.f32.mrb[54].mxu0 }
 0x33c   : > { %v3298_v26 = vadd.f32 %v9723_v7, %v11455_v10  ;;  %v9724_v24 = vadd.f32 %v11496_v47, %v3123_v0  ;;  %v3125_v54 = vpop.f32.mrb[55].mxu0  ;;  %3492 = vadd.xlane.f32.xlu0 %v3432_v34  ;;  %v3433_v25 = vmul.f32 %v11761_v62, %v11761_v62 }
 0x33e   : > { %v3362_v19 = vmul.f32 0.2, %v3298_v26  ;;  %v3301_v32 = vadd.f32 %v9724_v24, %v11459_v35  ;;  %3494 = vadd.xlane.f32.xlu1 %v3433_v25 }
 0x340   : > { %v3363_v18 = vmul.f32 0.2, %v3301_v32  ;;  %v11771_v52 = vmax.f32 %v3298_v26, %v3362_v19  ;;  %v11790_v26 = vshrl.u32 %v409_v51, 7 }
 0x341   : > { %v3128_v29 = vpop.f32.mrb[56].mxu0 }
 0x342   : > { %v9725_v21 = vadd.f32 %v11496_v47, %v3128_v29  ;;  %v3130_v33 = vpop.f32.mrb[57].mxu0  ;;  %v3434_v10 = vmul.f32 %v11771_v52, %v11771_v52  ;;  %v11776_v43 = vmax.f32 %v3301_v32, %v3363_v18  ;;  %v411_v19 = vadd.s32 8, %v11790_v26 }
 0x343   : > { %v3131_v30 = vpop.f32.mrb[58].mxu0 }
 0x344   : > { %v9726_v41 = vadd.f32 %v11496_v47, %v3131_v30  ;;  %v3306_v20 = vadd.f32 %v9725_v21, %v11465_v37  ;;  %v3133_v48 = vpop.f32.mrb[59].mxu0  ;;  %3496 = vadd.xlane.f32.xlu0 %v3434_v10  ;;  %v3435_v35 = vmul.f32 %v11776_v43, %v11776_v43 }
 0x345   : > { %v11801_v33 = vmul.u32.u64.low 3817748708, %v11790_v26  ;;  %v11802_v10 = vmul.u32.u64.high 3817748708, %v11790_v26, %v11801_v33 }
 0x346   : > { %v3364_v17 = vmul.f32 0.2, %v3306_v20  ;;  %v3309_v31 = vadd.f32 %v9726_v41, %v11472_v40  ;;  %3498 = vadd.xlane.f32.xlu1 %v3435_v35  ;;  %v11804_v30 = vmul.u32.u64.low 3817748708, %v411_v19  ;;  %v11805_v41 = vmul.u32.u64.high 3817748708, %v411_v19, %v11804_v30 }
 0x348   : > { %v11783_v27 = vmax.f32 %v3306_v20, %v3364_v17  ;;  %v3365_v23 = vmul.f32 0.2, %v3309_v31  ;;  %v463_v30 = vshrl.u32 %v11805_v41, 4 }
 0x349   : > { %v3136_v58 = vpop.f32.mrb[60].mxu0 }
 0x34a   : > { %v11785_v7 = vmax.f32 %v3309_v31, %v3365_v23  ;;  %v9727_v11 = vadd.f32 %v11496_v47, %v3136_v58  ;;  %v3138_v34 = vpop.f32.mrb[61].mxu0  ;;  %v3436_v37 = vmul.f32 %v11783_v27, %v11783_v27 }
 0x34b   : > { %v3139_v0 = vpop.f32.mrb[62].mxu0 }
 0x34c   : > { %14661 = vst [vmem:[#allocation4_spill] sm:$0xff] %v11785_v7  ;;  %v3314_v24 = vadd.f32 %v9727_v11, %v11463_v36  ;;  %v9728_v40 = vadd.f32 %v11496_v47, %v3139_v0  ;;  %v3141_v54 = vpop.f32.mrb[63].mxu0  ;;  %3500 = vadd.xlane.f32.xlu0 %v3436_v37  ;;  %v3437_v25 = vmul.f32 %v11785_v7, %v11785_v7  ;;  %v11817_v11 = vadd.s32 16, %v11790_v26 }
 0x34d   : > { %v11821_v0 = vadd.s32 24, %v11790_v26 }
 0x34e   : > { %v3366_v32 = vmul.f32 0.2, %v3314_v24  ;;  %v3317_v18 = vadd.f32 %v9728_v40, %v11470_v38  ;;  %3502 = vadd.xlane.f32.xlu1 %v3437_v25 }
 0x350   : > { %v3367_v29 = vmul.f32 0.2, %v3317_v18  ;;  %v11798_v21 = vmax.f32 %v3314_v24, %v3366_v32  ;;  %v11827_v25 = vmul.u32.u64.low 3817748708, %v11817_v11  ;;  %v11828_v32 = vmul.u32.u64.high 3817748708, %v11817_v11, %v11827_v25 }
 0x351   : > { %v3144_v36 = vpop.f32.mrb[64].mxu0 }
 0x352   : > { %14662 = vst [vmem:[#allocation5_spill] sm:$0xff] %v11798_v21  ;;  %v9729_v20 = vadd.f32 %v11496_v47, %v3144_v36  ;;  %v3146_v48 = vpop.f32.mrb[65].mxu0  ;;  %v3438_v35 = vmul.f32 %v11798_v21, %v11798_v21  ;;  %v11810_v17 = vmax.f32 %v3317_v18, %v3367_v29  ;;  %v11831_v18 = vadd.s32 32, %v11790_v26 }
 0x353   : > { %v3147_v38 = vpop.f32.mrb[66].mxu0 }
 0x354   : > { %14663 = vst [vmem:[#allocation6_spill] sm:$0xff] %v11810_v17  ;;  %v9730_v31 = vadd.f32 %v11496_v47, %v3147_v38  ;;  %v3322_v51 = vadd.f32 %v9729_v20, %v11506_v57  ;;  %v3149_v23 = vpop.f32.mrb[67].mxu0  ;;  %3504 = vadd.xlane.f32.xlu0 %v3438_v35  ;;  %v3439_v58 = vmul.f32 %v11810_v17, %v11810_v17  ;;  %v452_v57 = vshrl.u32 %v11802_v10, 4 }
 0x355   : > { %v11840_v10 = vmul.u32.u64.low 3817748708, %v11821_v0  ;;  %v11841_v48 = vmul.u32.u64.high 3817748708, %v11821_v0, %v11840_v10  ;;  %v12154_v17 = vadd.s32 128, %v11790_v26 }
 0x356   : > { %v3368_v34 = vmul.f32 0.2, %v3322_v51  ;;  %v3325_v37 = vadd.f32 %v9730_v31, %v11518_v6  ;;  %3506 = vadd.xlane.f32.xlu1 %v3439_v58  ;;  %v453_v23 = vmul.u32 18, %v452_v57  ;;  %v11861_v57 = vadd.s32 48, %v11790_v26 }
 0x358   : > { %v11823_v24 = vmax.f32 %v3322_v51, %v3368_v34  ;;  %v3369_v40 = vmul.f32 0.2, %v3325_v37  ;;  %v11848_v58 = vmul.u32.u64.low 3817748708, %v11831_v18  ;;  %v11849_v34 = vmul.u32.u64.high 3817748708, %v11831_v18, %v11848_v58 }
 0x359   : > { %v3152_v54 = vpop.f32.mrb[68].mxu0  ;;  %v11858_v25 = vsub.s32 %v11790_v26, %v453_v23 }
 0x35a   : > { %14664 = vst [vmem:[#allocation7_spill] sm:$0xff] %v11823_v24  ;;  %v11833_v29 = vmax.f32 %v3325_v37, %v3369_v40  ;;  %v9731_v6 = vadd.f32 %v11496_v47, %v3152_v54  ;;  %v3154_v33 = vpop.f32.mrb[69].mxu0  ;;  %v3440_v36 = vmul.f32 %v11823_v24, %v11823_v24  ;;  %v464_v40 = vmul.u32 18, %v463_v30 }
 0x35b   : > { %v3155_v20 = vpop.f32.mrb[70].mxu0  ;;  %v11853_v54 = vadd.s32 40, %v11790_v26  ;;  %v485_v30 = vshrl.u32 %v11841_v48, 4  ;;  %vm842_vm0 = vcmp.ne.s32.totalorder %v11858_v25, 0  ;;  %vm878_vm1 = vcmp.lt.s32.totalorder %v11858_v25, 0 }
 0x35c   : > { %14665 = vst [vmem:[#allocation8_spill] sm:$0xff] %v11833_v29  ;;  %v3330_v35 = vadd.f32 %v9731_v6, %v11502_v50  ;;  %v9732_v38 = vadd.f32 %v11496_v47, %v3155_v20  ;;  %v3157_v31 = vpop.f32.mrb[71].mxu0  ;;  %3508 = vadd.xlane.f32.xlu0 %v3440_v36  ;;  %v3441_v51 = vmul.f32 %v11833_v29, %v11833_v29  ;;  %v474_v36 = vshrl.u32 %v11828_v32, 4  ;;  %vm11893_vm4 = vmand %vm878_vm1, %vm842_vm0 }
 0x35d   : > { %v11872_v20 = vmul.u32.u64.low 3817748708, %v11853_v54  ;;  %v11873_v10 = vmul.u32.u64.high 3817748708, %v11853_v54, %v11872_v20  ;;  %v11884_v32 = vmul.u32.u64.low 3817748708, %v11861_v57  ;;  %v11885_v48 = vmul.u32.u64.high 3817748708, %v11861_v57, %v11884_v32 }
 0x35e   : > { %v3370_v41 = vmul.f32 0.2, %v3330_v35  ;;  %v3333_v37 = vadd.f32 %v9732_v38, %v11511_v59  ;;  %3510 = vadd.xlane.f32.xlu1 %v3441_v51  ;;  %v11867_v59 = vsub.s32 %v411_v19, %v464_v40  ;;  %v496_v19 = vshrl.u32 %v11849_v34, 4 }
 0x35f   : > { %v475_v31 = vmul.u32 18, %v474_v36  ;;  %v486_v51 = vmul.u32 18, %v485_v30  ;;  %v950_v34 = vadd.s32 18, %v11858_v25  ;;  %v11904_v36 = vadd.s32 64, %v11790_v26 }
 0x360   : > { %v3371_v50 = vmul.f32 0.2, %v3333_v37  ;;  %v11855_v47 = vmax.f32 %v3330_v35, %v3370_v41  ;;  %v11876_v35 = vadd.s32 56, %v11790_v26  ;;  %vm843_vm2 = vcmp.ne.s32.totalorder %v11867_v59, 0 }
 0x361   : > { %vm879_vm3 = vcmp.lt.s32.totalorder %v11867_v59, 0  ;;  %v476_v20 = vsub.s32 %v11817_v11, %v475_v31  ;;  %v507_v32 = vshrl.u32 %v11873_v10, 4 }
 0x362   : > { %14666 = vst [vmem:[#allocation9_spill] sm:$0xff] %v11855_v47  ;;  %v3442_v6 = vmul.f32 %v11855_v47, %v11855_v47  ;;  %v11865_v33 = vmax.f32 %v3333_v37, %v3371_v50  ;;  %v11890_v23 = vmul.u32.u64.low 3817748708, %v11876_v35  ;;  %v11891_v58 = vmul.u32.u64.high 3817748708, %v11876_v35, %v11890_v23  ;;  %vm11899_vm5 = vmand %vm879_vm3, %vm843_vm2 }
 0x363   : > { %v951_v37 = vadd.s32 18, %v11867_v59  ;;  %v986_v23 = vsel %vm11893_vm4, %v950_v34, %v11858_v25  ;;  %v11925_v10 = vmul.u32.u64.low 3817748708, %v11904_v36  ;;  %v11926_v31 = vmul.u32.u64.high 3817748708, %v11904_v36, %v11925_v10 }
 0x364   : > { %14667 = vst [vmem:[#allocation10_spill] sm:$0xff] %v11865_v33  ;;  %3512 = vadd.xlane.f32.xlu0 %v3442_v6  ;;  %v3443_v38 = vmul.f32 %v11865_v33, %v11865_v33  ;;  %v497_v6 = vmul.u32 18, %v496_v19  ;;  %v11918_v33 = vadd.s32 72, %v11790_v26  ;;  %vm844_vm6 = vcmp.ne.s32.totalorder %v476_v20, 0 }
 0x365   : > { %v987_v19 = vsel %vm11899_vm5, %v951_v37, %v11867_v59  ;;  %vm880_vm7 = vcmp.lt.s32.totalorder %v476_v20, 0  ;;  %v508_v59 = vmul.u32 18, %v507_v32  ;;  %v11951_v32 = vadd.s32 80, %v11790_v26 }
 0x366   : > { %3514 = vadd.xlane.f32.xlu1 %v3443_v38  ;;  %v11908_v38 = vsub.s32 %v11821_v0, %v486_v51  ;;  %v11921_v11 = vsub.s32 %v11831_v18, %v497_v6  ;;  %v518_v0 = vshrl.u32 %v11885_v48, 4  ;;  %v529_v51 = vshrl.u32 %v11891_v58, 4  ;;  %vm11935_vm10 = vmand %vm880_vm7, %vm844_vm6 }
 0x367   : > { %v952_v18 = vadd.s32 18, %v476_v20  ;;  %v11932_v34 = vmul.u32.u64.low 3817748708, %v11918_v33  ;;  %v11933_v48 = vmul.u32.u64.high 3817748708, %v11918_v33, %v11932_v34  ;;  %vm11962_vm14 = vcmp.lt.s32.totalorder %v986_v23, 16 }
 0x368   : > { %vm845_vm8 = vcmp.ne.s32.totalorder %v11908_v38, 0  ;;  %vm881_vm9 = vcmp.lt.s32.totalorder %v11908_v38, 0  ;;  %v953_v50 = vadd.s32 18, %v11908_v38  ;;  %vm846_vm11 = vcmp.ne.s32.totalorder %v11921_v11, 0 }
 0x369   : > { %v3445_v40 = vpop.xlane.xlu0 %3444  ;;  %vm882_vm12 = vcmp.lt.s32.totalorder %v11921_v11, 0  ;;  %v519_v6 = vmul.u32 18, %v518_v0  ;;  %vm11946_vm13 = vmand %vm881_vm9, %vm845_vm8  ;;  %v11957_v10 = vadd.s32 18, %v11921_v11  ;;  %v11960_v0 = vsub.s32 %v11853_v54, %v508_v59 }
 0x36a   : > { %v3516_v30 = vmul.f32 0.125, %v3445_v40  ;;  %vm11966_vm15 = vcmp.lt.s32.totalorder %v987_v19, 16  ;;  %v14679_v34 = vmov 0  ;;  %vm11972_vm0 = vmand %vm882_vm12, %vm846_vm11  ;;  %v988_v54 = vsel %vm11935_vm10, %v952_v18, %v476_v20  ;;  %v10613_v20 = vld [vmem:[%s14587_s3 + $0x208] sm:$0xff]  }
 0x36b   : > { %v14680_v34 = vsel %vm11966_vm15, 4294967295, %v14679_v34  ;;  %v989_v23 = vsel %vm11946_vm13, %v953_v50, %v11908_v38  ;;  %v11982_v19 = vsub.s32 %v11861_v57, %v519_v6  ;;  %v990_v38 = vsel %vm11972_vm0, %v11957_v10, %v11921_v11 }
 0x36c   : > { %v3552_v1 = vadd.f32 1e-08, %v3516_v30  ;;  %14681 = vst [vmem:[#allocation12_spill] sm:$0xff] %v14680_v34  ;;  %v11986_v29 = vmul.u32.u64.low 3817748708, %v11951_v32  ;;  %v11987_v24 = vmul.u32.u64.high 3817748708, %v11951_v32, %v11986_v29  ;;  %vm847_vm1 = vcmp.ne.s32.totalorder %v11960_v0, 0 }
 0x36d   : > { %v3447_v40 = vpop.xlane.xlu0 %3446  ;;  %vm12003_vm2 = vcmp.lt.s32.totalorder %v988_v54, 16  ;;  %v14684_v29 = vmov 0  ;;  %vm883_vm3 = vcmp.lt.s32.totalorder %v11960_v0, 0  ;;  %v955_v50 = vadd.s32 18, %v11960_v0 }
 0x36e   : > { %10712 = vrsqrt.f32 %v3552_v1  ;;  %v3517_v25 = vmul.f32 0.125, %v3447_v40  ;;  %v10612_v40 = vld [vmem:[%s14587_s3 + $0x200] sm:$0xff]   ;;  %v14685_v29 = vsel %vm12003_vm2, 4294967295, %v14684_v29  ;;  %v551_v47 = vshrl.u32 %v11933_v48, 4  ;;  %v10615_v48 = vld [vmem:[%s14587_s3 + $0x210] sm:$0xff]   ;;  %vm12039_vm8 = vmand %vm883_vm3, %vm847_vm1 }
 0x36f   : > { %9561 = vmatprep.subr.bf16.mxu0 %v10612_v40  ;;  %14686 = vst [vmem:[#allocation13_spill] sm:$0xff] %v14685_v29  ;;  %vm848_vm4 = vcmp.ne.s32.totalorder %v11982_v19, 0  ;;  %v12013_v30 = vadd.s32 96, %v11790_v26  ;;  %vm884_vm5 = vcmp.lt.s32.totalorder %v11982_v19, 0  ;;  %v12017_v10 = vadd.s32 18, %v11982_v19 }
 0x370   : > { %v3553_v41 = vadd.f32 1e-08, %v3517_v25  ;;  %v530_v25 = vmul.u32 18, %v529_v51  ;;  %v540_v51 = vshrl.u32 %v11926_v31, 4  ;;  %9562 = vmatpush3.bf16.msra.mxu0 %v10612_v40  ;;  %v12001_v31 = vadd.s32 88, %v11790_v26  ;;  %vm12051_vm10 = vmand %vm884_vm5, %vm848_vm4 }
 0x371   : > { %v3449_v1 = vpop.xlane.xlu1 %3448  ;;  %9563 = vmatprep.subr.bf16.mxu0 %v10613_v20  ;;  %vm12031_vm7 = vcmp.lt.s32.totalorder %v989_v23, 16  ;;  %vm12079_vm11 = vcmp.lt.s32.totalorder %v990_v38, 16 }
 0x372   : > { %10714 = vrsqrt.f32 %v3553_v41  ;;  %v3518_v58 = vmul.f32 0.125, %v3449_v1  ;;  %v14676_v41 = vmov 0  ;;  %v11998_v57 = vsub.s32 %v11876_v35, %v530_v25 }
 0x373   : > { %v14677_v41 = vsel %vm11962_vm14, 4294967295, %v14676_v41  ;;  %v541_v6 = vmul.u32 18, %v540_v51 }
 0x374   : > { %14678 = vst [vmem:[#allocation11_spill] sm:$0xff] %v14677_v41  ;;  %v3554_v1 = vadd.f32 1e-08, %v3518_v58  ;;  %9564 = vmatpush3.bf16.msra.mxu0 %v10613_v20  ;;  %vm849_vm6 = vcmp.ne.s32.totalorder %v11998_v57, 0  ;;  %vm885_vm9 = vcmp.lt.s32.totalorder %v11998_v57, 0  ;;  %v10616_v41 = vld [vmem:[%s14587_s3 + $0x218] sm:$0xff]  }
 0x375   : > { %v3451_v59 = vpop.xlane.xlu1 %3450  ;;  %9565 = vmatprep.subr.bf16.mxu0 %v10615_v48  ;;  %vm12091_vm12 = vmand %vm885_vm9, %vm849_vm6 }
 0x376   : > { %10716 = vrsqrt.f32 %v3554_v1  ;;  %v3519_v58 = vmul.f32 0.125, %v3451_v59  ;;  %v12025_v1 = vld [vmem:[#allocation2 + $0x2] sm:$0xff]  ;;  %v12028_v54 = vmul.u32.u64.low 3817748708, %v12001_v31  ;;  %v12029_v59 = vmul.u32.u64.high 3817748708, %v12001_v31, %v12028_v54 }
 0x378   : > { %v10713_v18 = vpop.eup %10712  ;;  %v3555_v37 = vadd.f32 1e-08, %v3519_v58  ;;  %v14687_v58 = vmov 0  ;;  %9566 = vmatpush3.bf16.msra.mxu0 %v10615_v48  ;;  %v12075_v48 = vadd.s32 18, %v11998_v57 }
 0x379   : > { %v3624_v11 = vmul.f32 %v10713_v18, %v11526_v13  ;;  %v3453_v35 = vpop.xlane.xlu0 %3452  ;;  %v14688_v58 = vsel %vm12031_vm7, 4294967295, %v14687_v58  ;;  %9567 = vmatprep.subr.bf16.mxu0 %v10616_v41 }
 0x37a   : > { %10718 = vrsqrt.f32 %v3555_v37  ;;  %v3520_v40 = vmul.f32 0.125, %v3453_v35  ;;  %14689 = vst [vmem:[#allocation14_spill] sm:$0xff] %v14688_v58  ;;  %v12044_v35 = vld [vmem:[#allocation2 + $0xa] sm:$0xff] }
 0x37b   : > { %v3660_v13 = vsel %vm11962_vm14, %v3624_v11, 0.0  ;;  %v3455_v25 = vpop.xlane.xlu1 %3454  ;;  %v552_v11 = vmul.u32 18, %v551_v47 }
 0x37c   : > { %v10715_v51 = vpop.eup %10714  ;;  %3696 = vst [vmem:[#allocation2 + $0x13] sm:$0xff] %v3660_v13  ;;  %v3556_v20 = vadd.f32 1e-08, %v3520_v40  ;;  %v3521_v37 = vmul.f32 0.125, %v3455_v25  ;;  %v12056_v13 = vsub.s32 %v11904_v36, %v541_v6  ;;  %v991_v6 = vsel %vm12039_vm8, %v955_v50, %v11960_v0  ;;  %9568 = vmatpush3.bf16.msra.mxu0 %v10616_v41 }
 0x37d   : > { %v3625_v23 = vmul.f32 %v10715_v51, %v11530_v16  ;;  %v12059_v25 = vmul.u32.u64.low 3817748708, %v12013_v30  ;;  %v12060_v54 = vmul.u32.u64.high 3817748708, %v12013_v30, %v12059_v25  ;;  %v562_v16 = vshrl.u32 %v11987_v24, 4 }
 0x37e   : > { %10720 = vrsqrt.f32 %v3556_v20  ;;  %v3557_v47 = vadd.f32 1e-08, %v3521_v37  ;;  %v12064_v51 = vadd.s32 104, %v11790_v26  ;;  %v14694_v37 = vmov 0 }
 0x37f   : > { %v3661_v36 = vsel %vm11966_vm15, %v3625_v23, 0.0  ;;  %v14695_v37 = vsel %vm12079_vm11, 4294967295, %v14694_v37  ;;  %v992_v23 = vsel %vm12051_vm10, %v12017_v10, %v11982_v19  ;;  %v12096_v50 = vsub.s32 %v11918_v33, %v552_v11 }
 0x380   : > { %v10717_v20 = vpop.eup %10716  ;;  %3697 = vst [vmem:[#allocation2 + $0x1b] sm:$0xff] %v3661_v36  ;;  %14696 = vst [vmem:[#allocation15_spill] sm:$0xff] %v14695_v37  ;;  %10722 = vrsqrt.f32 %v3557_v47  ;;  %vm850_vm13 = vcmp.ne.s32.totalorder %v12056_v13, 0  ;;  %vm886_vm0 = vcmp.lt.s32.totalorder %v12056_v13, 0  ;;  %v12102_v19 = vadd.s32 112, %v11790_v26 }
 0x381   : > { %v3626_v38 = vmul.f32 %v10717_v20, %v11554_v53  ;;  %v3457_v18 = vpop.xlane.xlu0 %3456  ;;  %vm12104_vm1 = vcmp.lt.s32.totalorder %v991_v6, 16  ;;  %v14699_v10 = vmov 0  ;;  %v563_v25 = vmul.u32 18, %v562_v16  ;;  %v10618_v53 = vld [vmem:[%s14587_s3 + $0x220] sm:$0xff]   ;;  %vm12129_vm3 = vmand %vm886_vm0, %vm850_vm13 }
 0x382   : > { %v14700_v10 = vsel %vm12104_vm1, 4294967295, %v14699_v10  ;;  %v3522_v40 = vmul.f32 0.125, %v3457_v18  ;;  %v12109_v33 = vmul.u32.u64.low 3817748708, %v12064_v51  ;;  %v12110_v11 = vmul.u32.u64.high 3817748708, %v12064_v51, %v12109_v33  ;;  %9569 = vmatprep.subr.bf16.mxu0 %v10618_v53 }
 0x383   : > { %14701 = vst [vmem:[#allocation16_spill] sm:$0xff] %v14700_v10  ;;  %v3662_v47 = vsel %vm12003_vm2, %v3626_v38, 0.0  ;;  %v993_v41 = vsel %vm12091_vm12, %v12075_v48, %v11998_v57  ;;  %v3459_v36 = vpop.xlane.xlu1 %3458  ;;  %v12122_v6 = vadd.s32 18, %v12056_v13  ;;  %v573_v16 = vshrl.u32 %v12029_v59, 4  ;;  %9570 = vmatpush3.bf16.msra.mxu0 %v10618_v53  ;;  %v3734_v24 = vld [vmem:[#allocation2 + $0x10] sm:$0xff]  ;;  %v10622_v38 = vld [vmem:[%s14587_s3 + $0x238] sm:$0xff]  }
 0x384   : > { %v10719_v20 = vpop.eup %10718  ;;  %3698 = vst [vmem:[#allocation2 + $0x23] sm:$0xff] %v3662_v47  ;;  %v3558_v18 = vadd.f32 1e-08, %v3522_v40  ;;  %v3523_v33 = vmul.f32 0.125, %v3459_v36  ;;  %vm851_vm4 = vcmp.ne.s32.totalorder %v12096_v50, 0  ;;  %vm887_vm5 = vcmp.lt.s32.totalorder %v12096_v50, 0 }
 0x385   : > { %v3627_v57 = vmul.f32 %v10719_v20, %v11566_v60  ;;  %v12137_v59 = vmul.u32.u64.low 3817748708, %v12102_v19  ;;  %v12138_v48 = vmul.u32.u64.high 3817748708, %v12102_v19, %v12137_v59  ;;  %v12141_v0 = vadd.s32 120, %v11790_v26  ;;  %v3806_v47 = vld [vmem:[#allocation2 + $0x11] sm:$0xff]  ;;  %v10600_v20 = vld [vmem:[%s14587_s3 + $0x100] sm:$0xff]   ;;  %vm12202_vm10 = vmand %vm887_vm5, %vm851_vm4 }
 0x386   : > { %10724 = vrsqrt.f32 %v3558_v18  ;;  %v3559_v40 = vadd.f32 1e-08, %v3523_v33  ;;  %v3948_v36 = vld [vmem:[#allocation2 + $0x12] sm:$0xff]  ;;  %v12144_v29 = vsub.s32 %v11951_v32, %v563_v25  ;;  %v584_v34 = vshrl.u32 %v12060_v54, 4 }
 0x387   : > { %v3663_v60 = vsel %vm12031_vm7, %v3627_v57, 0.0  ;;  %v3807_v59 = vld [vmem:[#allocation2 + $0x19] sm:$0xff]  ;;  %v574_v33 = vmul.u32 18, %v573_v16  ;;  %vm12156_vm6 = vcmp.lt.s32.totalorder %v992_v23, 16  ;;  %v14704_v32 = vmov 0  ;;  %v10619_v16 = vld [vmem:[%s14587_s3 + $0x228] sm:$0xff]  }
 0x388   : > { %v3949_v53 = vld [vmem:[#allocation2 + $0x1a] sm:$0xff]  ;;  %v10721_v21 = vpop.eup %10720  ;;  %3699 = vst [vmem:[#allocation2 + $0x2b] sm:$0xff] %v3663_v60  ;;  %v14705_v32 = vsel %vm12156_vm6, 4294967295, %v14704_v32  ;;  %10726 = vrsqrt.f32 %v3559_v40  ;;  %v3841_v54 = vpack.c.bf16 %v3807_v59, %v3806_v47  ;;  %v12170_v23 = vadd.s32 18, %v12096_v50  ;;  %9571 = vmatprep.subr.bf16.mxu0 %v10619_v16 }
 0x389   : > { %v3735_v18 = vld [vmem:[#allocation2 + $0x18] sm:$0xff]  ;;  %14706 = vst [vmem:[#allocation17_spill] sm:$0xff] %v14705_v32  ;;  %v12160_v25 = vpack.c.bf16 %v3949_v53, %v3948_v36  ;;  %v3628_v58 = vmul.f32 %v10721_v21, %v11582_v42  ;;  %v3461_v60 = vpop.xlane.xlu0 %3460  ;;  %v12173_v40 = vmul.u32.u64.low 3817748708, %v12141_v0  ;;  %v12174_v47 = vmul.u32.u64.high 3817748708, %v12141_v0, %v12173_v40  ;;  %v10621_v53 = vld [vmem:[%s14587_s3 + $0x230] sm:$0xff]   ;;  %9572 = vmatpush3.bf16.msra.mxu0 %v10619_v16 }
 0x38a   : > { %v3769_v57 = vpack.c.bf16 %v3735_v18, %v3734_v24  ;;  %v10723_v36 = vpop.eup %10722  ;;  %vm12176_vm8 = vcmp.lt.s32.totalorder %v993_v41, 16  ;;  %v14707_v24 = vmov 0  ;;  %v3524_v59 = vmul.f32 0.125, %v3461_v60  ;;  %5165 = vmatprep.mubr.bf16.mxu0 %v3841_v54  ;;  %9573 = vmatprep.subr.bf16.mxu0 %v10621_v53 }
 0x38b   : > { %v14708_v24 = vsel %vm12176_vm8, 4294967295, %v14707_v24  ;;  %5334 = vmatprep.mubr.bf16.mxu1 %v12160_v25  ;;  %vm852_vm9 = vcmp.ne.s32.totalorder %v12144_v29, 0  ;;  %v585_v42 = vmul.u32 18, %v584_v34  ;;  %v595_v21 = vshrl.u32 %v12110_v11, 4  ;;  %v3463_v40 = vpop.xlane.xlu1 %3462 }
 0x38c   : > { %14709 = vst [vmem:[#allocation18_spill] sm:$0xff] %v14708_v24  ;;  %v3664_v18 = vsel %vm12079_vm11, %v3628_v58, 0.0  ;;  %v3629_v41 = vmul.f32 %v10723_v36, %v11588_v5  ;;  %5166 = vmatmul.mubr.bf16.gmra.mrb[76].mxu0 %v3769_v57  ;;  %v14710_v54 = vpack.c.bf16 %v12044_v35, %v12025_v1  ;;  %v12193_v60 = vsub.s32 %v12001_v31, %v574_v33  ;;  %v10601_v31 = vld [vmem:[%s14587_s3 + $0x108] sm:$0xff]   ;;  %v10602_v5 = vld [vmem:[%s14587_s3 + $0x110] sm:$0xff]  }
 0x38d   : > { %v12196_v34 = vadd.s32 136, %v11790_v26  ;;  %3700 = vst [vmem:[#allocation2 + $0x33] sm:$0xff] %v3664_v18  ;;  %v3560_v11 = vadd.f32 1e-08, %v3524_v59  ;;  %v3525_v58 = vmul.f32 0.125, %v3463_v40  ;;  %vm888_vm12 = vcmp.lt.s32.totalorder %v12144_v29, 0  ;;  %9574 = vmatpush3.bf16.msra.mxu0 %v10621_v53 }
 0x38e   : > { %5335 = vmatmul.mubr.bf16.vlgmr.msra.gmra.mrb[36].mxu1 %v14710_v54  ;;  %v12210_v1 = vmul.u32.u64.low 3817748708, %v12154_v17  ;;  %v12211_v35 = vmul.u32.u64.high 3817748708, %v12154_v17, %v12210_v1  ;;  %v3665_v33 = vsel %vm12104_vm1, %v3629_v41, 0.0  ;;  %v12217_v57 = vadd.s32 18, %v12144_v29  ;;  %v3808_v18 = vld [vmem:[#allocation2 + $0x21] sm:$0xff]  ;;  %9575 = vmatprep.subr.bf16.mxu0 %v10622_v38 }
 0x38f   : > { %5480 = vmatpush1.bf16.msra.mxu1 %v10600_v20  ;;  %v14713_v36 = vmov 0   ;;  %v606_v20 = vshrl.u32 %v12138_v48, 4  ;;  %3701 = vst [vmem:[#allocation2 + $0x3b] sm:$0xff] %v3665_v33  ;;  %10728 = vrsqrt.f32 %v3560_v11  ;;  %v3561_v59 = vadd.f32 1e-08, %v3525_v58  ;;  %v3950_v40 = vld [vmem:[#allocation2 + $0x22] sm:$0xff] }
 0x390   : > { %5481 = vmatprep.subr.bf16.mxu1 %v14713_v36  ;;  %v3736_v54 = vld [vmem:[#allocation2 + $0x20] sm:$0xff]  ;;  %v12222_v1 = vsub.s32 %v12013_v30, %v585_v42  ;;  %v596_v41 = vmul.u32 18, %v595_v21  ;;  %v995_v10 = vsel %vm12202_vm10, %v12170_v23, %v12096_v50  ;;  %v3809_v37 = vld [vmem:[#allocation2 + $0x29] sm:$0xff]  ;;  %vm853_vm13 = vcmp.ne.s32.totalorder %v12193_v60, 0  ;;  %v10725_v58 = vpop.eup %10724 }
 0x391   : > { %v3951_v7 = vld [vmem:[#allocation2 + $0x2a] sm:$0xff]  ;;  %v12230_v16 = vmul.u32.u64.low 3817748708, %v12196_v34  ;;  %v12231_v11 = vmul.u32.u64.high 3817748708, %v12196_v34, %v12230_v16  ;;  %v14714_v30 = vsel %vm12129_vm3, %v12122_v6, %v12056_v13  ;;  %v14715_v42 = vmov 0  ;;  %vm12255_vm3 = vmand %vm888_vm12, %vm852_vm9  ;;  %9576 = vmatpush3.bf16.msra.mxu0 %v10622_v38 }
 0x392   : > { %v3737_v48 = vld [vmem:[#allocation2 + $0x28] sm:$0xff]  ;;  %vm12238_vm0 = vcmp.lt.s32.totalorder %v14714_v30, 16  ;;  %10730 = vrsqrt.f32 %v3561_v59  ;;  %v3842_v50 = vpack.c.bf16 %v3809_v37, %v3808_v18  ;;  %v12242_v23 = vpack.c.bf16 %v3951_v7, %v3950_v40  ;;  %v3465_v7 = vpop.xlane.xlu0 %3464  ;;  %v10727_v33 = vpop.eup %10726  ;;  %8330 = vmatprep.subr.bf16.mxu0 %v14713_v36 }
 0x393   : > { %v14716_v42 = vsel %vm12238_vm0, 4294967295, %v14715_v42  ;;  %v3770_v21 = vpack.c.bf16 %v3737_v48, %v3736_v54  ;;  %5482 = vmatpush1.bf16.msra.mxu1 %v10601_v31  ;;  %v3630_v13 = vmul.f32 %v10725_v58, %v11610_v2  ;;  %vm889_vm4 = vcmp.lt.s32.totalorder %v12193_v60, 0  ;;  %v3467_v53 = vpop.xlane.xlu1 %3466 }
 0x394   : > { %14717 = vst [vmem:[#allocation19_spill] sm:$0xff] %v14716_v42  ;;  %5483 = vmatprep.subr.bf16.mxu1 %v14713_v36  ;;  %v607_v6 = vmul.u32 18, %v606_v20  ;;  %v617_v31 = vshrl.u32 %v12174_v47, 4  ;;  %vm12262_vm5 = vcmp.lt.s32.totalorder %v995_v10, 16  ;;  %v14720_v2 = vmov 0  ;;  %5173 = vmatprep.mubr.bf16.mxu0 %v3842_v50  ;;  %v3810_v48 = vld [vmem:[#allocation2 + $0x31] sm:$0xff] }
 0x395   : > { %v14721_v2 = vsel %vm12262_vm5, 4294967295, %v14720_v2  ;;  %v3526_v59 = vmul.f32 0.125, %v3465_v7  ;;  %5342 = vmatprep.mubr.bf16.mxu1 %v12242_v23  ;;  %v12268_v18 = vadd.s32 18, %v12193_v60  ;;  %vm854_vm9 = vcmp.ne.s32.totalorder %v12222_v1, 0  ;;  %5174 = vmatmul.mubr.bf16.gmra.mrb[80].mxu0 %v3770_v21  ;;  %v3952_v30 = vld [vmem:[#allocation2 + $0x32] sm:$0xff] }
 0x396   : > { %14722 = vst [vmem:[#allocation20_spill] sm:$0xff] %v14721_v2  ;;  %v12272_v40 = vsub.s32 %v12064_v51, %v596_v41  ;;  %v3666_v47 = vsel %vm12156_vm6, %v3630_v13, 0.0  ;;  %v3631_v10 = vmul.f32 %v10727_v33, %v11616_v9  ;;  %5343 = vmatmul.mubr.bf16.gmra.mrb[40].mxu1 %v12160_v25  ;;  %v12280_v20 = vadd.s32 144, %v11790_v26  ;;  %v10603_v9 = vld [vmem:[%s14587_s3 + $0x118] sm:$0xff]  }
 0x397   : > { %3702 = vst [vmem:[#allocation2 + $0x43] sm:$0xff] %v3666_v47  ;;  %v996_v51 = vsel %vm12255_vm3, %v12217_v57, %v12144_v29  ;;  %v3562_v54 = vadd.f32 1e-08, %v3526_v59  ;;  %v3527_v41 = vmul.f32 0.125, %v3467_v53  ;;  %5484 = vmatpush1.bf16.msra.mxu1 %v10602_v5  ;;  %v628_v25 = vshrl.u32 %v12211_v35, 4  ;;  %v3811_v58 = vld [vmem:[#allocation2 + $0x39] sm:$0xff]  ;;  %vm12324_vm3 = vmand %vm889_vm4, %vm853_vm13 }
 0x398   : > { %v3667_v16 = vsel %vm12176_vm8, %v3631_v10, 0.0  ;;  %v3953_v50 = vld [vmem:[#allocation2 + $0x3a] sm:$0xff]  ;;  %v12293_v21 = vsub.s32 %v12102_v19, %v607_v6  ;;  %v618_v29 = vmul.u32 18, %v617_v31  ;;  %5485 = vmatprep.subr.bf16.mxu1 %v14713_v36  ;;  %v12297_v57 = vadd.s32 152, %v11790_v26  ;;  %v3738_v31 = vld [vmem:[#allocation2 + $0x30] sm:$0xff] }
 0x399   : > { %3703 = vst [vmem:[#allocation2 + $0x4b] sm:$0xff] %v3667_v16  ;;  %10732 = vrsqrt.f32 %v3562_v54  ;;  %v3563_v35 = vadd.f32 1e-08, %v3527_v41  ;;  %v3843_v5 = vpack.c.bf16 %v3811_v58, %v3810_v48  ;;  %v12299_v13 = vpack.c.bf16 %v3953_v50, %v3952_v30  ;;  %v3739_v37 = vld [vmem:[#allocation2 + $0x38] sm:$0xff]  ;;  %v10729_v38 = vpop.eup %10728 }
 0x39a   : > { %v12303_v7 = vadd.s32 18, %v12222_v1  ;;  %v12308_v19 = vadd.s32 18, %v12272_v40  ;;  %vm12310_vm10 = vcmp.lt.s32.totalorder %v996_v51, 16  ;;  %v14723_v6 = vmov 0  ;;  %v3469_v51 = vpop.xlane.xlu0 %3468 }
 0x39b   : > { %v14724_v6 = vsel %vm12310_vm10, 4294967295, %v14723_v6  ;;  %10734 = vrsqrt.f32 %v3563_v35  ;;  %5181 = vmatprep.mubr.bf16.mxu0 %v3843_v5  ;;  %5350 = vmatprep.mubr.bf16.mxu1 %v12299_v13  ;;  %v629_v33 = vmul.u32 18, %v628_v25  ;;  %v3632_v10 = vmul.f32 %v10729_v38, %v11638_v56  ;;  %v10604_v56 = vld [vmem:[%s14587_s3 + $0x120] sm:$0xff]   ;;  %v10605_v38 = vld [vmem:[%s14587_s3 + $0x128] sm:$0xff]  }
 0x39c   : > { %14725 = vst [vmem:[#allocation21_spill] sm:$0xff] %v14724_v6  ;;  %v12316_v59 = vmul.u32.u64.low 3817748708, %v12280_v20  ;;  %v12317_v47 = vmul.u32.u64.high 3817748708, %v12280_v20, %v12316_v59  ;;  %v3771_v54 = vpack.c.bf16 %v3739_v37, %v3738_v31  ;;  %v12329_v41 = vsub.s32 %v12141_v0, %v618_v29  ;;  %5486 = vmatpush1.bf16.msra.mxu1 %v10603_v9  ;;  %v10731_v25 = vpop.eup %10730 }
 0x39d   : > { %v639_v48 = vshrl.u32 %v12231_v11, 4  ;;  %v3528_v16 = vmul.f32 0.125, %v3469_v51  ;;  %5487 = vmatprep.subr.bf16.mxu1 %v14713_v36  ;;  %v12338_v58 = vmul.u32.u64.low 3817748708, %v12297_v57  ;;  %v12339_v30 = vmul.u32.u64.high 3817748708, %v12297_v57, %v12338_v58  ;;  %v3471_v11 = vpop.xlane.xlu1 %3470 }
 0x39e   : > { %v3668_v0 = vsel %vm12238_vm0, %v3632_v10, 0.0  ;;  %v3633_v9 = vmul.f32 %v10731_v25, %v11641_v15  ;;  %5182 = vmatmul.mubr.bf16.gmra.mrb[84].mxu0 %v3771_v54  ;;  %5351 = vmatmul.mubr.bf16.gmra.mrb[44].mxu1 %v12242_v23  ;;  %v12347_v50 = vadd.s32 160, %v11790_v26  ;;  %v997_v29 = vsel %vm12324_vm3, %v12268_v18, %v12193_v60  ;;  %v3812_v5 = vld [vmem:[#allocation2 + $0x41] sm:$0xff] }
 0x39f   : > { %3704 = vst [vmem:[#allocation2 + $0x53] sm:$0xff] %v3668_v0  ;;  %vm14728_vm4 = vcmp.lt.s32.totalorder %v12222_v1, 0  ;;  %v3564_v23 = vadd.f32 1e-08, %v3528_v16  ;;  %v3529_v35 = vmul.f32 0.125, %v3471_v11  ;;  %v12362_v37 = vadd.s32 18, %v12293_v21 }
 0x3a0   : > { %vm12357_vm12 = vmand %vm14728_vm4, %vm854_vm9  ;;  %v3669_v60 = vsel %vm12262_vm5, %v3633_v9, 0.0  ;;  %v3813_v18 = vld [vmem:[#allocation2 + $0x49] sm:$0xff]  ;;  %5488 = vmatpush1.bf16.msra.mxu1 %v10604_v56  ;;  %vm14731_vm4 = vcmp.ne.s32.totalorder %v12272_v40, 0  ;;  %vm14732_vm13 = vcmp.lt.s32.totalorder %v12272_v40, 0  ;;  %vm12382_vm9 = vcmp.lt.s32.totalorder %v997_v29, 16 }
 0x3a1   : > { %v3954_v31 = vld [vmem:[#allocation2 + $0x42] sm:$0xff]  ;;  %v3955_v59 = vld [vmem:[#allocation2 + $0x4a] sm:$0xff]  ;;  %3705 = vst [vmem:[#allocation2 + $0x5b] sm:$0xff] %v3669_v60  ;;  %10736 = vrsqrt.f32 %v3564_v23  ;;  %vm12375_vm0 = vmand %vm14732_vm13, %vm14731_vm4  ;;  %v3565_v53 = vadd.f32 1e-08, %v3529_v35  ;;  %v3844_v51 = vpack.c.bf16 %v3813_v18, %v3812_v5  ;;  %5489 = vmatprep.subr.bf16.mxu1 %v14713_v36  ;;  %v14735_v16 = vmov 0  ;;  %v3473_v18 = vpop.xlane.xlu0 %3472 }
 0x3a2   : > { %v12379_v54 = vpack.c.bf16 %v3955_v59, %v3954_v31  ;;  %v3741_v25 = vld [vmem:[#allocation2 + $0x48] sm:$0xff]  ;;  %v14736_v16 = vsel %vm12382_vm9, 4294967295, %v14735_v16  ;;  %vm14738_vm3 = vcmp.ne.s32.totalorder %v12293_v21, 0  ;;  %vm14739_vm5 = vcmp.lt.s32.totalorder %v12293_v21, 0  ;;  %v3740_v35 = vld [vmem:[#allocation2 + $0x40] sm:$0xff] }
 0x3a3   : > { %14737 = vst [vmem:[#allocation22_spill] sm:$0xff] %v14736_v16  ;;  %vm12390_vm8 = vmand %vm14739_vm5, %vm14738_vm3  ;;  %v12395_v58 = vmul.u32.u64.low 3817748708, %v12347_v50  ;;  %v12396_v0 = vmul.u32.u64.high 3817748708, %v12347_v50, %v12395_v58  ;;  %v12399_v9 = vadd.s32 168, %v11790_v26  ;;  %v10733_v11 = vpop.eup %10732  ;;  %v998_v29 = vsel %vm12357_vm12, %v12303_v7, %v12222_v1  ;;  %5189 = vmatprep.mubr.bf16.mxu0 %v3844_v51  ;;  %v3475_v51 = vpop.xlane.xlu1 %3474 }
 0x3a4   : > { %10738 = vrsqrt.f32 %v3565_v53  ;;  %5358 = vmatprep.mubr.bf16.mxu1 %v12379_v54  ;;  %v12407_v23 = vadd.s32 18, %v12329_v41  ;;  %v12410_v5 = vsub.s32 %v12154_v17, %v629_v33  ;;  %v3634_v60 = vmul.f32 %v10733_v11, %v11666_v55  ;;  %5490 = vmatpush1.bf16.msra.mxu1 %v10605_v38  ;;  %v10606_v17 = vld [vmem:[%s14587_s3 + $0x130] sm:$0xff]  }
 0x3a5   : > { %vm14742_vm5 = vcmp.ne.s32.totalorder %v12329_v41, 0  ;;  %vm14743_vm13 = vcmp.lt.s32.totalorder %v12329_v41, 0  ;;  %v3772_v7 = vpack.c.bf16 %v3741_v25, %v3740_v35  ;;  %v640_v15 = vmul.u32 18, %v639_v48  ;;  %v10735_v33 = vpop.eup %10734  ;;  %5491 = vmatprep.subr.bf16.mxu1 %v14713_v36 }
 0x3a6   : > { %vm12417_vm3 = vmand %vm14743_vm13, %vm14742_vm5  ;;  %v650_v31 = vshrl.u32 %v12317_v47, 4  ;;  %v999_v55 = vsel %vm12375_vm0, %v12308_v19, %v12272_v40  ;;  %v1000_v59 = vsel %vm12390_vm8, %v12362_v37, %v12293_v21  ;;  %v3530_v53 = vmul.f32 0.125, %v3473_v18  ;;  %5359 = vmatmul.mubr.bf16.gmra.mrb[48].mxu1 %v12299_v13  ;;  %v3814_v25 = vld [vmem:[#allocation2 + $0x51] sm:$0xff] }
 0x3a7   : > { %v12435_v47 = vadd.s32 176, %v11790_v26  ;;  %v3670_v48 = vsel %vm12310_vm10, %v3634_v60, 0.0  ;;  %v3635_v38 = vmul.f32 %v10735_v33, %v11672_v12  ;;  %5190 = vmatmul.mubr.bf16.gmra.mrb[88].mxu0 %v3772_v7  ;;  %v1001_v37 = vsel %vm12417_vm3, %v12407_v23, %v12329_v41  ;;  %v10607_v12 = vld [vmem:[%s14587_s3 + $0x138] sm:$0xff]  }
 0x3a8   : > { %v12442_v40 = vmul.u32.u64.low 3817748708, %v12399_v9  ;;  %v12443_v19 = vmul.u32.u64.high 3817748708, %v12399_v9, %v12442_v40  ;;  %3706 = vst [vmem:[#allocation2 + $0x63] sm:$0xff] %v3670_v48  ;;  %v3566_v21 = vadd.f32 1e-08, %v3530_v53  ;;  %v3531_v10 = vmul.f32 0.125, %v3475_v51  ;;  %5492 = vmatpush1.bf16.msra.mxu1 %v10606_v17 }
 0x3a9   : > { %v661_v56 = vshrl.u32 %v12339_v30, 4  ;;  %v3671_v13 = vsel %vm12382_vm9, %v3635_v38, 0.0  ;;  %v3815_v58 = vld [vmem:[#allocation2 + $0x59] sm:$0xff]  ;;  %vm858_vm8 = vcmp.ne.s32.totalorder %v12410_v5, 0  ;;  %v12457_v60 = vsub.s32 %v12196_v34, %v640_v15  ;;  %5493 = vmatprep.subr.bf16.mxu1 %v14713_v36  ;;  %v3742_v17 = vld [vmem:[#allocation2 + $0x50] sm:$0xff]  ;;  %v3477_v51 = vpop.xlane.xlu0 %3476 }
 0x3aa   : > { %v3956_v11 = vld [vmem:[#allocation2 + $0x52] sm:$0xff]  ;;  %v3957_v35 = vld [vmem:[#allocation2 + $0x5a] sm:$0xff]  ;;  %v651_v41 = vmul.u32 18, %v650_v31  ;;  %3707 = vst [vmem:[#allocation2 + $0x6b] sm:$0xff] %v3671_v13  ;;  %10740 = vrsqrt.f32 %v3566_v21  ;;  %v3567_v30 = vadd.f32 1e-08, %v3531_v10  ;;  %v3845_v23 = vpack.c.bf16 %v3815_v58, %v3814_v25 }
 0x3ab   : > { %v12459_v18 = vpack.c.bf16 %v3957_v35, %v3956_v11  ;;  %v3743_v1 = vld [vmem:[#allocation2 + $0x58] sm:$0xff]  ;;  %vm894_vm0 = vcmp.lt.s32.totalorder %v12410_v5, 0  ;;  %v672_v7 = vshrl.u32 %v12396_v0, 4  ;;  %v10737_v34 = vpop.eup %10736  ;;  %vm12468_vm12 = vcmp.lt.s32.totalorder %v998_v29, 16 }
 0x3ac   : > { %v12465_v33 = vmul.u32.u64.low 3817748708, %v12435_v47  ;;  %v12466_v53 = vmul.u32.u64.high 3817748708, %v12435_v47, %v12465_v33  ;;  %v14746_v15 = vmov 0  ;;  %vm12472_vm4 = vcmp.lt.s32.totalorder %v999_v55, 16  ;;  %5197 = vmatprep.mubr.bf16.mxu0 %v3845_v23  ;;  %5494 = vmatpush1.bf16.msra.mxu1 %v10607_v12  ;;  %v10608_v55 = vld [vmem:[%s14587_s3 + $0x140] sm:$0xff]   ;;  %vm12494_vm3 = vmand %vm894_vm0, %vm858_vm8  ;;  %v3479_v12 = vpop.xlane.xlu1 %3478 }
 0x3ad   : > { %v14747_v15 = vsel %vm12468_vm12, 4294967295, %v14746_v15  ;;  %v14749_v31 = vmov 0  ;;  %10742 = vrsqrt.f32 %v3567_v30  ;;  %5366 = vmatprep.mubr.bf16.mxu1 %v12459_v18  ;;  %v662_v48 = vmul.u32 18, %v661_v56  ;;  %5495 = vmatprep.subr.bf16.mxu1 %v14713_v36 }
 0x3ae   : > { %14748 = vst [vmem:[#allocation23_spill] sm:$0xff] %v14747_v15  ;;  %v14750_v31 = vsel %vm12472_vm4, 4294967295, %v14749_v31  ;;  %v3636_v0 = vmul.f32 %v10737_v34, %v11686_v61  ;;  %vm12478_vm5 = vcmp.lt.s32.totalorder %v1000_v59, 16  ;;  %v14752_v38 = vmov 0  ;;  %v10739_v21 = vpop.eup %10738  ;;  %5367 = vmatmul.mubr.bf16.gmra.mrb[52].mxu1 %v12379_v54 }
 0x3af   : > { %14751 = vst [vmem:[#allocation24_spill] sm:$0xff] %v14750_v31  ;;  %v14753_v38 = vsel %vm12478_vm5, 4294967295, %v14752_v38  ;;  %v966_v29 = vadd.s32 18, %v12410_v5  ;;  %v3773_v40 = vpack.c.bf16 %v3743_v1, %v3742_v17  ;;  %vm12486_vm13 = vcmp.lt.s32.totalorder %v1001_v37, 16  ;;  %v3816_v35 = vld [vmem:[#allocation2 + $0x61] sm:$0xff] }
 0x3b0   : > { %14754 = vst [vmem:[#allocation25_spill] sm:$0xff] %v14753_v38  ;;  %v14755_v10 = vmov 0  ;;  %v3532_v59 = vmul.f32 0.125, %v3477_v51  ;;  %vm859_vm9 = vcmp.ne.s32.totalorder %v12457_v60, 0  ;;  %v12500_v25 = vsub.s32 %v12280_v20, %v651_v41  ;;  %5496 = vmatpush1.bf16.msra.mxu1 %v10608_v55  ;;  %v3744_v55 = vld [vmem:[#allocation2 + $0x60] sm:$0xff] }
 0x3b1   : > { %v14756_v10 = vsel %vm12486_vm13, 4294967295, %v14755_v10  ;;  %v3672_v37 = vsel %vm12468_vm12, %v3636_v0, 0.0  ;;  %v3637_v56 = vmul.f32 %v10739_v21, %v11688_v3  ;;  %vm895_vm10 = vcmp.lt.s32.totalorder %v12457_v60, 0  ;;  %5198 = vmatmul.mubr.bf16.gmra.mrb[92].mxu0 %v3773_v40  ;;  %v10609_v3 = vld [vmem:[%s14587_s3 + $0x148] sm:$0xff]   ;;  %5497 = vmatprep.subr.bf16.mxu1 %v14713_v36 }
 0x3b2   : > { %14757 = vst [vmem:[#allocation26_spill] sm:$0xff] %v14756_v10  ;;  %v673_v13 = vmul.u32 18, %v672_v7  ;;  %3708 = vst [vmem:[#allocation2 + $0x73] sm:$0xff] %v3672_v37  ;;  %v3568_v58 = vadd.f32 1e-08, %v3532_v59  ;;  %v3533_v11 = vmul.f32 0.125, %v3479_v12  ;;  %v12509_v20 = vsub.s32 %v12297_v57, %v662_v48  ;;  %v3481_v59 = vpop.xlane.xlu0 %3480 }
 0x3b3   : > { %v683_v41 = vshrl.u32 %v12443_v19, 4  ;;  %v3673_v30 = vsel %vm12472_vm4, %v3637_v56, 0.0  ;;  %v1002_v54 = vsel %vm12494_vm3, %v966_v29, %v12410_v5  ;;  %v12521_v23 = vadd.s32 18, %v12457_v60  ;;  %v3817_v1 = vld [vmem:[#allocation2 + $0x69] sm:$0xff]  ;;  %vm12559_vm8 = vmand %vm895_vm10, %vm859_vm9 }
 0x3b4   : > { %v3958_v7 = vld [vmem:[#allocation2 + $0x62] sm:$0xff]  ;;  %v3959_v57 = vld [vmem:[#allocation2 + $0x6a] sm:$0xff]  ;;  %v12524_v33 = vadd.s32 184, %v11790_v26  ;;  %3709 = vst [vmem:[#allocation2 + $0x7b] sm:$0xff] %v3673_v30  ;;  %10744 = vrsqrt.f32 %v3568_v58  ;;  %v3569_v19 = vadd.f32 1e-08, %v3533_v11  ;;  %v3846_v34 = vpack.c.bf16 %v3817_v1, %v3816_v35  ;;  %v10741_v51 = vpop.eup %10740  ;;  %5498 = vmatpush1.bf16.msra.mxu1 %v10609_v3  ;;  %v3483_v30 = vpop.xlane.xlu1 %3482 }
 0x3b5   : > { %v12526_v17 = vpack.c.bf16 %v3959_v57, %v3958_v7  ;;  %v3745_v48 = vld [vmem:[#allocation2 + $0x68] sm:$0xff]  ;;  %v12532_v5 = vadd.s32 18, %v12500_v25  ;;  %v12535_v0 = vsub.s32 %v12347_v50, %v673_v13  ;;  %v694_v29 = vshrl.u32 %v12466_v53, 4  ;;  %v10610_v12 = vld [vmem:[%s14587_s3 + $0x150] sm:$0xff]   ;;  %5499 = vmatprep.subr.bf16.mxu1 %v14713_v36 }
 0x3b6   : > { %vm12538_vm3 = vcmp.lt.s32.totalorder %v1002_v54, 16  ;;  %v14760_v40 = vmov 0  ;;  %10746 = vrsqrt.f32 %v3569_v19  ;;  %5205 = vmatprep.mubr.bf16.mxu0 %v3846_v34  ;;  %v684_v21 = vmul.u32 18, %v683_v41 }
 0x3b7   : > { %v14761_v40 = vsel %vm12538_vm3, 4294967295, %v14760_v40  ;;  %5374 = vmatprep.mubr.bf16.mxu1 %v12526_v17  ;;  %v12545_v61 = vadd.s32 192, %v11790_v26  ;;  %v3638_v50 = vmul.f32 %v10741_v51, %v11699_v44  ;;  %v3774_v53 = vpack.c.bf16 %v3745_v48, %v3744_v55  ;;  %v10743_v13 = vpop.eup %10742 }
 0x3b8   : > { %14762 = vst [vmem:[#allocation27_spill] sm:$0xff] %v14761_v40  ;;  %v12549_v37 = vmul.u32.u64.low 3817748708, %v12524_v33  ;;  %v12550_v56 = vmul.u32.u64.high 3817748708, %v12524_v33, %v12549_v37  ;;  %v3534_v44 = vmul.f32 0.125, %v3481_v59  ;;  %v12565_v11 = vadd.s32 18, %v12509_v20  ;;  %5375 = vmatmul.mubr.bf16.gmra.mrb[56].mxu1 %v12459_v18 }
 0x3b9   : > { %v12568_v35 = vadd.s32 200, %v11790_v26  ;;  %v3674_v41 = vsel %vm12478_vm5, %v3638_v50, 0.0  ;;  %v3639_v3 = vmul.f32 %v10743_v13, %v11704_v4  ;;  %5206 = vmatmul.mubr.bf16.gmra.mrb[96].mxu0 %v3774_v53  ;;  %v695_v54 = vmul.u32 18, %v694_v29  ;;  %v3818_v57 = vld [vmem:[#allocation2 + $0x71] sm:$0xff]  ;;  %5500 = vmatpush1.bf16.msra.mxu1 %v10610_v12 }
 0x3ba   : > { %3710 = vst [vmem:[#allocation2 + $0x83] sm:$0xff] %v3674_v41  ;;  %v3570_v1 = vadd.f32 1e-08, %v3534_v44  ;;  %v3535_v7 = vmul.f32 0.125, %v3483_v30  ;;  %v12577_v19 = vsub.s32 %v12399_v9, %v684_v21  ;;  %v12580_v34 = vadd.s32 208, %v11790_v26  ;;  %v10611_v4 = vld [vmem:[%s14587_s3 + $0x158] sm:$0xff]   ;;  %5501 = vmatprep.subr.bf16.mxu1 %v14713_v36  ;;  %v3485_v30 = vpop.xlane.xlu0 %3484 }
 0x3bb   : > { %v3675_v18 = vsel %vm12486_vm13, %v3639_v3, 0.0  ;;  %v1003_v48 = vsel %vm12559_vm8, %v12521_v23, %v12457_v60  ;;  %v3819_v29 = vld [vmem:[#allocation2 + $0x79] sm:$0xff]  ;;  %v12592_v9 = vmul.u32.u64.low 3817748708, %v12545_v61  ;;  %v12593_v21 = vmul.u32.u64.high 3817748708, %v12545_v61, %v12592_v9  ;;  %v3746_v12 = vld [vmem:[#allocation2 + $0x70] sm:$0xff] }
 0x3bc   : > { %v3960_v51 = vld [vmem:[#allocation2 + $0x72] sm:$0xff]  ;;  %v3961_v55 = vld [vmem:[#allocation2 + $0x7a] sm:$0xff]  ;;  %3711 = vst [vmem:[#allocation2 + $0x8b] sm:$0xff] %v3675_v18  ;;  %10748 = vrsqrt.f32 %v3570_v1  ;;  %v3571_v50 = vadd.f32 1e-08, %v3535_v7  ;;  %v3847_v59 = vpack.c.bf16 %v3819_v29, %v3818_v57  ;;  %v12600_v60 = vsub.s32 %v12435_v47, %v695_v54  ;;  %v3487_v9 = vpop.xlane.xlu1 %3486 }
 0x3bd   : > { %v12595_v53 = vpack.c.bf16 %v3961_v55, %v3960_v51  ;;  %v3747_v37 = vld [vmem:[#allocation2 + $0x78] sm:$0xff]  ;;  %v12603_v23 = vmul.u32.u64.low 3817748708, %v12568_v35  ;;  %v12604_v13 = vmul.u32.u64.high 3817748708, %v12568_v35, %v12603_v23  ;;  %vm14765_vm9 = vcmp.ne.s32.totalorder %v12500_v25, 0  ;;  %5502 = vmatpush1.bf16.msra.mxu1 %v10611_v4  ;;  %v10614_v7 = vld [vmem:[%s14587_s3 + $0x160] sm:$0xff]   ;;  %v4245_v40 = vld [vmem:[#allocation2 + $0x6d] sm:$0xff] }
 0x3be   : > { %v10745_v58 = vpop.eup %10744  ;;  %10750 = vrsqrt.f32 %v3571_v50  ;;  %5213 = vmatprep.mubr.bf16.mxu0 %v3847_v59  ;;  %v12609_v44 = vmul.u32.u64.low 3817748708, %v12580_v34  ;;  %v12610_v41 = vmul.u32.u64.high 3817748708, %v12580_v34, %v12609_v44  ;;  %vm14766_vm10 = vcmp.lt.s32.totalorder %v12500_v25, 0  ;;  %5503 = vmatprep.subr.bf16.mxu1 %v14713_v36 }
 0x3bf   : > { %5382 = vmatprep.mubr.bf16.mxu1 %v12595_v53  ;;  %v3640_v3 = vmul.f32 %v10745_v58, %v11711_v49  ;;  %vm12617_vm0 = vmand %vm14766_vm10, %vm14765_vm9  ;;  %v3775_v54 = vpack.c.bf16 %v3747_v37, %v3746_v12  ;;  %v705_v1 = vshrl.u32 %v12550_v56, 4  ;;  %vm12626_vm8 = vcmp.lt.s32.totalorder %v1003_v48, 16 }
 0x3c0   : > { %v10747_v49 = vpop.eup %10746  ;;  %v14769_v57 = vmov 0  ;;  %vm14772_vm10 = vcmp.ne.s32.totalorder %v12509_v20, 0  ;;  %vm14773_vm9 = vcmp.lt.s32.totalorder %v12509_v20, 0  ;;  %v970_v56 = vadd.s32 18, %v12535_v0  ;;  %5383 = vmatmul.mubr.bf16.gmra.mrb[60].mxu1 %v12526_v17  ;;  %v10617_v17 = vld [vmem:[%s14587_s3 + $0x168] sm:$0xff]  }
 0x3c1   : > { %v14770_v57 = vsel %vm12626_vm8, 4294967295, %v14769_v57  ;;  %vm12634_vm5 = vmand %vm14773_vm9, %vm14772_vm10  ;;  %v3536_v4 = vmul.f32 0.125, %v3485_v30  ;;  %v3676_v29 = vsel %vm12538_vm3, %v3640_v3, 0.0  ;;  %v3641_v48 = vmul.f32 %v10747_v49, %v11713_v8  ;;  %5214 = vmatmul.mubr.bf16.gmra.mrb[100].mxu0 %v3775_v54  ;;  %v3820_v23 = vld [vmem:[#allocation2 + $0x81] sm:$0xff]  ;;  %5504 = vmatpush1.bf16.msra.mxu1 %v10614_v7 }
 0x3c2   : > { %14771 = vst [vmem:[#allocation28_spill] sm:$0xff] %v14770_v57  ;;  %vm14776_vm13 = vcmp.ne.s32.totalorder %v12535_v0, 0  ;;  %vm14777_vm4 = vcmp.lt.s32.totalorder %v12535_v0, 0  ;;  %v971_v55 = vadd.s32 18, %v12577_v19  ;;  %vm864_vm10 = vcmp.ne.s32.totalorder %v12600_v60, 0  ;;  %3712 = vst [vmem:[#allocation2 + $0x93] sm:$0xff] %v3676_v29  ;;  %5505 = vmatprep.subr.bf16.mxu1 %v14713_v36 }
 0x3c3   : > { %vm12647_vm12 = vmand %vm14777_vm4, %vm14776_vm13  ;;  %v1004_v8 = vsel %vm12617_vm0, %v12532_v5, %v12500_v25  ;;  %v3572_v50 = vadd.f32 1e-08, %v3536_v4  ;;  %vm14780_vm4 = vcmp.ne.s32.totalorder %v12577_v19, 0  ;;  %vm14781_vm13 = vcmp.lt.s32.totalorder %v12577_v19, 0  ;;  %v3821_v58 = vld [vmem:[#allocation2 + $0x89] sm:$0xff]  ;;  %v4247_v10 = vld [vmem:[#allocation2 + $0x7d] sm:$0xff] }
 0x3c4   : > { %vm12662_vm9 = vmand %vm14781_vm13, %vm14780_vm4  ;;  %v3537_v37 = vmul.f32 0.125, %v3487_v9  ;;  %vm900_vm3 = vcmp.lt.s32.totalorder %v12600_v60, 0  ;;  %v3677_v25 = vsel %vm12626_vm8, %v3641_v48, 0.0  ;;  %v1005_v5 = vsel %vm12634_vm5, %v12565_v11, %v12509_v20  ;;  %v3962_v12 = vld [vmem:[#allocation2 + $0x82] sm:$0xff]  ;;  %v3963_v44 = vld [vmem:[#allocation2 + $0x8a] sm:$0xff] }
 0x3c5   : > { %v706_v3 = vmul.u32 18, %v705_v1  ;;  %v716_v47 = vshrl.u32 %v12593_v21, 4  ;;  %3713 = vst [vmem:[#allocation2 + $0x9b] sm:$0xff] %v3677_v25  ;;  %10752 = vrsqrt.f32 %v3572_v50  ;;  %v3848_v54 = vpack.c.bf16 %v3821_v58, %v3820_v23  ;;  %v3749_v4 = vld [vmem:[#allocation2 + $0x88] sm:$0xff]  ;;  %v3748_v48 = vld [vmem:[#allocation2 + $0x80] sm:$0xff]  ;;  %5506 = vmatpush1.bf16.msra.mxu1 %v10617_v17  ;;  %v3491_v25 = vpop.xlane.xlu1 %3490 }
 0x3c6   : > { %v3573_v30 = vadd.f32 1e-08, %v3537_v37  ;;  %v12677_v49 = vpack.c.bf16 %v3963_v44, %v3962_v12  ;;  %vm12680_vm0 = vcmp.lt.s32.totalorder %v1004_v8, 16  ;;  %v14784_v29 = vmov 0  ;;  %v10749_v1 = vpop.eup %10748  ;;  %5507 = vmatprep.subr.bf16.mxu1 %v14713_v36 }
 0x3c7   : > { %v14785_v29 = vsel %vm12680_vm0, 4294967295, %v14784_v29  ;;  %v1006_v20 = vsel %vm12647_vm12, %v970_v56, %v12535_v0  ;;  %v1007_v11 = vsel %vm12662_vm9, %v971_v55, %v12577_v19  ;;  %v727_v21 = vshrl.u32 %v12604_v13, 4  ;;  %5221 = vmatprep.mubr.bf16.mxu0 %v3848_v54  ;;  %vm12703_vm12 = vmand %vm900_vm3, %vm864_vm10  ;;  %v3489_v13 = vpop.xlane.xlu0 %3488 }
 0x3c8   : > { %14786 = vst [vmem:[#allocation29_spill] sm:$0xff] %v14785_v29  ;;  %vm12691_vm5 = vcmp.lt.s32.totalorder %v1005_v5, 16  ;;  %v14787_v7 = vmov 0  ;;  %10754 = vrsqrt.f32 %v3573_v30  ;;  %5390 = vmatprep.mubr.bf16.mxu1 %v12677_v49  ;;  %v972_v18 = vadd.s32 18, %v12600_v60 }
 0x3c9   : > { %v14788_v7 = vsel %vm12691_vm5, 4294967295, %v14787_v7  ;;  %v738_v0 = vshrl.u32 %v12610_v41, 4  ;;  %v3642_v56 = vmul.f32 %v10749_v1, %v11723_v14  ;;  %v3776_v51 = vpack.c.bf16 %v3749_v4, %v3748_v48  ;;  %v10620_v41 = vld [vmem:[%s14587_s3 + $0x170] sm:$0xff]   ;;  %v10751_v14 = vpop.eup %10750  ;;  %5391 = vmatmul.mubr.bf16.gmra.mrb[64].mxu1 %v12595_v53 }
 0x3ca   : > { %14789 = vst [vmem:[#allocation30_spill] sm:$0xff] %v14788_v7  ;;  %v717_v55 = vmul.u32 18, %v716_v47  ;;  %v12708_v9 = vadd.s32 216, %v11790_v26  ;;  %vm12713_vm4 = vcmp.lt.s32.totalorder %v1006_v20, 16  ;;  %v14792_v8 = vmov 0  ;;  %v3964_v54 = vld [vmem:[#allocation2 + $0x92] sm:$0xff]  ;;  %5508 = vmatpush1.bf16.msra.mxu1 %v10620_v41 }
 0x3cb   : > { %v14793_v8 = vsel %vm12713_vm4, 4294967295, %v14792_v8  ;;  %vm12717_vm3 = vcmp.lt.s32.totalorder %v1007_v11, 16  ;;  %v14795_v50 = vmov 0  ;;  %v3538_v59 = vmul.f32 0.125, %v3489_v13  ;;  %5222 = vmatmul.mubr.bf16.gmra.mrb[104].mxu0 %v3776_v51  ;;  %5509 = vmatprep.subr.bf16.mxu1 %v14713_v36  ;;  %v3750_v51 = vld [vmem:[#allocation2 + $0x90] sm:$0xff] }
 0x3cc   : > { %14794 = vst [vmem:[#allocation31_spill] sm:$0xff] %v14793_v8  ;;  %v14796_v50 = vsel %vm12717_vm3, 4294967295, %v14795_v50  ;;  %v12722_v37 = vsub.s32 %v12524_v33, %v706_v3  ;;  %v3678_v23 = vsel %vm12680_vm0, %v3642_v56, 0.0  ;;  %v3643_v17 = vmul.f32 %v10751_v14, %v11728_v46  ;;  %v3822_v3 = vld [vmem:[#allocation2 + $0x91] sm:$0xff]  ;;  %v3823_v30 = vld [vmem:[#allocation2 + $0x99] sm:$0xff] }
 0x3cd   : > { %14797 = vst [vmem:[#allocation32_spill] sm:$0xff] %v14796_v50  ;;  %v728_v5 = vmul.u32 18, %v727_v21  ;;  %v12730_v58 = vadd.s32 224, %v11790_v26  ;;  %3714 = vst [vmem:[#allocation2 + $0xa3] sm:$0xff] %v3678_v23  ;;  %v1008_v33 = vsel %vm12703_vm12, %v972_v18, %v12600_v60  ;;  %v3574_v12 = vadd.f32 1e-08, %v3538_v59  ;;  %v3493_v59 = vpop.xlane.xlu0 %3492 }
 0x3ce   : > { %v3539_v44 = vmul.f32 0.125, %v3491_v25  ;;  %v739_v47 = vmul.u32 18, %v738_v0  ;;  %v10623_v46 = vld [vmem:[%s14587_s3 + $0x178] sm:$0xff]   ;;  %v3679_v53 = vsel %vm12691_vm5, %v3643_v17, 0.0  ;;  %v12741_v20 = vsub.s32 %v12545_v61, %v717_v55  ;;  %v4249_v38 = vld [vmem:[#allocation2 + $0x8d] sm:$0xff] }
 0x3cf   : > { %v3965_v4 = vld [vmem:[#allocation2 + $0x9a] sm:$0xff]  ;;  %v12744_v11 = vmul.u32.u64.low 3817748708, %v12708_v9  ;;  %v12745_v60 = vmul.u32.u64.high 3817748708, %v12708_v9, %v12744_v11  ;;  %3715 = vst [vmem:[#allocation2 + $0xab] sm:$0xff] %v3679_v53  ;;  %10756 = vrsqrt.f32 %v3574_v12  ;;  %v3849_v1 = vpack.c.bf16 %v3823_v30, %v3822_v3  ;;  %v10753_v56 = vpop.eup %10752  ;;  %5510 = vmatpush1.bf16.msra.mxu1 %v10623_v46  ;;  %v3495_v3 = vpop.xlane.xlu1 %3494 }
 0x3d0   : > { %v3575_v21 = vadd.f32 1e-08, %v3539_v44  ;;  %v12747_v18 = vpack.c.bf16 %v3965_v4, %v3964_v54  ;;  %v3751_v48 = vld [vmem:[#allocation2 + $0x98] sm:$0xff]  ;;  %vm865_vm10 = vcmp.ne.s32.totalorder %v12722_v37, 0  ;;  %v12753_v61 = vadd.s32 18, %v12722_v37  ;;  %5656 = vmatprep.subr.bf16.mxu1 %v14713_v36 }
 0x3d1   : > { %v12756_v0 = vadd.s32 232, %v11790_v26  ;;  %vm12758_vm9 = vcmp.lt.s32.totalorder %v1008_v33, 16  ;;  %v14798_v19 = vmov 0  ;;  %5229 = vmatprep.mubr.bf16.mxu0 %v3849_v1  ;;  %v12764_v13 = vsub.s32 %v12568_v35, %v728_v5 }
 0x3d2   : > { %v14799_v19 = vsel %vm12758_vm9, 4294967295, %v14798_v19  ;;  %10758 = vrsqrt.f32 %v3575_v21  ;;  %5398 = vmatprep.mubr.bf16.mxu1 %v12747_v18  ;;  %v12767_v55 = vmul.u32.u64.low 3817748708, %v12730_v58  ;;  %v12768_v41 = vmul.u32.u64.high 3817748708, %v12730_v58, %v12767_v55  ;;  %v10755_v17 = vpop.eup %10754 }
 0x3d3   : > { %14800 = vst [vmem:[#allocation33_spill] sm:$0xff] %v14799_v19  ;;  %v3644_v14 = vmul.f32 %v10753_v56, %v11735_v39  ;;  %vm866_vm12 = vcmp.ne.s32.totalorder %v12741_v20, 0  ;;  %vm902_vm13 = vcmp.lt.s32.totalorder %v12741_v20, 0  ;;  %v3777_v23 = vpack.c.bf16 %v3751_v48, %v3750_v51  ;;  %5399 = vmatmul.mubr.bf16.gmra.mrb[68].mxu1 %v12677_v49 }
 0x3d4   : > { %vm14801_vm5 = vcmp.lt.s32.totalorder %v12722_v37, 0  ;;  %v12782_v25 = vadd.s32 18, %v12741_v20  ;;  %v3540_v39 = vmul.f32 0.125, %v3493_v59  ;;  %v12785_v5 = vsub.s32 %v12580_v34, %v739_v47  ;;  %v3824_v30 = vld [vmem:[#allocation2 + $0xa1] sm:$0xff] }
 0x3d5   : > { %vm12777_vm0 = vmand %vm14801_vm5, %vm865_vm10  ;;  %v12788_v33 = vadd.s32 240, %v11790_v26  ;;  %v3680_v12 = vsel %vm12713_vm4, %v3644_v14, 0.0  ;;  %v3645_v44 = vmul.f32 %v10755_v17, %v11737_v22  ;;  %5230 = vmatmul.mubr.bf16.gmra.mrb[108].mxu0 %v3777_v23  ;;  %v3541_v47 = vmul.f32 0.125, %v3495_v3  ;;  %v3966_v11 = vld [vmem:[#allocation2 + $0xa2] sm:$0xff]  ;;  %v3497_v3 = vpop.xlane.xlu0 %3496 }
 0x3d6   : > { %v12796_v46 = vmul.u32.u64.low 3817748708, %v12756_v0  ;;  %v12797_v53 = vmul.u32.u64.high 3817748708, %v12756_v0, %v12796_v46  ;;  %3716 = vst [vmem:[#allocation2 + $0xb3] sm:$0xff] %v3680_v12  ;;  %v3576_v34 = vadd.f32 1e-08, %v3540_v39  ;;  %v12801_v54 = vadd.s32 248, %v11790_v26  ;;  %vm12817_vm5 = vmand %vm902_vm13, %vm866_vm12 }
 0x3d7   : > { %v3681_v22 = vsel %vm12717_vm3, %v3645_v44, 0.0  ;;  %v1009_v49 = vsel %vm12777_vm0, %v12753_v61, %v12722_v37  ;;  %v3825_v4 = vld [vmem:[#allocation2 + $0xa9] sm:$0xff]  ;;  %v749_v1 = vshrl.u32 %v12745_v60, 4  ;;  %v3577_v48 = vadd.f32 1e-08, %v3541_v47  ;;  %v3752_v17 = vld [vmem:[#allocation2 + $0xa0] sm:$0xff] }
 0x3d8   : > { %v3967_v21 = vld [vmem:[#allocation2 + $0xaa] sm:$0xff]  ;;  %3717 = vst [vmem:[#allocation2 + $0xbb] sm:$0xff] %v3681_v22  ;;  %10760 = vrsqrt.f32 %v3576_v34  ;;  %v3850_v56 = vpack.c.bf16 %v3825_v4, %v3824_v30  ;;  %v975_v61 = vadd.s32 18, %v12764_v13  ;;  %vm868_vm0 = vcmp.ne.s32.totalorder %v12785_v5, 0  ;;  %v4251_v31 = vld [vmem:[#allocation2 + $0x9d] sm:$0xff] }
 0x3d9   : > { %v12811_v51 = vpack.c.bf16 %v3967_v21, %v3966_v11  ;;  %v3753_v55 = vld [vmem:[#allocation2 + $0xa8] sm:$0xff]  ;;  %v12824_v60 = vmul.u32.u64.low 3817748708, %v12788_v33  ;;  %v12825_v14 = vmul.u32.u64.high 3817748708, %v12788_v33, %v12824_v60  ;;  %v10757_v59 = vpop.eup %10756  ;;  %vm14806_vm10 = vcmp.ne.s32.totalorder %v12764_v13, 0  ;;  %v3499_v21 = vpop.xlane.xlu1 %3498 }
 0x3da   : > { %vm14807_vm3 = vcmp.lt.s32.totalorder %v12764_v13, 0  ;;  %10762 = vrsqrt.f32 %v3577_v48  ;;  %5237 = vmatprep.mubr.bf16.mxu0 %v3850_v56  ;;  %v760_v35 = vshrl.u32 %v12768_v41, 4  ;;  %v3646_v44 = vmul.f32 %v10757_v59, %v11747_v63 }
 0x3db   : > { %vm12831_vm4 = vmand %vm14807_vm3, %vm14806_vm10  ;;  %5406 = vmatprep.mubr.bf16.mxu1 %v12811_v51  ;;  %v12838_v39 = vmul.u32.u64.low 3817748708, %v12801_v54  ;;  %v12839_v12 = vmul.u32.u64.high 3817748708, %v12801_v54, %v12838_v39  ;;  %vm904_vm13 = vcmp.lt.s32.totalorder %v12785_v5, 0  ;;  %v750_v46 = vmul.u32 18, %v749_v1 }
 0x3dc   : > { %v3778_v34 = vpack.c.bf16 %v3753_v55, %v3752_v17  ;;  %v10759_v47 = vpop.eup %10758  ;;  %vm12843_vm3 = vcmp.lt.s32.totalorder %v1009_v49, 16  ;;  %v14810_v30 = vmov 0  ;;  %v1010_v41 = vsel %vm12817_vm5, %v12782_v25, %v12741_v20  ;;  %5407 = vmatmul.mubr.bf16.gmra.mrb[72].mxu1 %v12747_v18  ;;  %vm12865_vm12 = vmand %vm904_vm13, %vm868_vm0 }
 0x3dd   : > { %v14811_v30 = vsel %vm12843_vm3, 4294967295, %v14810_v30  ;;  %v3542_v22 = vmul.f32 0.125, %v3497_v3  ;;  %v3682_v4 = vsel %vm12758_vm9, %v3646_v44, 0.0  ;;  %v3647_v63 = vmul.f32 %v10759_v47, %v11752_v45  ;;  %v3826_v1 = vld [vmem:[#allocation2 + $0xb1] sm:$0xff] }
 0x3de   : > { %14812 = vst [vmem:[#allocation34_spill] sm:$0xff] %v14811_v30  ;;  %v1011_v11 = vsel %vm12831_vm4, %v975_v61, %v12764_v13  ;;  %v12858_v49 = vadd.s32 18, %v12785_v5  ;;  %5238 = vmatmul.mubr.bf16.gmra.mrb[112].mxu0 %v3778_v34  ;;  %3718 = vst [vmem:[#allocation2 + $0xc3] sm:$0xff] %v3682_v4  ;;  %v3543_v25 = vmul.f32 0.125, %v3499_v21  ;;  %v761_v13 = vmul.u32 18, %v760_v35  ;;  %v3968_v61 = vld [vmem:[#allocation2 + $0xb2] sm:$0xff] }
 0x3df   : > { %v3578_v45 = vadd.f32 1e-08, %v3542_v22  ;;  %v771_v48 = vshrl.u32 %v12797_v53, 4  ;;  %v3683_v56 = vsel %vm12843_vm3, %v3647_v63, 0.0  ;;  %vm12872_vm4 = vcmp.lt.s32.totalorder %v1010_v41, 16  ;;  %v3827_v37 = vld [vmem:[#allocation2 + $0xb9] sm:$0xff]  ;;  %v3501_v63 = vpop.xlane.xlu0 %3500 }
 0x3e0   : > { %v14815_v18 = vmov 0  ;;  %v12877_v55 = vsub.s32 %v12708_v9, %v750_v46  ;;  %v3969_v60 = vld [vmem:[#allocation2 + $0xba] sm:$0xff]  ;;  %v12880_v59 = vadd.s32 256, %v11790_v26  ;;  %3719 = vst [vmem:[#allocation2 + $0xcb] sm:$0xff] %v3683_v56  ;;  %v3579_v23 = vadd.f32 1e-08, %v3543_v25 }
 0x3e1   : > { %v14816_v18 = vsel %vm12872_vm4, 4294967295, %v14815_v18  ;;  %10764 = vrsqrt.f32 %v3578_v45  ;;  %v3851_v53 = vpack.c.bf16 %v3827_v37, %v3826_v1  ;;  %v12882_v17 = vpack.c.bf16 %v3969_v60, %v3968_v61  ;;  %v3755_v35 = vld [vmem:[#allocation2 + $0xb8] sm:$0xff]  ;;  %v12896_v46 = vpop.f32.mrb[72].mxu0  ;;  %v3754_v22 = vld [vmem:[#allocation2 + $0xb0] sm:$0xff] }
 0x3e2   : > { %14817 = vst [vmem:[#allocation35_spill] sm:$0xff] %v14816_v18  ;;  %vm12884_vm5 = vcmp.lt.s32.totalorder %v1011_v11, 16  ;;  %v14818_v39 = vmov 0  ;;  %v1012_v9 = vsel %vm12865_vm12, %v12858_v49, %v12785_v5  ;;  %v782_v44 = vshrl.u32 %v12825_v14, 4  ;;  %v10761_v34 = vpop.eup %10760  ;;  %v5161_v5 = vpop.f32.mrb[73].mxu0  ;;  %v4253_v15 = vld [vmem:[#allocation2 + $0xad] sm:$0xff] }
 0x3e3   : > { %v14819_v39 = vsel %vm12884_vm5, 4294967295, %v14818_v39  ;;  %v12894_v3 = vadd.s32 264, %v11790_v26  ;;  %10766 = vrsqrt.f32 %v3579_v23  ;;  %5245 = vmatprep.mubr.bf16.mxu0 %v3851_v53  ;;  %5414 = vmatprep.mubr.bf16.mxu1 %v12882_v17  ;;  %v12900_v47 = vsub.s32 %v12730_v58, %v761_v13 }
 0x3e4   : > { %14820 = vst [vmem:[#allocation36_spill] sm:$0xff] %v14819_v39  ;;  %v772_v41 = vmul.u32 18, %v771_v48  ;;  %v793_v4 = vshrl.u32 %v12839_v12, 4  ;;  %v3648_v14 = vmul.f32 %v10761_v34, %v11759_v28  ;;  %vm869_vm10 = vcmp.ne.s32.totalorder %v12877_v55, 0  ;;  %v10763_v49 = vpop.eup %10762  ;;  %v3503_v28 = vpop.xlane.xlu1 %3502  ;;  %5415 = vmatmul.mubr.bf16.gmra.mrb[76].mxu1 %v12811_v51 }
 0x3e5   : > { %vm905_vm0 = vcmp.lt.s32.totalorder %v12877_v55, 0  ;;  %v3779_v11 = vpack.c.bf16 %v3755_v35, %v3754_v22  ;;  %v977_v21 = vadd.s32 18, %v12877_v55  ;;  %v3544_v20 = vmul.f32 0.125, %v3501_v63  ;;  %v12919_v48 = vpop.f32.mrb[74].mxu0  ;;  %v3828_v61 = vld [vmem:[#allocation2 + $0xc1] sm:$0xff] }
 0x3e6   : > { %v12908_v58 = vmul.u32.u64.low 3817748708, %v12880_v59  ;;  %v12909_v45 = vmul.u32.u64.high 3817748708, %v12880_v59, %v12908_v58  ;;  %v3684_v12 = vsel %vm12872_vm4, %v3648_v14, 0.0  ;;  %v3649_v25 = vmul.f32 %v10763_v49, %v11761_v62  ;;  %vm12925_vm13 = vmand %vm905_vm0, %vm869_vm10  ;;  %v5164_v23 = vpop.f32.mrb[75].mxu0  ;;  %v3970_v34 = vld [vmem:[#allocation2 + $0xc2] sm:$0xff] }
 0x3e7   : > { %5246 = vmatmul.mubr.bf16.gmra.mrb[116].mxu0 %v3779_v11  ;;  %v12916_v1 = vmul.u32.u64.low 3817748708, %v12894_v3  ;;  %v12917_v13 = vmul.u32.u64.high 3817748708, %v12894_v3, %v12916_v1  ;;  %3720 = vst [vmem:[#allocation2 + $0xd3] sm:$0xff] %v3684_v12  ;;  %v3580_v62 = vadd.f32 1e-08, %v3544_v20  ;;  %v12930_v37 = vsub.s32 %v12756_v0, %v772_v41  ;;  %v3829_v35 = vld [vmem:[#allocation2 + $0xc9] sm:$0xff] }
 0x3e8   : > { %v3545_v51 = vmul.f32 0.125, %v3503_v28  ;;  %v783_v60 = vmul.u32 18, %v782_v44  ;;  %v3685_v53 = vsel %vm12884_vm5, %v3649_v25, 0.0  ;;  %vm870_vm12 = vcmp.ne.s32.totalorder %v12900_v47, 0  ;;  %v3971_v22 = vld [vmem:[#allocation2 + $0xca] sm:$0xff] }
 0x3e9   : > { %3721 = vst [vmem:[#allocation2 + $0xdb] sm:$0xff] %v3685_v53  ;;  %10768 = vrsqrt.f32 %v3580_v62  ;;  %v3852_v14 = vpack.c.bf16 %v3829_v35, %v3828_v61  ;;  %v12936_v0 = vpack.c.bf16 %v3971_v22, %v3970_v34  ;;  %v3757_v41 = vld [vmem:[#allocation2 + $0xc8] sm:$0xff]  ;;  %vm12938_vm10 = vcmp.lt.s32.totalorder %v1012_v9, 16  ;;  %v3756_v9 = vld [vmem:[#allocation2 + $0xc0] sm:$0xff]  ;;  %v3507_v53 = vpop.xlane.xlu1 %3506 }
 0x3ea   : > { %v3581_v5 = vadd.f32 1e-08, %v3545_v51  ;;  %v14823_v44 = vmov 0  ;;  %v1013_v63 = vsel %vm12925_vm13, %v977_v21, %v12877_v55  ;;  %v978_v11 = vadd.s32 18, %v12900_v47  ;;  %v3505_v21 = vpop.xlane.xlu0 %3504  ;;  %v4256_v16 = vld [vmem:[#allocation2 + $0xc5] sm:$0xff] }
 0x3eb   : > { %v14824_v44 = vsel %vm12938_vm10, 4294967295, %v14823_v44  ;;  %v12947_v49 = vadd.s32 272, %v11790_v26  ;;  %v10765_v20 = vpop.eup %10764  ;;  %vm871_vm0 = vcmp.ne.s32.totalorder %v12930_v37, 0  ;;  %v979_v58 = vadd.s32 18, %v12930_v37  ;;  %5253 = vmatprep.mubr.bf16.mxu0 %v3852_v14  ;;  %5422 = vmatprep.mubr.bf16.mxu1 %v12936_v0 }
 0x3ec   : > { %14825 = vst [vmem:[#allocation37_spill] sm:$0xff] %v14824_v44  ;;  %10770 = vrsqrt.f32 %v3581_v5  ;;  %v3650_v12 = vmul.f32 %v10765_v20, %v11771_v52  ;;  %vm14826_vm13 = vcmp.lt.s32.totalorder %v12900_v47, 0  ;;  %v794_v25 = vmul.u32 18, %v793_v4  ;;  %5423 = vmatmul.mubr.bf16.gmra.mrb[80].mxu1 %v12882_v17 }
 0x3ed   : > { %vm12958_vm5 = vmand %vm14826_vm13, %vm870_vm12  ;;  %v3780_v28 = vpack.c.bf16 %v3757_v41, %v3756_v9  ;;  %v12963_v1 = vadd.s32 280, %v11790_v26  ;;  %v10767_v56 = vpop.eup %10766  ;;  %vm12965_vm4 = vcmp.lt.s32.totalorder %v1013_v63, 16  ;;  %v14829_v62 = vmov 0 }
 0x3ee   : > { %v14830_v62 = vsel %vm12965_vm4, 4294967295, %v14829_v62  ;;  %v12970_v52 = vsub.s32 %v12788_v33, %v783_v60  ;;  %v3546_v51 = vmul.f32 0.125, %v3505_v21  ;;  %v804_v61 = vshrl.u32 %v12909_v45, 4  ;;  %v3830_v17 = vld [vmem:[#allocation2 + $0xd1] sm:$0xff] }
 0x3ef   : > { %14831 = vst [vmem:[#allocation38_spill] sm:$0xff] %v14830_v62  ;;  %v3686_v23 = vsel %vm12938_vm10, %v3650_v12, 0.0  ;;  %v3651_v4 = vmul.f32 %v10767_v56, %v11776_v43  ;;  %5254 = vmatmul.mubr.bf16.gmra.mrb[120].mxu0 %v3780_v28  ;;  %v12978_v26 = vmul.u32.u64.low 3817748708, %v12947_v49  ;;  %v12979_v35 = vmul.u32.u64.high 3817748708, %v12947_v49, %v12978_v26  ;;  %v3972_v14 = vld [vmem:[#allocation2 + $0xd2] sm:$0xff] }
 0x3f0   : > { %3722 = vst [vmem:[#allocation2 + $0xe3] sm:$0xff] %v3686_v23  ;;  %v1014_v33 = vsel %vm12958_vm5, %v978_v11, %v12900_v47  ;;  %vm14832_vm12 = vcmp.lt.s32.totalorder %v12930_v37, 0  ;;  %v3582_v43 = vadd.f32 1e-08, %v3546_v51  ;;  %v3547_v60 = vmul.f32 0.125, %v3507_v53  ;;  %v3831_v47 = vld [vmem:[#allocation2 + $0xd9] sm:$0xff] }
 0x3f1   : > { %vm12988_vm13 = vmand %vm14832_vm12, %vm871_vm0  ;;  %v815_v34 = vshrl.u32 %v12917_v13, 4  ;;  %v3687_v22 = vsel %vm12965_vm4, %v3651_v4, 0.0  ;;  %v12996_v5 = vsub.s32 %v12801_v54, %v794_v25  ;;  %v3973_v41 = vld [vmem:[#allocation2 + $0xda] sm:$0xff]  ;;  %v3853_v9 = vpack.c.bf16 %v3831_v47, %v3830_v17  ;;  %v3758_v51 = vld [vmem:[#allocation2 + $0xd0] sm:$0xff]  ;;  %v3511_v17 = vpop.xlane.xlu1 %3510 }
 0x3f2   : > { %v12999_v63 = vmul.u32.u64.low 3817748708, %v12963_v1  ;;  %v13000_v11 = vmul.u32.u64.high 3817748708, %v12963_v1, %v12999_v63  ;;  %3723 = vst [vmem:[#allocation2 + $0xeb] sm:$0xff] %v3687_v22  ;;  %10772 = vrsqrt.f32 %v3582_v43  ;;  %v3583_v20 = vadd.f32 1e-08, %v3547_v60  ;;  %v3759_v13 = vld [vmem:[#allocation2 + $0xd8] sm:$0xff] }
 0x3f3   : > { %v13002_v12 = vpack.c.bf16 %v3973_v41, %v3972_v14  ;;  %v1015_v55 = vsel %vm12988_vm13, %v979_v58, %v12930_v37  ;;  %v805_v54 = vmul.u32 18, %v804_v61  ;;  %v10769_v21 = vpop.eup %10768  ;;  %vm13009_vm12 = vcmp.lt.s32.totalorder %v1014_v33, 16  ;;  %5261 = vmatprep.mubr.bf16.mxu0 %v3853_v9  ;;  %v3509_v58 = vpop.xlane.xlu0 %3508  ;;  %v14845_v45 = vld [vmem:[#allocation4_spill] sm:$0xff] }
 0x3f4   : > { %v14835_v25 = vmov 0  ;;  %v980_v28 = vadd.s32 18, %v12970_v52  ;;  %10774 = vrsqrt.f32 %v3583_v20  ;;  %v816_v56 = vmul.u32 18, %v815_v34  ;;  %v4258_v42 = vld [vmem:[#allocation2 + $0xd5] sm:$0xff] }
 0x3f5   : > { %v14836_v25 = vsel %vm13009_vm12, 4294967295, %v14835_v25  ;;  %5430 = vmatprep.mubr.bf16.mxu1 %v13002_v12  ;;  %v3652_v37 = vmul.f32 %v10769_v21, %v11783_v27  ;;  %vm873_vm13 = vcmp.ne.s32.totalorder %v12996_v5, 0  ;;  %vm909_vm0 = vcmp.lt.s32.totalorder %v12996_v5, 0 }
 0x3f6   : > { %14837 = vst [vmem:[#allocation39_spill] sm:$0xff] %v14836_v25  ;;  %v3781_v61 = vpack.c.bf16 %v3759_v13, %v3758_v51  ;;  %v10771_v23 = vpop.eup %10770  ;;  %vm13018_vm5 = vcmp.lt.s32.totalorder %v1015_v55, 16  ;;  %v14838_v4 = vmov 0  ;;  %vm14841_vm4 = vcmp.ne.s32.totalorder %v12970_v52, 0  ;;  %5431 = vmatmul.mubr.bf16.gmra.mrb[84].mxu1 %v12936_v0 }
 0x3f7   : > { %v14839_v4 = vsel %vm13018_vm5, 4294967295, %v14838_v4  ;;  %vm14842_vm10 = vcmp.lt.s32.totalorder %v12970_v52, 0  ;;  %v981_v27 = vadd.s32 18, %v12996_v5  ;;  %v3548_v26 = vmul.f32 0.125, %v3509_v58  ;;  %v3832_v41 = vld [vmem:[#allocation2 + $0xe1] sm:$0xff] }
 0x3f8   : > { %14840 = vst [vmem:[#allocation40_spill] sm:$0xff] %v14839_v4  ;;  %vm13026_vm3 = vmand %vm14842_vm10, %vm14841_vm4  ;;  %v3688_v33 = vsel %vm13009_vm12, %v3652_v37, 0.0  ;;  %v3653_v43 = vmul.f32 %v10771_v23, %v14845_v45  ;;  %v13035_v60 = vsub.s32 %v12880_v59, %v805_v54  ;;  %5262 = vmatmul.mubr.bf16.gmra.mrb[124].mxu0 %v3781_v61  ;;  %v826_v34 = vshrl.u32 %v12979_v35, 4  ;;  %v3974_v20 = vld [vmem:[#allocation2 + $0xe2] sm:$0xff]  ;;  %v3513_v61 = vpop.xlane.xlu0 %3512 }
 0x3f9   : > { %3724 = vst [vmem:[#allocation2 + $0xf3] sm:$0xff] %v3688_v33  ;;  %vm13043_vm4 = vmand %vm909_vm0, %vm873_vm13  ;;  %v3584_v47 = vadd.f32 1e-08, %v3548_v26  ;;  %v13048_v14 = vsub.s32 %v12894_v3, %v816_v56  ;;  %v3549_v59 = vmul.f32 0.125, %v3511_v17  ;;  %v1016_v35 = vsel %vm13026_vm3, %v980_v28, %v12970_v52  ;;  %v3833_v63 = vld [vmem:[#allocation2 + $0xe9] sm:$0xff]  ;;  %v3760_v37 = vld [vmem:[#allocation2 + $0xe0] sm:$0xff] }
 0x3fa   : > { %v3689_v0 = vsel %vm13018_vm5, %v3653_v43, 0.0  ;;  %v3975_v9 = vld [vmem:[#allocation2 + $0xea] sm:$0xff]  ;;  %v837_v13 = vshrl.u32 %v13000_v11, 4  ;;  %v3854_v54 = vpack.c.bf16 %v3833_v63, %v3832_v41  ;;  %v1017_v56 = vsel %vm13043_vm4, %v981_v27, %v12996_v5  ;;  %v14851_v5 = vld [vmem:[#allocation5_spill] sm:$0xff]  ;;  %v14871_v33 = vld [vmem:[#allocation8_spill] sm:$0xff] }
 0x3fb   : > { %3725 = vst [vmem:[#allocation2 + $0xfb] sm:$0xff] %v3689_v0  ;;  %10776 = vrsqrt.f32 %v3584_v47  ;;  %v3585_v55 = vadd.f32 1e-08, %v3549_v59  ;;  %v13056_v3 = vpack.c.bf16 %v3975_v9, %v3974_v20  ;;  %v3761_v21 = vld [vmem:[#allocation2 + $0xe8] sm:$0xff]  ;;  %vm874_vm10 = vcmp.ne.s32.totalorder %v13035_v60, 0  ;;  %v3515_v59 = vpop.xlane.xlu1 %3514 }
 0x3fc   : > { %v827_v52 = vmul.u32 18, %v826_v34  ;;  %v10773_v28 = vpop.eup %10772  ;;  %vm13063_vm0 = vcmp.lt.s32.totalorder %v1016_v35, 16  ;;  %v14848_v51 = vmov 0  ;;  %v982_v11 = vadd.s32 18, %v13035_v60  ;;  %5269 = vmatprep.mubr.bf16.mxu0 %v3854_v54  ;;  %v14858_v17 = vld [vmem:[#allocation6_spill] sm:$0xff] }
 0x3fd   : > { %v14849_v51 = vsel %vm13063_vm0, 4294967295, %v14848_v51  ;;  %10778 = vrsqrt.f32 %v3585_v55  ;;  %5438 = vmatprep.mubr.bf16.mxu1 %v13056_v3  ;;  %v3654_v58 = vmul.f32 %v10773_v28, %v14851_v5  ;;  %vm911_vm4 = vcmp.lt.s32.totalorder %v13048_v14, 0  ;;  %v14865_v5 = vld [vmem:[#allocation7_spill] sm:$0xff] }
 0x3fe   : > { %14850 = vst [vmem:[#allocation4_spill] sm:$0xff] %v14849_v51  ;;  %v838_v23 = vmul.u32 18, %v837_v13  ;;  %v3782_v53 = vpack.c.bf16 %v3761_v21, %v3760_v37  ;;  %v10775_v27 = vpop.eup %10774  ;;  %vm13072_vm3 = vcmp.lt.s32.totalorder %v1017_v56, 16  ;;  %v14852_v26 = vmov 0  ;;  %5439 = vmatmul.mubr.bf16.gmra.mrb[88].mxu1 %v13002_v12  ;;  %v4118_v51 = vld [vmem:[#allocation2 + $0xe4] sm:$0xff] }
 0x3ff   : > { %v14853_v26 = vsel %vm13072_vm3, 4294967295, %v14852_v26  ;;  %vm14855_vm13 = vcmp.lt.s32.totalorder %v13035_v60, 0  ;;  %v3550_v45 = vmul.f32 0.125, %v3513_v61  ;;  %v3690_v43 = vsel %vm13063_vm0, %v3654_v58, 0.0 }
 0x400   : > { %14854 = vst [vmem:[#allocation5_spill] sm:$0xff] %v14853_v26  ;;  %vm13080_vm5 = vmand %vm14855_vm13, %vm874_vm10  ;;  %v3655_v34 = vmul.f32 %v10775_v27, %v14858_v17  ;;  %v983_v22 = vadd.s32 18, %v13048_v14  ;;  %v828_v47 = vsub.s32 %v12947_v49, %v827_v52  ;;  %5270 = vmatmul.mubr.bf16.gmra.mrb[128].mxu0 %v3782_v53  ;;  %vm14859_vm10 = vcmp.ne.s32.totalorder %v13048_v14, 0  ;;  %v3834_v63 = vld [vmem:[#allocation2 + $0xf1] sm:$0xff] }
 0x401   : > { %3726 = vst [vmem:[#allocation2 + $0x103] sm:$0xff] %v3690_v43  ;;  %vm13094_vm13 = vmand %vm911_vm4, %vm14859_vm10  ;;  %v3586_v0 = vadd.f32 1e-08, %v3550_v45  ;;  %v3551_v35 = vmul.f32 0.125, %v3515_v59  ;;  %v1018_v49 = vsel %vm13080_vm5, %v982_v11, %v13035_v60  ;;  %v839_v12 = vsub.s32 %v12963_v1, %v838_v23  ;;  %v3976_v13 = vld [vmem:[#allocation2 + $0xf2] sm:$0xff] }
 0x402   : > { %v3691_v20 = vsel %vm13072_vm3, %v3655_v34, 0.0  ;;  %v3835_v9 = vld [vmem:[#allocation2 + $0xf9] sm:$0xff]  ;;  %v1019_v28 = vsel %vm13094_vm13, %v983_v22, %v13048_v14  ;;  %vm876_vm4 = vcmp.ne.s32.totalorder %v828_v47, 0  ;;  %vm912_vm10 = vcmp.lt.s32.totalorder %v828_v47, 0  ;;  %v3762_v11 = vld [vmem:[#allocation2 + $0xf0] sm:$0xff] }
 0x403   : > { %v3977_v55 = vld [vmem:[#allocation2 + $0xfa] sm:$0xff]  ;;  %3727 = vst [vmem:[#allocation2 + $0x10b] sm:$0xff] %v3691_v20  ;;  %10780 = vrsqrt.f32 %v3586_v0  ;;  %v3587_v54 = vadd.f32 1e-08, %v3551_v35  ;;  %v3855_v21 = vpack.c.bf16 %v3835_v9, %v3834_v63  ;;  %vm13107_vm3 = vcmp.lt.s32.totalorder %v1018_v49, 16  ;;  %vm13117_vm13 = vmand %vm912_vm10, %vm876_vm4 }
 0x404   : > { %v3998_v56 = vpack.c.bf16 %v3977_v55, %v3976_v13  ;;  %v3763_v52 = vld [vmem:[#allocation2 + $0xf8] sm:$0xff]  ;;  %v14862_v60 = vmov 0  ;;  %v984_v1 = vadd.s32 18, %v828_v47  ;;  %vm877_vm5 = vcmp.ne.s32.totalorder %v839_v12, 0 }
 0x405   : > { %v10777_v37 = vpop.eup %10776  ;;  %v14863_v60 = vsel %vm13107_vm3, 4294967295, %v14862_v60  ;;  %10782 = vrsqrt.f32 %v3587_v54  ;;  %5277 = vmatprep.mubr.bf16.mxu0 %v3855_v21  ;;  %vm913_vm0 = vcmp.lt.s32.totalorder %v839_v12, 0  ;;  %v3783_v61 = vpack.c.bf16 %v3763_v52, %v3762_v11  ;;  %v14877_v54 = vld [vmem:[#allocation9_spill] sm:$0xff]  ;;  %v4120_v62 = vld [vmem:[#allocation2 + $0xf4] sm:$0xff] }
 0x406   : > { %14864 = vst [vmem:[#allocation6_spill] sm:$0xff] %v14863_v60  ;;  %5446 = vmatprep.mubr.bf16.mxu1 %v3998_v56  ;;  %v3656_v58 = vmul.f32 %v10777_v37, %v14865_v5  ;;  %vm13112_vm12 = vcmp.lt.s32.totalorder %v1019_v28, 16  ;;  %v14866_v14 = vmov 0  ;;  %v985_v43 = vadd.s32 18, %v839_v12  ;;  %vm13125_vm9 = vmand %vm913_vm0, %vm877_vm5  ;;  %v14881_v37 = vld [vmem:[#allocation10_spill] sm:$0xff] }
 0x407   : > { %v10779_v23 = vpop.eup %10778  ;;  %v14867_v14 = vsel %vm13112_vm12, 4294967295, %v14866_v14  ;;  %5447 = vmatmul.mubr.bf16.gmra.mrb[92].mxu1 %v13056_v3  ;;  %v1020_v59 = vsel %vm13117_vm13, %v984_v1, %v828_v47  ;;  %v14874_v13 = vmov 0  ;;  %v14878_v28 = vmov 0 }
 0x408   : > { %14868 = vst [vmem:[#allocation7_spill] sm:$0xff] %v14867_v14  ;;  %v3692_v27 = vsel %vm13107_vm3, %v3656_v58, 0.0  ;;  %v3657_v45 = vmul.f32 %v10779_v23, %v14871_v33  ;;  %5278 = vmatmul.mubr.bf16.gmra.mrb[132].mxu0 %v3783_v61  ;;  %v3836_v34 = vld [vmem:[#allocation2 + $0x101] sm:$0xff]  ;;  %v1021_v3 = vsel %vm13125_vm9, %v985_v43, %v839_v12  ;;  %vm13135_vm0 = vcmp.lt.s32.totalorder %v1020_v59, 16  ;;  %v4116_v14 = vld [vmem:[#allocation2 + $0xd4] sm:$0xff] }
 0x409   : > { %3728 = vst [vmem:[#allocation2 + $0x113] sm:$0xff] %v3692_v27  ;;  %v3978_v0 = vld [vmem:[#allocation2 + $0x102] sm:$0xff]  ;;  %v14875_v13 = vsel %vm13135_vm0, 4294967295, %v14874_v13  ;;  %vm13142_vm4 = vcmp.lt.s32.totalorder %v1021_v3, 16 }
 0x40a   : > { %v3693_v22 = vsel %vm13112_vm12, %v3657_v45, 0.0  ;;  %v3837_v41 = vld [vmem:[#allocation2 + $0x109] sm:$0xff]  ;;  %14876 = vst [vmem:[#allocation8_spill] sm:$0xff] %v14875_v13  ;;  %v3764_v55 = vld [vmem:[#allocation2 + $0x100] sm:$0xff]  ;;  %v14879_v28 = vsel %vm13142_vm4, 4294967295, %v14878_v28  ;;  %vm10945_vm9 = vmpackc.low %vm13142_vm4, %vm13135_vm0 }
 0x40b   : > { %v3979_v35 = vld [vmem:[#allocation2 + $0x10a] sm:$0xff]  ;;  %3729 = vst [vmem:[#allocation2 + $0x11b] sm:$0xff] %v3693_v22  ;;  %v3856_v63 = vpack.c.bf16 %v3837_v41, %v3836_v34  ;;  %14880 = vst [vmem:[#allocation9_spill] sm:$0xff] %v14879_v28 }
 0x40c   : > { %v3999_v20 = vpack.c.bf16 %v3979_v35, %v3978_v0  ;;  %v3765_v49 = vld [vmem:[#allocation2 + $0x108] sm:$0xff]  ;;  %v4311_v0 = vld [vmem:[#allocation2 + $0x3e] sm:$0xff] }
 0x40d   : > { %v10781_v9 = vpop.eup %10780  ;;  %5285 = vmatprep.mubr.bf16.mxu0 %v3856_v63  ;;  %v3784_v21 = vpack.c.bf16 %v3765_v49, %v3764_v55  ;;  %v4309_v45 = vld [vmem:[#allocation2 + $0x2e] sm:$0xff]  ;;  %v4308_v34 = vld [vmem:[#allocation2 + $0x26] sm:$0xff]  ;;  %v4093_v35 = vld [vmem:[#allocation2 + $0x1c] sm:$0xff] }
 0x40e   : > { %5454 = vmatprep.mubr.bf16.mxu1 %v3999_v20  ;;  %v13140_v47 = vmul.f32 %v10781_v9, %v14877_v54  ;;  %v4313_v63 = vld [vmem:[#allocation2 + $0x4e] sm:$0xff]  ;;  %v4310_v49 = vld [vmem:[#allocation2 + $0x36] sm:$0xff]  ;;  %v4312_v55 = vld [vmem:[#allocation2 + $0x46] sm:$0xff] }
 0x40f   : > { %v10783_v52 = vpop.eup %10782  ;;  %5455 = vmatmul.mubr.bf16.gmra.mrb[96].mxu1 %v3998_v56  ;;  %v4344_v56 = vpack.c.bf16 %v4309_v45, %v4308_v34  ;;  %v4345_v3 = vpack.c.bf16 %v4311_v0, %v4310_v49  ;;  %v4092_v9 = vld [vmem:[#allocation2 + $0x14] sm:$0xff]  ;;  %v4316_v45 = vld [vmem:[#allocation2 + $0x66] sm:$0xff]  ;;  %v4319_v34 = vld [vmem:[#allocation2 + $0x7e] sm:$0xff] }
 0x410   : > { %v3694_v12 = vsel %vm13135_vm0, %v13140_v47, 0.0  ;;  %v13150_v1 = vmul.f32 %v10783_v52, %v14881_v37  ;;  %5286 = vmatmul.mubr.bf16.gmra.mrb[136].mxu0 %v3784_v21  ;;  %v3838_v11 = vld [vmem:[#allocation2 + $0x111] sm:$0xff]  ;;  %v4128_v54 = vpack.c.bf16 %v4093_v35, %v4092_v9  ;;  %v4346_v21 = vpack.c.bf16 %v4313_v63, %v4312_v55  ;;  %v4021_v52 = vld [vmem:[#allocation2 + $0x1b] sm:$0xff]  ;;  %v4320_v49 = vld [vmem:[#allocation2 + $0x86] sm:$0xff] }
 0x411   : > { %3730 = vst [vmem:[#allocation2 + $0x123] sm:$0xff] %v3694_v12  ;;  %v3980_v61 = vld [vmem:[#allocation2 + $0x112] sm:$0xff]  ;;  %v4122_v18 = vld [vmem:[#allocation2 + $0x104] sm:$0xff] }
 0x412   : > { %v3695_v5 = vsel %vm13142_vm4, %v13150_v1, 0.0  ;;  %v3839_v58 = vld [vmem:[#allocation2 + $0x119] sm:$0xff]  ;;  %v3766_v43 = vld [vmem:[#allocation2 + $0x110] sm:$0xff] }
 0x413   : > { %v3981_v23 = vld [vmem:[#allocation2 + $0x11a] sm:$0xff]  ;;  %3731 = vst [vmem:[#allocation2 + $0x12b] sm:$0xff] %v3695_v5  ;;  %v3857_v53 = vpack.c.bf16 %v3839_v58, %v3838_v11  ;;  %v4095_v37 = vld [vmem:[#allocation2 + $0x2c] sm:$0xff] }
 0x414   : > { %v4000_v27 = vpack.c.bf16 %v3981_v23, %v3980_v61  ;;  %v3767_v33 = vld [vmem:[#allocation2 + $0x118] sm:$0xff]  ;;  %v10624_v5 = vld [vmem:[%s14587_s3 + $0x180] sm:$0xff]   ;;  %v4317_v58 = vld [vmem:[#allocation2 + $0x6e] sm:$0xff] }
 0x415   : > { %5293 = vmatprep.mubr.bf16.mxu0 %v3857_v53  ;;  %v3785_v17 = vpack.c.bf16 %v3767_v33, %v3766_v43  ;;  %v4020_v12 = vld [vmem:[#allocation2 + $0x13] sm:$0xff]  ;;  %v4094_v53 = vld [vmem:[#allocation2 + $0x24] sm:$0xff] }
 0x416   : > { %5462 = vmatprep.mubr.bf16.mxu1 %v4000_v27  ;;  %v4314_v11 = vld [vmem:[#allocation2 + $0x56] sm:$0xff]  ;;  %v4056_v61 = vpack.c.bf16 %v4021_v52, %v4020_v12  ;;  %v13158_v33 = vpack.c.bf16 %v4095_v37, %v4094_v53  ;;  %v10625_v43 = vld [vmem:[%s14587_s3 + $0x188] sm:$0xff]   ;;  %v4323_v52 = vld [vmem:[#allocation2 + $0x9e] sm:$0xff] }
 0x417   : > { %5463 = vmatmul.mubr.bf16.gmra.mrb[100].mxu1 %v3999_v20  ;;  %v4315_v20 = vld [vmem:[#allocation2 + $0x5e] sm:$0xff]  ;;  %v4096_v63 = vld [vmem:[#allocation2 + $0x34] sm:$0xff] }
 0x418   : > { %5294 = vmatmul.mubr.bf16.gmra.mrb[140].mxu0 %v3785_v17  ;;  %v3982_v22 = vld [vmem:[#allocation2 + $0x122] sm:$0xff]  ;;  %v4347_v23 = vpack.c.bf16 %v4315_v20, %v4314_v11  ;;  %v4023_v17 = vld [vmem:[#allocation2 + $0x2b] sm:$0xff]  ;;  %v4024_v37 = vld [vmem:[#allocation2 + $0x33] sm:$0xff] }
 0x419   : > { %9577 = vmatprep.mubr.bf16.mxu0 %v4344_v56  ;;  %v4097_v56 = vld [vmem:[#allocation2 + $0x3c] sm:$0xff]  ;;  %v4099_v20 = vld [vmem:[#allocation2 + $0x4c] sm:$0xff]  ;;  %v4124_v50 = vld [vmem:[#allocation2 + $0x114] sm:$0xff] }
 0x41a   : > { %v3983_v59 = vld [vmem:[#allocation2 + $0x12a] sm:$0xff]  ;;  %v13169_v9 = vpack.c.bf16 %v4097_v56, %v4096_v63  ;;  %v4322_v11 = vld [vmem:[#allocation2 + $0x96] sm:$0xff]  ;;  %v10628_v53 = vld [vmem:[%s14587_s3 + $0x1a0] sm:$0xff]  }
 0x41b   : > { %v4001_v41 = vpack.c.bf16 %v3983_v59, %v3982_v22  ;;  %v4321_v22 = vld [vmem:[#allocation2 + $0x8e] sm:$0xff]  ;;  %v4022_v59 = vld [vmem:[#allocation2 + $0x23] sm:$0xff] }
 0x41c   : > { %v4057_v0 = vpack.c.bf16 %v4023_v17, %v4022_v59  ;;  %v4350_v55 = vpack.c.bf16 %v4321_v22, %v4320_v49  ;;  %v4325_v12 = vld [vmem:[#allocation2 + $0xae] sm:$0xff]  ;;  %v4101_v56 = vld [vmem:[#allocation2 + $0x5c] sm:$0xff]  ;;  %v4328_v49 = vld [vmem:[#allocation2 + $0xc6] sm:$0xff] }
 0x41d   : > { %5470 = vmatprep.mubr.bf16.mxu1 %v4001_v41  ;;  %v4318_v41 = vld [vmem:[#allocation2 + $0x76] sm:$0xff]  ;;  %v4027_v17 = vld [vmem:[#allocation2 + $0x4b] sm:$0xff]  ;;  %v4026_v59 = vld [vmem:[#allocation2 + $0x43] sm:$0xff] }
 0x41e   : > { %v4349_v35 = vpack.c.bf16 %v4319_v34, %v4318_v41  ;;  %v4327_v34 = vld [vmem:[#allocation2 + $0xbe] sm:$0xff]  ;;  %v4329_v22 = vld [vmem:[#allocation2 + $0xce] sm:$0xff]  ;;  %v4326_v41 = vld [vmem:[#allocation2 + $0xb6] sm:$0xff] }
 0x41f   : > { %5471 = vmatmul.mubr.bf16.gmra.mrb[104].mxu1 %v4000_v27  ;;  %v4348_v27 = vpack.c.bf16 %v4317_v58, %v4316_v45  ;;  %v4351_v58 = vpack.c.bf16 %v4323_v52, %v4322_v11  ;;  %v4100_v63 = vld [vmem:[#allocation2 + $0x54] sm:$0xff] }
 0x420   : > { %9578 = vmatmul.mubr.bf16.vlgmr.msra.gmra.mrb[144].mxu0 %v4345_v3  ;;  %5511 = vmatprep.mubr.bf16.mxu1 %v4128_v54  ;;  %v10626_v3 = vld [vmem:[%s14587_s3 + $0x190] sm:$0xff]   ;;  %v10627_v54 = vld [vmem:[%s14587_s3 + $0x198] sm:$0xff]  }
 0x421   : > { %9581 = vmatprep.mubr.bf16.mxu0 %v4346_v21  ;;  %v4025_v21 = vld [vmem:[#allocation2 + $0x3b] sm:$0xff]  ;;  %v4028_v11 = vld [vmem:[#allocation2 + $0x53] sm:$0xff] }
 0x422   : > { %v4029_v52 = vld [vmem:[#allocation2 + $0x5b] sm:$0xff] }
 0x427   : > { %5512 = vmatmul.mubr.bf16.vlgmr.msra.gmra.mrb[36].mxu1 %v4056_v61  ;;  %v4098_v61 = vld [vmem:[#allocation2 + $0x44] sm:$0xff] }
 0x428   : > { %9582 = vmatmul.mubr.bf16.gmra.mrb[148].mxu0 %v4347_v23  ;;  %5519 = vmatprep.mubr.bf16.mxu1 %v13158_v33  ;;  %v4324_v23 = vld [vmem:[#allocation2 + $0xa6] sm:$0xff]  ;;  %v13179_v45 = vpack.c.bf16 %v4099_v20, %v4098_v61  ;;  %v4331_v20 = vld [vmem:[#allocation2 + $0xde] sm:$0xff] }
 0x429   : > { %5657 = vmatpush1.bf16.msra.mxu1 %v10624_v5  ;;  %9585 = vmatprep.mubr.bf16.mxu0 %v4348_v27  ;;  %v4058_v5 = vpack.c.bf16 %v4025_v21, %v4024_v37  ;;  %v4352_v27 = vpack.c.bf16 %v4325_v12, %v4324_v23  ;;  %v10631_v21 = vld [vmem:[%s14587_s3 + $0x1b8] sm:$0xff]   ;;  %v4103_v12 = vld [vmem:[#allocation2 + $0x6c] sm:$0xff]  ;;  %v4102_v23 = vld [vmem:[#allocation2 + $0x64] sm:$0xff] }
 0x42a   : > { %5658 = vmatprep.subr.bf16.mxu1 %v14713_v36  ;;  %v4333_v37 = vld [vmem:[#allocation2 + $0xee] sm:$0xff] }
 0x42d   : > { %5659 = vmatpush1.bf16.msra.mxu1 %v10625_v43  ;;  %v10629_v43 = vld [vmem:[%s14587_s3 + $0x1a8] sm:$0xff]  }
 0x42e   : > { %5660 = vmatprep.subr.bf16.mxu1 %v14713_v36 }
 0x42f   : > { %5520 = vmatmul.mubr.bf16.gmra.mrb[40].mxu1 %v4057_v0  ;;  %v4059_v0 = vpack.c.bf16 %v4027_v17, %v4026_v59  ;;  %v4105_v59 = vld [vmem:[#allocation2 + $0x7c] sm:$0xff] }
 0x430   : > { %9586 = vmatmul.mubr.bf16.gmra.mrb[152].mxu0 %v4349_v35  ;;  %5527 = vmatprep.mubr.bf16.mxu1 %v13169_v9  ;;  %v4353_v35 = vpack.c.bf16 %v4327_v34, %v4326_v41  ;;  %v10633_v34 = vld [vmem:[%s14587_s3 + $0x1c8] sm:$0xff]  }
 0x431   : > { %9589 = vmatprep.mubr.bf16.mxu0 %v4350_v55  ;;  %5661 = vmatpush1.bf16.msra.mxu1 %v10626_v3  ;;  %v10630_v3 = vld [vmem:[%s14587_s3 + $0x1b0] sm:$0xff]   ;;  %v13190_v55 = vpack.c.bf16 %v4101_v56, %v4100_v63 }
 0x432   : > { %5662 = vmatprep.subr.bf16.mxu1 %v14713_v36  ;;  %v4031_v56 = vld [vmem:[#allocation2 + $0x6b] sm:$0xff] }
 0x433   : > { %v4337_v41 = vld [vmem:[#allocation2 + $0x10e] sm:$0xff] }
 0x435   : > { %5663 = vmatpush1.bf16.msra.mxu1 %v10627_v54  ;;  %v4354_v54 = vpack.c.bf16 %v4329_v22, %v4328_v49  ;;  %v4335_v22 = vld [vmem:[#allocation2 + $0xfe] sm:$0xff] }
 0x436   : > { %5664 = vmatprep.subr.bf16.mxu1 %v14713_v36 }
 0x437   : > { %5528 = vmatmul.mubr.bf16.gmra.mrb[44].mxu1 %v4058_v5  ;;  %v4330_v5 = vld [vmem:[#allocation2 + $0xd6] sm:$0xff] }
 0x438   : > { %9590 = vmatmul.mubr.bf16.gmra.mrb[156].mxu0 %v4351_v58  ;;  %5535 = vmatprep.mubr.bf16.mxu1 %v13179_v45  ;;  %v4060_v58 = vpack.c.bf16 %v4029_v52, %v4028_v11  ;;  %v4355_v61 = vpack.c.bf16 %v4331_v20, %v4330_v5  ;;  %v4339_v11 = vld [vmem:[#allocation2 + $0x11e] sm:$0xff]  ;;  %v4107_v5 = vld [vmem:[#allocation2 + $0x8c] sm:$0xff] }
 0x439   : > { %9593 = vmatprep.mubr.bf16.mxu0 %v4352_v27  ;;  %5665 = vmatpush1.bf16.msra.mxu1 %v10628_v53  ;;  %v4332_v53 = vld [vmem:[#allocation2 + $0xe6] sm:$0xff] }
 0x43a   : > { %5666 = vmatprep.subr.bf16.mxu1 %v14713_v36  ;;  %v10632_v27 = vld [vmem:[%s14587_s3 + $0x1c0] sm:$0xff]   ;;  %v4356_v17 = vpack.c.bf16 %v4333_v37, %v4332_v53  ;;  %v4338_v53 = vld [vmem:[#allocation2 + $0x116] sm:$0xff] }
 0x43b   : > { %v4033_v37 = vld [vmem:[#allocation2 + $0x7b] sm:$0xff] }
 0x43d   : > { %5667 = vmatpush1.bf16.msra.mxu1 %v10629_v43  ;;  %v13201_v43 = vpack.c.bf16 %v4103_v12, %v4102_v23  ;;  %v10635_v12 = vld [vmem:[%s14587_s3 + $0x1d8] sm:$0xff]  }
 0x43e   : > { %5668 = vmatprep.subr.bf16.mxu1 %v14713_v36  ;;  %v4032_v23 = vld [vmem:[#allocation2 + $0x73] sm:$0xff] }
 0x43f   : > { %5536 = vmatmul.mubr.bf16.gmra.mrb[48].mxu1 %v4059_v0  ;;  %v4030_v0 = vld [vmem:[#allocation2 + $0x63] sm:$0xff] }
 0x440   : > { %9594 = vmatmul.mubr.bf16.gmra.mrb[160].mxu0 %v4353_v35  ;;  %5543 = vmatprep.mubr.bf16.mxu1 %v13190_v55  ;;  %v4334_v35 = vld [vmem:[#allocation2 + $0xf6] sm:$0xff]  ;;  %v4061_v63 = vpack.c.bf16 %v4031_v56, %v4030_v0  ;;  %v10636_v56 = vld [vmem:[%s14587_s3 + $0x1e0] sm:$0xff]   ;;  %v4035_v0 = vld [vmem:[#allocation2 + $0x8b] sm:$0xff] }
 0x441   : > { %9597 = vmatprep.mubr.bf16.mxu0 %v4354_v54  ;;  %5669 = vmatpush1.bf16.msra.mxu1 %v10630_v3  ;;  %v4357_v49 = vpack.c.bf16 %v4335_v22, %v4334_v35  ;;  %v4104_v3 = vld [vmem:[#allocation2 + $0x74] sm:$0xff]  ;;  %v4336_v54 = vld [vmem:[#allocation2 + $0x106] sm:$0xff]  ;;  %v4109_v35 = vld [vmem:[#allocation2 + $0x9c] sm:$0xff] }
 0x442   : > { %5670 = vmatprep.subr.bf16.mxu1 %v14713_v36  ;;  %v13212_v52 = vpack.c.bf16 %v4105_v59, %v4104_v3  ;;  %v4358_v20 = vpack.c.bf16 %v4337_v41, %v4336_v54  ;;  %v10637_v41 = vld [vmem:[%s14587_s3 + $0x1e8] sm:$0xff]   ;;  %v4108_v3 = vld [vmem:[#allocation2 + $0x94] sm:$0xff] }
 0x443   : > { %v10638_v54 = vld [vmem:[%s14587_s3 + $0x1f0] sm:$0xff]  }
 0x445   : > { %5671 = vmatpush1.bf16.msra.mxu1 %v10631_v21  ;;  %v10634_v21 = vld [vmem:[%s14587_s3 + $0x1d0] sm:$0xff]  }
 0x446   : > { %5672 = vmatprep.subr.bf16.mxu1 %v14713_v36 }
 0x447   : > { %5544 = vmatmul.mubr.bf16.gmra.mrb[52].mxu1 %v4060_v58  ;;  %v4340_v58 = vld [vmem:[#allocation2 + $0x126] sm:$0xff] }
 0x448   : > { %9598 = vmatmul.mubr.bf16.gmra.mrb[164].mxu0 %v4355_v61  ;;  %5551 = vmatprep.mubr.bf16.mxu1 %v13201_v43  ;;  %v4341_v61 = vld [vmem:[#allocation2 + $0x12e] sm:$0xff] }
 0x449   : > { %9601 = vmatprep.mubr.bf16.mxu0 %v4356_v17  ;;  %5673 = vmatpush1.bf16.msra.mxu1 %v10632_v27  ;;  %v4062_v27 = vpack.c.bf16 %v4033_v37, %v4032_v23  ;;  %v4359_v17 = vpack.c.bf16 %v4339_v11, %v4338_v53  ;;  %v4360_v59 = vpack.c.bf16 %v4341_v61, %v4340_v58  ;;  %v4111_v37 = vld [vmem:[#allocation2 + $0xac] sm:$0xff]  ;;  %v4110_v58 = vld [vmem:[#allocation2 + $0xa4] sm:$0xff] }
 0x44a   : > { %5674 = vmatprep.subr.bf16.mxu1 %v14713_v36  ;;  %v4036_v11 = vld [vmem:[#allocation2 + $0x93] sm:$0xff]  ;;  %v13242_v61 = vpack.c.bf16 %v4111_v37, %v4110_v58  ;;  %v4039_v53 = vld [vmem:[#allocation2 + $0xab] sm:$0xff] }
 0x44d   : > { %5675 = vmatpush1.bf16.msra.mxu1 %v10633_v34  ;;  %v4106_v34 = vld [vmem:[#allocation2 + $0x84] sm:$0xff] }
 0x44e   : > { %5676 = vmatprep.subr.bf16.mxu1 %v14713_v36  ;;  %v13223_v22 = vpack.c.bf16 %v4107_v5, %v4106_v34 }
 0x44f   : > { %5552 = vmatmul.mubr.bf16.gmra.mrb[56].mxu1 %v4061_v63  ;;  %v4034_v63 = vld [vmem:[#allocation2 + $0x83] sm:$0xff] }
 0x450   : > { %9602 = vmatmul.mubr.bf16.gmra.mrb[168].mxu0 %v4357_v49  ;;  %5559 = vmatprep.mubr.bf16.mxu1 %v13212_v52  ;;  %v4063_v49 = vpack.c.bf16 %v4035_v0, %v4034_v63  ;;  %v4112_v0 = vld [vmem:[#allocation2 + $0xb4] sm:$0xff] }
 0x451   : > { %9605 = vmatprep.mubr.bf16.mxu0 %v4358_v20  ;;  %5677 = vmatpush1.bf16.msra.mxu1 %v10634_v21  ;;  %v13234_v21 = vpack.c.bf16 %v4109_v35, %v4108_v3  ;;  %v10639_v20 = vld [vmem:[%s14587_s3 + $0x1f8] sm:$0xff]  }
 0x452   : > { %5678 = vmatprep.subr.bf16.mxu1 %v14713_v36 }
 0x455   : > { %5679 = vmatpush1.bf16.msra.mxu1 %v10635_v12  ;;  %v4037_v12 = vld [vmem:[#allocation2 + $0x9b] sm:$0xff] }
 0x456   : > { %5680 = vmatprep.subr.bf16.mxu1 %v14713_v36  ;;  %v4064_v5 = vpack.c.bf16 %v4037_v12, %v4036_v11  ;;  %v4040_v12 = vld [vmem:[#allocation2 + $0xb3] sm:$0xff] }
 0x457   : > { %5560 = vmatmul.mubr.bf16.gmra.mrb[60].mxu1 %v4062_v27 }
 0x458   : > { %9606 = vmatmul.mubr.bf16.gmra.mrb[172].mxu0 %v4359_v17  ;;  %5567 = vmatprep.mubr.bf16.mxu1 %v13223_v22  ;;  %v4113_v17 = vld [vmem:[#allocation2 + $0xbc] sm:$0xff] }
 0x459   : > { %9609 = vmatprep.mubr.bf16.mxu0 %v4360_v59  ;;  %5681 = vmatpush1.bf16.msra.mxu1 %v10636_v56  ;;  %v4038_v56 = vld [vmem:[#allocation2 + $0xa3] sm:$0xff]  ;;  %v13250_v35 = vpack.c.bf16 %v4113_v17, %v4112_v0 }
 0x45a   : > { %5682 = vmatprep.subr.bf16.mxu1 %v14713_v36 }
 0x45d   : > { %5683 = vmatpush1.bf16.msra.mxu1 %v10637_v41  ;;  %v4065_v41 = vpack.c.bf16 %v4039_v53, %v4038_v56  ;;  %v4117_v56 = vld [vmem:[#allocation2 + $0xdc] sm:$0xff] }
 0x45e   : > { %5684 = vmatprep.subr.bf16.mxu1 %v14713_v36  ;;  %v13264_v60 = vpack.c.bf16 %v4117_v56, %v4116_v14 }
 0x45f   : > { %5568 = vmatmul.mubr.bf16.gmra.mrb[64].mxu1 %v4063_v49  ;;  %v13246_v23 = vpop.f32.mrb[76].mxu0  ;;  %v4041_v49 = vld [vmem:[#allocation2 + $0xbb] sm:$0xff] }
 0x460   : > { %5575 = vmatprep.mubr.bf16.mxu1 %v13234_v21  ;;  %v5169_v27 = vpop.f32.mrb[77].mxu0  ;;  %v4066_v11 = vpack.c.bf16 %v4041_v49, %v4040_v12 }
 0x461   : > { %5685 = vmatpush1.bf16.msra.mxu1 %v10638_v54  ;;  %v13248_v34 = vpop.f32.mrb[78].mxu0  ;;  %v4115_v54 = vld [vmem:[#allocation2 + $0xcc] sm:$0xff] }
 0x462   : > { %5686 = vmatprep.subr.bf16.mxu1 %v14713_v36  ;;  %v5172_v59 = vpop.f32.mrb[79].mxu0  ;;  %v4043_v27 = vld [vmem:[#allocation2 + $0xcb] sm:$0xff] }
 0x465   : > { %5687 = vmatpush1.bf16.msra.mxu1 %v10639_v20 }
 0x466   : > { %7799 = vmatprep.subr.bf16.mxu1 %v14713_v36 }
 0x467   : > { %5576 = vmatmul.mubr.bf16.gmra.mrb[68].mxu1 %v4064_v5  ;;  %v4114_v5 = vld [vmem:[#allocation2 + $0xc4] sm:$0xff] }
 0x468   : > { %5583 = vmatprep.mubr.bf16.mxu1 %v13242_v61  ;;  %v13253_v63 = vpop.f32.mrb[80].mxu0  ;;  %v13257_v58 = vpack.c.bf16 %v4115_v54, %v4114_v5  ;;  %v4045_v54 = vld [vmem:[#allocation2 + $0xdb] sm:$0xff]  ;;  %v4044_v5 = vld [vmem:[#allocation2 + $0xd3] sm:$0xff] }
 0x469   : > { %v5177_v3 = vpop.f32.mrb[81].mxu0  ;;  %v4068_v26 = vpack.c.bf16 %v4045_v54, %v4044_v5 }
 0x46a   : > { %v13255_v20 = vpop.f32.mrb[82].mxu0 }
 0x46b   : > { %v5180_v37 = vpop.f32.mrb[83].mxu0 }
 0x46c   : > { %v4119_v37 = vld [vmem:[#allocation2 + $0xec] sm:$0xff] }
 0x46d   : > { %v13271_v4 = vpack.c.bf16 %v4119_v37, %v4118_v51  ;;  %v4123_v37 = vld [vmem:[#allocation2 + $0x10c] sm:$0xff] }
 0x46e   : > { %v13285_v30 = vpack.c.bf16 %v4123_v37, %v4122_v18  ;;  %v4126_v37 = vld [vmem:[#allocation2 + $0x124] sm:$0xff] }
 0x46f   : > { %5584 = vmatmul.mubr.bf16.gmra.mrb[72].mxu1 %v4065_v41  ;;  %v4042_v41 = vld [vmem:[#allocation2 + $0xc3] sm:$0xff] }
 0x470   : > { %5591 = vmatprep.mubr.bf16.mxu1 %v13250_v35  ;;  %v4067_v3 = vpack.c.bf16 %v4043_v27, %v4042_v41  ;;  %v4047_v27 = vld [vmem:[#allocation2 + $0xeb] sm:$0xff]  ;;  %v4121_v41 = vld [vmem:[#allocation2 + $0xfc] sm:$0xff] }
 0x471   : > { %v13260_v53 = vpop.f32.mrb[84].mxu0  ;;  %v13278_v44 = vpack.c.bf16 %v4121_v41, %v4120_v62  ;;  %v4125_v41 = vld [vmem:[#allocation2 + $0x11c] sm:$0xff] }
 0x472   : > { %v5185_v17 = vpop.f32.mrb[85].mxu0  ;;  %v13292_v8 = vpack.c.bf16 %v4125_v41, %v4124_v50 }
 0x473   : > { %v13262_v59 = vpop.f32.mrb[86].mxu0 }
 0x474   : > { %v5188_v0 = vpop.f32.mrb[87].mxu0 }
 0x477   : > { %5592 = vmatmul.mubr.bf16.gmra.mrb[76].mxu1 %v4066_v11 }
 0x478   : > { %5599 = vmatprep.mubr.bf16.mxu1 %v13257_v58 }
 0x47a   : > { %v13267_v49 = vpop.f32.mrb[88].mxu0 }
 0x47b   : > { %v5193_v12 = vpop.f32.mrb[89].mxu0 }
 0x47c   : > { %v13269_v11 = vpop.f32.mrb[90].mxu0 }
 0x47d   : > { %v5196_v17 = vpop.f32.mrb[91].mxu0 }
 0x47e   : > { %v4048_v17 = vld [vmem:[#allocation2 + $0xf3] sm:$0xff] }
 0x47f   : > { %5600 = vmatmul.mubr.bf16.gmra.mrb[80].mxu1 %v4067_v3  ;;  %v4046_v3 = vld [vmem:[#allocation2 + $0xe3] sm:$0xff] }
 0x480   : > { %5607 = vmatprep.mubr.bf16.mxu1 %v13264_v60  ;;  %v4069_v25 = vpack.c.bf16 %v4047_v27, %v4046_v3 }
 0x484   : > { %v13274_v14 = vpop.f32.mrb[92].mxu0 }
 0x485   : > { %v5201_v56 = vpop.f32.mrb[93].mxu0 }
 0x486   : > { %v13276_v0 = vpop.f32.mrb[94].mxu0 }
 0x487   : > { %5608 = vmatmul.mubr.bf16.gmra.mrb[84].mxu1 %v4068_v26  ;;  %v5204_v12 = vpop.f32.mrb[95].mxu0  ;;  %v4049_v26 = vld [vmem:[#allocation2 + $0xfb] sm:$0xff] }
 0x488   : > { %5615 = vmatprep.mubr.bf16.mxu1 %v13271_v4  ;;  %v4070_v39 = vpack.c.bf16 %v4049_v26, %v4048_v17  ;;  %v4050_v12 = vld [vmem:[#allocation2 + $0x103] sm:$0xff]  ;;  %v4127_v17 = vld [vmem:[#allocation2 + $0x12c] sm:$0xff] }
 0x489   : > { %v13299_v57 = vpack.c.bf16 %v4127_v17, %v4126_v37 }
 0x48c   : > { %v13281_v51 = vpop.f32.mrb[96].mxu0 }
 0x48d   : > { %v5209_v54 = vpop.f32.mrb[97].mxu0 }
 0x48e   : > { %v13283_v5 = vpop.f32.mrb[98].mxu0 }
 0x48f   : > { %5616 = vmatmul.mubr.bf16.gmra.mrb[88].mxu1 %v4069_v25  ;;  %v5212_v56 = vpop.f32.mrb[99].mxu0  ;;  %v4051_v25 = vld [vmem:[#allocation2 + $0x10b] sm:$0xff] }
 0x490   : > { %5623 = vmatprep.mubr.bf16.mxu1 %v13278_v44  ;;  %v4071_v19 = vpack.c.bf16 %v4051_v25, %v4050_v12  ;;  %v4237_v25 = vld [vmem:[#allocation2 + $0x2d] sm:$0xff] }
 0x494   : > { %v13288_v62 = vpop.f32.mrb[100].mxu0 }
 0x495   : > { %v5217_v27 = vpop.f32.mrb[101].mxu0 }
 0x496   : > { %v13290_v3 = vpop.f32.mrb[102].mxu0  ;;  %v4052_v27 = vld [vmem:[#allocation2 + $0x113] sm:$0xff] }
 0x497   : > { %5624 = vmatmul.mubr.bf16.gmra.mrb[92].mxu1 %v4070_v39  ;;  %v5220_v54 = vpop.f32.mrb[103].mxu0  ;;  %v4053_v39 = vld [vmem:[#allocation2 + $0x11b] sm:$0xff] }
 0x498   : > { %5631 = vmatprep.mubr.bf16.mxu1 %v13285_v30  ;;  %v4072_v29 = vpack.c.bf16 %v4053_v39, %v4052_v27  ;;  %v4236_v54 = vld [vmem:[#allocation2 + $0x25] sm:$0xff] }
 0x499   : > { %v4343_v39 = vld [vmem:[#allocation2 + $0x13e] sm:$0xff] }
 0x49e   : > { %v13295_v18 = vpop.f32.mrb[104].mxu0 }
 0x49f   : > { %5632 = vmatmul.mubr.bf16.gmra.mrb[96].mxu1 %v4071_v19  ;;  %v5225_v26 = vpop.f32.mrb[105].mxu0 }
 0x4a0   : > { %5639 = vmatprep.mubr.bf16.mxu1 %v13292_v8  ;;  %v13297_v56 = vpop.f32.mrb[106].mxu0  ;;  %v4272_v26 = vpack.c.bf16 %v4237_v25, %v4236_v54  ;;  %v4238_v54 = vld [vmem:[#allocation2 + $0x35] sm:$0xff] }
 0x4a1   : > { %v5228_v7 = vpop.f32.mrb[107].mxu0 }
 0x4a2   : > { %v10946_v7 = vpack.c.bf16 %v13150_v1, %v13140_v47  ;;  %v4241_v1 = vld [vmem:[#allocation2 + $0x4d] sm:$0xff] }
 0x4a7   : > { %5640 = vmatmul.mubr.bf16.gmra.mrb[100].mxu1 %v4072_v29  ;;  %v4342_v29 = vld [vmem:[#allocation2 + $0x136] sm:$0xff] }
 0x4a8   : > { %5647 = vmatprep.mubr.bf16.mxu1 %v13299_v57  ;;  %v13302_v50 = vpop.f32.mrb[108].mxu0  ;;  %v4361_v37 = vpack.c.bf16 %v4343_v39, %v4342_v29  ;;  %v4240_v29 = vld [vmem:[#allocation2 + $0x45] sm:$0xff] }
 0x4a9   : > { %v5233_v19 = vpop.f32.mrb[109].mxu0  ;;  %v4274_v39 = vpack.c.bf16 %v4241_v1, %v4240_v29  ;;  %v4244_v29 = vld [vmem:[#allocation2 + $0x65] sm:$0xff] }
 0x4aa   : > { %v13304_v41 = vpop.f32.mrb[110].mxu0  ;;  %v4239_v19 = vld [vmem:[#allocation2 + $0x3d] sm:$0xff]  ;;  %9610 = vmatmul.mubr.bf16.gmra.mrb[176].mxu0 %v4361_v37 }
 0x4ab   : > { %v5236_v12 = vpop.f32.mrb[111].mxu0  ;;  %v4273_v13 = vpack.c.bf16 %v4239_v19, %v4238_v54 }
 0x4af   : > { %10947 = vmatmul.mubr.msk.bf16.gmra.mrb[104].mxu1 %vm10945_vm9, %v10946_v7 }
 0x4b0   : > { %5688 = vmatprep.mubr.bf16.mxu1 %v4272_v26 }
 0x4b1   : > { %v13312_v17 = vpop.f32.mrb[112].mxu0 }
 0x4b2   : > { %v5241_v27 = vpop.f32.mrb[113].mxu0 }
 0x4b3   : > { %v13314_v12 = vpop.f32.mrb[114].mxu0 }
 0x4b4   : > { %v5244_v25 = vpop.f32.mrb[115].mxu0 }
 0x4b5   : > { %v4243_v25 = vld [vmem:[#allocation2 + $0x5d] sm:$0xff] }
 0x4b7   : > { %5689 = vmatmul.mubr.bf16.vlgmr.msra.gmra.mrb[36].mxu1 %v13158_v33 }
 0x4b8   : > { %5696 = vmatprep.mubr.bf16.mxu1 %v4273_v13  ;;  %v4242_v13 = vld [vmem:[#allocation2 + $0x55] sm:$0xff] }
 0x4b9   : > { %v4275_v54 = vpack.c.bf16 %v4243_v25, %v4242_v13  ;;  %v4246_v13 = vld [vmem:[#allocation2 + $0x75] sm:$0xff] }
 0x4ba   : > { %v13317_v28 = vpop.f32.mrb[116].mxu0 }
 0x4bb   : > { %v5249_v47 = vpop.f32.mrb[117].mxu0 }
 0x4bc   : > { %v13319_v26 = vpop.f32.mrb[118].mxu0 }
 0x4bd   : > { %v5252_v7 = vpop.f32.mrb[119].mxu0 }
 0x4bf   : > { %5697 = vmatmul.mubr.bf16.gmra.mrb[40].mxu1 %v13169_v9 }
 0x4c0   : > { %5704 = vmatprep.mubr.bf16.mxu1 %v4274_v39  ;;  %v4276_v39 = vpack.c.bf16 %v4245_v40, %v4244_v29  ;;  %v4248_v29 = vld [vmem:[#allocation2 + $0x85] sm:$0xff] }
 0x4c2   : > { %v13322_v37 = vpop.f32.mrb[120].mxu0 }
 0x4c3   : > { %14882 = vst [vmem:[#allocation10_spill] sm:$0xff] %v13322_v37  ;;  %v5257_v27 = vpop.f32.mrb[121].mxu0 }
 0x4c4   : > { %v13324_v19 = vpop.f32.mrb[122].mxu0 }
 0x4c5   : > { %14883 = vst [vmem:[#allocation41_spill] sm:$0xff] %v13324_v19  ;;  %v5260_v33 = vpop.f32.mrb[123].mxu0 }
 0x4c7   : > { %5705 = vmatmul.mubr.bf16.gmra.mrb[44].mxu1 %v13179_v45 }
 0x4c8   : > { %5712 = vmatprep.mubr.bf16.mxu1 %v4275_v54  ;;  %v4277_v54 = vpack.c.bf16 %v4247_v10, %v4246_v13  ;;  %v4250_v13 = vld [vmem:[#allocation2 + $0x95] sm:$0xff] }
 0x4cb   : > { %v13327_v47 = vpop.f32.mrb[124].mxu0 }
 0x4cc   : > { %14884 = vst [vmem:[#allocation42_spill] sm:$0xff] %v13327_v47  ;;  %v5265_v7 = vpop.f32.mrb[125].mxu0  ;;  %v4266_v47 = vld [vmem:[#allocation2 + $0x115] sm:$0xff] }
 0x4cd   : > { %v13329_v1 = vpop.f32.mrb[126].mxu0 }
 0x4ce   : > { %14885 = vst [vmem:[#allocation43_spill] sm:$0xff] %v13329_v1  ;;  %v5268_v9 = vpop.f32.mrb[127].mxu0 }
 0x4cf   : > { %5713 = vmatmul.mubr.bf16.gmra.mrb[48].mxu1 %v13190_v55 }
 0x4d0   : > { %5720 = vmatprep.mubr.bf16.mxu1 %v4276_v39  ;;  %v4278_v39 = vpack.c.bf16 %v4249_v38, %v4248_v29  ;;  %v4252_v29 = vld [vmem:[#allocation2 + $0xa5] sm:$0xff] }
 0x4d3   : > { %v13332_v27 = vpop.f32.mrb[128].mxu0 }
 0x4d4   : > { %14886 = vst [vmem:[#allocation44_spill] sm:$0xff] %v13332_v27  ;;  %v5273_v33 = vpop.f32.mrb[129].mxu0 }
 0x4d5   : > { %v13334_v25 = vpop.f32.mrb[130].mxu0 }
 0x4d6   : > { %14887 = vst [vmem:[#allocation45_spill] sm:$0xff] %v13334_v25  ;;  %v5276_v45 = vpop.f32.mrb[131].mxu0  ;;  %v4264_v25 = vld [vmem:[#allocation2 + $0x105] sm:$0xff] }
 0x4d7   : > { %5721 = vmatmul.mubr.bf16.gmra.mrb[52].mxu1 %v13201_v43 }
 0x4d8   : > { %5728 = vmatprep.mubr.bf16.mxu1 %v4277_v54  ;;  %v4279_v54 = vpack.c.bf16 %v4251_v31, %v4250_v13  ;;  %v4255_v31 = vld [vmem:[#allocation2 + $0xbd] sm:$0xff] }
 0x4db   : > { %v13337_v7 = vpop.f32.mrb[132].mxu0 }
 0x4dc   : > { %14888 = vst [vmem:[#allocation46_spill] sm:$0xff] %v13337_v7  ;;  %v5281_v9 = vpop.f32.mrb[133].mxu0 }
 0x4dd   : > { %v13339_v40 = vpop.f32.mrb[134].mxu0 }
 0x4de   : > { %14889 = vst [vmem:[#allocation47_spill] sm:$0xff] %v13339_v40  ;;  %v5284_v55 = vpop.f32.mrb[135].mxu0 }
 0x4df   : > { %5729 = vmatmul.mubr.bf16.gmra.mrb[56].mxu1 %v13212_v52 }
 0x4e0   : > { %5736 = vmatprep.mubr.bf16.mxu1 %v4278_v39  ;;  %v4280_v39 = vpack.c.bf16 %v4253_v15, %v4252_v29 }
 0x4e3   : > { %v13342_v33 = vpop.f32.mrb[136].mxu0 }
 0x4e4   : > { %14890 = vst [vmem:[#allocation48_spill] sm:$0xff] %v13342_v33  ;;  %v5289_v45 = vpop.f32.mrb[137].mxu0  ;;  %v4262_v33 = vld [vmem:[#allocation2 + $0xf5] sm:$0xff] }
 0x4e5   : > { %v13344_v10 = vpop.f32.mrb[138].mxu0 }
 0x4e6   : > { %14891 = vst [vmem:[#allocation49_spill] sm:$0xff] %v13344_v10  ;;  %v5292_v43 = vpop.f32.mrb[139].mxu0 }
 0x4e7   : > { %5737 = vmatmul.mubr.bf16.gmra.mrb[60].mxu1 %v13223_v22 }
 0x4e8   : > { %5744 = vmatprep.mubr.bf16.mxu1 %v4279_v54  ;;  %v4254_v54 = vld [vmem:[#allocation2 + $0xb5] sm:$0xff] }
 0x4eb   : > { %v13347_v9 = vpop.f32.mrb[140].mxu0 }
 0x4ec   : > { %14892 = vst [vmem:[#allocation50_spill] sm:$0xff] %v13347_v9  ;;  %v5297_v55 = vpop.f32.mrb[141].mxu0 }
 0x4ed   : > { %v13349_v38 = vpop.f32.mrb[142].mxu0  ;;  %v4281_v55 = vpack.c.bf16 %v4255_v31, %v4254_v54 }
 0x4ee   : > { %14893 = vst [vmem:[#allocation51_spill] sm:$0xff] %v13349_v38  ;;  %v5300_v52 = vpop.f32.mrb[143].mxu0  ;;  %v4260_v38 = vld [vmem:[#allocation2 + $0xe5] sm:$0xff] }
 0x4ef   : > { %5745 = vmatmul.mubr.bf16.gmra.mrb[64].mxu1 %v13234_v21  ;;  %v4257_v21 = vld [vmem:[#allocation2 + $0xcd] sm:$0xff] }
 0x4f0   : > { %5752 = vmatprep.mubr.bf16.mxu1 %v4280_v39  ;;  %v4282_v6 = vpack.c.bf16 %v4257_v21, %v4256_v16 }
 0x4f3   : > { %v13352_v45 = vpop.f32.mrb[144].mxu0 }
 0x4f4   : > { %v13354_v43 = vpop.f32.mrb[145].mxu0 }
 0x4f5   : > { %v13356_v13 = vpop.f32.mrb[146].mxu0 }
 0x4f6   : > { %v13358_v22 = vpop.f32.mrb[147].mxu0 }
 0x4f7   : > { %5753 = vmatmul.mubr.bf16.gmra.mrb[68].mxu1 %v13242_v61  ;;  %v4259_v61 = vld [vmem:[#allocation2 + $0xdd] sm:$0xff] }
 0x4f8   : > { %5760 = vmatprep.mubr.bf16.mxu1 %v4281_v55  ;;  %v4283_v24 = vpack.c.bf16 %v4259_v61, %v4258_v42 }
 0x4fb   : > { %v13361_v52 = vpop.f32.mrb[148].mxu0 }
 0x4fc   : > { %v13363_v15 = vpop.f32.mrb[149].mxu0 }
 0x4fd   : > { %v13365_v29 = vpop.f32.mrb[150].mxu0 }
 0x4fe   : > { %v13367_v39 = vpop.f32.mrb[151].mxu0 }
 0x4ff   : > { %5761 = vmatmul.mubr.bf16.gmra.mrb[72].mxu1 %v13250_v35  ;;  %v4261_v35 = vld [vmem:[#allocation2 + $0xed] sm:$0xff] }
 0x500   : > { %5768 = vmatprep.mubr.bf16.mxu1 %v4282_v6  ;;  %v4284_v9 = vpack.c.bf16 %v4261_v35, %v4260_v38 }
 0x503   : > { %v13370_v2 = vpop.f32.mrb[152].mxu0 }
 0x504   : > { %v13372_v31 = vpop.f32.mrb[153].mxu0 }
 0x505   : > { %v13374_v54 = vpop.f32.mrb[154].mxu0 }
 0x506   : > { %v13376_v55 = vpop.f32.mrb[155].mxu0 }
 0x507   : > { %5769 = vmatmul.mubr.bf16.gmra.mrb[76].mxu1 %v13257_v58  ;;  %v4263_v58 = vld [vmem:[#allocation2 + $0xfd] sm:$0xff] }
 0x508   : > { %5776 = vmatprep.mubr.bf16.mxu1 %v4283_v24  ;;  %v4285_v40 = vpack.c.bf16 %v4263_v58, %v4262_v33 }
 0x50b   : > { %v13379_v32 = vpop.f32.mrb[156].mxu0 }
 0x50c   : > { %v13381_v16 = vpop.f32.mrb[157].mxu0 }
 0x50d   : > { %v13383_v6 = vpop.f32.mrb[158].mxu0 }
 0x50e   : > { %v13385_v21 = vpop.f32.mrb[159].mxu0 }
 0x50f   : > { %5777 = vmatmul.mubr.bf16.gmra.mrb[80].mxu1 %v13264_v60  ;;  %v4265_v60 = vld [vmem:[#allocation2 + $0x10d] sm:$0xff] }
 0x510   : > { %5784 = vmatprep.mubr.bf16.mxu1 %v4284_v9  ;;  %v4286_v27 = vpack.c.bf16 %v4265_v60, %v4264_v25 }
 0x513   : > { %v13388_v10 = vpop.f32.mrb[160].mxu0 }
 0x514   : > { %v13390_v42 = vpop.f32.mrb[161].mxu0 }
 0x515   : > { %v13392_v24 = vpop.f32.mrb[162].mxu0 }
 0x516   : > { %v13394_v61 = vpop.f32.mrb[163].mxu0 }
 0x517   : > { %5785 = vmatmul.mubr.bf16.gmra.mrb[84].mxu1 %v13271_v4  ;;  %v4267_v4 = vld [vmem:[#allocation2 + $0x11d] sm:$0xff] }
 0x518   : > { %5792 = vmatprep.mubr.bf16.mxu1 %v4285_v40  ;;  %v4287_v19 = vpack.c.bf16 %v4267_v4, %v4266_v47  ;;  %v10640_v47 = vld [vmem:[%s14589_s5] sm:$0xff]  }
 0x519   : > { %7800 = vmatpush1.bf16.msra.mxu1 %v10640_v47  ;;  %v10647_v47 = vld [vmem:[%s14589_s5 + $0x38] sm:$0xff]  }
 0x51a   : > { %7801 = vmatprep.subr.bf16.mxu1 %v14713_v36 }
 0x51b   : > { %v13397_v7 = vpop.f32.mrb[164].mxu0 }
 0x51c   : > { %v13399_v38 = vpop.f32.mrb[165].mxu0 }
 0x51d   : > { %v13401_v9 = vpop.f32.mrb[166].mxu0 }
 0x51e   : > { %v13403_v35 = vpop.f32.mrb[167].mxu0 }
 0x51f   : > { %5793 = vmatmul.mubr.bf16.gmra.mrb[88].mxu1 %v13278_v44  ;;  %v4268_v44 = vld [vmem:[#allocation2 + $0x125] sm:$0xff] }
 0x520   : > { %5800 = vmatprep.mubr.bf16.mxu1 %v4286_v27  ;;  %v4269_v27 = vld [vmem:[#allocation2 + $0x12d] sm:$0xff] }
 0x523   : > { %v13406_v1 = vpop.f32.mrb[168].mxu0 }
 0x524   : > { %14894 = vst [vmem:[#allocation52_spill] sm:$0xff] %v13406_v1  ;;  %v13408_v33 = vpop.f32.mrb[169].mxu0 }
 0x525   : > { %14895 = vst [vmem:[#allocation53_spill] sm:$0xff] %v13408_v33  ;;  %v13410_v40 = vpop.f32.mrb[170].mxu0  ;;  %v4288_v33 = vpack.c.bf16 %v4269_v27, %v4268_v44  ;;  %v10645_v27 = vld [vmem:[%s14589_s5 + $0x28] sm:$0xff]  }
 0x526   : > { %14896 = vst [vmem:[#allocation54_spill] sm:$0xff] %v13410_v40  ;;  %v13412_v58 = vpop.f32.mrb[171].mxu0 }
 0x527   : > { %14897 = vst [vmem:[#allocation55_spill] sm:$0xff] %v13412_v58  ;;  %5801 = vmatmul.mubr.bf16.gmra.mrb[92].mxu1 %v13285_v30  ;;  %v4270_v30 = vld [vmem:[#allocation2 + $0x135] sm:$0xff] }
 0x528   : > { %5808 = vmatprep.mubr.bf16.mxu1 %v4287_v19  ;;  %v4271_v19 = vld [vmem:[#allocation2 + $0x13d] sm:$0xff] }
 0x529   : > { %v4289_v4 = vpack.c.bf16 %v4271_v19, %v4270_v30  ;;  %v10648_v30 = vld [vmem:[%s14589_s5 + $0x40] sm:$0xff]   ;;  %v10649_v19 = vld [vmem:[%s14589_s5 + $0x48] sm:$0xff]  }
 0x52b   : > { %v13415_v37 = vpop.f32.mrb[172].mxu0 }
 0x52c   : > { %14898 = vst [vmem:[#allocation56_spill] sm:$0xff] %v13415_v37  ;;  %v13417_v25 = vpop.f32.mrb[173].mxu0  ;;  %v4199_v37 = vld [vmem:[#allocation2 + $0x13c] sm:$0xff] }
 0x52d   : > { %14899 = vst [vmem:[#allocation57_spill] sm:$0xff] %v13417_v25  ;;  %v13419_v60 = vpop.f32.mrb[174].mxu0 }
 0x52e   : > { %14900 = vst [vmem:[#allocation58_spill] sm:$0xff] %v13419_v60  ;;  %v13421_v1 = vpop.f32.mrb[175].mxu0  ;;  %v4198_v60 = vld [vmem:[#allocation2 + $0x134] sm:$0xff] }
 0x52f   : > { %14901 = vst [vmem:[#allocation59_spill] sm:$0xff] %v13421_v1  ;;  %5809 = vmatmul.mubr.bf16.gmra.mrb[96].mxu1 %v13292_v8  ;;  %v10641_v8 = vld [vmem:[%s14589_s5 + $0x8] sm:$0xff]   ;;  %v4217_v44 = vpack.c.bf16 %v4199_v37, %v4198_v60  ;;  %v10644_v37 = vld [vmem:[%s14589_s5 + $0x20] sm:$0xff]   ;;  %v10646_v60 = vld [vmem:[%s14589_s5 + $0x30] sm:$0xff]  }
 0x530   : > { %5816 = vmatprep.mubr.bf16.mxu1 %v4288_v33  ;;  %7802 = vmatpush1.bf16.msra.mxu1 %v10641_v8  ;;  %v10642_v33 = vld [vmem:[%s14589_s5 + $0x10] sm:$0xff]  }
 0x531   : > { %7803 = vmatprep.subr.bf16.mxu1 %v14713_v36 }
 0x534   : > { %7804 = vmatpush1.bf16.msra.mxu1 %v10642_v33 }
 0x535   : > { %7805 = vmatprep.subr.bf16.mxu1 %v14713_v36 }
 0x537   : > { %5817 = vmatmul.mubr.bf16.gmra.mrb[100].mxu1 %v13299_v57  ;;  %v10643_v57 = vld [vmem:[%s14589_s5 + $0x18] sm:$0xff]  }
 0x538   : > { %5824 = vmatprep.mubr.bf16.mxu1 %v4289_v4  ;;  %7806 = vmatpush1.bf16.msra.mxu1 %v10643_v57  ;;  %v13468_v4 = vld [vmem:[%s14588_s4] ss:$0 sm:$0xff] }
 0x539   : > { %7807 = vmatprep.subr.bf16.mxu1 %v14713_v36  ;;  %v5160_v8 = vadd.f32 %v13468_v4, %v12896_v46 }
 0x53c   : > { %7808 = vmatpush1.bf16.msra.mxu1 %v10644_v37  ;;  %v5163_v37 = vadd.f32 %v13468_v4, %v12919_v48  ;;  %v5168_v48 = vadd.f32 %v13468_v4, %v13246_v23  ;;  %v10652_v23 = vld [vmem:[%s14589_s5 + $0x180] sm:$0xff]  }
 0x53d   : > { %7809 = vmatprep.subr.bf16.mxu1 %v14713_v36  ;;  %8331 = vmatpush1.bf16.msra.mxu0 %v10652_v23 }
 0x53e   : > { %8332 = vmatprep.subr.bf16.mxu0 %v14713_v36 }
 0x53f   : > { %5825 = vmatmul.mubr.bf16.gmra.mrb[104].mxu1 %v4217_v44  ;;  %v10650_v44 = vld [vmem:[%s14589_s5 + $0x50] sm:$0xff]  }
 0x540   : > { %7810 = vmatpush1.bf16.msra.mxu1 %v10645_v27 }
 0x541   : > { %7811 = vmatprep.subr.bf16.mxu1 %v14713_v36 }
 0x544   : > { %7812 = vmatpush1.bf16.msra.mxu1 %v10646_v60 }
 0x545   : > { %7813 = vmatprep.subr.bf16.mxu1 %v14713_v36 }
 0x548   : > { %7814 = vmatpush1.bf16.msra.mxu1 %v10647_v47 }
 0x549   : > { %7815 = vmatprep.subr.bf16.mxu1 %v14713_v36 }
 0x54c   : > { %7816 = vmatpush1.bf16.msra.mxu1 %v10648_v30 }
 0x54d   : > { %7817 = vmatprep.subr.bf16.mxu1 %v14713_v36 }
 0x550   : > { %7818 = vmatpush1.bf16.msra.mxu1 %v10649_v19 }
 0x551   : > { %7819 = vmatprep.subr.bf16.mxu1 %v14713_v36 }
 0x554   : > { %7820 = vmatpush1.bf16.msra.mxu1 %v10650_v44 }
 0x555   : > { %7821 = vmatprep.subr.bf16.mxu1 %v14713_v36 }
 0x57d   : > { %v13475_v33 = vpop.f32.mrb[176].mxu0 }
 0x57e   : > { %14902 = vst [vmem:[#allocation60_spill] sm:$0xff] %v13475_v33  ;;  %v13479_v47 = vpop.f32.mrb[177].mxu0 }
 0x57f   : > { %v13483_v25 = vpop.f32.mrb[178].mxu0 }
 0x580   : > { %v13486_v58 = vpop.f32.mrb[179].mxu0 }
 0x58a   : > { %v5690_v57 = vpop.f32.mrb[36].mxu1 }
 0x58b   : > { %v9734_v27 = vadd.f32 %v5690_v57, %v5160_v8  ;;  %v5692_v60 = vpop.f32.mrb[37].mxu1 }
 0x58c   : > { %v5693_v30 = vpop.f32.mrb[38].mxu1  ;;  %v5171_v60 = vadd.f32 %v13468_v4, %v13248_v34 }
 0x58d   : > { %v5868_v46 = vadd.f32 %v9734_v27, %v13354_v43  ;;  %v9736_v19 = vadd.f32 %v5693_v30, %v5163_v37  ;;  %v5695_v1 = vpop.f32.mrb[39].mxu1 }
 0x58f   : > { %v6010_v40 = vmul.f32 0.2, %v5868_v46  ;;  %v5871_v33 = vadd.f32 %v9736_v19, %v13358_v22  ;;  %v10651_v22 = vld [vmem:[%s14589_s5 + $0x58] sm:$0xff]  }
 0x590   : > { %7822 = vmatpush1.bf16.msra.mxu1 %v10651_v22 }
 0x591   : > { %v6011_v8 = vmul.f32 0.2, %v5871_v33  ;;  %v13490_v44 = vmax.f32 %v5868_v46, %v6010_v40  ;;  %7823 = vmatprep.subr.bf16.mxu1 %v14713_v36 }
 0x592   : > { %v5698_v57 = vpop.f32.mrb[40].mxu1 }
 0x593   : > { %v9738_v43 = vadd.f32 %v5698_v57, %v5168_v48  ;;  %v5700_v37 = vpop.f32.mrb[41].mxu1  ;;  %v6082_v1 = vmul.f32 %v13490_v44, %v13490_v44  ;;  %v13496_v27 = vmax.f32 %v5871_v33, %v6011_v8  ;;  %v5176_v8 = vadd.f32 %v13468_v4, %v13253_v63 }
 0x594   : > { %v5701_v40 = vpop.f32.mrb[42].mxu1 }
 0x595   : > { %v5876_v30 = vadd.f32 %v9738_v43, %v13352_v45  ;;  %v9740_v46 = vadd.f32 %v5701_v40, %v5171_v60  ;;  %v5703_v34 = vpop.f32.mrb[43].mxu1  ;;  %6118 = vadd.xlane.f32.xlu0 %v6082_v1  ;;  %v6083_v19 = vmul.f32 %v13496_v27, %v13496_v27  ;;  %v10653_v45 = vld [vmem:[%s14589_s5 + $0x188] sm:$0xff]   ;;  %v10654_v43 = vld [vmem:[%s14589_s5 + $0x60] sm:$0xff]   ;;  %v10655_v1 = vld [vmem:[%s14589_s5 + $0x190] sm:$0xff]  }
 0x596   : > { %8333 = vmatpush1.bf16.msra.mxu0 %v10653_v45  ;;  %7824 = vmatpush1.bf16.msra.mxu1 %v10654_v43 }
 0x597   : > { %v6012_v33 = vmul.f32 0.2, %v5876_v30  ;;  %v5879_v48 = vadd.f32 %v9740_v46, %v13356_v13  ;;  %6120 = vadd.xlane.f32.xlu1 %v6083_v19  ;;  %v5179_v13 = vadd.f32 %v13468_v4, %v13255_v20  ;;  %8334 = vmatprep.subr.bf16.mxu0 %v14713_v36 }
 0x598   : > { %7825 = vmatprep.subr.bf16.mxu1 %v14713_v36 }
 0x599   : > { %v6013_v57 = vmul.f32 0.2, %v5879_v48  ;;  %v13515_v60 = vmax.f32 %v5876_v30, %v6012_v33  ;;  %v10656_v33 = vld [vmem:[%s14589_s5 + $0x198] sm:$0xff]  }
 0x59a   : > { %v5706_v37 = vpop.f32.mrb[44].mxu1  ;;  %8335 = vmatpush1.bf16.msra.mxu0 %v10655_v1 }
 0x59b   : > { %v9742_v22 = vadd.f32 %v5706_v37, %v5176_v8  ;;  %v5708_v23 = vpop.f32.mrb[45].mxu1  ;;  %v6084_v63 = vmul.f32 %v13515_v60, %v13515_v60  ;;  %v13527_v40 = vmax.f32 %v5879_v48, %v6013_v57  ;;  %8336 = vmatprep.subr.bf16.mxu0 %v14713_v36  ;;  %v5184_v8 = vadd.f32 %v13468_v4, %v13260_v53 }
 0x59c   : > { %v5709_v30 = vpop.f32.mrb[46].mxu1  ;;  %v5187_v37 = vadd.f32 %v13468_v4, %v13262_v59 }
 0x59d   : > { %v5884_v20 = vadd.f32 %v9742_v22, %v13363_v15  ;;  %v9744_v46 = vadd.f32 %v5709_v30, %v5179_v13  ;;  %v5711_v34 = vpop.f32.mrb[47].mxu1  ;;  %6122 = vadd.xlane.f32.xlu0 %v6084_v63  ;;  %v6085_v19 = vmul.f32 %v13527_v40, %v13527_v40  ;;  %v10657_v15 = vld [vmem:[%s14589_s5 + $0x68] sm:$0xff]  }
 0x59e   : > { %7826 = vmatpush1.bf16.msra.mxu1 %v10657_v15  ;;  %8337 = vmatpush1.bf16.msra.mxu0 %v10656_v33  ;;  %v10659_v33 = vld [vmem:[%s14589_s5 + $0x1a8] sm:$0xff]  }
 0x59f   : > { %v6014_v48 = vmul.f32 0.2, %v5884_v20  ;;  %v5887_v45 = vadd.f32 %v9744_v46, %v13367_v39  ;;  %6124 = vadd.xlane.f32.xlu1 %v6085_v19  ;;  %v10658_v39 = vld [vmem:[%s14589_s5 + $0x1a0] sm:$0xff]   ;;  %7827 = vmatprep.subr.bf16.mxu1 %v14713_v36 }
 0x5a0   : > { %8338 = vmatprep.subr.bf16.mxu0 %v14713_v36 }
 0x5a1   : > { %v6015_v57 = vmul.f32 0.2, %v5887_v45  ;;  %v13544_v43 = vmax.f32 %v5884_v20, %v6014_v48 }
 0x5a2   : > { %v5714_v13 = vpop.f32.mrb[48].mxu1  ;;  %8339 = vmatpush1.bf16.msra.mxu0 %v10658_v39 }
 0x5a3   : > { %v9746_v1 = vadd.f32 %v5714_v13, %v5184_v8  ;;  %v5716_v22 = vpop.f32.mrb[49].mxu1  ;;  %v6086_v53 = vmul.f32 %v13544_v43, %v13544_v43  ;;  %v13554_v23 = vmax.f32 %v5887_v45, %v6015_v57  ;;  %8340 = vmatprep.subr.bf16.mxu0 %v14713_v36  ;;  %v5195_v8 = vadd.f32 %v13468_v4, %v13269_v11 }
 0x5a4   : > { %v5717_v63 = vpop.f32.mrb[50].mxu1 }
 0x5a5   : > { %v5892_v30 = vadd.f32 %v9746_v1, %v13361_v52  ;;  %v9748_v20 = vadd.f32 %v5717_v63, %v5187_v37  ;;  %v5719_v46 = vpop.f32.mrb[51].mxu1  ;;  %6126 = vadd.xlane.f32.xlu0 %v6086_v53  ;;  %v6087_v34 = vmul.f32 %v13554_v23, %v13554_v23  ;;  %v5192_v52 = vadd.f32 %v13468_v4, %v13267_v49  ;;  %v10661_v49 = vld [vmem:[%s14589_s5 + $0x1b0] sm:$0xff]  }
 0x5a6   : > { %8341 = vmatpush1.bf16.msra.mxu0 %v10659_v33 }
 0x5a7   : > { %v6016_v59 = vmul.f32 0.2, %v5892_v30  ;;  %v5895_v19 = vadd.f32 %v9748_v20, %v13365_v29  ;;  %6128 = vadd.xlane.f32.xlu1 %v6087_v34  ;;  %8342 = vmatprep.subr.bf16.mxu0 %v14713_v36  ;;  %v10662_v20 = vld [vmem:[%s14589_s5 + $0x1b8] sm:$0xff]  }
 0x5a9   : > { %v6017_v48 = vmul.f32 0.2, %v5895_v19  ;;  %v13567_v45 = vmax.f32 %v5892_v30, %v6016_v59 }
 0x5aa   : > { %v5722_v15 = vpop.f32.mrb[52].mxu1  ;;  %8343 = vmatpush1.bf16.msra.mxu0 %v10661_v49 }
 0x5ab   : > { %v9750_v57 = vadd.f32 %v5722_v15, %v5192_v52  ;;  %v5724_v29 = vpop.f32.mrb[53].mxu1  ;;  %v6088_v13 = vmul.f32 %v13567_v45, %v13567_v45  ;;  %v13573_v39 = vmax.f32 %v5895_v19, %v6017_v48  ;;  %8344 = vmatprep.subr.bf16.mxu0 %v14713_v36  ;;  %v5203_v19 = vadd.f32 %v13468_v4, %v13276_v0 }
 0x5ac   : > { %v5725_v37 = vpop.f32.mrb[54].mxu1 }
 0x5ad   : > { %v5900_v1 = vadd.f32 %v9750_v57, %v13372_v31  ;;  %v9752_v22 = vadd.f32 %v5725_v37, %v5195_v8  ;;  %v5727_v53 = vpop.f32.mrb[55].mxu1  ;;  %6130 = vadd.xlane.f32.xlu0 %v6088_v13  ;;  %v6089_v11 = vmul.f32 %v13573_v39, %v13573_v39  ;;  %v5200_v31 = vadd.f32 %v13468_v4, %v13274_v14  ;;  %v10663_v14 = vld [vmem:[%s14589_s5 + $0x1c0] sm:$0xff]   ;;  %v10660_v13 = vld [vmem:[%s14589_s5 + $0x70] sm:$0xff]  }
 0x5ae   : > { %8345 = vmatpush1.bf16.msra.mxu0 %v10662_v20  ;;  %7828 = vmatpush1.bf16.msra.mxu1 %v10660_v13  ;;  %v6479_v20 = vld [vmem:[#allocation2 + $0x9] sm:$0xff] }
 0x5af   : > { %v6018_v63 = vmul.f32 0.2, %v5900_v1  ;;  %v5903_v30 = vadd.f32 %v9752_v22, %v13376_v55  ;;  %6132 = vadd.xlane.f32.xlu1 %v6089_v11  ;;  %8346 = vmatprep.subr.bf16.mxu0 %v14713_v36  ;;  %v5211_v11 = vadd.f32 %v13468_v4, %v13283_v5  ;;  %v6407_v5 = vld [vmem:[#allocation2 + $0x8] sm:$0xff] }
 0x5b0   : > { %7829 = vmatprep.subr.bf16.mxu1 %v14713_v36 }
 0x5b1   : > { %v6019_v46 = vmul.f32 0.2, %v5903_v30  ;;  %v13589_v34 = vmax.f32 %v5900_v1, %v6018_v63  ;;  %v5208_v1 = vadd.f32 %v13468_v4, %v13281_v51 }
 0x5b2   : > { %v5730_v59 = vpop.f32.mrb[56].mxu1  ;;  %8347 = vmatpush1.bf16.msra.mxu0 %v10663_v14 }
 0x5b3   : > { %v9754_v33 = vadd.f32 %v5730_v59, %v5200_v31  ;;  %v5732_v55 = vpop.f32.mrb[57].mxu1  ;;  %v6090_v52 = vmul.f32 %v13589_v34, %v13589_v34  ;;  %v13595_v48 = vmax.f32 %v5903_v30, %v6019_v46  ;;  %8348 = vmatprep.subr.bf16.mxu0 %v14713_v36  ;;  %v6478_v30 = vld [vmem:[#allocation2 + $0x1] sm:$0xff] }
 0x5b4   : > { %v5733_v15 = vpop.f32.mrb[58].mxu1 }
 0x5b5   : > { %v5908_v8 = vadd.f32 %v9754_v33, %v13370_v2  ;;  %v9756_v57 = vadd.f32 %v5733_v15, %v5203_v19  ;;  %v5735_v29 = vpop.f32.mrb[59].mxu1  ;;  %6134 = vadd.xlane.f32.xlu0 %v6090_v52  ;;  %v6091_v0 = vmul.f32 %v13595_v48, %v13595_v48  ;;  %v10665_v2 = vld [vmem:[%s14589_s5 + $0x1c8] sm:$0xff]   ;;  %v10666_v19 = vld [vmem:[%s14589_s5 + $0x1d0] sm:$0xff]   ;;  %v6406_v33 = vld [vmem:[#allocation2] sm:$0xff]  ;;  %v6514_v52 = vpack.c.bf16 %v6479_v20, %v6478_v30 }
 0x5b6   : > { %8349 = vmatpush1.bf16.msra.mxu0 %v10665_v2  ;;  %v6442_v14 = vpack.c.bf16 %v6407_v5, %v6406_v33  ;;  %v10671_v33 = vld [vmem:[%s14589_s5 + $0x1e8] sm:$0xff]  }
 0x5b7   : > { %v6020_v49 = vmul.f32 0.2, %v5908_v8  ;;  %v5911_v37 = vadd.f32 %v9756_v57, %v13374_v54  ;;  %6136 = vadd.xlane.f32.xlu1 %v6091_v0  ;;  %v10664_v54 = vld [vmem:[%s14589_s5 + $0x78] sm:$0xff]   ;;  %8350 = vmatprep.subr.bf16.mxu0 %v14713_v36 }
 0x5b8   : > { %7830 = vmatpush1.bf16.msra.mxu1 %v10664_v54  ;;  %7831 = vmatprep.mubr.bf16.mxu1 %v6514_v52 }
 0x5b9   : > { %v6021_v22 = vmul.f32 0.2, %v5911_v37  ;;  %v13615_v53 = vmax.f32 %v5908_v8, %v6020_v49  ;;  %7976 = vmatprep.subr.bf16.mxu1 %v14713_v36  ;;  %v10668_v49 = vld [vmem:[%s14589_s5 + $0x1d8] sm:$0xff]  }
 0x5ba   : > { %v5738_v63 = vpop.f32.mrb[60].mxu1  ;;  %8351 = vmatpush1.bf16.msra.mxu0 %v10666_v19 }
 0x5bb   : > { %v9758_v31 = vadd.f32 %v5738_v63, %v5208_v1  ;;  %v5740_v46 = vpop.f32.mrb[61].mxu1  ;;  %v6092_v59 = vmul.f32 %v13615_v53, %v13615_v53  ;;  %v13624_v51 = vmax.f32 %v5911_v37, %v6021_v22  ;;  %7832 = vmatmul.mubr.bf16.vlgmr.msra.gmra.mrb[108].mxu1 %v6442_v14  ;;  %8352 = vmatprep.subr.bf16.mxu0 %v14713_v36 }
 0x5bc   : > { %v5741_v55 = vpop.f32.mrb[62].mxu1  ;;  %v5219_v22 = vadd.f32 %v13468_v4, %v13290_v3  ;;  %v5227_v14 = vadd.f32 %v13468_v4, %v13297_v56 }
 0x5bd   : > { %v5916_v15 = vadd.f32 %v9758_v31, %v13381_v16  ;;  %v9760_v8 = vadd.f32 %v5741_v55, %v5211_v11  ;;  %v5743_v57 = vpop.f32.mrb[63].mxu1  ;;  %6138 = vadd.xlane.f32.xlu0 %v6092_v59  ;;  %v6093_v29 = vmul.f32 %v13624_v51, %v13624_v51  ;;  %v5216_v16 = vadd.f32 %v13468_v4, %v13288_v62  ;;  %v10669_v62 = vld [vmem:[%s14589_s5 + $0x1e0] sm:$0xff]  }
 0x5be   : > { %8353 = vmatpush1.bf16.msra.mxu0 %v10668_v49 }
 0x5bf   : > { %v6022_v0 = vmul.f32 0.2, %v5916_v15  ;;  %v5919_v13 = vadd.f32 %v9760_v8, %v13385_v21  ;;  %6140 = vadd.xlane.f32.xlu1 %v6093_v29  ;;  %8354 = vmatprep.subr.bf16.mxu0 %v14713_v36 }
 0x5c1   : > { %v6023_v37 = vmul.f32 0.2, %v5919_v13  ;;  %v13641_v2 = vmax.f32 %v5916_v15, %v6022_v0 }
 0x5c2   : > { %v5746_v1 = vpop.f32.mrb[64].mxu1  ;;  %8355 = vmatpush1.bf16.msra.mxu0 %v10669_v62 }
 0x5c3   : > { %v9762_v21 = vadd.f32 %v5746_v1, %v5216_v16  ;;  %v5748_v54 = vpop.f32.mrb[65].mxu1  ;;  %v6094_v11 = vmul.f32 %v13641_v2, %v13641_v2  ;;  %v13647_v63 = vmax.f32 %v5919_v13, %v6023_v37  ;;  %8356 = vmatprep.subr.bf16.mxu0 %v14713_v36  ;;  %v10667_v16 = vld [vmem:[%s14589_s5 + $0x80] sm:$0xff]  }
 0x5c4   : > { %v5749_v30 = vpop.f32.mrb[66].mxu1  ;;  %7977 = vmatpush1.bf16.msra.mxu1 %v10667_v16 }
 0x5c5   : > { %v5924_v20 = vadd.f32 %v9762_v21, %v13379_v32  ;;  %v9764_v31 = vadd.f32 %v5749_v30, %v5219_v22  ;;  %v5751_v46 = vpop.f32.mrb[67].mxu1  ;;  %6142 = vadd.xlane.f32.xlu0 %v6094_v11  ;;  %v6095_v3 = vmul.f32 %v13647_v63, %v13647_v63  ;;  %v5224_v32 = vadd.f32 %v13468_v4, %v13295_v18  ;;  %v10672_v18 = vld [vmem:[%s14589_s5 + $0x1f0] sm:$0xff]  }
 0x5c6   : > { %8357 = vmatpush1.bf16.msra.mxu0 %v10671_v33  ;;  %7978 = vmatprep.subr.bf16.mxu1 %v14713_v36  ;;  %v5232_v22 = vadd.f32 %v13468_v4, %v13302_v50 }
 0x5c7   : > { %v6024_v59 = vmul.f32 0.2, %v5924_v20  ;;  %v5927_v19 = vadd.f32 %v9764_v31, %v13383_v6  ;;  %6144 = vadd.xlane.f32.xlu1 %v6095_v3  ;;  %8358 = vmatprep.subr.bf16.mxu0 %v14713_v36 }
 0x5c9   : > { %v6025_v5 = vmul.f32 0.2, %v5927_v19  ;;  %v13663_v55 = vmax.f32 %v5924_v20, %v6024_v59 }
 0x5ca   : > { %v5754_v52 = vpop.f32.mrb[68].mxu1  ;;  %8359 = vmatpush1.bf16.msra.mxu0 %v10672_v18 }
 0x5cb   : > { %v9766_v15 = vadd.f32 %v5754_v52, %v5224_v32  ;;  %v5756_v6 = vpop.f32.mrb[69].mxu1  ;;  %v6096_v8 = vmul.f32 %v13663_v55, %v13663_v55  ;;  %v13669_v57 = vmax.f32 %v5927_v19, %v6025_v5  ;;  %8360 = vmatprep.subr.bf16.mxu0 %v14713_v36 }
 0x5cc   : > { %v5757_v29 = vpop.f32.mrb[70].mxu1 }
 0x5cd   : > { %v5932_v0 = vadd.f32 %v9766_v15, %v13390_v42  ;;  %v9768_v13 = vadd.f32 %v5757_v29, %v5227_v14  ;;  %v5759_v49 = vpop.f32.mrb[71].mxu1  ;;  %6146 = vadd.xlane.f32.xlu0 %v6096_v8  ;;  %v6097_v56 = vmul.f32 %v13669_v57, %v13669_v57  ;;  %v10674_v42 = vld [vmem:[%s14589_s5 + $0x1f8] sm:$0xff]   ;;  %v5243_v15 = vadd.f32 %v13468_v4, %v13314_v12  ;;  %v10673_v12 = vld [vmem:[%s14589_s5 + $0x90] sm:$0xff]  }
 0x5ce   : > { %8361 = vmatpush1.bf16.msra.mxu0 %v10674_v42 }
 0x5cf   : > { %v6026_v37 = vmul.f32 0.2, %v5932_v0  ;;  %v5935_v1 = vadd.f32 %v9768_v13, %v13394_v61  ;;  %6148 = vadd.xlane.f32.xlu1 %v6097_v56  ;;  %v5235_v61 = vadd.f32 %v13468_v4, %v13304_v41  ;;  %v10670_v41 = vld [vmem:[%s14589_s5 + $0x88] sm:$0xff]  }
 0x5d0   : > { %7979 = vmatpush1.bf16.msra.mxu1 %v10670_v41 }
 0x5d1   : > { %v6027_v21 = vmul.f32 0.2, %v5935_v1  ;;  %v13689_v54 = vmax.f32 %v5932_v0, %v6026_v37  ;;  %7980 = vmatprep.subr.bf16.mxu1 %v14713_v36  ;;  %v5248_v37 = vadd.f32 %v13468_v4, %v13317_v28 }
 0x5d2   : > { %v5762_v11 = vpop.f32.mrb[72].mxu1 }
 0x5d3   : > { %v9770_v62 = vadd.f32 %v5762_v11, %v5232_v22  ;;  %v5764_v30 = vpop.f32.mrb[73].mxu1  ;;  %v6098_v20 = vmul.f32 %v13689_v54, %v13689_v54  ;;  %v13695_v31 = vmax.f32 %v5935_v1, %v6027_v21  ;;  %v5251_v22 = vadd.f32 %v13468_v4, %v13319_v26  ;;  %v10675_v26 = vld [vmem:[%s14589_s5 + $0x98] sm:$0xff]  }
 0x5d4   : > { %v5765_v46 = vpop.f32.mrb[74].mxu1  ;;  %7981 = vmatpush1.bf16.msra.mxu1 %v10673_v12  ;;  %v14907_v12 = vld [vmem:[#allocation42_spill] sm:$0xff] }
 0x5d5   : > { %v5940_v3 = vadd.f32 %v9770_v62, %v13388_v10  ;;  %v9772_v59 = vadd.f32 %v5765_v46, %v5235_v61  ;;  %v5767_v50 = vpop.f32.mrb[75].mxu1  ;;  %6150 = vadd.xlane.f32.xlu0 %v6098_v20  ;;  %v6099_v19 = vmul.f32 %v13695_v31, %v13695_v31  ;;  %v5240_v10 = vadd.f32 %v13468_v4, %v13312_v17 }
 0x5d6   : > { %7982 = vmatprep.subr.bf16.mxu1 %v14713_v36  ;;  %v14903_v50 = vld [vmem:[#allocation10_spill] sm:$0xff] }
 0x5d7   : > { %v6028_v33 = vmul.f32 0.2, %v5940_v3  ;;  %v5943_v32 = vadd.f32 %v9772_v59, %v13392_v24  ;;  %6152 = vadd.xlane.f32.xlu1 %v6099_v19  ;;  %v5256_v19 = vadd.f32 %v13468_v4, %v14903_v50 }
 0x5d8   : > { %7983 = vmatpush1.bf16.msra.mxu1 %v10675_v26 }
 0x5d9   : > { %v6029_v5 = vmul.f32 0.2, %v5943_v32  ;;  %v13707_v52 = vmax.f32 %v5940_v3, %v6028_v33  ;;  %7984 = vmatprep.subr.bf16.mxu1 %v14713_v36 }
 0x5da   : > { %v5770_v14 = vpop.f32.mrb[76].mxu1 }
 0x5db   : > { %v9774_v6 = vadd.f32 %v5770_v14, %v5240_v10  ;;  %v5772_v8 = vpop.f32.mrb[77].mxu1  ;;  %v6100_v18 = vmul.f32 %v13707_v52, %v13707_v52  ;;  %v13713_v24 = vmax.f32 %v5943_v32, %v6029_v5  ;;  %v14904_v32 = vld [vmem:[#allocation41_spill] sm:$0xff] }
 0x5dc   : > { %v5773_v29 = vpop.f32.mrb[78].mxu1  ;;  %v5259_v10 = vadd.f32 %v13468_v4, %v14904_v32  ;;  %v14905_v8 = vld [vmem:[#allocation53_spill] sm:$0xff]  ;;  %v10677_v32 = vld [vmem:[%s14589_s5 + $0xa8] sm:$0xff]  }
 0x5dd   : > { %v5948_v0 = vadd.f32 %v9774_v6, %v13399_v38  ;;  %v9776_v13 = vadd.f32 %v5773_v29, %v5243_v15  ;;  %v5775_v49 = vpop.f32.mrb[79].mxu1  ;;  %6154 = vadd.xlane.f32.xlu0 %v6100_v18  ;;  %v6101_v17 = vmul.f32 %v13713_v24, %v13713_v24 }
 0x5df   : > { %v6030_v56 = vmul.f32 0.2, %v5948_v0  ;;  %v5951_v16 = vadd.f32 %v9776_v13, %v13403_v35  ;;  %6156 = vadd.xlane.f32.xlu1 %v6101_v17  ;;  %v14906_v17 = vld [vmem:[#allocation55_spill] sm:$0xff] }
 0x5e1   : > { %v6031_v1 = vmul.f32 0.2, %v5951_v16  ;;  %v13724_v42 = vmax.f32 %v5948_v0, %v6030_v56 }
 0x5e2   : > { %v5778_v38 = vpop.f32.mrb[80].mxu1 }
 0x5e3   : > { %v9778_v21 = vadd.f32 %v5778_v38, %v5248_v37  ;;  %v5780_v35 = vpop.f32.mrb[81].mxu1  ;;  %v6102_v11 = vmul.f32 %v13724_v42, %v13724_v42  ;;  %v13731_v61 = vmax.f32 %v5951_v16, %v6031_v1  ;;  %v10676_v16 = vld [vmem:[%s14589_s5 + $0xa0] sm:$0xff]   ;;  %v5264_v37 = vadd.f32 %v13468_v4, %v14907_v12 }
 0x5e4   : > { %v5781_v62 = vpop.f32.mrb[82].mxu1  ;;  %7985 = vmatpush1.bf16.msra.mxu1 %v10676_v16 }
 0x5e5   : > { %v5956_v28 = vadd.f32 %v9778_v21, %v13397_v7  ;;  %v9780_v30 = vadd.f32 %v5781_v62, %v5251_v22  ;;  %v5783_v20 = vpop.f32.mrb[83].mxu1  ;;  %6158 = vadd.xlane.f32.xlu0 %v6102_v11  ;;  %v6103_v46 = vmul.f32 %v13731_v61, %v13731_v61  ;;  %7986 = vmatprep.subr.bf16.mxu1 %v14713_v36  ;;  %v14908_v21 = vld [vmem:[#allocation43_spill] sm:$0xff] }
 0x5e6   : > { %v5267_v35 = vadd.f32 %v13468_v4, %v14908_v21  ;;  %v14914_v21 = vld [vmem:[#allocation59_spill] sm:$0xff] }
 0x5e7   : > { %v6032_v3 = vmul.f32 0.2, %v5956_v28  ;;  %v5959_v59 = vadd.f32 %v9780_v30, %v13401_v9  ;;  %6160 = vadd.xlane.f32.xlu1 %v6103_v46  ;;  %v14909_v46 = vld [vmem:[#allocation52_spill] sm:$0xff] }
 0x5e8   : > { %7987 = vmatpush1.bf16.msra.mxu1 %v10677_v32 }
 0x5e9   : > { %v6033_v41 = vmul.f32 0.2, %v5959_v59  ;;  %v13742_v33 = vmax.f32 %v5956_v28, %v6032_v3  ;;  %7988 = vmatprep.subr.bf16.mxu1 %v14713_v36 }
 0x5ea   : > { %v5786_v7 = vpop.f32.mrb[84].mxu1 }
 0x5eb   : > { %v9782_v5 = vadd.f32 %v5786_v7, %v5256_v19  ;;  %v5788_v9 = vpop.f32.mrb[85].mxu1  ;;  %v6104_v14 = vmul.f32 %v13742_v33, %v13742_v33  ;;  %v13749_v15 = vmax.f32 %v5959_v59, %v6033_v41  ;;  %v14910_v41 = vld [vmem:[#allocation54_spill] sm:$0xff] }
 0x5ec   : > { %v5789_v6 = vpop.f32.mrb[86].mxu1 }
 0x5ed   : > { %v5964_v18 = vadd.f32 %v9782_v5, %v14905_v8  ;;  %v9784_v29 = vadd.f32 %v5789_v6, %v5259_v10  ;;  %v5791_v0 = vpop.f32.mrb[87].mxu1  ;;  %6162 = vadd.xlane.f32.xlu0 %v6104_v14  ;;  %v6105_v13 = vmul.f32 %v13749_v15, %v13749_v15  ;;  %v14911_v10 = vld [vmem:[#allocation44_spill] sm:$0xff]  ;;  %v14912_v8 = vld [vmem:[#allocation45_spill] sm:$0xff] }
 0x5ee   : > { %v5272_v5 = vadd.f32 %v13468_v4, %v14911_v10  ;;  %v14917_v10 = vld [vmem:[#allocation56_spill] sm:$0xff] }
 0x5ef   : > { %v6034_v49 = vmul.f32 0.2, %v5964_v18  ;;  %v5967_v56 = vadd.f32 %v9784_v29, %v14906_v17  ;;  %6164 = vadd.xlane.f32.xlu1 %v6105_v13 }
 0x5f1   : > { %v6035_v1 = vmul.f32 0.2, %v5967_v56  ;;  %v13760_v38 = vmax.f32 %v5964_v18, %v6034_v49  ;;  %v5275_v18 = vadd.f32 %v13468_v4, %v14912_v8 }
 0x5f2   : > { %v5794_v22 = vpop.f32.mrb[88].mxu1 }
 0x5f3   : > { %v9786_v11 = vadd.f32 %v5794_v22, %v5264_v37  ;;  %v5796_v62 = vpop.f32.mrb[89].mxu1  ;;  %v6106_v28 = vmul.f32 %v13760_v38, %v13760_v38  ;;  %v13767_v30 = vmax.f32 %v5967_v56, %v6035_v1  ;;  %v14913_v56 = vld [vmem:[#allocation57_spill] sm:$0xff] }
 0x5f4   : > { %v5797_v20 = vpop.f32.mrb[90].mxu1  ;;  %v14915_v62 = vld [vmem:[#allocation46_spill] sm:$0xff] }
 0x5f5   : > { %v5972_v3 = vadd.f32 %v9786_v11, %v14909_v46  ;;  %v9788_v59 = vadd.f32 %v5797_v20, %v5267_v35  ;;  %v5799_v26 = vpop.f32.mrb[91].mxu1  ;;  %6166 = vadd.xlane.f32.xlu0 %v6106_v28  ;;  %v6107_v50 = vmul.f32 %v13767_v30, %v13767_v30  ;;  %v10678_v11 = vld [vmem:[%s14589_s5 + $0xb0] sm:$0xff]   ;;  %v5280_v28 = vadd.f32 %v13468_v4, %v14915_v62 }
 0x5f6   : > { %7989 = vmatpush1.bf16.msra.mxu1 %v10678_v11 }
 0x5f7   : > { %v6036_v19 = vmul.f32 0.2, %v5972_v3  ;;  %v5975_v7 = vadd.f32 %v9788_v59, %v14910_v41  ;;  %6168 = vadd.xlane.f32.xlu1 %v6107_v50  ;;  %7990 = vmatprep.subr.bf16.mxu1 %v14713_v36  ;;  %v14916_v59 = vld [vmem:[#allocation47_spill] sm:$0xff] }
 0x5f8   : > { %v5283_v26 = vadd.f32 %v13468_v4, %v14916_v59 }
 0x5f9   : > { %v6037_v9 = vmul.f32 0.2, %v5975_v7  ;;  %v13778_v14 = vmax.f32 %v5972_v3, %v6036_v19 }
 0x5fa   : > { %v5802_v6 = vpop.f32.mrb[92].mxu1 }
 0x5fb   : > { %v9790_v29 = vadd.f32 %v5802_v6, %v5272_v5  ;;  %v5804_v0 = vpop.f32.mrb[93].mxu1  ;;  %v6108_v13 = vmul.f32 %v13778_v14, %v13778_v14  ;;  %v13785_v49 = vmax.f32 %v5975_v7, %v6037_v9 }
 0x5fc   : > { %v5805_v17 = vpop.f32.mrb[94].mxu1 }
 0x5fd   : > { %v5980_v16 = vadd.f32 %v9790_v29, %v14913_v56  ;;  %v9792_v12 = vadd.f32 %v5805_v17, %v5275_v18  ;;  %v5807_v37 = vpop.f32.mrb[95].mxu1  ;;  %6170 = vadd.xlane.f32.xlu0 %v6108_v13  ;;  %v6109_v1 = vmul.f32 %v13785_v49, %v13785_v49  ;;  %v14918_v29 = vld [vmem:[#allocation58_spill] sm:$0xff]  ;;  %v10679_v13 = vld [vmem:[%s14589_s5 + $0xb8] sm:$0xff]  }
 0x5fe   : > { %v14919_v17 = vld [vmem:[#allocation48_spill] sm:$0xff]  ;;  %7991 = vmatpush1.bf16.msra.mxu1 %v10679_v13 }
 0x5ff   : > { %v6038_v22 = vmul.f32 0.2, %v5980_v16  ;;  %v5983_v35 = vadd.f32 %v9792_v12, %v14914_v21  ;;  %6172 = vadd.xlane.f32.xlu1 %v6109_v1  ;;  %v5288_v56 = vadd.f32 %v13468_v4, %v14919_v17  ;;  %7992 = vmatprep.subr.bf16.mxu1 %v14713_v36  ;;  %v13820_v1 = vld [vmem:[%s14589_s5 + $0x200] sm:$0xff]  }
 0x600   : > { %9613 = vmatprep.subr.bf16.mxu0 %v13820_v1 }
 0x601   : > { %v6039_v20 = vmul.f32 0.2, %v5983_v35  ;;  %v13796_v46 = vmax.f32 %v5980_v16, %v6038_v22  ;;  %v14920_v22 = vld [vmem:[#allocation49_spill] sm:$0xff] }
 0x602   : > { %v5810_v3 = vpop.f32.mrb[96].mxu1  ;;  %v5291_v21 = vadd.f32 %v13468_v4, %v14920_v22 }
 0x603   : > { %v9794_v50 = vadd.f32 %v5810_v3, %v5280_v28  ;;  %v5812_v19 = vpop.f32.mrb[97].mxu1  ;;  %v6110_v41 = vmul.f32 %v13796_v46, %v13796_v46  ;;  %v13803_v7 = vmax.f32 %v5983_v35, %v6039_v20 }
 0x604   : > { %v5813_v32 = vpop.f32.mrb[98].mxu1 }
 0x605   : > { %v5988_v5 = vadd.f32 %v9794_v50, %v14917_v10  ;;  %v9796_v9 = vadd.f32 %v5813_v32, %v5283_v26  ;;  %v5815_v6 = vpop.f32.mrb[99].mxu1  ;;  %6174 = vadd.xlane.f32.xlu0 %v6110_v41  ;;  %v6111_v8 = vmul.f32 %v13803_v7, %v13803_v7  ;;  %v14921_v32 = vld [vmem:[#allocation50_spill] sm:$0xff] }
 0x606   : > { %v5296_v10 = vadd.f32 %v13468_v4, %v14921_v32 }
 0x607   : > { %v6040_v18 = vmul.f32 0.2, %v5988_v5  ;;  %v5991_v0 = vadd.f32 %v9796_v9, %v14918_v29  ;;  %6176 = vadd.xlane.f32.xlu1 %v6111_v8  ;;  %v14922_v8 = vld [vmem:[#allocation51_spill] sm:$0xff] }
 0x609   : > { %v6041_v16 = vmul.f32 0.2, %v5991_v0  ;;  %v13814_v12 = vmax.f32 %v5988_v5, %v6040_v18 }
 0x60a   : > { %v5818_v37 = vpop.f32.mrb[100].mxu1 }
 0x60b   : > { %v9798_v35 = vadd.f32 %v5818_v37, %v5288_v56  ;;  %v5820_v11 = vpop.f32.mrb[101].mxu1  ;;  %v6112_v62 = vmul.f32 %v13814_v12, %v13814_v12  ;;  %v13826_v28 = vmax.f32 %v5991_v0, %v6041_v16 }
 0x60c   : > { %v5821_v20 = vpop.f32.mrb[102].mxu1 }
 0x60d   : > { %v5996_v3 = vadd.f32 %v9798_v35, %v13479_v47  ;;  %v9800_v59 = vadd.f32 %v5821_v20, %v5291_v21  ;;  %v5823_v26 = vpop.f32.mrb[103].mxu1  ;;  %6178 = vadd.xlane.f32.xlu0 %v6112_v62  ;;  %v6113_v50 = vmul.f32 %v13826_v28, %v13826_v28  ;;  %v5299_v47 = vadd.f32 %v13468_v4, %v14922_v8  ;;  %v10680_v4 = vld [vmem:[%s14589_s5 + $0xc0] sm:$0xff]  }
 0x60e   : > { %7993 = vmatpush1.bf16.msra.mxu1 %v10680_v4 }
 0x60f   : > { %v6042_v19 = vmul.f32 0.2, %v5996_v3  ;;  %v5999_v41 = vadd.f32 %v9800_v59, %v13486_v58  ;;  %6180 = vadd.xlane.f32.xlu1 %v6113_v50  ;;  %v14923_v58 = vld [vmem:[#allocation60_spill] sm:$0xff]  ;;  %7994 = vmatprep.subr.bf16.mxu1 %v14713_v36 }
 0x611   : > { %v13835_v5 = vmax.f32 %v5996_v3, %v6042_v19  ;;  %v6043_v9 = vmul.f32 0.2, %v5999_v41 }
 0x612   : > { %v5826_v6 = vpop.f32.mrb[104].mxu1 }
 0x613   : > { %v13839_v18 = vmax.f32 %v5999_v41, %v6043_v9  ;;  %v9802_v29 = vadd.f32 %v5826_v6, %v5296_v10  ;;  %v5828_v0 = vpop.f32.mrb[105].mxu1  ;;  %v6114_v13 = vmul.f32 %v13835_v5, %v13835_v5  ;;  %v10686_v9 = vld [vmem:[%s14589_s5 + $0xd0] sm:$0xff]  }
 0x614   : > { %v5829_v17 = vpop.f32.mrb[106].mxu1 }
 0x615   : > { %v6004_v56 = vadd.f32 %v9802_v29, %v14923_v58  ;;  %v9804_v16 = vadd.f32 %v5829_v17, %v5299_v47  ;;  %v5831_v37 = vpop.f32.mrb[107].mxu1  ;;  %6182 = vadd.xlane.f32.xlu0 %v6114_v13  ;;  %v6115_v22 = vmul.f32 %v13839_v18, %v13839_v18  ;;  %v10689_v17 = vld [vmem:[%s14589_s5 + $0xd8] sm:$0xff]  }
 0x617   : > { %v6044_v21 = vmul.f32 0.2, %v6004_v56  ;;  %v6007_v35 = vadd.f32 %v9804_v16, %v13483_v25  ;;  %6184 = vadd.xlane.f32.xlu1 %v6115_v22  ;;  %v10682_v25 = vld [vmem:[%s14589_s5 + $0xc8] sm:$0xff]  }
 0x618   : > { %7995 = vmatpush1.bf16.msra.mxu1 %v10682_v25 }
 0x619   : > { %v6045_v11 = vmul.f32 0.2, %v6007_v35  ;;  %v13851_v62 = vmax.f32 %v6004_v56, %v6044_v21  ;;  %7996 = vmatprep.subr.bf16.mxu1 %v14713_v36 }
 0x61b   : > { %v6116_v20 = vmul.f32 %v13851_v62, %v13851_v62  ;;  %v13855_v3 = vmax.f32 %v6007_v35, %v6045_v11 }
 0x61c   : > { %7997 = vmatpush1.bf16.msra.mxu1 %v10686_v9 }
 0x61d   : > { %6186 = vadd.xlane.f32.xlu0 %v6116_v20  ;;  %v6117_v59 = vmul.f32 %v13855_v3, %v13855_v3  ;;  %7998 = vmatprep.subr.bf16.mxu1 %v14713_v36 }
 0x61f   : > { %6188 = vadd.xlane.f32.xlu1 %v6117_v59 }
 0x620   : > { %7999 = vmatpush1.bf16.msra.mxu1 %v10689_v17 }
 0x621   : > { %8000 = vmatprep.subr.bf16.mxu1 %v14713_v36 }
 0x622   : > { %v6119_v26 = vpop.xlane.xlu0 %6118 }
 0x623   : > { %v6190_v50 = vmul.f32 0.125, %v6119_v26 }
 0x624   : > { %v6121_v19 = vpop.xlane.xlu1 %6120 }
 0x625   : > { %v6226_v41 = vadd.f32 1e-08, %v6190_v50  ;;  %v6191_v32 = vmul.f32 0.125, %v6121_v19  ;;  %v10692_v50 = vld [vmem:[%s14589_s5 + $0xe0] sm:$0xff]  }
 0x626   : > { %8001 = vmatpush1.bf16.msra.mxu1 %v10692_v50 }
 0x627   : > { %10784 = vrsqrt.f32 %v6226_v41  ;;  %v6227_v10 = vadd.f32 1e-08, %v6191_v32  ;;  %8002 = vmatprep.subr.bf16.mxu1 %v14713_v36 }
 0x629   : > { %10786 = vrsqrt.f32 %v6227_v10 }
 0x62a   : > { %v6123_v6 = vpop.xlane.xlu0 %6122 }
 0x62b   : > { %v6192_v8 = vmul.f32 0.125, %v6123_v6 }
 0x62c   : > { %v6125_v47 = vpop.xlane.xlu1 %6124 }
 0x62d   : > { %v6228_v29 = vadd.f32 1e-08, %v6192_v8  ;;  %v6193_v0 = vmul.f32 0.125, %v6125_v47 }
 0x62f   : > { %10788 = vrsqrt.f32 %v6228_v29  ;;  %v6229_v13 = vadd.f32 1e-08, %v6193_v0 }
 0x631   : > { %v10785_v58 = vpop.eup %10784  ;;  %10790 = vrsqrt.f32 %v6229_v13 }
 0x632   : > { %v6298_v56 = vmul.f32 %v10785_v58, %v13490_v44  ;;  %v6127_v16 = vpop.xlane.xlu0 %6126 }
 0x633   : > { %v10787_v37 = vpop.eup %10786  ;;  %v6194_v22 = vmul.f32 0.125, %v6127_v16 }
 0x634   : > { %v6334_v21 = vsel %vm11962_vm14, %v6298_v56, 0.0  ;;  %v6299_v35 = vmul.f32 %v10787_v37, %v13496_v27  ;;  %v6129_v11 = vpop.xlane.xlu1 %6128 }
 0x635   : > { %6370 = vst [vmem:[#allocation2 + $0x13] sm:$0xff] %v6334_v21  ;;  %v6230_v20 = vadd.f32 1e-08, %v6194_v22  ;;  %v6195_v59 = vmul.f32 0.125, %v6129_v11 }
 0x636   : > { %v6335_v26 = vsel %vm11966_vm15, %v6299_v35, 0.0  ;;  %v10694_v35 = vld [vmem:[%s14589_s5 + $0xf0] sm:$0xff]  }
 0x637   : > { %6371 = vst [vmem:[#allocation2 + $0x1b] sm:$0xff] %v6335_v26  ;;  %10792 = vrsqrt.f32 %v6230_v20  ;;  %v6231_v44 = vadd.f32 1e-08, %v6195_v59 }
 0x639   : > { %v10789_v19 = vpop.eup %10788  ;;  %10794 = vrsqrt.f32 %v6231_v44 }
 0x63a   : > { %v6300_v41 = vmul.f32 %v10789_v19, %v13515_v60  ;;  %v6131_v27 = vpop.xlane.xlu0 %6130 }
 0x63b   : > { %v10791_v32 = vpop.eup %10790  ;;  %v6196_v10 = vmul.f32 0.125, %v6131_v27 }
 0x63c   : > { %v6336_v6 = vsel %vm12003_vm2, %v6300_v41, 0.0  ;;  %v6301_v8 = vmul.f32 %v10791_v32, %v13527_v40  ;;  %v6133_v47 = vpop.xlane.xlu1 %6132  ;;  %v6480_v13 = vld [vmem:[#allocation2 + $0x11] sm:$0xff]  ;;  %v10693_v40 = vld [vmem:[%s14589_s5 + $0xe8] sm:$0xff]  }
 0x63d   : > { %6372 = vst [vmem:[#allocation2 + $0x23] sm:$0xff] %v6336_v6  ;;  %v6232_v29 = vadd.f32 1e-08, %v6196_v10  ;;  %v6197_v0 = vmul.f32 0.125, %v6133_v47  ;;  %v6408_v60 = vld [vmem:[#allocation2 + $0x10] sm:$0xff]  ;;  %8003 = vmatpush1.bf16.msra.mxu1 %v10693_v40 }
 0x63e   : > { %v6337_v58 = vsel %vm12031_vm7, %v6301_v8, 0.0  ;;  %v6481_v56 = vld [vmem:[#allocation2 + $0x19] sm:$0xff]  ;;  %8004 = vmatprep.subr.bf16.mxu1 %v14713_v36 }
 0x63f   : > { %v6409_v16 = vld [vmem:[#allocation2 + $0x18] sm:$0xff]  ;;  %6373 = vst [vmem:[#allocation2 + $0x2b] sm:$0xff] %v6337_v58  ;;  %10796 = vrsqrt.f32 %v6232_v29  ;;  %v6233_v37 = vadd.f32 1e-08, %v6197_v0  ;;  %v6515_v22 = vpack.c.bf16 %v6481_v56, %v6480_v13 }
 0x640   : > { %v6443_v4 = vpack.c.bf16 %v6409_v16, %v6408_v60 }
 0x641   : > { %v10793_v21 = vpop.eup %10792  ;;  %10798 = vrsqrt.f32 %v6233_v37  ;;  %7839 = vmatprep.mubr.bf16.mxu1 %v6515_v22  ;;  %8005 = vmatpush1.bf16.msra.mxu1 %v10694_v35 }
 0x642   : > { %v6302_v11 = vmul.f32 %v10793_v21, %v13544_v43  ;;  %7840 = vmatmul.mubr.bf16.gmra.mrb[112].mxu1 %v6443_v4  ;;  %v6135_v20 = vpop.xlane.xlu0 %6134  ;;  %v10695_v43 = vld [vmem:[%s14589_s5 + $0xf8] sm:$0xff]   ;;  %8006 = vmatprep.subr.bf16.mxu1 %v14713_v36 }
 0x643   : > { %v10795_v59 = vpop.eup %10794  ;;  %v6198_v25 = vmul.f32 0.125, %v6135_v20 }
 0x644   : > { %v6338_v44 = vsel %vm12079_vm11, %v6302_v11, 0.0  ;;  %v6303_v50 = vmul.f32 %v10795_v59, %v13554_v23  ;;  %v6137_v19 = vpop.xlane.xlu1 %6136  ;;  %v6482_v32 = vld [vmem:[#allocation2 + $0x21] sm:$0xff] }
 0x645   : > { %6374 = vst [vmem:[#allocation2 + $0x33] sm:$0xff] %v6338_v44  ;;  %v6234_v41 = vadd.f32 1e-08, %v6198_v25  ;;  %v6199_v27 = vmul.f32 0.125, %v6137_v19  ;;  %v6410_v8 = vld [vmem:[#allocation2 + $0x20] sm:$0xff]  ;;  %8007 = vmatpush1.bf16.msra.mxu1 %v10695_v43  ;;  %v10683_v44 = vld [vmem:[%s14589_s5 + $0x208] sm:$0xff]  }
 0x646   : > { %v6339_v9 = vsel %vm12104_vm1, %v6303_v50, 0.0  ;;  %v6483_v6 = vld [vmem:[#allocation2 + $0x29] sm:$0xff]  ;;  %8153 = vmatprep.subr.bf16.mxu1 %v14713_v36 }
 0x647   : > { %v6411_v47 = vld [vmem:[#allocation2 + $0x28] sm:$0xff]  ;;  %6375 = vst [vmem:[#allocation2 + $0x3b] sm:$0xff] %v6339_v9  ;;  %10800 = vrsqrt.f32 %v6234_v41  ;;  %v6235_v23 = vadd.f32 1e-08, %v6199_v27  ;;  %v6516_v29 = vpack.c.bf16 %v6483_v6, %v6482_v32 }
 0x648   : > { %v6444_v0 = vpack.c.bf16 %v6411_v47, %v6410_v8  ;;  %v6910_v16 = vld [vmem:[#allocation2 + $0x25] sm:$0xff]  ;;  %v10684_v47 = vld [vmem:[%s14589_s5 + $0x210] sm:$0xff]  }
 0x649   : > { %v10797_v13 = vpop.eup %10796  ;;  %10802 = vrsqrt.f32 %v6235_v23  ;;  %7847 = vmatprep.mubr.bf16.mxu1 %v6516_v29  ;;  %v6838_v35 = vld [vmem:[#allocation2 + $0x24] sm:$0xff] }
 0x64a   : > { %v6304_v17 = vmul.f32 %v10797_v13, %v13567_v45  ;;  %7848 = vmatmul.mubr.bf16.gmra.mrb[116].mxu1 %v6444_v0  ;;  %v6139_v58 = vpop.xlane.xlu0 %6138  ;;  %v14931_v50 = vld [vmem:[#allocation18_spill] sm:$0xff]  ;;  %v14933_v13 = vld [vmem:[#allocation19_spill] sm:$0xff] }
 0x64b   : > { %v10799_v56 = vpop.eup %10798  ;;  %v6200_v60 = vmul.f32 0.125, %v6139_v58  ;;  %vm14932_vm14 = vnez %v14931_v50  ;;  %vm14934_vm15 = vnez %v14933_v13 }
 0x64c   : > { %v6340_v22 = vsel %vm12156_vm6, %v6304_v17, 0.0  ;;  %v6305_v4 = vmul.f32 %v10799_v56, %v13573_v39  ;;  %v6141_v40 = vpop.xlane.xlu1 %6140  ;;  %v6911_v21 = vld [vmem:[#allocation2 + $0x2d] sm:$0xff] }
 0x64d   : > { %v6839_v11 = vld [vmem:[#allocation2 + $0x2c] sm:$0xff]  ;;  %6376 = vst [vmem:[#allocation2 + $0x43] sm:$0xff] %v6340_v22  ;;  %v6236_v20 = vadd.f32 1e-08, %v6200_v60  ;;  %v6201_v59 = vmul.f32 0.125, %v6141_v40  ;;  %v6946_v45 = vpack.c.bf16 %v6911_v21, %v6910_v16  ;;  %v10685_v21 = vld [vmem:[%s14589_s5 + $0x218] sm:$0xff]  }
 0x64e   : > { %v6874_v25 = vpack.c.bf16 %v6839_v11, %v6838_v35  ;;  %v6484_v26 = vld [vmem:[#allocation2 + $0x31] sm:$0xff]  ;;  %v6341_v19 = vsel %vm14932_vm14, %v6305_v4, 0.0  ;;  %v6485_v41 = vld [vmem:[#allocation2 + $0x39] sm:$0xff] }
 0x64f   : > { %v6412_v27 = vld [vmem:[#allocation2 + $0x30] sm:$0xff]  ;;  %v6413_v39 = vld [vmem:[#allocation2 + $0x38] sm:$0xff]  ;;  %6377 = vst [vmem:[#allocation2 + $0x4b] sm:$0xff] %v6341_v19  ;;  %10804 = vrsqrt.f32 %v6236_v20  ;;  %v6237_v32 = vadd.f32 1e-08, %v6201_v59  ;;  %8362 = vmatprep.mubr.bf16.mxu0 %v6946_v45  ;;  %v6517_v43 = vpack.c.bf16 %v6485_v41, %v6484_v26  ;;  %v10687_v41 = vld [vmem:[%s14589_s5 + $0x220] sm:$0xff]  }
 0x650   : > { %v6445_v10 = vpack.c.bf16 %v6413_v39, %v6412_v27  ;;  %8363 = vmatmul.mubr.bf16.vlgmr.msra.gmra.mrb[180].mxu0 %v6874_v25  ;;  %v6912_v0 = vld [vmem:[#allocation2 + $0x35] sm:$0xff] }
 0x651   : > { %v10801_v9 = vpop.eup %10800  ;;  %10806 = vrsqrt.f32 %v6237_v32  ;;  %7855 = vmatprep.mubr.bf16.mxu1 %v6517_v43  ;;  %9614 = vmatpush3.bf16.msra.mxu0 %v13820_v1  ;;  %v6840_v1 = vld [vmem:[#allocation2 + $0x34] sm:$0xff]  ;;  %v14937_v43 = vld [vmem:[#allocation21_spill] sm:$0xff] }
 0x652   : > { %v6306_v6 = vmul.f32 %v10801_v9, %v13589_v34  ;;  %7856 = vmatmul.mubr.bf16.gmra.mrb[120].mxu1 %v6445_v10  ;;  %v6143_v8 = vpop.xlane.xlu0 %6142  ;;  %9615 = vmatprep.subr.bf16.mxu0 %v10683_v44  ;;  %v14935_v35 = vld [vmem:[#allocation20_spill] sm:$0xff]  ;;  %vm14938_vm7 = vnez %v14937_v43 }
 0x653   : > { %v10803_v23 = vpop.eup %10802  ;;  %v6202_v29 = vmul.f32 0.125, %v6143_v8  ;;  %vm14936_vm2 = vnez %v14935_v35  ;;  %v10690_v35 = vld [vmem:[%s14589_s5 + $0x230] sm:$0xff]   ;;  %v10691_v43 = vld [vmem:[%s14589_s5 + $0x238] sm:$0xff]  }
 0x654   : > { %v6342_v17 = vsel %vm14934_vm15, %v6306_v6, 0.0  ;;  %v6307_v58 = vmul.f32 %v10803_v23, %v13595_v48  ;;  %v6145_v56 = vpop.xlane.xlu1 %6144  ;;  %v6913_v60 = vld [vmem:[#allocation2 + $0x3d] sm:$0xff] }
 0x655   : > { %v6841_v16 = vld [vmem:[#allocation2 + $0x3c] sm:$0xff]  ;;  %6378 = vst [vmem:[#allocation2 + $0x53] sm:$0xff] %v6342_v17  ;;  %v6238_v34 = vadd.f32 1e-08, %v6202_v29  ;;  %v6203_v37 = vmul.f32 0.125, %v6145_v56  ;;  %v6947_v22 = vpack.c.bf16 %v6913_v60, %v6912_v0  ;;  %9616 = vmatpush3.bf16.msra.mxu0 %v10683_v44  ;;  %v14939_v56 = vld [vmem:[#allocation22_spill] sm:$0xff] }
 0x656   : > { %v6875_v4 = vpack.c.bf16 %v6841_v16, %v6840_v1  ;;  %v6486_v40 = vld [vmem:[#allocation2 + $0x41] sm:$0xff]  ;;  %v6343_v11 = vsel %vm14936_vm2, %v6307_v58, 0.0  ;;  %v6487_v20 = vld [vmem:[#allocation2 + $0x49] sm:$0xff]  ;;  %9617 = vmatprep.subr.bf16.mxu0 %v10684_v47  ;;  %vm14940_vm11 = vnez %v14939_v56 }
 0x657   : > { %v6414_v48 = vld [vmem:[#allocation2 + $0x40] sm:$0xff]  ;;  %v6415_v59 = vld [vmem:[#allocation2 + $0x48] sm:$0xff]  ;;  %6379 = vst [vmem:[#allocation2 + $0x5b] sm:$0xff] %v6343_v11  ;;  %10808 = vrsqrt.f32 %v6238_v34  ;;  %v6239_v45 = vadd.f32 1e-08, %v6203_v37  ;;  %8370 = vmatprep.mubr.bf16.mxu0 %v6947_v22  ;;  %v6518_v25 = vpack.c.bf16 %v6487_v20, %v6486_v40 }
 0x658   : > { %v6446_v26 = vpack.c.bf16 %v6415_v59, %v6414_v48  ;;  %8371 = vmatmul.mubr.bf16.gmra.mrb[184].mxu0 %v6875_v4  ;;  %v6914_v32 = vld [vmem:[#allocation2 + $0x45] sm:$0xff]  ;;  %v14941_v59 = vld [vmem:[#allocation23_spill] sm:$0xff] }
 0x659   : > { %v10805_v50 = vpop.eup %10804  ;;  %10810 = vrsqrt.f32 %v6239_v45  ;;  %7863 = vmatprep.mubr.bf16.mxu1 %v6518_v25  ;;  %9618 = vmatpush3.bf16.msra.mxu0 %v10684_v47  ;;  %v6842_v47 = vld [vmem:[#allocation2 + $0x44] sm:$0xff]  ;;  %vm14942_vm1 = vnez %v14941_v59 }
 0x65a   : > { %v6308_v44 = vmul.f32 %v10805_v50, %v13615_v53  ;;  %7864 = vmatmul.mubr.bf16.gmra.mrb[124].mxu1 %v6446_v26  ;;  %v6147_v19 = vpop.xlane.xlu0 %6146  ;;  %9619 = vmatprep.subr.bf16.mxu0 %v10685_v21  ;;  %v10688_v58 = vld [vmem:[%s14589_s5 + $0x228] sm:$0xff]  }
 0x65b   : > { %v10807_v27 = vpop.eup %10806  ;;  %v6204_v39 = vmul.f32 0.125, %v6147_v19 }
 0x65c   : > { %v6344_v10 = vsel %vm14938_vm7, %v6308_v44, 0.0  ;;  %v6309_v9 = vmul.f32 %v10807_v27, %v13624_v51  ;;  %v6149_v6 = vpop.xlane.xlu1 %6148  ;;  %v6915_v8 = vld [vmem:[#allocation2 + $0x4d] sm:$0xff] }
 0x65d   : > { %v6843_v23 = vld [vmem:[#allocation2 + $0x4c] sm:$0xff]  ;;  %6380 = vst [vmem:[#allocation2 + $0x63] sm:$0xff] %v6344_v10  ;;  %v6240_v53 = vadd.f32 1e-08, %v6204_v39  ;;  %v6205_v29 = vmul.f32 0.125, %v6149_v6  ;;  %v6948_v0 = vpack.c.bf16 %v6915_v8, %v6914_v32  ;;  %9620 = vmatpush3.bf16.msra.mxu0 %v10685_v21  ;;  %v14943_v10 = vld [vmem:[#allocation24_spill] sm:$0xff] }
 0x65e   : > { %v6876_v13 = vpack.c.bf16 %v6843_v23, %v6842_v47  ;;  %v6488_v17 = vld [vmem:[#allocation2 + $0x51] sm:$0xff]  ;;  %v6345_v60 = vsel %vm14940_vm11, %v6309_v9, 0.0  ;;  %v6489_v1 = vld [vmem:[#allocation2 + $0x59] sm:$0xff]  ;;  %9621 = vmatprep.subr.bf16.mxu0 %v10687_v41  ;;  %vm14944_vm6 = vnez %v14943_v10 }
 0x65f   : > { %v6416_v51 = vld [vmem:[#allocation2 + $0x50] sm:$0xff]  ;;  %v6417_v16 = vld [vmem:[#allocation2 + $0x58] sm:$0xff]  ;;  %6381 = vst [vmem:[#allocation2 + $0x6b] sm:$0xff] %v6345_v60  ;;  %10812 = vrsqrt.f32 %v6240_v53  ;;  %v6241_v34 = vadd.f32 1e-08, %v6205_v29  ;;  %8378 = vmatprep.mubr.bf16.mxu0 %v6948_v0  ;;  %v6519_v37 = vpack.c.bf16 %v6489_v1, %v6488_v17  ;;  %v14945_v60 = vld [vmem:[#allocation25_spill] sm:$0xff] }
 0x660   : > { %v6447_v22 = vpack.c.bf16 %v6417_v16, %v6416_v51  ;;  %8379 = vmatmul.mubr.bf16.gmra.mrb[188].mxu0 %v6876_v13  ;;  %v6916_v48 = vld [vmem:[#allocation2 + $0x55] sm:$0xff]  ;;  %vm14946_vm10 = vnez %v14945_v60 }
 0x661   : > { %v10809_v4 = vpop.eup %10808  ;;  %10814 = vrsqrt.f32 %v6241_v34  ;;  %7871 = vmatprep.mubr.bf16.mxu1 %v6519_v37  ;;  %9622 = vmatpush3.bf16.msra.mxu0 %v10687_v41  ;;  %v6844_v44 = vld [vmem:[#allocation2 + $0x54] sm:$0xff] }
 0x662   : > { %v6310_v40 = vmul.f32 %v10809_v4, %v13641_v2  ;;  %7872 = vmatmul.mubr.bf16.gmra.mrb[128].mxu1 %v6447_v22  ;;  %v6151_v21 = vpop.xlane.xlu0 %6150  ;;  %9623 = vmatprep.subr.bf16.mxu0 %v10688_v58 }
 0x663   : > { %v10811_v11 = vpop.eup %10810  ;;  %v6206_v20 = vmul.f32 0.125, %v6151_v21 }
 0x664   : > { %v6346_v45 = vsel %vm14942_vm1, %v6310_v40, 0.0  ;;  %v6311_v25 = vmul.f32 %v10811_v11, %v13647_v63  ;;  %v6153_v26 = vpop.xlane.xlu1 %6152  ;;  %v6917_v50 = vld [vmem:[#allocation2 + $0x5d] sm:$0xff]  ;;  %v14947_v11 = vld [vmem:[#allocation26_spill] sm:$0xff] }
 0x665   : > { %v6845_v19 = vld [vmem:[#allocation2 + $0x5c] sm:$0xff]  ;;  %6382 = vst [vmem:[#allocation2 + $0x73] sm:$0xff] %v6346_v45  ;;  %v6242_v2 = vadd.f32 1e-08, %v6206_v20  ;;  %v6207_v41 = vmul.f32 0.125, %v6153_v26  ;;  %v6949_v27 = vpack.c.bf16 %v6917_v50, %v6916_v48  ;;  %9624 = vmatpush3.bf16.msra.mxu0 %v10688_v58  ;;  %vm14948_vm5 = vnez %v14947_v11 }
 0x666   : > { %v6877_v39 = vpack.c.bf16 %v6845_v19, %v6844_v44  ;;  %v6490_v32 = vld [vmem:[#allocation2 + $0x61] sm:$0xff]  ;;  %v6347_v9 = vsel %vm14944_vm6, %v6311_v25, 0.0  ;;  %v6491_v6 = vld [vmem:[#allocation2 + $0x69] sm:$0xff]  ;;  %9625 = vmatprep.subr.bf16.mxu0 %v10690_v35 }
 0x667   : > { %v6418_v63 = vld [vmem:[#allocation2 + $0x60] sm:$0xff]  ;;  %v6419_v8 = vld [vmem:[#allocation2 + $0x68] sm:$0xff]  ;;  %6383 = vst [vmem:[#allocation2 + $0x7b] sm:$0xff] %v6347_v9  ;;  %10816 = vrsqrt.f32 %v6242_v2  ;;  %v6243_v47 = vadd.f32 1e-08, %v6207_v41  ;;  %8386 = vmatprep.mubr.bf16.mxu0 %v6949_v27  ;;  %v6520_v23 = vpack.c.bf16 %v6491_v6, %v6490_v32 }
 0x668   : > { %v6448_v53 = vpack.c.bf16 %v6419_v8, %v6418_v63  ;;  %8387 = vmatmul.mubr.bf16.gmra.mrb[192].mxu0 %v6877_v39  ;;  %v6918_v56 = vld [vmem:[#allocation2 + $0x65] sm:$0xff]  ;;  %v14949_v39 = vld [vmem:[#allocation27_spill] sm:$0xff] }
 0x669   : > { %v10813_v29 = vpop.eup %10812  ;;  %10818 = vrsqrt.f32 %v6243_v47  ;;  %7879 = vmatprep.mubr.bf16.mxu1 %v6520_v23  ;;  %9626 = vmatpush3.bf16.msra.mxu0 %v10690_v35  ;;  %v6846_v37 = vld [vmem:[#allocation2 + $0x64] sm:$0xff]  ;;  %vm14950_vm13 = vnez %v14949_v39 }
 0x66a   : > { %v6312_v0 = vmul.f32 %v10813_v29, %v13663_v55  ;;  %7880 = vmatmul.mubr.bf16.gmra.mrb[132].mxu1 %v6448_v53  ;;  %v6155_v13 = vpop.xlane.xlu0 %6154  ;;  %9627 = vmatprep.subr.bf16.mxu0 %v10691_v43 }
 0x66b   : > { %v10815_v17 = vpop.eup %10814  ;;  %v6208_v58 = vmul.f32 0.125, %v6155_v13 }
 0x66c   : > { %v6348_v1 = vsel %vm14946_vm10, %v6312_v0, 0.0  ;;  %v6313_v51 = vmul.f32 %v10815_v17, %v13669_v57  ;;  %v6157_v16 = vpop.xlane.xlu1 %6156  ;;  %v6919_v34 = vld [vmem:[#allocation2 + $0x6d] sm:$0xff] }
 0x66d   : > { %v6847_v22 = vld [vmem:[#allocation2 + $0x6c] sm:$0xff]  ;;  %6384 = vst [vmem:[#allocation2 + $0x83] sm:$0xff] %v6348_v1  ;;  %v6244_v4 = vadd.f32 1e-08, %v6208_v58  ;;  %v6209_v40 = vmul.f32 0.125, %v6157_v16  ;;  %v6950_v21 = vpack.c.bf16 %v6919_v34, %v6918_v56  ;;  %9628 = vmatpush3.bf16.msra.mxu0 %v10691_v43 }
 0x66e   : > { %v6878_v55 = vpack.c.bf16 %v6847_v22, %v6846_v37  ;;  %v6492_v35 = vld [vmem:[#allocation2 + $0x71] sm:$0xff]  ;;  %v6349_v20 = vsel %vm14948_vm5, %v6313_v51, 0.0  ;;  %v6493_v48 = vld [vmem:[#allocation2 + $0x79] sm:$0xff] }
 0x66f   : > { %v6420_v59 = vld [vmem:[#allocation2 + $0x70] sm:$0xff]  ;;  %v6421_v45 = vld [vmem:[#allocation2 + $0x78] sm:$0xff]  ;;  %6385 = vst [vmem:[#allocation2 + $0x8b] sm:$0xff] %v6349_v20  ;;  %10820 = vrsqrt.f32 %v6244_v4  ;;  %v6245_v57 = vadd.f32 1e-08, %v6209_v40  ;;  %8394 = vmatprep.mubr.bf16.mxu0 %v6950_v21  ;;  %v6521_v25 = vpack.c.bf16 %v6493_v48, %v6492_v35  ;;  %v14952_v4 = vld [vmem:[#allocation29_spill] sm:$0xff] }
 0x670   : > { %v6449_v26 = vpack.c.bf16 %v6421_v45, %v6420_v59  ;;  %8395 = vmatmul.mubr.bf16.gmra.mrb[196].mxu0 %v6878_v55  ;;  %v6920_v27 = vld [vmem:[#allocation2 + $0x75] sm:$0xff] }
 0x671   : > { %v10817_v50 = vpop.eup %10816  ;;  %10822 = vrsqrt.f32 %v6245_v57  ;;  %7887 = vmatprep.mubr.bf16.mxu1 %v6521_v25  ;;  %v6848_v6 = vld [vmem:[#allocation2 + $0x74] sm:$0xff]  ;;  %v14954_v25 = vld [vmem:[#allocation30_spill] sm:$0xff] }
 0x672   : > { %v6314_v44 = vmul.f32 %v10817_v50, %v13689_v54  ;;  %7888 = vmatmul.mubr.bf16.gmra.mrb[136].mxu1 %v6449_v26  ;;  %v6159_v19 = vpop.xlane.xlu0 %6158  ;;  %vm14955_vm9 = vnez %v14954_v25 }
 0x673   : > { %v10819_v2 = vpop.eup %10818  ;;  %v6210_v41 = vmul.f32 0.125, %v6159_v19 }
 0x674   : > { %v6350_v32 = vsel %vm14950_vm13, %v6314_v44, 0.0  ;;  %v6315_v43 = vmul.f32 %v10819_v2, %v13695_v31  ;;  %v6161_v10 = vpop.xlane.xlu1 %6160  ;;  %v6921_v9 = vld [vmem:[#allocation2 + $0x7d] sm:$0xff] }
 0x675   : > { %v6849_v63 = vld [vmem:[#allocation2 + $0x7c] sm:$0xff]  ;;  %6386 = vst [vmem:[#allocation2 + $0x93] sm:$0xff] %v6350_v32  ;;  %v6246_v8 = vadd.f32 1e-08, %v6210_v41  ;;  %v6211_v47 = vmul.f32 0.125, %v6161_v10  ;;  %v6951_v23 = vpack.c.bf16 %v6921_v9, %v6920_v27 }
 0x676   : > { %v6879_v53 = vpack.c.bf16 %v6849_v63, %v6848_v6  ;;  %v6494_v54 = vld [vmem:[#allocation2 + $0x81] sm:$0xff]  ;;  %v6351_v0 = vsel %vm12626_vm8, %v6315_v43, 0.0  ;;  %v6495_v13 = vld [vmem:[#allocation2 + $0x89] sm:$0xff]  ;;  %vm14953_vm8 = vnez %v14952_v4 }
 0x677   : > { %v6422_v17 = vld [vmem:[#allocation2 + $0x80] sm:$0xff]  ;;  %v6423_v58 = vld [vmem:[#allocation2 + $0x88] sm:$0xff]  ;;  %6387 = vst [vmem:[#allocation2 + $0x9b] sm:$0xff] %v6351_v0  ;;  %10824 = vrsqrt.f32 %v6246_v8  ;;  %v6247_v56 = vadd.f32 1e-08, %v6211_v47  ;;  %8402 = vmatprep.mubr.bf16.mxu0 %v6951_v23  ;;  %v6522_v31 = vpack.c.bf16 %v6495_v13, %v6494_v54  ;;  %v14956_v6 = vld [vmem:[#allocation31_spill] sm:$0xff] }
 0x678   : > { %v6450_v60 = vpack.c.bf16 %v6423_v58, %v6422_v17  ;;  %8403 = vmatmul.mubr.bf16.gmra.mrb[200].mxu0 %v6879_v53  ;;  %v6922_v22 = vld [vmem:[#allocation2 + $0x85] sm:$0xff]  ;;  %vm14957_vm14 = vnez %v14956_v6  ;;  %v14958_v58 = vld [vmem:[#allocation32_spill] sm:$0xff] }
 0x679   : > { %v10821_v1 = vpop.eup %10820  ;;  %10826 = vrsqrt.f32 %v6247_v56  ;;  %7895 = vmatprep.mubr.bf16.mxu1 %v6522_v31  ;;  %v6850_v11 = vld [vmem:[#allocation2 + $0x84] sm:$0xff]  ;;  %vm14959_vm15 = vnez %v14958_v58  ;;  %v14966_v58 = vld [vmem:[#allocation36_spill] sm:$0xff] }
 0x67a   : > { %v6316_v51 = vmul.f32 %v10821_v1, %v13707_v52  ;;  %7896 = vmatmul.mubr.bf16.gmra.mrb[140].mxu1 %v6450_v60  ;;  %v6163_v16 = vpop.xlane.xlu0 %6162  ;;  %vm14967_vm1 = vnez %v14966_v58 }
 0x67b   : > { %v10823_v34 = vpop.eup %10822  ;;  %v6212_v37 = vmul.f32 0.125, %v6163_v16 }
 0x67c   : > { %v6352_v40 = vsel %vm14953_vm8, %v6316_v51, 0.0  ;;  %v6317_v21 = vmul.f32 %v10823_v34, %v13713_v24  ;;  %v6165_v55 = vpop.xlane.xlu1 %6164  ;;  %v6923_v35 = vld [vmem:[#allocation2 + $0x8d] sm:$0xff] }
 0x67d   : > { %v6851_v20 = vld [vmem:[#allocation2 + $0x8c] sm:$0xff]  ;;  %6388 = vst [vmem:[#allocation2 + $0xa3] sm:$0xff] %v6352_v40  ;;  %v6248_v48 = vadd.f32 1e-08, %v6212_v37  ;;  %v6213_v59 = vmul.f32 0.125, %v6165_v55  ;;  %v6952_v45 = vpack.c.bf16 %v6923_v35, %v6922_v22  ;;  %v14960_v55 = vld [vmem:[#allocation33_spill] sm:$0xff] }
 0x67e   : > { %v6880_v57 = vpack.c.bf16 %v6851_v20, %v6850_v11  ;;  %v6496_v52 = vld [vmem:[#allocation2 + $0x91] sm:$0xff]  ;;  %v6353_v26 = vsel %vm14955_vm9, %v6317_v21, 0.0  ;;  %v6497_v50 = vld [vmem:[#allocation2 + $0x99] sm:$0xff]  ;;  %vm14961_vm2 = vnez %v14960_v55 }
 0x67f   : > { %v6424_v44 = vld [vmem:[#allocation2 + $0x90] sm:$0xff]  ;;  %v6425_v19 = vld [vmem:[#allocation2 + $0x98] sm:$0xff]  ;;  %6389 = vst [vmem:[#allocation2 + $0xab] sm:$0xff] %v6353_v26  ;;  %10828 = vrsqrt.f32 %v6248_v48  ;;  %v6249_v2 = vadd.f32 1e-08, %v6213_v59  ;;  %8410 = vmatprep.mubr.bf16.mxu0 %v6952_v45  ;;  %v6523_v24 = vpack.c.bf16 %v6497_v50, %v6496_v52  ;;  %v14962_v50 = vld [vmem:[#allocation34_spill] sm:$0xff] }
 0x680   : > { %v6451_v41 = vpack.c.bf16 %v6425_v19, %v6424_v44  ;;  %8411 = vmatmul.mubr.bf16.gmra.mrb[204].mxu0 %v6880_v57  ;;  %v6924_v9 = vld [vmem:[#allocation2 + $0x95] sm:$0xff]  ;;  %vm14963_vm7 = vnez %v14962_v50  ;;  %v14968_v55 = vld [vmem:[#allocation37_spill] sm:$0xff]  ;;  %v14970_v50 = vld [vmem:[#allocation38_spill] sm:$0xff] }
 0x681   : > { %v10825_v27 = vpop.eup %10824  ;;  %10830 = vrsqrt.f32 %v6249_v2  ;;  %7903 = vmatprep.mubr.bf16.mxu1 %v6523_v24  ;;  %v6852_v53 = vld [vmem:[#allocation2 + $0x94] sm:$0xff]  ;;  %vm14969_vm6 = vnez %v14968_v55  ;;  %vm14971_vm10 = vnez %v14970_v50 }
 0x682   : > { %v6318_v39 = vmul.f32 %v10825_v27, %v13724_v42  ;;  %7904 = vmatmul.mubr.bf16.gmra.mrb[144].mxu1 %v6451_v41  ;;  %v6167_v32 = vpop.xlane.xlu0 %6166 }
 0x683   : > { %v10827_v43 = vpop.eup %10826  ;;  %v6214_v10 = vmul.f32 0.125, %v6167_v32 }
 0x684   : > { %v6354_v63 = vsel %vm14957_vm14, %v6318_v39, 0.0  ;;  %v6319_v8 = vmul.f32 %v10827_v43, %v13731_v61  ;;  %v6169_v47 = vpop.xlane.xlu1 %6168  ;;  %v6925_v23 = vld [vmem:[#allocation2 + $0x9d] sm:$0xff] }
 0x685   : > { %v6853_v54 = vld [vmem:[#allocation2 + $0x9c] sm:$0xff]  ;;  %6390 = vst [vmem:[#allocation2 + $0xb3] sm:$0xff] %v6354_v63  ;;  %v6250_v29 = vadd.f32 1e-08, %v6214_v10  ;;  %v6215_v0 = vmul.f32 0.125, %v6169_v47  ;;  %v6953_v13 = vpack.c.bf16 %v6925_v23, %v6924_v9  ;;  %v14964_v63 = vld [vmem:[#allocation35_spill] sm:$0xff] }
 0x686   : > { %v6881_v17 = vpack.c.bf16 %v6853_v54, %v6852_v53  ;;  %v6498_v42 = vld [vmem:[#allocation2 + $0xa1] sm:$0xff]  ;;  %v6355_v56 = vsel %vm14959_vm15, %v6319_v8, 0.0  ;;  %v6499_v31 = vld [vmem:[#allocation2 + $0xa9] sm:$0xff]  ;;  %vm14965_vm11 = vnez %v14964_v63 }
 0x687   : > { %v6426_v60 = vld [vmem:[#allocation2 + $0xa0] sm:$0xff]  ;;  %v6427_v1 = vld [vmem:[#allocation2 + $0xa8] sm:$0xff]  ;;  %6391 = vst [vmem:[#allocation2 + $0xbb] sm:$0xff] %v6355_v56  ;;  %10832 = vrsqrt.f32 %v6250_v29  ;;  %v6251_v51 = vadd.f32 1e-08, %v6215_v0  ;;  %8418 = vmatprep.mubr.bf16.mxu0 %v6953_v13  ;;  %v6524_v61 = vpack.c.bf16 %v6499_v31, %v6498_v42 }
 0x688   : > { %v6452_v16 = vpack.c.bf16 %v6427_v1, %v6426_v60  ;;  %8419 = vmatmul.mubr.bf16.gmra.mrb[208].mxu0 %v6881_v17  ;;  %v6926_v21 = vld [vmem:[#allocation2 + $0xa5] sm:$0xff]  ;;  %v6987_v63 = vld [vmem:[#allocation2 + $0x4e] sm:$0xff] }
 0x689   : > { %v10829_v34 = vpop.eup %10828  ;;  %10834 = vrsqrt.f32 %v6251_v51  ;;  %7911 = vmatprep.mubr.bf16.mxu1 %v6524_v61  ;;  %v6854_v59 = vld [vmem:[#allocation2 + $0xa4] sm:$0xff] }
 0x68a   : > { %v6320_v37 = vmul.f32 %v10829_v34, %v13742_v33  ;;  %7912 = vmatmul.mubr.bf16.gmra.mrb[148].mxu1 %v6452_v16  ;;  %v6171_v22 = vpop.xlane.xlu0 %6170 }
 0x68b   : > { %v10831_v4 = vpop.eup %10830  ;;  %v6216_v40 = vmul.f32 0.125, %v6171_v22 }
 0x68c   : > { %v6356_v35 = vsel %vm14961_vm2, %v6320_v37, 0.0  ;;  %v6321_v11 = vmul.f32 %v10831_v4, %v13749_v15  ;;  %v6173_v20 = vpop.xlane.xlu1 %6172  ;;  %v6927_v48 = vld [vmem:[#allocation2 + $0xad] sm:$0xff] }
 0x68d   : > { %v6855_v45 = vld [vmem:[#allocation2 + $0xac] sm:$0xff]  ;;  %6392 = vst [vmem:[#allocation2 + $0xc3] sm:$0xff] %v6356_v35  ;;  %v6252_v57 = vadd.f32 1e-08, %v6216_v40  ;;  %v6217_v52 = vmul.f32 0.125, %v6173_v20  ;;  %v6954_v25 = vpack.c.bf16 %v6927_v48, %v6926_v21 }
 0x68e   : > { %v6882_v26 = vpack.c.bf16 %v6855_v45, %v6854_v59  ;;  %v6500_v33 = vld [vmem:[#allocation2 + $0xb1] sm:$0xff]  ;;  %v6357_v44 = vsel %vm14963_vm7, %v6321_v11, 0.0  ;;  %v6501_v19 = vld [vmem:[#allocation2 + $0xb9] sm:$0xff] }
 0x68f   : > { %v6428_v2 = vld [vmem:[#allocation2 + $0xb0] sm:$0xff]  ;;  %v6429_v24 = vld [vmem:[#allocation2 + $0xb8] sm:$0xff]  ;;  %6393 = vst [vmem:[#allocation2 + $0xcb] sm:$0xff] %v6357_v44  ;;  %10836 = vrsqrt.f32 %v6252_v57  ;;  %v6253_v41 = vadd.f32 1e-08, %v6217_v52  ;;  %8426 = vmatprep.mubr.bf16.mxu0 %v6954_v25  ;;  %v6525_v15 = vpack.c.bf16 %v6501_v19, %v6500_v33  ;;  %v6982_v33 = vld [vmem:[#allocation2 + $0x26] sm:$0xff] }
 0x690   : > { %v6453_v27 = vpack.c.bf16 %v6429_v24, %v6428_v2  ;;  %8427 = vmatmul.mubr.bf16.gmra.mrb[212].mxu0 %v6882_v26  ;;  %v6928_v6 = vld [vmem:[#allocation2 + $0xb5] sm:$0xff] }
 0x691   : > { %v10833_v39 = vpop.eup %10832  ;;  %10838 = vrsqrt.f32 %v6253_v41  ;;  %7919 = vmatprep.mubr.bf16.mxu1 %v6525_v15  ;;  %v6856_v54 = vld [vmem:[#allocation2 + $0xb4] sm:$0xff] }
 0x692   : > { %v6322_v32 = vmul.f32 %v10833_v39, %v13760_v38  ;;  %7920 = vmatmul.mubr.bf16.gmra.mrb[152].mxu1 %v6453_v27  ;;  %v6175_v43 = vpop.xlane.xlu0 %6174  ;;  %v6983_v21 = vld [vmem:[#allocation2 + $0x2e] sm:$0xff] }
 0x693   : > { %v10835_v10 = vpop.eup %10834  ;;  %v6218_v9 = vmul.f32 0.125, %v6175_v43  ;;  %v7018_v2 = vpack.c.bf16 %v6983_v21, %v6982_v33 }
 0x694   : > { %v6358_v8 = vsel %vm14965_vm11, %v6322_v32, 0.0  ;;  %v6323_v47 = vmul.f32 %v10835_v10, %v13767_v30  ;;  %v6177_v23 = vpop.xlane.xlu1 %6176  ;;  %v6929_v53 = vld [vmem:[#allocation2 + $0xbd] sm:$0xff] }
 0x695   : > { %v6857_v29 = vld [vmem:[#allocation2 + $0xbc] sm:$0xff]  ;;  %6394 = vst [vmem:[#allocation2 + $0xd3] sm:$0xff] %v6358_v8  ;;  %v6254_v0 = vadd.f32 1e-08, %v6218_v9  ;;  %v6219_v13 = vmul.f32 0.125, %v6177_v23  ;;  %v6955_v17 = vpack.c.bf16 %v6929_v53, %v6928_v6  ;;  %v14972_v8 = vld [vmem:[#allocation39_spill] sm:$0xff] }
 0x696   : > { %v6883_v42 = vpack.c.bf16 %v6857_v29, %v6856_v54  ;;  %v6502_v38 = vld [vmem:[#allocation2 + $0xc1] sm:$0xff]  ;;  %v6359_v56 = vsel %vm14967_vm1, %v6323_v47, 0.0  ;;  %v6503_v31 = vld [vmem:[#allocation2 + $0xc9] sm:$0xff]  ;;  %vm14973_vm5 = vnez %v14972_v8 }
 0x697   : > { %v6430_v60 = vld [vmem:[#allocation2 + $0xc0] sm:$0xff]  ;;  %v6431_v1 = vld [vmem:[#allocation2 + $0xc8] sm:$0xff]  ;;  %6395 = vst [vmem:[#allocation2 + $0xdb] sm:$0xff] %v6359_v56  ;;  %10840 = vrsqrt.f32 %v6254_v0  ;;  %v6255_v51 = vadd.f32 1e-08, %v6219_v13  ;;  %8434 = vmatprep.mubr.bf16.mxu0 %v6955_v17  ;;  %v6526_v30 = vpack.c.bf16 %v6503_v31, %v6502_v38  ;;  %v6984_v0 = vld [vmem:[#allocation2 + $0x36] sm:$0xff] }
 0x698   : > { %v6454_v61 = vpack.c.bf16 %v6431_v1, %v6430_v60  ;;  %8435 = vmatmul.mubr.bf16.gmra.mrb[216].mxu0 %v6883_v42  ;;  %v6930_v40 = vld [vmem:[#allocation2 + $0xc5] sm:$0xff]  ;;  %v14974_v42 = vld [vmem:[#allocation40_spill] sm:$0xff] }
 0x699   : > { %v10837_v16 = vpop.eup %10836  ;;  %10842 = vrsqrt.f32 %v6255_v51  ;;  %7927 = vmatprep.mubr.bf16.mxu1 %v6526_v30  ;;  %v6858_v59 = vld [vmem:[#allocation2 + $0xc4] sm:$0xff]  ;;  %vm14975_vm13 = vnez %v14974_v42 }
 0x69a   : > { %v6324_v34 = vmul.f32 %v10837_v16, %v13778_v14  ;;  %7928 = vmatmul.mubr.bf16.gmra.mrb[156].mxu1 %v6454_v61  ;;  %v6179_v37 = vpop.xlane.xlu0 %6178  ;;  %v6985_v6 = vld [vmem:[#allocation2 + $0x3e] sm:$0xff]  ;;  %v6986_v17 = vld [vmem:[#allocation2 + $0x46] sm:$0xff] }
 0x69b   : > { %v10839_v22 = vpop.eup %10838  ;;  %v6220_v4 = vmul.f32 0.125, %v6179_v37  ;;  %v7019_v38 = vpack.c.bf16 %v6985_v6, %v6984_v0  ;;  %v7020_v56 = vpack.c.bf16 %v6987_v63, %v6986_v17  ;;  %v6630_v17 = vld [vmem:[#allocation2 + $0x52] sm:$0xff] }
 0x69c   : > { %v6360_v35 = vsel %vm14969_vm6, %v6324_v34, 0.0  ;;  %v6325_v11 = vmul.f32 %v10839_v22, %v13785_v49  ;;  %v6181_v20 = vpop.xlane.xlu1 %6180  ;;  %v6931_v48 = vld [vmem:[#allocation2 + $0xcd] sm:$0xff]  ;;  %v6989_v22 = vld [vmem:[#allocation2 + $0x5e] sm:$0xff] }
 0x69d   : > { %v6859_v45 = vld [vmem:[#allocation2 + $0xcc] sm:$0xff]  ;;  %6396 = vst [vmem:[#allocation2 + $0xe3] sm:$0xff] %v6360_v35  ;;  %v6256_v57 = vadd.f32 1e-08, %v6220_v4  ;;  %v6221_v52 = vmul.f32 0.125, %v6181_v20  ;;  %v6956_v25 = vpack.c.bf16 %v6931_v48, %v6930_v40  ;;  %v14976_v40 = vld [vmem:[#allocation4_spill] sm:$0xff] }
 0x69e   : > { %v6884_v14 = vpack.c.bf16 %v6859_v45, %v6858_v59  ;;  %v6504_v26 = vld [vmem:[#allocation2 + $0xd1] sm:$0xff]  ;;  %v6361_v44 = vsel %vm14971_vm10, %v6325_v11, 0.0  ;;  %v6505_v19 = vld [vmem:[#allocation2 + $0xd9] sm:$0xff]  ;;  %vm14977_vm8 = vnez %v14976_v40  ;;  %v6990_v45 = vld [vmem:[#allocation2 + $0x66] sm:$0xff] }
 0x69f   : > { %v6432_v24 = vld [vmem:[#allocation2 + $0xd0] sm:$0xff]  ;;  %v6433_v41 = vld [vmem:[#allocation2 + $0xd8] sm:$0xff]  ;;  %6397 = vst [vmem:[#allocation2 + $0xeb] sm:$0xff] %v6361_v44  ;;  %10844 = vrsqrt.f32 %v6256_v57  ;;  %v6257_v49 = vadd.f32 1e-08, %v6221_v52  ;;  %8442 = vmatprep.mubr.bf16.mxu0 %v6956_v25  ;;  %v6527_v15 = vpack.c.bf16 %v6505_v19, %v6504_v26  ;;  %v14978_v57 = vld [vmem:[#allocation5_spill] sm:$0xff] }
 0x6a0   : > { %v6455_v27 = vpack.c.bf16 %v6433_v41, %v6432_v24  ;;  %8443 = vmatmul.mubr.bf16.gmra.mrb[220].mxu0 %v6884_v14  ;;  %v6991_v4 = vld [vmem:[#allocation2 + $0x6e] sm:$0xff]  ;;  %v6988_v48 = vld [vmem:[#allocation2 + $0x56] sm:$0xff]  ;;  %vm14979_vm9 = vnez %v14978_v57  ;;  %v6993_v41 = vld [vmem:[#allocation2 + $0x7e] sm:$0xff] }
 0x6a1   : > { %v10841_v39 = vpop.eup %10840  ;;  %10846 = vrsqrt.f32 %v6257_v49  ;;  %7935 = vmatprep.mubr.bf16.mxu1 %v6527_v15  ;;  %9629 = vmatprep.mubr.bf16.mxu0 %v7018_v2  ;;  %v7021_v52 = vpack.c.bf16 %v6989_v22, %v6988_v48  ;;  %v7022_v14 = vpack.c.bf16 %v6991_v4, %v6990_v45  ;;  %v6622_v22 = vld [vmem:[#allocation2 + $0x12] sm:$0xff]  ;;  %v7001_v4 = vld [vmem:[#allocation2 + $0xbe] sm:$0xff] }
 0x6a2   : > { %v6326_v32 = vmul.f32 %v10841_v39, %v13796_v46  ;;  %7936 = vmatmul.mubr.bf16.gmra.mrb[160].mxu1 %v6455_v27  ;;  %v6183_v43 = vpop.xlane.xlu0 %6182  ;;  %v6995_v39 = vld [vmem:[#allocation2 + $0x8e] sm:$0xff]  ;;  %v6550_v40 = vld [vmem:[#allocation2 + $0x2] sm:$0xff] }
 0x6a3   : > { %v10843_v10 = vpop.eup %10842  ;;  %v6222_v9 = vmul.f32 0.125, %v6183_v43  ;;  %v10696_v57 = vld [vmem:[%s14589_s5 + $0x100] sm:$0xff]  }
 0x6a4   : > { %v6362_v47 = vsel %vm14973_vm5, %v6326_v32, 0.0  ;;  %v6327_v23 = vmul.f32 %v10843_v10, %v13803_v7  ;;  %v6185_v53 = vpop.xlane.xlu1 %6184  ;;  %v6506_v13 = vld [vmem:[#allocation2 + $0xe1] sm:$0xff]  ;;  %v6992_v32 = vld [vmem:[#allocation2 + $0x76] sm:$0xff] }
 0x6a5   : > { %6398 = vst [vmem:[#allocation2 + $0xf3] sm:$0xff] %v6362_v47  ;;  %v6258_v54 = vadd.f32 1e-08, %v6222_v9  ;;  %v6223_v29 = vmul.f32 0.125, %v6185_v53  ;;  %v6434_v31 = vld [vmem:[#allocation2 + $0xe0] sm:$0xff]  ;;  %v7023_v63 = vpack.c.bf16 %v6993_v41, %v6992_v32 }
 0x6a6   : > { %v6363_v46 = vsel %vm14975_vm13, %v6327_v23, 0.0  ;;  %v6507_v58 = vld [vmem:[#allocation2 + $0xe9] sm:$0xff] }
 0x6a7   : > { %v6435_v60 = vld [vmem:[#allocation2 + $0xe8] sm:$0xff]  ;;  %6399 = vst [vmem:[#allocation2 + $0xfb] sm:$0xff] %v6363_v46  ;;  %10848 = vrsqrt.f32 %v6258_v54  ;;  %v6259_v1 = vadd.f32 1e-08, %v6223_v29  ;;  %v6528_v51 = vpack.c.bf16 %v6507_v58, %v6506_v13  ;;  %v6997_v13 = vld [vmem:[#allocation2 + $0x9e] sm:$0xff] }
 0x6a8   : > { %v6456_v7 = vpack.c.bf16 %v6435_v60, %v6434_v31  ;;  %9630 = vmatmul.mubr.bf16.vlgmr.msra.gmra.mrb[224].mxu0 %v7019_v38  ;;  %v6994_v10 = vld [vmem:[#allocation2 + $0x86] sm:$0xff]  ;;  %v6999_v38 = vld [vmem:[#allocation2 + $0xae] sm:$0xff]  ;;  %v6623_v58 = vld [vmem:[#allocation2 + $0x1a] sm:$0xff] }
 0x6a9   : > { %v10845_v30 = vpop.eup %10844  ;;  %10850 = vrsqrt.f32 %v6259_v1  ;;  %7943 = vmatprep.mubr.bf16.mxu1 %v6528_v51  ;;  %9633 = vmatprep.mubr.bf16.mxu0 %v7020_v56  ;;  %v7024_v53 = vpack.c.bf16 %v6995_v39, %v6994_v10  ;;  %v6996_v56 = vld [vmem:[#allocation2 + $0x96] sm:$0xff]  ;;  %v6998_v60 = vld [vmem:[#allocation2 + $0xa6] sm:$0xff] }
 0x6aa   : > { %v6328_v61 = vmul.f32 %v10845_v30, %v13814_v12  ;;  %7944 = vmatmul.mubr.bf16.gmra.mrb[164].mxu1 %v6456_v7  ;;  %v6187_v16 = vpop.xlane.xlu0 %6186  ;;  %v7025_v7 = vpack.c.bf16 %v6997_v13, %v6996_v56  ;;  %v6629_v10 = vld [vmem:[#allocation2 + $0x4a] sm:$0xff]  ;;  %v6632_v56 = vld [vmem:[#allocation2 + $0x62] sm:$0xff]  ;;  %v6635_v1 = vld [vmem:[#allocation2 + $0x7a] sm:$0xff] }
 0x6ab   : > { %v10847_v34 = vpop.eup %10846  ;;  %v6224_v37 = vmul.f32 0.125, %v6187_v16  ;;  %v10702_v13 = vld [vmem:[%s14589_s5 + $0x130] sm:$0xff]  }
 0x6ac   : > { %v6364_v21 = vsel %vm14977_vm8, %v6328_v61, 0.0  ;;  %v6329_v55 = vmul.f32 %v10847_v34, %v13826_v28  ;;  %v6189_v35 = vpop.xlane.xlu1 %6188  ;;  %v6508_v59 = vld [vmem:[#allocation2 + $0xf1] sm:$0xff]  ;;  %v7026_v34 = vpack.c.bf16 %v6999_v38, %v6998_v60  ;;  %v10705_v60 = vld [vmem:[%s14589_s5 + $0x148] sm:$0xff]  }
 0x6ad   : > { %6400 = vst [vmem:[#allocation2 + $0x103] sm:$0xff] %v6364_v21  ;;  %v6260_v11 = vadd.f32 1e-08, %v6224_v37  ;;  %v6225_v20 = vmul.f32 0.125, %v6189_v35  ;;  %v6436_v26 = vld [vmem:[#allocation2 + $0xf0] sm:$0xff] }
 0x6ae   : > { %v6365_v12 = vsel %vm14979_vm9, %v6329_v55, 0.0  ;;  %v6509_v25 = vld [vmem:[#allocation2 + $0xf9] sm:$0xff]  ;;  %v6551_v21 = vld [vmem:[#allocation2 + $0xa] sm:$0xff] }
 0x6af   : > { %v6437_v33 = vld [vmem:[#allocation2 + $0xf8] sm:$0xff]  ;;  %6401 = vst [vmem:[#allocation2 + $0x10b] sm:$0xff] %v6365_v12  ;;  %10852 = vrsqrt.f32 %v6260_v11  ;;  %v6261_v50 = vadd.f32 1e-08, %v6225_v20  ;;  %v6529_v44 = vpack.c.bf16 %v6509_v25, %v6508_v59  ;;  %v7003_v55 = vld [vmem:[#allocation2 + $0xce] sm:$0xff]  ;;  %v7002_v20 = vld [vmem:[#allocation2 + $0xc6] sm:$0xff]  ;;  %v6586_v48 = vpack.c.bf16 %v6551_v21, %v6550_v40 }
 0x6b0   : > { %v6457_v28 = vpack.c.bf16 %v6437_v33, %v6436_v26  ;;  %9634 = vmatmul.mubr.bf16.gmra.mrb[228].mxu0 %v7021_v52  ;;  %v7000_v35 = vld [vmem:[#allocation2 + $0xb6] sm:$0xff]  ;;  %v6625_v59 = vld [vmem:[#allocation2 + $0x2a] sm:$0xff]  ;;  %v7028_v45 = vpack.c.bf16 %v7003_v55, %v7002_v20  ;;  %v6624_v12 = vld [vmem:[#allocation2 + $0x22] sm:$0xff] }
 0x6b1   : > { %v10849_v19 = vpop.eup %10848  ;;  %10854 = vrsqrt.f32 %v6261_v50  ;;  %7951 = vmatprep.mubr.bf16.mxu1 %v6529_v44  ;;  %9637 = vmatprep.mubr.bf16.mxu0 %v7022_v14  ;;  %v7027_v11 = vpack.c.bf16 %v7001_v4, %v7000_v35  ;;  %v6659_v52 = vpack.c.bf16 %v6625_v59, %v6624_v12  ;;  %v7005_v25 = vld [vmem:[#allocation2 + $0xde] sm:$0xff]  ;;  %v10697_v14 = vld [vmem:[%s14589_s5 + $0x108] sm:$0xff]   ;;  %v7004_v33 = vld [vmem:[#allocation2 + $0xd6] sm:$0xff] }
 0x6b2   : > { %v6330_v2 = vmul.f32 %v10849_v19, %v13835_v5  ;;  %7952 = vmatmul.mubr.bf16.gmra.mrb[168].mxu1 %v6457_v28  ;;  %v7007_v26 = vld [vmem:[#allocation2 + $0xee] sm:$0xff]  ;;  %v7029_v50 = vpack.c.bf16 %v7005_v25, %v7004_v33  ;;  %v7006_v44 = vld [vmem:[#allocation2 + $0xe6] sm:$0xff]  ;;  %v6627_v28 = vld [vmem:[#allocation2 + $0x3a] sm:$0xff] }
 0x6b3   : > { %v10851_v24 = vpop.eup %10850  ;;  %v7030_v19 = vpack.c.bf16 %v7007_v26, %v7006_v44  ;;  %v7008_v39 = vld [vmem:[#allocation2 + $0xf6] sm:$0xff]  ;;  %v6633_v38 = vld [vmem:[#allocation2 + $0x6a] sm:$0xff]  ;;  %v6644_v12 = vld [vmem:[#allocation2 + $0xc2] sm:$0xff] }
 0x6b4   : > { %v6366_v15 = vsel %vm13107_vm3, %v6330_v2, 0.0  ;;  %v6331_v27 = vmul.f32 %v10851_v24, %v13839_v18  ;;  %v6510_v43 = vld [vmem:[#allocation2 + $0x101] sm:$0xff]  ;;  %v10698_v2 = vld [vmem:[%s14589_s5 + $0x110] sm:$0xff]   ;;  %v10711_v55 = vld [vmem:[%s14589_s5 + $0x178] sm:$0xff]  }
 0x6b5   : > { %6402 = vst [vmem:[#allocation2 + $0x113] sm:$0xff] %v6366_v15  ;;  %v6438_v47 = vld [vmem:[#allocation2 + $0x100] sm:$0xff]  ;;  %v6626_v24 = vld [vmem:[#allocation2 + $0x32] sm:$0xff]  ;;  %v6641_v35 = vld [vmem:[#allocation2 + $0xaa] sm:$0xff] }
 0x6b6   : > { %v6367_v6 = vsel %vm13112_vm12, %v6331_v27, 0.0  ;;  %v6511_v8 = vld [vmem:[#allocation2 + $0x109] sm:$0xff]  ;;  %v6660_v41 = vpack.c.bf16 %v6627_v28, %v6626_v24  ;;  %v7009_v49 = vld [vmem:[#allocation2 + $0xfe] sm:$0xff]  ;;  %v6638_v40 = vld [vmem:[#allocation2 + $0x92] sm:$0xff] }
 0x6b7   : > { %v6439_v5 = vld [vmem:[#allocation2 + $0x108] sm:$0xff]  ;;  %6403 = vst [vmem:[#allocation2 + $0x11b] sm:$0xff] %v6367_v6  ;;  %v6530_v23 = vpack.c.bf16 %v6511_v8, %v6510_v43  ;;  %v10699_v15 = vld [vmem:[%s14589_s5 + $0x118] sm:$0xff]   ;;  %v7031_v32 = vpack.c.bf16 %v7009_v49, %v7008_v39  ;;  %v10700_v6 = vld [vmem:[%s14589_s5 + $0x120] sm:$0xff]  }
 0x6b8   : > { %v6458_v54 = vpack.c.bf16 %v6439_v5, %v6438_v47  ;;  %9638 = vmatmul.mubr.bf16.gmra.mrb[232].mxu0 %v7023_v63  ;;  %v7010_v43 = vld [vmem:[#allocation2 + $0x106] sm:$0xff]  ;;  %v10710_v4 = vld [vmem:[%s14589_s5 + $0x170] sm:$0xff]   ;;  %v6647_v25 = vld [vmem:[#allocation2 + $0xda] sm:$0xff] }
 0x6b9   : > { %v10853_v29 = vpop.eup %10852  ;;  %7959 = vmatprep.mubr.bf16.mxu1 %v6530_v23  ;;  %9641 = vmatprep.mubr.bf16.mxu0 %v7024_v53  ;;  %v6628_v63 = vld [vmem:[#allocation2 + $0x42] sm:$0xff]  ;;  %v6642_v59 = vld [vmem:[#allocation2 + $0xb2] sm:$0xff]  ;;  %v6651_v39 = vld [vmem:[#allocation2 + $0xfa] sm:$0xff] }
 0x6ba   : > { %v6332_v18 = vmul.f32 %v10853_v29, %v13851_v62  ;;  %7960 = vmatmul.mubr.bf16.gmra.mrb[172].mxu1 %v6458_v54  ;;  %v6661_v8 = vpack.c.bf16 %v6629_v10, %v6628_v63  ;;  %v10701_v5 = vld [vmem:[%s14589_s5 + $0x128] sm:$0xff]  }
 0x6bb   : > { %v10855_v0 = vpop.eup %10854 }
 0x6bc   : > { %v6368_v42 = vsel %vm13135_vm0, %v6332_v18, 0.0  ;;  %v6333_v46 = vmul.f32 %v10855_v0, %v13855_v3  ;;  %v6512_v31 = vld [vmem:[#allocation2 + $0x111] sm:$0xff]  ;;  %v6658_v3 = vpack.c.bf16 %v6623_v58, %v6622_v22  ;;  %v6631_v18 = vld [vmem:[#allocation2 + $0x5a] sm:$0xff]  ;;  %v10709_v22 = vld [vmem:[%s14589_s5 + $0x168] sm:$0xff]  }
 0x6bd   : > { %6404 = vst [vmem:[#allocation2 + $0x123] sm:$0xff] %v6368_v42  ;;  %v6440_v62 = vld [vmem:[#allocation2 + $0x110] sm:$0xff]  ;;  %v6662_v42 = vpack.c.bf16 %v6631_v18, %v6630_v17  ;;  %v10704_v58 = vld [vmem:[%s14589_s5 + $0x140] sm:$0xff]  }
 0x6be   : > { %v6369_v51 = vsel %vm13142_vm4, %v6333_v46, 0.0  ;;  %v6513_v30 = vld [vmem:[#allocation2 + $0x119] sm:$0xff]  ;;  %v7011_v27 = vld [vmem:[#allocation2 + $0x10e] sm:$0xff] }
 0x6bf   : > { %v6441_v61 = vld [vmem:[#allocation2 + $0x118] sm:$0xff]  ;;  %6405 = vst [vmem:[#allocation2 + $0x12b] sm:$0xff] %v6369_v51  ;;  %v6531_v16 = vpack.c.bf16 %v6513_v30, %v6512_v31  ;;  %v7032_v9 = vpack.c.bf16 %v7011_v27, %v7010_v43  ;;  %v6663_v31 = vpack.c.bf16 %v6633_v38, %v6632_v56  ;;  %v10706_v51 = vld [vmem:[%s14589_s5 + $0x150] sm:$0xff]  }
 0x6c0   : > { %v6459_v37 = vpack.c.bf16 %v6441_v61, %v6440_v62  ;;  %9642 = vmatmul.mubr.bf16.gmra.mrb[236].mxu0 %v7025_v7  ;;  %v7012_v54 = vld [vmem:[#allocation2 + $0x116] sm:$0xff]  ;;  %v6637_v61 = vld [vmem:[#allocation2 + $0x8a] sm:$0xff] }
 0x6c1   : > { %7967 = vmatprep.mubr.bf16.mxu1 %v6531_v16  ;;  %9645 = vmatprep.mubr.bf16.mxu0 %v7026_v34  ;;  %v10703_v46 = vld [vmem:[%s14589_s5 + $0x138] sm:$0xff]   ;;  %v10708_v16 = vld [vmem:[%s14589_s5 + $0x160] sm:$0xff]  }
 0x6c2   : > { %7968 = vmatmul.mubr.bf16.gmra.mrb[176].mxu1 %v6459_v37  ;;  %v6634_v7 = vld [vmem:[#allocation2 + $0x72] sm:$0xff]  ;;  %v6636_v34 = vld [vmem:[#allocation2 + $0x82] sm:$0xff]  ;;  %v6655_v18 = vld [vmem:[#allocation2 + $0x11a] sm:$0xff] }
 0x6c3   : > { %8008 = vmatprep.mubr.bf16.mxu1 %v6658_v3  ;;  %v6664_v30 = vpack.c.bf16 %v6635_v1, %v6634_v7  ;;  %v10707_v62 = vld [vmem:[%s14589_s5 + $0x158] sm:$0xff]   ;;  %v6665_v37 = vpack.c.bf16 %v6637_v61, %v6636_v34 }
 0x6c4   : > { %v7013_v47 = vld [vmem:[#allocation2 + $0x11e] sm:$0xff] }
 0x6c5   : > { %v7033_v29 = vpack.c.bf16 %v7013_v47, %v7012_v54  ;;  %v6652_v47 = vld [vmem:[#allocation2 + $0x102] sm:$0xff] }
 0x6c6   : > { %v7014_v23 = vld [vmem:[#allocation2 + $0x126] sm:$0xff]  ;;  %v7015_v53 = vld [vmem:[#allocation2 + $0x12e] sm:$0xff] }
 0x6c7   : > { %v7034_v0 = vpack.c.bf16 %v7015_v53, %v7014_v23  ;;  %v6656_v56 = vld [vmem:[#allocation2 + $0x122] sm:$0xff] }
 0x6c8   : > { %9646 = vmatmul.mubr.bf16.gmra.mrb[240].mxu0 %v7027_v11  ;;  %v6640_v11 = vld [vmem:[#allocation2 + $0xa2] sm:$0xff] }
 0x6c9   : > { %9649 = vmatprep.mubr.bf16.mxu0 %v7028_v45  ;;  %v6667_v20 = vpack.c.bf16 %v6641_v35, %v6640_v11  ;;  %v10929_v11 = vld [vmem:[%s14589_s5 + $0x180] sm:$0xff]  }
 0x6ca   : > { %8009 = vmatmul.mubr.bf16.vlgmr.msra.gmra.mrb[108].mxu1 %v6586_v48  ;;  %v6643_v48 = vld [vmem:[#allocation2 + $0xba] sm:$0xff] }
 0x6cb   : > { %8016 = vmatprep.mubr.bf16.mxu1 %v6659_v52  ;;  %8154 = vmatpush1.bf16.msra.mxu1 %v10696_v57  ;;  %v6668_v45 = vpack.c.bf16 %v6643_v48, %v6642_v59  ;;  %v6645_v57 = vld [vmem:[#allocation2 + $0xca] sm:$0xff] }
 0x6cc   : > { %8155 = vmatprep.subr.bf16.mxu1 %v14713_v36 }
 0x6cf   : > { %8156 = vmatpush1.bf16.msra.mxu1 %v10697_v14  ;;  %v6646_v14 = vld [vmem:[#allocation2 + $0xd2] sm:$0xff] }
 0x6d0   : > { %9650 = vmatmul.mubr.bf16.gmra.mrb[244].mxu0 %v7029_v50  ;;  %8157 = vmatprep.subr.bf16.mxu1 %v14713_v36  ;;  %v6670_v26 = vpack.c.bf16 %v6647_v25, %v6646_v14  ;;  %v10930_v25 = vld [vmem:[%s14589_s5 + $0x188] sm:$0xff]  }
 0x6d1   : > { %9653 = vmatprep.mubr.bf16.mxu0 %v7030_v19  ;;  %v6649_v19 = vld [vmem:[#allocation2 + $0xea] sm:$0xff] }
 0x6d2   : > { %8017 = vmatmul.mubr.bf16.gmra.mrb[112].mxu1 %v6658_v3  ;;  %v6639_v3 = vld [vmem:[#allocation2 + $0x9a] sm:$0xff] }
 0x6d3   : > { %8024 = vmatprep.mubr.bf16.mxu1 %v6660_v41  ;;  %8158 = vmatpush1.bf16.msra.mxu1 %v10698_v2  ;;  %v6666_v21 = vpack.c.bf16 %v6639_v3, %v6638_v40  ;;  %v6648_v2 = vld [vmem:[#allocation2 + $0xe2] sm:$0xff]  ;;  %v6694_v40 = vld [vmem:[#allocation2 + $0x13] sm:$0xff] }
 0x6d4   : > { %8159 = vmatprep.subr.bf16.mxu1 %v14713_v36  ;;  %v6671_v24 = vpack.c.bf16 %v6649_v19, %v6648_v2  ;;  %v10931_v19 = vld [vmem:[%s14589_s5 + $0x190] sm:$0xff]  }
 0x6d7   : > { %8160 = vmatpush1.bf16.msra.mxu1 %v10699_v15 }
 0x6d8   : > { %9654 = vmatmul.mubr.bf16.gmra.mrb[248].mxu0 %v7031_v32  ;;  %8161 = vmatprep.subr.bf16.mxu1 %v14713_v36  ;;  %v6650_v32 = vld [vmem:[#allocation2 + $0xf2] sm:$0xff] }
 0x6d9   : > { %9657 = vmatprep.mubr.bf16.mxu0 %v7032_v9  ;;  %v6672_v43 = vpack.c.bf16 %v6651_v39, %v6650_v32  ;;  %v6773_v39 = vld [vmem:[#allocation2 + $0x4c] sm:$0xff] }
 0x6da   : > { %8025 = vmatmul.mubr.bf16.gmra.mrb[116].mxu1 %v6659_v52  ;;  %v6669_v52 = vpack.c.bf16 %v6645_v57, %v6644_v12  ;;  %v6771_v12 = vld [vmem:[#allocation2 + $0x3c] sm:$0xff]  ;;  %v6698_v32 = vld [vmem:[#allocation2 + $0x33] sm:$0xff] }
 0x6db   : > { %8032 = vmatprep.mubr.bf16.mxu1 %v6661_v8  ;;  %8162 = vmatpush1.bf16.msra.mxu1 %v10700_v6 }
 0x6dc   : > { %8163 = vmatprep.subr.bf16.mxu1 %v14713_v36 }
 0x6df   : > { %8164 = vmatpush1.bf16.msra.mxu1 %v10701_v5 }
 0x6e0   : > { %9658 = vmatmul.mubr.bf16.gmra.mrb[252].mxu0 %v7033_v29  ;;  %8165 = vmatprep.subr.bf16.mxu1 %v14713_v36 }
 0x6e1   : > { %9661 = vmatprep.mubr.bf16.mxu0 %v7034_v0  ;;  %v6654_v0 = vld [vmem:[#allocation2 + $0x112] sm:$0xff] }
 0x6e2   : > { %8033 = vmatmul.mubr.bf16.gmra.mrb[120].mxu1 %v6660_v41 }
 0x6e3   : > { %8040 = vmatprep.mubr.bf16.mxu1 %v6662_v42  ;;  %8166 = vmatpush1.bf16.msra.mxu1 %v10702_v13  ;;  %v6674_v13 = vpack.c.bf16 %v6655_v18, %v6654_v0  ;;  %v6701_v18 = vld [vmem:[#allocation2 + $0x4b] sm:$0xff] }
 0x6e4   : > { %8167 = vmatprep.subr.bf16.mxu1 %v14713_v36 }
 0x6e7   : > { %8168 = vmatpush1.bf16.msra.mxu1 %v10703_v46 }
 0x6e8   : > { %8169 = vmatprep.subr.bf16.mxu1 %v14713_v36 }
 0x6ea   : > { %8041 = vmatmul.mubr.bf16.gmra.mrb[124].mxu1 %v6661_v8  ;;  %v6653_v8 = vld [vmem:[#allocation2 + $0x10a] sm:$0xff] }
 0x6eb   : > { %8048 = vmatprep.mubr.bf16.mxu1 %v6663_v31  ;;  %8170 = vmatpush1.bf16.msra.mxu1 %v10704_v58  ;;  %v6673_v5 = vpack.c.bf16 %v6653_v8, %v6652_v47  ;;  %v6657_v58 = vld [vmem:[#allocation2 + $0x12a] sm:$0xff] }
 0x6ec   : > { %8171 = vmatprep.subr.bf16.mxu1 %v14713_v36 }
 0x6ef   : > { %8172 = vmatpush1.bf16.msra.mxu1 %v10705_v60 }
 0x6f0   : > { %8173 = vmatprep.subr.bf16.mxu1 %v14713_v36 }
 0x6f2   : > { %8049 = vmatmul.mubr.bf16.gmra.mrb[128].mxu1 %v6662_v42 }
 0x6f3   : > { %8056 = vmatprep.mubr.bf16.mxu1 %v6664_v30  ;;  %8174 = vmatpush1.bf16.msra.mxu1 %v10706_v51 }
 0x6f4   : > { %8175 = vmatprep.subr.bf16.mxu1 %v14713_v36 }
 0x6f7   : > { %8176 = vmatpush1.bf16.msra.mxu1 %v10707_v62  ;;  %v6766_v62 = vld [vmem:[#allocation2 + $0x14] sm:$0xff] }
 0x6f8   : > { %8177 = vmatprep.subr.bf16.mxu1 %v14713_v36 }
 0x6fa   : > { %8057 = vmatmul.mubr.bf16.gmra.mrb[132].mxu1 %v6663_v31  ;;  %v6675_v31 = vpack.c.bf16 %v6657_v58, %v6656_v56  ;;  %v6774_v56 = vld [vmem:[#allocation2 + $0x54] sm:$0xff] }
 0x6fb   : > { %8064 = vmatprep.mubr.bf16.mxu1 %v6665_v37  ;;  %8178 = vmatpush1.bf16.msra.mxu1 %v10708_v16 }
 0x6fc   : > { %8179 = vmatprep.subr.bf16.mxu1 %v14713_v36 }
 0x6ff   : > { %8180 = vmatpush1.bf16.msra.mxu1 %v10709_v22  ;;  %v6695_v22 = vld [vmem:[#allocation2 + $0x1b] sm:$0xff] }
 0x700   : > { %8181 = vmatprep.subr.bf16.mxu1 %v14713_v36 }
 0x702   : > { %8065 = vmatmul.mubr.bf16.gmra.mrb[136].mxu1 %v6664_v30  ;;  %v6767_v30 = vld [vmem:[#allocation2 + $0x1c] sm:$0xff] }
 0x703   : > { %8072 = vmatprep.mubr.bf16.mxu1 %v6666_v21  ;;  %8182 = vmatpush1.bf16.msra.mxu1 %v10710_v4  ;;  %v6802_v61 = vpack.c.bf16 %v6767_v30, %v6766_v62  ;;  %v6769_v4 = vld [vmem:[#allocation2 + $0x2c] sm:$0xff] }
 0x704   : > { %8183 = vmatprep.subr.bf16.mxu1 %v14713_v36 }
 0x707   : > { %8184 = vmatpush1.bf16.msra.mxu1 %v10711_v55  ;;  %v6768_v55 = vld [vmem:[#allocation2 + $0x24] sm:$0xff] }
 0x708   : > { %9665 = vmatprep.subr.bf16.mxu1 %v14713_v36  ;;  %v6803_v35 = vpack.c.bf16 %v6769_v4, %v6768_v55  ;;  %v10936_v4 = vld [vmem:[%s14589_s5 + $0x1b8] sm:$0xff]  }
 0x70a   : > { %8073 = vmatmul.mubr.bf16.gmra.mrb[140].mxu1 %v6665_v37 }
 0x70b   : > { %8080 = vmatprep.mubr.bf16.mxu1 %v6667_v20 }
 0x712   : > { %8081 = vmatmul.mubr.bf16.gmra.mrb[144].mxu1 %v6666_v21  ;;  %v6730_v21 = vpack.c.bf16 %v6695_v22, %v6694_v40  ;;  %v6777_v22 = vld [vmem:[#allocation2 + $0x6c] sm:$0xff] }
 0x713   : > { %8088 = vmatprep.mubr.bf16.mxu1 %v6668_v45 }
 0x71a   : > { %8089 = vmatmul.mubr.bf16.gmra.mrb[148].mxu1 %v6667_v20 }
 0x71b   : > { %8096 = vmatprep.mubr.bf16.mxu1 %v6669_v52 }
 0x722   : > { %8097 = vmatmul.mubr.bf16.gmra.mrb[152].mxu1 %v6668_v45  ;;  %v6697_v45 = vld [vmem:[#allocation2 + $0x2b] sm:$0xff] }
 0x723   : > { %8104 = vmatprep.mubr.bf16.mxu1 %v6670_v26  ;;  %v14081_v33 = vpop.f32.mrb[180].mxu0 }
 0x724   : > { %v8366_v50 = vpop.f32.mrb[181].mxu0 }
 0x725   : > { %v14083_v44 = vpop.f32.mrb[182].mxu0 }
 0x726   : > { %v8369_v28 = vpop.f32.mrb[183].mxu0 }
 0x72a   : > { %8105 = vmatmul.mubr.bf16.gmra.mrb[156].mxu1 %v6669_v52  ;;  %v6696_v52 = vld [vmem:[#allocation2 + $0x23] sm:$0xff] }
 0x72b   : > { %8112 = vmatprep.mubr.bf16.mxu1 %v6671_v24  ;;  %v14085_v41 = vpop.f32.mrb[184].mxu0  ;;  %v6731_v14 = vpack.c.bf16 %v6697_v45, %v6696_v52  ;;  %v6779_v52 = vld [vmem:[#allocation2 + $0x7c] sm:$0xff] }
 0x72c   : > { %v8374_v49 = vpop.f32.mrb[185].mxu0 }
 0x72d   : > { %v14087_v15 = vpop.f32.mrb[186].mxu0  ;;  %v6699_v49 = vld [vmem:[#allocation2 + $0x3b] sm:$0xff] }
 0x72e   : > { %v8377_v27 = vpop.f32.mrb[187].mxu0 }
 0x732   : > { %8113 = vmatmul.mubr.bf16.gmra.mrb[160].mxu1 %v6670_v26  ;;  %v6770_v26 = vld [vmem:[#allocation2 + $0x34] sm:$0xff] }
 0x733   : > { %8120 = vmatprep.mubr.bf16.mxu1 %v6672_v43  ;;  %v14089_v10 = vpop.f32.mrb[188].mxu0  ;;  %v6804_v50 = vpack.c.bf16 %v6771_v12, %v6770_v26 }
 0x734   : > { %v8382_v9 = vpop.f32.mrb[189].mxu0 }
 0x735   : > { %v14091_v6 = vpop.f32.mrb[190].mxu0  ;;  %v6732_v9 = vpack.c.bf16 %v6699_v49, %v6698_v32  ;;  %v10939_v49 = vld [vmem:[%s14589_s5 + $0x1d0] sm:$0xff]   ;;  %v6707_v32 = vld [vmem:[#allocation2 + $0x7b] sm:$0xff] }
 0x736   : > { %v8385_v63 = vpop.f32.mrb[191].mxu0 }
 0x737   : > { %v6772_v63 = vld [vmem:[#allocation2 + $0x44] sm:$0xff] }
 0x738   : > { %v6805_v8 = vpack.c.bf16 %v6773_v39, %v6772_v63  ;;  %v6706_v63 = vld [vmem:[#allocation2 + $0x73] sm:$0xff] }
 0x73a   : > { %8121 = vmatmul.mubr.bf16.gmra.mrb[164].mxu1 %v6671_v24 }
 0x73b   : > { %8128 = vmatprep.mubr.bf16.mxu1 %v6673_v5  ;;  %v14093_v23 = vpop.f32.mrb[192].mxu0 }
 0x73c   : > { %v8390_v53 = vpop.f32.mrb[193].mxu0 }
 0x73d   : > { %v14095_v54 = vpop.f32.mrb[194].mxu0 }
 0x73e   : > { %v8393_v29 = vpop.f32.mrb[195].mxu0 }
 0x742   : > { %8129 = vmatmul.mubr.bf16.gmra.mrb[168].mxu1 %v6672_v43  ;;  %v10932_v43 = vld [vmem:[%s14589_s5 + $0x198] sm:$0xff]  }
 0x743   : > { %8136 = vmatprep.mubr.bf16.mxu1 %v6674_v13  ;;  %v14097_v17 = vpop.f32.mrb[196].mxu0 }
 0x744   : > { %v8398_v42 = vpop.f32.mrb[197].mxu0 }
 0x745   : > { %v14099_v46 = vpop.f32.mrb[198].mxu0  ;;  %v6700_v42 = vld [vmem:[#allocation2 + $0x43] sm:$0xff] }
 0x746   : > { %v8401_v38 = vpop.f32.mrb[199].mxu0  ;;  %v6733_v58 = vpack.c.bf16 %v6701_v18, %v6700_v42 }
 0x747   : > { %v10934_v38 = vld [vmem:[%s14589_s5 + $0x1a8] sm:$0xff]  }
 0x74a   : > { %8137 = vmatmul.mubr.bf16.gmra.mrb[172].mxu1 %v6673_v5  ;;  %v10933_v5 = vld [vmem:[%s14589_s5 + $0x1a0] sm:$0xff]  }
 0x74b   : > { %8144 = vmatprep.mubr.bf16.mxu1 %v6675_v31  ;;  %v14101_v60 = vpop.f32.mrb[200].mxu0 }
 0x74c   : > { %v8406_v1 = vpop.f32.mrb[201].mxu0 }
 0x74d   : > { %v14103_v51 = vpop.f32.mrb[202].mxu0 }
 0x74e   : > { %v8409_v7 = vpop.f32.mrb[203].mxu0 }
 0x74f   : > { %v10935_v7 = vld [vmem:[%s14589_s5 + $0x1b0] sm:$0xff]  }
 0x752   : > { %8145 = vmatmul.mubr.bf16.gmra.mrb[176].mxu1 %v6674_v13  ;;  %v6775_v13 = vld [vmem:[#allocation2 + $0x5c] sm:$0xff] }
 0x753   : > { %8185 = vmatprep.mubr.bf16.mxu1 %v6802_v61  ;;  %v14105_v16 = vpop.f32.mrb[204].mxu0  ;;  %v6806_v31 = vpack.c.bf16 %v6775_v13, %v6774_v56  ;;  %v6703_v61 = vld [vmem:[#allocation2 + $0x5b] sm:$0xff] }
 0x754   : > { %v8414_v34 = vpop.f32.mrb[205].mxu0  ;;  %v10941_v13 = vld [vmem:[%s14589_s5 + $0x1e0] sm:$0xff]  }
 0x755   : > { %v14107_v37 = vpop.f32.mrb[206].mxu0 }
 0x756   : > { %v8417_v3 = vpop.f32.mrb[207].mxu0 }
 0x757   : > { %v6702_v3 = vld [vmem:[#allocation2 + $0x53] sm:$0xff] }
 0x758   : > { %v6734_v40 = vpack.c.bf16 %v6703_v61, %v6702_v3  ;;  %v7016_v3 = vld [vmem:[#allocation2 + $0x136] sm:$0xff] }
 0x75a   : > { %8186 = vmatmul.mubr.bf16.vlgmr.msra.gmra.mrb[108].mxu1 %v6730_v21  ;;  %v6776_v21 = vld [vmem:[#allocation2 + $0x64] sm:$0xff] }
 0x75b   : > { %8193 = vmatprep.mubr.bf16.mxu1 %v6803_v35  ;;  %9681 = vmatpush1.bf16.msra.mxu1 %v10929_v11  ;;  %v14112_v20 = vpop.f32.mrb[208].mxu0  ;;  %v6807_v55 = vpack.c.bf16 %v6777_v22, %v6776_v21  ;;  %v10937_v11 = vld [vmem:[%s14589_s5 + $0x1c0] sm:$0xff]   ;;  %v10943_v21 = vld [vmem:[%s14589_s5 + $0x1f0] sm:$0xff]  }
 0x75c   : > { %v8422_v48 = vpop.f32.mrb[209].mxu0  ;;  %9666 = vmatprep.subr.bf16.mxu1 %v14713_v36 }
 0x75d   : > { %v14115_v59 = vpop.f32.mrb[210].mxu0 }
 0x75e   : > { %v8425_v57 = vpop.f32.mrb[211].mxu0 }
 0x75f   : > { %9682 = vmatpush1.bf16.msra.mxu1 %v10930_v25  ;;  %v6705_v57 = vld [vmem:[#allocation2 + $0x6b] sm:$0xff]  ;;  %v6704_v25 = vld [vmem:[#allocation2 + $0x63] sm:$0xff] }
 0x760   : > { %9667 = vmatprep.subr.bf16.mxu1 %v14713_v36  ;;  %v6735_v26 = vpack.c.bf16 %v6705_v57, %v6704_v25 }
 0x762   : > { %8194 = vmatmul.mubr.bf16.gmra.mrb[112].mxu1 %v6731_v14  ;;  %v10938_v14 = vld [vmem:[%s14589_s5 + $0x1c8] sm:$0xff]  }
 0x763   : > { %8201 = vmatprep.mubr.bf16.mxu1 %v6804_v50  ;;  %v14121_v28 = vpop.f32.mrb[212].mxu0  ;;  %9683 = vmatpush1.bf16.msra.mxu1 %v10931_v19  ;;  %v6778_v50 = vld [vmem:[#allocation2 + $0x74] sm:$0xff] }
 0x764   : > { %v8430_v2 = vpop.f32.mrb[213].mxu0  ;;  %9668 = vmatprep.subr.bf16.mxu1 %v14713_v36  ;;  %v6808_v19 = vpack.c.bf16 %v6779_v52, %v6778_v50  ;;  %v6711_v52 = vld [vmem:[#allocation2 + $0x9b] sm:$0xff] }
 0x765   : > { %v14127_v24 = vpop.f32.mrb[214].mxu0  ;;  %v10944_v50 = vld [vmem:[%s14589_s5 + $0x1f8] sm:$0xff]  }
 0x766   : > { %v8433_v27 = vpop.f32.mrb[215].mxu0 }
 0x767   : > { %9684 = vmatpush1.bf16.msra.mxu1 %v10932_v43 }
 0x768   : > { %9669 = vmatprep.subr.bf16.mxu1 %v14713_v36 }
 0x76a   : > { %8202 = vmatmul.mubr.bf16.gmra.mrb[116].mxu1 %v6732_v9  ;;  %v6781_v9 = vld [vmem:[#allocation2 + $0x8c] sm:$0xff] }
 0x76b   : > { %8209 = vmatprep.mubr.bf16.mxu1 %v6805_v8  ;;  %v14133_v47 = vpop.f32.mrb[216].mxu0  ;;  %9685 = vmatpush1.bf16.msra.mxu1 %v10933_v5  ;;  %v10940_v8 = vld [vmem:[%s14589_s5 + $0x1d8] sm:$0xff]   ;;  %v6736_v5 = vpack.c.bf16 %v6707_v32, %v6706_v63 }
 0x76c   : > { %v8438_v53 = vpop.f32.mrb[217].mxu0  ;;  %9670 = vmatprep.subr.bf16.mxu1 %v14713_v36 }
 0x76d   : > { %v14139_v29 = vpop.f32.mrb[218].mxu0  ;;  %v6780_v53 = vld [vmem:[#allocation2 + $0x84] sm:$0xff] }
 0x76e   : > { %v8441_v0 = vpop.f32.mrb[219].mxu0  ;;  %v6809_v18 = vpack.c.bf16 %v6781_v9, %v6780_v53  ;;  %v6787_v53 = vld [vmem:[#allocation2 + $0xbc] sm:$0xff] }
 0x76f   : > { %9686 = vmatpush1.bf16.msra.mxu1 %v10934_v38 }
 0x770   : > { %9671 = vmatprep.subr.bf16.mxu1 %v14713_v36 }
 0x772   : > { %8210 = vmatmul.mubr.bf16.gmra.mrb[120].mxu1 %v6733_v58  ;;  %v6709_v58 = vld [vmem:[#allocation2 + $0x8b] sm:$0xff] }
 0x773   : > { %8217 = vmatprep.mubr.bf16.mxu1 %v6806_v31  ;;  %v14145_v1 = vpop.f32.mrb[220].mxu0  ;;  %9687 = vmatpush1.bf16.msra.mxu1 %v10935_v7  ;;  %v6783_v31 = vld [vmem:[#allocation2 + $0x9c] sm:$0xff] }
 0x774   : > { %v8446_v30 = vpop.f32.mrb[221].mxu0  ;;  %9672 = vmatprep.subr.bf16.mxu1 %v14713_v36  ;;  %v6708_v7 = vld [vmem:[#allocation2 + $0x83] sm:$0xff] }
 0x775   : > { %v14151_v62 = vpop.f32.mrb[222].mxu0  ;;  %v10942_v30 = vld [vmem:[%s14589_s5 + $0x1e8] sm:$0xff]   ;;  %v6737_v61 = vpack.c.bf16 %v6709_v58, %v6708_v7  ;;  %v6786_v58 = vld [vmem:[#allocation2 + $0xb4] sm:$0xff] }
 0x776   : > { %14984 = vst [vmem:[#allocation10_spill] sm:$0xff] %v14151_v62  ;;  %v8449_v34 = vpop.f32.mrb[223].mxu0 }
 0x777   : > { %9688 = vmatpush1.bf16.msra.mxu1 %v10936_v4  ;;  %v6782_v34 = vld [vmem:[#allocation2 + $0x94] sm:$0xff]  ;;  %v7017_v4 = vld [vmem:[#allocation2 + $0x13e] sm:$0xff] }
 0x778   : > { %9673 = vmatprep.subr.bf16.mxu1 %v14713_v36  ;;  %v6810_v22 = vpack.c.bf16 %v6783_v31, %v6782_v34  ;;  %v6812_v31 = vpack.c.bf16 %v6787_v53, %v6786_v58  ;;  %v6715_v34 = vld [vmem:[#allocation2 + $0xbb] sm:$0xff] }
 0x77a   : > { %8218 = vmatmul.mubr.bf16.gmra.mrb[124].mxu1 %v6734_v40 }
 0x77b   : > { %8225 = vmatprep.mubr.bf16.mxu1 %v6807_v55  ;;  %v14157_v35 = vpop.f32.mrb[224].mxu0  ;;  %9689 = vmatpush1.bf16.msra.mxu1 %v10937_v11  ;;  %v7035_v55 = vpack.c.bf16 %v7017_v4, %v7016_v3  ;;  %v6789_v3 = vld [vmem:[#allocation2 + $0xcc] sm:$0xff] }
 0x77c   : > { %v14162_v48 = vpop.f32.mrb[225].mxu0  ;;  %9674 = vmatprep.subr.bf16.mxu1 %v14713_v36  ;;  %v6714_v4 = vld [vmem:[#allocation2 + $0xb3] sm:$0xff] }
 0x77d   : > { %v14165_v45 = vpop.f32.mrb[226].mxu0  ;;  %9662 = vmatmul.mubr.bf16.gmra.mrb[0].mxu0 %v7035_v55  ;;  %v6788_v55 = vld [vmem:[#allocation2 + $0xc4] sm:$0xff] }
 0x77e   : > { %v14167_v12 = vpop.f32.mrb[227].mxu0 }
 0x77f   : > { %9690 = vmatpush1.bf16.msra.mxu1 %v10938_v14  ;;  %v6785_v14 = vld [vmem:[#allocation2 + $0xac] sm:$0xff] }
 0x780   : > { %9675 = vmatprep.subr.bf16.mxu1 %v14713_v36 }
 0x782   : > { %8226 = vmatmul.mubr.bf16.gmra.mrb[128].mxu1 %v6735_v26  ;;  %v6710_v26 = vld [vmem:[#allocation2 + $0x93] sm:$0xff] }
 0x783   : > { %8233 = vmatprep.mubr.bf16.mxu1 %v6808_v19  ;;  %v14173_v2 = vpop.f32.mrb[228].mxu0  ;;  %9691 = vmatpush1.bf16.msra.mxu1 %v10939_v49  ;;  %v6738_v19 = vpack.c.bf16 %v6711_v52, %v6710_v26  ;;  %v6784_v49 = vld [vmem:[#allocation2 + $0xa4] sm:$0xff]  ;;  %v6813_v52 = vpack.c.bf16 %v6789_v3, %v6788_v55  ;;  %v6719_v3 = vld [vmem:[#allocation2 + $0xdb] sm:$0xff]  ;;  %v6718_v55 = vld [vmem:[#allocation2 + $0xd3] sm:$0xff] }
 0x784   : > { %v14178_v27 = vpop.f32.mrb[229].mxu0  ;;  %9676 = vmatprep.subr.bf16.mxu1 %v14713_v36  ;;  %v6811_v32 = vpack.c.bf16 %v6785_v14, %v6784_v49 }
 0x785   : > { %v14181_v39 = vpop.f32.mrb[230].mxu0 }
 0x786   : > { %v14183_v43 = vpop.f32.mrb[231].mxu0 }
 0x787   : > { %9692 = vmatpush1.bf16.msra.mxu1 %v10940_v8  ;;  %v6713_v8 = vld [vmem:[#allocation2 + $0xab] sm:$0xff] }
 0x788   : > { %9677 = vmatprep.subr.bf16.mxu1 %v14713_v36 }
 0x78a   : > { %8234 = vmatmul.mubr.bf16.gmra.mrb[132].mxu1 %v6736_v5 }
 0x78b   : > { %8241 = vmatprep.mubr.bf16.mxu1 %v6809_v18  ;;  %v14189_v0 = vpop.f32.mrb[232].mxu0  ;;  %9693 = vmatpush1.bf16.msra.mxu1 %v10941_v13  ;;  %v6712_v18 = vld [vmem:[#allocation2 + $0xa3] sm:$0xff] }
 0x78c   : > { %v14194_v42 = vpop.f32.mrb[233].mxu0  ;;  %9678 = vmatprep.subr.bf16.mxu1 %v14713_v36  ;;  %v6739_v13 = vpack.c.bf16 %v6713_v8, %v6712_v18  ;;  %v6716_v8 = vld [vmem:[#allocation2 + $0xc3] sm:$0xff]  ;;  %v6790_v18 = vld [vmem:[#allocation2 + $0xd4] sm:$0xff] }
 0x78d   : > { %v14197_v38 = vpop.f32.mrb[234].mxu0 }
 0x78e   : > { %v14199_v56 = vpop.f32.mrb[235].mxu0 }
 0x78f   : > { %9694 = vmatpush1.bf16.msra.mxu1 %v10942_v30 }
 0x790   : > { %9679 = vmatprep.subr.bf16.mxu1 %v14713_v36 }
 0x792   : > { %8242 = vmatmul.mubr.bf16.gmra.mrb[136].mxu1 %v6737_v61 }
 0x793   : > { %8249 = vmatprep.mubr.bf16.mxu1 %v6810_v22  ;;  %v14205_v40 = vpop.f32.mrb[236].mxu0  ;;  %9695 = vmatpush1.bf16.msra.mxu1 %v10943_v21  ;;  %v6740_v21 = vpack.c.bf16 %v6715_v34, %v6714_v4 }
 0x794   : > { %v14210_v11 = vpop.f32.mrb[237].mxu0  ;;  %9680 = vmatprep.subr.bf16.mxu1 %v14713_v36 }
 0x795   : > { %v14213_v57 = vpop.f32.mrb[238].mxu0 }
 0x796   : > { %v14215_v25 = vpop.f32.mrb[239].mxu0 }
 0x797   : > { %9696 = vmatpush1.bf16.msra.mxu1 %v10944_v50 }
 0x79a   : > { %8250 = vmatmul.mubr.bf16.gmra.mrb[140].mxu1 %v6738_v19  ;;  %v6717_v19 = vld [vmem:[#allocation2 + $0xcb] sm:$0xff] }
 0x79b   : > { %8257 = vmatprep.mubr.bf16.mxu1 %v6811_v32  ;;  %v14220_v9 = vpop.f32.mrb[240].mxu0  ;;  %v6791_v32 = vld [vmem:[#allocation2 + $0xdc] sm:$0xff]  ;;  %v6741_v53 = vpack.c.bf16 %v6717_v19, %v6716_v8  ;;  %v6721_v19 = vld [vmem:[#allocation2 + $0xeb] sm:$0xff] }
 0x79c   : > { %v14222_v36 = vpop.f32.mrb[241].mxu0  ;;  %v6720_v8 = vld [vmem:[#allocation2 + $0xe3] sm:$0xff] }
 0x79d   : > { %v14224_v63 = vpop.f32.mrb[242].mxu0 }
 0x79e   : > { %v14226_v5 = vpop.f32.mrb[243].mxu0 }
 0x7a2   : > { %8258 = vmatmul.mubr.bf16.gmra.mrb[144].mxu1 %v6739_v13  ;;  %v6814_v13 = vpack.c.bf16 %v6791_v32, %v6790_v18  ;;  %v6795_v32 = vld [vmem:[#allocation2 + $0xfc] sm:$0xff]  ;;  %v6794_v18 = vld [vmem:[#allocation2 + $0xf4] sm:$0xff] }
 0x7a3   : > { %8265 = vmatprep.mubr.bf16.mxu1 %v6812_v31  ;;  %v14228_v7 = vpop.f32.mrb[244].mxu0 }
 0x7a4   : > { %14985 = vst [vmem:[#allocation41_spill] sm:$0xff] %v14228_v7  ;;  %v14230_v30 = vpop.f32.mrb[245].mxu0 }
 0x7a5   : > { %14986 = vst [vmem:[#allocation53_spill] sm:$0xff] %v14230_v30  ;;  %v14232_v61 = vpop.f32.mrb[246].mxu0 }
 0x7a6   : > { %14987 = vst [vmem:[#allocation55_spill] sm:$0xff] %v14232_v61  ;;  %v14234_v22 = vpop.f32.mrb[247].mxu0 }
 0x7a7   : > { %14988 = vst [vmem:[#allocation42_spill] sm:$0xff] %v14234_v22 }
 0x7aa   : > { %8266 = vmatmul.mubr.bf16.gmra.mrb[148].mxu1 %v6740_v21  ;;  %v6793_v21 = vld [vmem:[#allocation2 + $0xec] sm:$0xff] }
 0x7ab   : > { %8273 = vmatprep.mubr.bf16.mxu1 %v6813_v52  ;;  %v14236_v14 = vpop.f32.mrb[248].mxu0  ;;  %v6742_v52 = vpack.c.bf16 %v6719_v3, %v6718_v55  ;;  %v6725_v3 = vld [vmem:[#allocation2 + $0x10b] sm:$0xff] }
 0x7ac   : > { %14989 = vst [vmem:[#allocation43_spill] sm:$0xff] %v14236_v14  ;;  %v14238_v26 = vpop.f32.mrb[249].mxu0 }
 0x7ad   : > { %14990 = vst [vmem:[#allocation52_spill] sm:$0xff] %v14238_v26  ;;  %v14240_v50 = vpop.f32.mrb[250].mxu0 }
 0x7ae   : > { %14991 = vst [vmem:[#allocation54_spill] sm:$0xff] %v14240_v50  ;;  %v14242_v49 = vpop.f32.mrb[251].mxu0  ;;  %v6792_v50 = vld [vmem:[#allocation2 + $0xe4] sm:$0xff] }
 0x7af   : > { %14992 = vst [vmem:[#allocation44_spill] sm:$0xff] %v14242_v49  ;;  %v6815_v14 = vpack.c.bf16 %v6793_v21, %v6792_v50  ;;  %v6722_v49 = vld [vmem:[#allocation2 + $0xf3] sm:$0xff]  ;;  %v6799_v50 = vld [vmem:[#allocation2 + $0x11c] sm:$0xff] }
 0x7b0   : > { %v6724_v21 = vld [vmem:[#allocation2 + $0x103] sm:$0xff] }
 0x7b1   : > { %v6745_v55 = vpack.c.bf16 %v6725_v3, %v6724_v21  ;;  %v6935_v3 = vld [vmem:[#allocation2 + $0xed] sm:$0xff] }
 0x7b2   : > { %8274 = vmatmul.mubr.bf16.gmra.mrb[152].mxu1 %v6741_v53  ;;  %v6743_v53 = vpack.c.bf16 %v6721_v19, %v6720_v8  ;;  %v6727_v19 = vld [vmem:[#allocation2 + $0x11b] sm:$0xff]  ;;  %v6801_v8 = vld [vmem:[#allocation2 + $0x12c] sm:$0xff] }
 0x7b3   : > { %8281 = vmatprep.mubr.bf16.mxu1 %v6814_v13  ;;  %v14244_v58 = vpop.f32.mrb[252].mxu0 }
 0x7b4   : > { %14993 = vst [vmem:[#allocation45_spill] sm:$0xff] %v14244_v58  ;;  %v14246_v31 = vpop.f32.mrb[253].mxu0  ;;  %v6816_v58 = vpack.c.bf16 %v6795_v32, %v6794_v18  ;;  %v6800_v32 = vld [vmem:[#allocation2 + $0x124] sm:$0xff] }
 0x7b5   : > { %14994 = vst [vmem:[#allocation57_spill] sm:$0xff] %v14246_v31  ;;  %v14248_v34 = vpop.f32.mrb[254].mxu0  ;;  %v6723_v31 = vld [vmem:[#allocation2 + $0xfb] sm:$0xff]  ;;  %v6819_v22 = vpack.c.bf16 %v6801_v8, %v6800_v32  ;;  %v6938_v32 = vld [vmem:[#allocation2 + $0x105] sm:$0xff] }
 0x7b6   : > { %14995 = vst [vmem:[#allocation59_spill] sm:$0xff] %v14248_v34  ;;  %v14250_v4 = vpop.f32.mrb[255].mxu0  ;;  %v6797_v34 = vld [vmem:[#allocation2 + $0x10c] sm:$0xff]  ;;  %v6744_v26 = vpack.c.bf16 %v6723_v31, %v6722_v49  ;;  %v6933_v31 = vld [vmem:[#allocation2 + $0xdd] sm:$0xff] }
 0x7b7   : > { %14996 = vst [vmem:[#allocation46_spill] sm:$0xff] %v14250_v4  ;;  %v6796_v4 = vld [vmem:[#allocation2 + $0x104] sm:$0xff] }
 0x7b8   : > { %v6817_v61 = vpack.c.bf16 %v6797_v34, %v6796_v4  ;;  %v6729_v49 = vld [vmem:[#allocation2 + $0x12b] sm:$0xff]  ;;  %v6932_v4 = vld [vmem:[#allocation2 + $0xd5] sm:$0xff] }
 0x7b9   : > { %v6957_v62 = vpack.c.bf16 %v6933_v31, %v6932_v4  ;;  %v6943_v31 = vld [vmem:[#allocation2 + $0x12d] sm:$0xff] }
 0x7ba   : > { %8282 = vmatmul.mubr.bf16.gmra.mrb[156].mxu1 %v6742_v52  ;;  %v6798_v52 = vld [vmem:[#allocation2 + $0x114] sm:$0xff] }
 0x7bb   : > { %8289 = vmatprep.mubr.bf16.mxu1 %v6815_v14  ;;  %v6818_v7 = vpack.c.bf16 %v6799_v50, %v6798_v52  ;;  %v6934_v50 = vld [vmem:[#allocation2 + $0xe5] sm:$0xff]  ;;  %v6936_v52 = vld [vmem:[#allocation2 + $0xf5] sm:$0xff] }
 0x7bc   : > { %v6958_v21 = vpack.c.bf16 %v6935_v3, %v6934_v50 }
 0x7c2   : > { %8290 = vmatmul.mubr.bf16.gmra.mrb[160].mxu1 %v6743_v53  ;;  %v6726_v53 = vld [vmem:[#allocation2 + $0x113] sm:$0xff] }
 0x7c3   : > { %8297 = vmatprep.mubr.bf16.mxu1 %v6816_v58  ;;  %v6746_v18 = vpack.c.bf16 %v6727_v19, %v6726_v53  ;;  %v6939_v19 = vld [vmem:[#allocation2 + $0x10d] sm:$0xff]  ;;  %v6941_v53 = vld [vmem:[#allocation2 + $0x11d] sm:$0xff] }
 0x7c4   : > { %v6960_v8 = vpack.c.bf16 %v6939_v19, %v6938_v32 }
 0x7ca   : > { %8298 = vmatmul.mubr.bf16.gmra.mrb[164].mxu1 %v6744_v26  ;;  %v6728_v26 = vld [vmem:[#allocation2 + $0x123] sm:$0xff] }
 0x7cb   : > { %8305 = vmatprep.mubr.bf16.mxu1 %v6817_v61  ;;  %v6747_v34 = vpack.c.bf16 %v6729_v49, %v6728_v26 }
 0x7d2   : > { %8306 = vmatmul.mubr.bf16.gmra.mrb[168].mxu1 %v6745_v55  ;;  %v6937_v55 = vld [vmem:[#allocation2 + $0xfd] sm:$0xff] }
 0x7d3   : > { %8313 = vmatprep.mubr.bf16.mxu1 %v6818_v7  ;;  %v6959_v30 = vpack.c.bf16 %v6937_v55, %v6936_v52 }
 0x7da   : > { %8314 = vmatmul.mubr.bf16.gmra.mrb[172].mxu1 %v6746_v18  ;;  %v6940_v18 = vld [vmem:[#allocation2 + $0x115] sm:$0xff] }
 0x7db   : > { %8321 = vmatprep.mubr.bf16.mxu1 %v6819_v22  ;;  %v6961_v49 = vpack.c.bf16 %v6941_v53, %v6940_v18 }
 0x7e2   : > { %8322 = vmatmul.mubr.bf16.gmra.mrb[176].mxu1 %v6747_v34  ;;  %v6945_v34 = vld [vmem:[#allocation2 + $0x13d] sm:$0xff] }
 0x7e3   : > { %8450 = vmatprep.mubr.bf16.mxu1 %v6957_v62  ;;  %v6942_v62 = vld [vmem:[#allocation2 + $0x125] sm:$0xff] }
 0x7e4   : > { %v6962_v26 = vpack.c.bf16 %v6943_v31, %v6942_v62 }
 0x7ea   : > { %8451 = vmatmul.mubr.bf16.vlgmr.msra.gmra.mrb[152].mxu1 %v6814_v13  ;;  %v6944_v13 = vld [vmem:[#allocation2 + $0x135] sm:$0xff] }
 0x7eb   : > { %8458 = vmatprep.mubr.bf16.mxu1 %v6958_v21  ;;  %v6963_v4 = vpack.c.bf16 %v6945_v34, %v6944_v13 }
 0x7f2   : > { %8459 = vmatmul.mubr.bf16.gmra.mrb[156].mxu1 %v6815_v14  ;;  %v6873_v14 = vld [vmem:[#allocation2 + $0x13c] sm:$0xff] }
 0x7f3   : > { %8466 = vmatprep.mubr.bf16.mxu1 %v6959_v30  ;;  %v6872_v30 = vld [vmem:[#allocation2 + $0x134] sm:$0xff] }
 0x7f4   : > { %v6891_v3 = vpack.c.bf16 %v6873_v14, %v6872_v30 }
 0x7fa   : > { %8467 = vmatmul.mubr.bf16.gmra.mrb[160].mxu1 %v6816_v58  ;;  %v14255_v58 = vld [vmem:[%s14590_s6] ss:$0 sm:$0xff] }
 0x7fb   : > { %8474 = vmatprep.mubr.bf16.mxu1 %v6960_v8 }
 0x802   : > { %8475 = vmatmul.mubr.bf16.gmra.mrb[164].mxu1 %v6817_v61 }
 0x803   : > { %8482 = vmatprep.mubr.bf16.mxu1 %v6961_v49 }
 0x80a   : > { %8483 = vmatmul.mubr.bf16.gmra.mrb[168].mxu1 %v6818_v7 }
 0x80b   : > { %8490 = vmatprep.mubr.bf16.mxu1 %v6962_v26 }
 0x812   : > { %8491 = vmatmul.mubr.bf16.gmra.mrb[172].mxu1 %v6819_v22 }
 0x813   : > { %8498 = vmatprep.mubr.bf16.mxu1 %v6963_v4 }
 0x81a   : > { %8499 = vmatmul.mubr.bf16.gmra.mrb[176].mxu1 %v6891_v3 }
 0x82d   : > { %v8187_v61 = vpop.f32.mrb[108].mxu1 }
 0x82e   : > { %v9805_v50 = vadd.f32 %v14255_v58, %v8187_v61  ;;  %v8189_v21 = vpop.f32.mrb[109].mxu1 }
 0x82f   : > { %v8190_v7 = vpop.f32.mrb[110].mxu1 }
 0x830   : > { %v9806_v55 = vadd.f32 %v9805_v50, %v14081_v33  ;;  %v9807_v52 = vadd.f32 %v14255_v58, %v8190_v7  ;;  %v8192_v22 = vpop.f32.mrb[111].mxu1 }
 0x832   : > { %v8542_v19 = vadd.f32 %v9806_v55, %v14162_v48  ;;  %v9808_v32 = vadd.f32 %v9807_v52, %v14083_v44 }
 0x834   : > { %v8545_v8 = vadd.f32 %v9808_v32, %v14167_v12  ;;  %v8684_v53 = vmul.f32 0.2, %v8542_v19 }
 0x835   : > { %v8195_v18 = vpop.f32.mrb[112].mxu1 }
 0x836   : > { %v9809_v49 = vadd.f32 %v14255_v58, %v8195_v18  ;;  %v8197_v62 = vpop.f32.mrb[113].mxu1  ;;  %v14264_v31 = vmax.f32 %v8542_v19, %v8684_v53  ;;  %v8685_v26 = vmul.f32 0.2, %v8545_v8 }
 0x837   : > { %v8198_v13 = vpop.f32.mrb[114].mxu1 }
 0x838   : > { %v9810_v33 = vadd.f32 %v9809_v49, %v14085_v41  ;;  %v9811_v34 = vadd.f32 %v14255_v58, %v8198_v13  ;;  %v8200_v4 = vpop.f32.mrb[115].mxu1  ;;  %v8756_v48 = vmul.f32 %v14264_v31, %v14264_v31  ;;  %v14270_v44 = vmax.f32 %v8545_v8, %v8685_v26 }
 0x83a   : > { %v8550_v12 = vadd.f32 %v9810_v33, %v14157_v35  ;;  %v9812_v30 = vadd.f32 %v9811_v34, %v14087_v15  ;;  %8792 = vadd.xlane.f32.xlu0 %v8756_v48  ;;  %v8757_v14 = vmul.f32 %v14270_v44, %v14270_v44 }
 0x83c   : > { %v8553_v3 = vadd.f32 %v9812_v30, %v14165_v45  ;;  %8794 = vadd.xlane.f32.xlu1 %v8757_v14  ;;  %v8686_v41 = vmul.f32 0.2, %v8550_v12 }
 0x83d   : > { %v8203_v61 = vpop.f32.mrb[116].mxu1 }
 0x83e   : > { %v9813_v50 = vadd.f32 %v14255_v58, %v8203_v61  ;;  %v8205_v21 = vpop.f32.mrb[117].mxu1  ;;  %v14278_v7 = vmax.f32 %v8550_v12, %v8686_v41  ;;  %v8687_v55 = vmul.f32 0.2, %v8553_v3 }
 0x83f   : > { %v8206_v52 = vpop.f32.mrb[118].mxu1 }
 0x840   : > { %v9814_v35 = vadd.f32 %v9813_v50, %v14089_v10  ;;  %v9815_v15 = vadd.f32 %v14255_v58, %v8206_v52  ;;  %v8208_v22 = vpop.f32.mrb[119].mxu1  ;;  %v8758_v19 = vmul.f32 %v14278_v7, %v14278_v7  ;;  %v14284_v32 = vmax.f32 %v8553_v3, %v8687_v55 }
 0x842   : > { %v8558_v45 = vadd.f32 %v9814_v35, %v14178_v27  ;;  %v9816_v8 = vadd.f32 %v9815_v15, %v14091_v6  ;;  %8796 = vadd.xlane.f32.xlu0 %v8758_v19  ;;  %v8759_v53 = vmul.f32 %v14284_v32, %v14284_v32 }
 0x844   : > { %v8561_v18 = vadd.f32 %v9816_v8, %v14183_v43  ;;  %8798 = vadd.xlane.f32.xlu1 %v8759_v53  ;;  %v8688_v10 = vmul.f32 0.2, %v8558_v45 }
 0x845   : > { %v8211_v49 = vpop.f32.mrb[120].mxu1 }
 0x846   : > { %v9817_v62 = vadd.f32 %v14255_v58, %v8211_v49  ;;  %v8213_v26 = vpop.f32.mrb[121].mxu1  ;;  %v14292_v13 = vmax.f32 %v8558_v45, %v8688_v10  ;;  %v8689_v33 = vmul.f32 0.2, %v8561_v18 }
 0x847   : > { %v8214_v34 = vpop.f32.mrb[122].mxu1 }
 0x848   : > { %v9818_v27 = vadd.f32 %v9817_v62, %v14093_v23  ;;  %v9819_v6 = vadd.f32 %v14255_v58, %v8214_v34  ;;  %v8216_v4 = vpop.f32.mrb[123].mxu1  ;;  %v8760_v48 = vmul.f32 %v14292_v13, %v14292_v13  ;;  %v14298_v12 = vmax.f32 %v8561_v18, %v8689_v33 }
 0x84a   : > { %v8566_v43 = vadd.f32 %v9818_v27, %v14173_v2  ;;  %v9820_v30 = vadd.f32 %v9819_v6, %v14095_v54  ;;  %8800 = vadd.xlane.f32.xlu0 %v8760_v48  ;;  %v8761_v14 = vmul.f32 %v14298_v12, %v14298_v12 }
 0x84c   : > { %v8569_v3 = vadd.f32 %v9820_v30, %v14181_v39  ;;  %8802 = vadd.xlane.f32.xlu1 %v8761_v14  ;;  %v8690_v23 = vmul.f32 0.2, %v8566_v43 }
 0x84d   : > { %v8219_v41 = vpop.f32.mrb[124].mxu1 }
 0x84e   : > { %v9821_v61 = vadd.f32 %v14255_v58, %v8219_v41  ;;  %v8221_v50 = vpop.f32.mrb[125].mxu1  ;;  %v14306_v21 = vmax.f32 %v8566_v43, %v8690_v23  ;;  %v8691_v55 = vmul.f32 0.2, %v8569_v3 }
 0x84f   : > { %v8222_v52 = vpop.f32.mrb[126].mxu1 }
 0x850   : > { %v9822_v2 = vadd.f32 %v9821_v61, %v14097_v17  ;;  %v9823_v54 = vadd.f32 %v14255_v58, %v8222_v52  ;;  %v8224_v35 = vpop.f32.mrb[127].mxu1  ;;  %v8762_v15 = vmul.f32 %v14306_v21, %v14306_v21  ;;  %v14312_v22 = vmax.f32 %v8569_v3, %v8691_v55 }
 0x852   : > { %v8574_v39 = vadd.f32 %v9822_v2, %v14194_v42  ;;  %v9824_v19 = vadd.f32 %v9823_v54, %v14099_v46  ;;  %8804 = vadd.xlane.f32.xlu0 %v8762_v15  ;;  %v8763_v45 = vmul.f32 %v14312_v22, %v14312_v22 }
 0x854   : > { %v8577_v8 = vadd.f32 %v9824_v19, %v14199_v56  ;;  %8806 = vadd.xlane.f32.xlu1 %v8763_v45  ;;  %v8692_v17 = vmul.f32 0.2, %v8574_v39 }
 0x855   : > { %v8227_v53 = vpop.f32.mrb[128].mxu1 }
 0x856   : > { %v9825_v18 = vadd.f32 %v14255_v58, %v8227_v53  ;;  %v8229_v10 = vpop.f32.mrb[129].mxu1  ;;  %v14320_v49 = vmax.f32 %v8574_v39, %v8692_v17  ;;  %v8693_v62 = vmul.f32 0.2, %v8577_v8 }
 0x857   : > { %v8230_v26 = vpop.f32.mrb[130].mxu1 }
 0x858   : > { %v9826_v42 = vadd.f32 %v9825_v18, %v14101_v60  ;;  %v9827_v46 = vadd.f32 %v14255_v58, %v8230_v26  ;;  %v8232_v33 = vpop.f32.mrb[131].mxu1  ;;  %v8764_v34 = vmul.f32 %v14320_v49, %v14320_v49  ;;  %v14326_v27 = vmax.f32 %v8577_v8, %v8693_v62  ;;  %v14360_v26 = vpop.f32.mrb[0].mxu0 }
 0x85a   : > { %v8582_v56 = vadd.f32 %v9826_v42, %v14189_v0  ;;  %v9828_v6 = vadd.f32 %v9827_v46, %v14103_v51  ;;  %8808 = vadd.xlane.f32.xlu0 %v8764_v34  ;;  %v8765_v4 = vmul.f32 %v14326_v27, %v14326_v27  ;;  %v14362_v42 = vpop.f32.mrb[1].mxu0 }
 0x85b   : > { %v14365_v33 = vpop.f32.mrb[2].mxu0 }
 0x85c   : > { %v8585_v48 = vadd.f32 %v9828_v6, %v14197_v38  ;;  %8810 = vadd.xlane.f32.xlu1 %v8765_v4  ;;  %v8694_v60 = vmul.f32 0.2, %v8582_v56 }
 0x85d   : > { %v8235_v43 = vpop.f32.mrb[132].mxu1 }
 0x85e   : > { %v9829_v30 = vadd.f32 %v14255_v58, %v8235_v43  ;;  %v8237_v14 = vpop.f32.mrb[133].mxu1  ;;  %v14334_v3 = vmax.f32 %v8582_v56, %v8694_v60  ;;  %v8695_v23 = vmul.f32 0.2, %v8585_v48  ;;  %v14367_v56 = vpop.f32.mrb[3].mxu0 }
 0x85f   : > { %v8238_v41 = vpop.f32.mrb[134].mxu1 }
 0x860   : > { %v9830_v0 = vadd.f32 %v9829_v30, %v14105_v16  ;;  %v9831_v51 = vadd.f32 %v14255_v58, %v8238_v41  ;;  %v8240_v61 = vpop.f32.mrb[135].mxu1  ;;  %v8766_v50 = vmul.f32 %v14334_v3, %v14334_v3  ;;  %v14340_v55 = vmax.f32 %v8585_v48, %v8695_v23 }
 0x862   : > { %v8590_v38 = vadd.f32 %v9830_v0, %v14210_v11  ;;  %v9832_v52 = vadd.f32 %v9831_v51, %v14107_v37  ;;  %8812 = vadd.xlane.f32.xlu0 %v8766_v50  ;;  %v8767_v2 = vmul.f32 %v14340_v55, %v14340_v55 }
 0x864   : > { %v8593_v54 = vadd.f32 %v9832_v52, %v14215_v25  ;;  %8814 = vadd.xlane.f32.xlu1 %v8767_v2  ;;  %v8696_v16 = vmul.f32 0.2, %v8590_v38 }
 0x865   : > { %v8243_v35 = vpop.f32.mrb[136].mxu1 }
 0x866   : > { %v9833_v15 = vadd.f32 %v14255_v58, %v8243_v35  ;;  %v8245_v39 = vpop.f32.mrb[137].mxu1  ;;  %v14348_v19 = vmax.f32 %v8590_v38, %v8696_v16  ;;  %v8697_v45 = vmul.f32 0.2, %v8593_v54 }
 0x867   : > { %v8246_v8 = vpop.f32.mrb[138].mxu1 }
 0x868   : > { %v9834_v11 = vadd.f32 %v9833_v15, %v14112_v20  ;;  %v9835_v37 = vadd.f32 %v14255_v58, %v8246_v8  ;;  %v8248_v17 = vpop.f32.mrb[139].mxu1  ;;  %v8768_v53 = vmul.f32 %v14348_v19, %v14348_v19  ;;  %v14354_v18 = vmax.f32 %v8593_v54, %v8697_v45 }
 0x86a   : > { %v8598_v25 = vadd.f32 %v9834_v11, %v14205_v40  ;;  %v9836_v10 = vadd.f32 %v9835_v37, %v14115_v59  ;;  %8816 = vadd.xlane.f32.xlu0 %v8768_v53  ;;  %v8769_v62 = vmul.f32 %v14354_v18, %v14354_v18 }
 0x86c   : > { %v8601_v20 = vadd.f32 %v9836_v10, %v14213_v57  ;;  %8818 = vadd.xlane.f32.xlu1 %v8769_v62  ;;  %v8698_v46 = vmul.f32 0.2, %v8598_v25 }
 0x86d   : > { %v8251_v34 = vpop.f32.mrb[140].mxu1 }
 0x86e   : > { %v9837_v40 = vadd.f32 %v14255_v58, %v8251_v34  ;;  %v8253_v59 = vpop.f32.mrb[141].mxu1  ;;  %v14370_v6 = vmax.f32 %v8598_v25, %v8698_v46  ;;  %v8699_v4 = vmul.f32 0.2, %v8601_v20 }
 0x86f   : > { %v8254_v48 = vpop.f32.mrb[142].mxu1 }
 0x870   : > { %v9838_v60 = vadd.f32 %v9837_v40, %v14121_v28  ;;  %v9839_v43 = vadd.f32 %v14255_v58, %v8254_v48  ;;  %v8256_v30 = vpop.f32.mrb[143].mxu1  ;;  %v8770_v57 = vmul.f32 %v14370_v6, %v14370_v6  ;;  %v14376_v14 = vmax.f32 %v8601_v20, %v8699_v4  ;;  %v14998_v40 = vld [vmem:[#allocation10_spill] sm:$0xff] }
 0x871   : > { %v14999_v48 = vld [vmem:[#allocation42_spill] sm:$0xff] }
 0x872   : > { %v8606_v23 = vadd.f32 %v9838_v60, %v14222_v36  ;;  %v9840_v41 = vadd.f32 %v9839_v43, %v14127_v24  ;;  %8820 = vadd.xlane.f32.xlu0 %v8770_v57  ;;  %v8771_v0 = vmul.f32 %v14376_v14, %v14376_v14 }
 0x874   : > { %v8609_v51 = vadd.f32 %v9840_v41, %v14226_v5  ;;  %8822 = vadd.xlane.f32.xlu1 %v8771_v0  ;;  %v8700_v28 = vmul.f32 0.2, %v8606_v23 }
 0x875   : > { %v8259_v61 = vpop.f32.mrb[144].mxu1 }
 0x876   : > { %v9841_v50 = vadd.f32 %v14255_v58, %v8259_v61  ;;  %v8261_v38 = vpop.f32.mrb[145].mxu1  ;;  %v14384_v52 = vmax.f32 %v8606_v23, %v8700_v28  ;;  %v8701_v2 = vmul.f32 0.2, %v8609_v51 }
 0x877   : > { %v8262_v54 = vpop.f32.mrb[146].mxu1 }
 0x878   : > { %v9842_v36 = vadd.f32 %v9841_v50, %v14133_v47  ;;  %v9843_v24 = vadd.f32 %v14255_v58, %v8262_v54  ;;  %v8264_v16 = vpop.f32.mrb[147].mxu1  ;;  %v8772_v35 = vmul.f32 %v14384_v52, %v14384_v52  ;;  %v14390_v15 = vmax.f32 %v8609_v51, %v8701_v2  ;;  %v15000_v50 = vld [vmem:[#allocation41_spill] sm:$0xff] }
 0x87a   : > { %v8614_v5 = vadd.f32 %v9842_v36, %v14220_v9  ;;  %v9844_v39 = vadd.f32 %v9843_v24, %v14139_v29  ;;  %8824 = vadd.xlane.f32.xlu0 %v8772_v35  ;;  %v8773_v45 = vmul.f32 %v14390_v15, %v14390_v15  ;;  %v15001_v24 = vld [vmem:[#allocation55_spill] sm:$0xff] }
 0x87c   : > { %v8617_v8 = vadd.f32 %v9844_v39, %v14224_v63  ;;  %8826 = vadd.xlane.f32.xlu1 %v8773_v45  ;;  %v8702_v47 = vmul.f32 0.2, %v8614_v5  ;;  %v14997_v63 = vld [vmem:[#allocation53_spill] sm:$0xff] }
 0x87d   : > { %v8267_v11 = vpop.f32.mrb[148].mxu1 }
 0x87e   : > { %v9845_v37 = vadd.f32 %v14255_v58, %v8267_v11  ;;  %v8269_v17 = vpop.f32.mrb[149].mxu1  ;;  %v14398_v53 = vmax.f32 %v8614_v5, %v8702_v47  ;;  %v8703_v25 = vmul.f32 0.2, %v8617_v8 }
 0x87f   : > { %v8270_v10 = vpop.f32.mrb[150].mxu1 }
 0x880   : > { %v9846_v9 = vadd.f32 %v9845_v37, %v14145_v1  ;;  %v9847_v29 = vadd.f32 %v14255_v58, %v8270_v10  ;;  %v8272_v62 = vpop.f32.mrb[151].mxu1  ;;  %v8774_v20 = vmul.f32 %v14398_v53, %v14398_v53  ;;  %v14404_v46 = vmax.f32 %v8617_v8, %v8703_v25  ;;  %v15002_v25 = vld [vmem:[#allocation52_spill] sm:$0xff] }
 0x882   : > { %v8622_v34 = vadd.f32 %v9846_v9, %v14997_v63  ;;  %v9848_v59 = vadd.f32 %v9847_v29, %v14998_v40  ;;  %8828 = vadd.xlane.f32.xlu0 %v8774_v20  ;;  %v8775_v4 = vmul.f32 %v14404_v46, %v14404_v46 }
 0x884   : > { %v8625_v60 = vadd.f32 %v9848_v59, %v14999_v48  ;;  %8830 = vadd.xlane.f32.xlu1 %v8775_v4  ;;  %v8704_v1 = vmul.f32 0.2, %v8622_v34  ;;  %v15003_v59 = vld [vmem:[#allocation44_spill] sm:$0xff] }
 0x886   : > { %v14411_v43 = vmax.f32 %v8622_v34, %v8704_v1  ;;  %v8705_v30 = vmul.f32 0.2, %v8625_v60 }
 0x888   : > { %v8776_v57 = vmul.f32 %v14411_v43, %v14411_v43  ;;  %v14415_v23 = vmax.f32 %v8625_v60, %v8705_v30 }
 0x88a   : > { %8832 = vadd.xlane.f32.xlu0 %v8776_v57  ;;  %v8777_v41 = vmul.f32 %v14415_v23, %v14415_v23 }
 0x88c   : > { %8834 = vadd.xlane.f32.xlu1 %v8777_v41 }
 0x8bd   : > { %v8452_v0 = vpop.f32.mrb[152].mxu1 }
 0x8be   : > { %v9849_v51 = vadd.f32 %v14255_v58, %v8452_v0  ;;  %v8454_v28 = vpop.f32.mrb[153].mxu1 }
 0x8bf   : > { %v8455_v61 = vpop.f32.mrb[154].mxu1 }
 0x8c0   : > { %v8630_v38 = vadd.f32 %v9849_v51, %v15000_v50  ;;  %v9850_v2 = vadd.f32 %v14255_v58, %v8455_v61  ;;  %v8457_v54 = vpop.f32.mrb[155].mxu1 }
 0x8c2   : > { %v8706_v36 = vmul.f32 0.2, %v8630_v38  ;;  %v8633_v16 = vadd.f32 %v9850_v2, %v15001_v24 }
 0x8c4   : > { %v8707_v35 = vmul.f32 0.2, %v8633_v16  ;;  %v14423_v5 = vmax.f32 %v8630_v38, %v8706_v36  ;;  %v15004_v38 = vld [vmem:[#allocation43_spill] sm:$0xff] }
 0x8c5   : > { %v8460_v39 = vpop.f32.mrb[156].mxu1 }
 0x8c6   : > { %v9851_v45 = vadd.f32 %v14255_v58, %v8460_v39  ;;  %v8462_v8 = vpop.f32.mrb[157].mxu1  ;;  %v8778_v47 = vmul.f32 %v14423_v5, %v14423_v5  ;;  %v14428_v11 = vmax.f32 %v8633_v16, %v8707_v35 }
 0x8c7   : > { %v8793_v37 = vpop.xlane.xlu0 %8792  ;;  %v8463_v17 = vpop.f32.mrb[158].mxu1  ;;  %v15005_v8 = vld [vmem:[#allocation54_spill] sm:$0xff] }
 0x8c8   : > { %v8638_v10 = vadd.f32 %v9851_v45, %v15002_v25  ;;  %v8864_v9 = vmul.f32 0.125, %v8793_v37  ;;  %v9852_v29 = vadd.f32 %v14255_v58, %v8463_v17  ;;  %v8465_v62 = vpop.f32.mrb[159].mxu1  ;;  %8836 = vadd.xlane.f32.xlu0 %v8778_v47  ;;  %v8779_v20 = vmul.f32 %v14428_v11, %v14428_v11 }
 0x8c9   : > { %v8795_v63 = vpop.xlane.xlu1 %8794 }
 0x8ca   : > { %v8708_v34 = vmul.f32 0.2, %v8638_v10  ;;  %v8900_v40 = vadd.f32 1e-08, %v8864_v9  ;;  %v8641_v4 = vadd.f32 %v9852_v29, %v15003_v59  ;;  %v8865_v48 = vmul.f32 0.125, %v8795_v63  ;;  %8838 = vadd.xlane.f32.xlu1 %v8779_v20 }
 0x8cc   : > { %10856 = vrsqrt.f32 %v8900_v40  ;;  %v8709_v60 = vmul.f32 0.2, %v8641_v4  ;;  %v8901_v1 = vadd.f32 1e-08, %v8865_v48  ;;  %v14435_v30 = vmax.f32 %v8638_v10, %v8708_v34 }
 0x8cd   : > { %v8468_v57 = vpop.f32.mrb[160].mxu1 }
 0x8ce   : > { %10858 = vrsqrt.f32 %v8901_v1  ;;  %v9853_v41 = vadd.f32 %v14255_v58, %v8468_v57  ;;  %v8470_v0 = vpop.f32.mrb[161].mxu1  ;;  %v8780_v51 = vmul.f32 %v14435_v30, %v14435_v30  ;;  %v14440_v28 = vmax.f32 %v8641_v4, %v8709_v60  ;;  %v15006_v60 = vld [vmem:[#allocation57_spill] sm:$0xff] }
 0x8cf   : > { %v8797_v61 = vpop.xlane.xlu0 %8796  ;;  %v8471_v50 = vpop.f32.mrb[162].mxu1 }
 0x8d0   : > { %v8646_v2 = vadd.f32 %v9853_v41, %v15004_v38  ;;  %v8866_v54 = vmul.f32 0.125, %v8797_v61  ;;  %v9854_v36 = vadd.f32 %v14255_v58, %v8471_v50  ;;  %v8473_v24 = vpop.f32.mrb[163].mxu1  ;;  %8840 = vadd.xlane.f32.xlu0 %v8780_v51  ;;  %v8781_v16 = vmul.f32 %v14440_v28, %v14440_v28 }
 0x8d1   : > { %v8799_v35 = vpop.xlane.xlu1 %8798 }
 0x8d2   : > { %v8710_v39 = vmul.f32 0.2, %v8646_v2  ;;  %v8902_v45 = vadd.f32 1e-08, %v8866_v54  ;;  %v8649_v47 = vadd.f32 %v9854_v36, %v15005_v8  ;;  %v8867_v37 = vmul.f32 0.125, %v8799_v35  ;;  %8842 = vadd.xlane.f32.xlu1 %v8781_v16 }
 0x8d4   : > { %v14448_v17 = vmax.f32 %v8646_v2, %v8710_v39  ;;  %10860 = vrsqrt.f32 %v8902_v45  ;;  %v8711_v25 = vmul.f32 0.2, %v8649_v47  ;;  %v8903_v10 = vadd.f32 1e-08, %v8867_v37  ;;  %v15007_v2 = vld [vmem:[#allocation46_spill] sm:$0xff] }
 0x8d5   : > { %v8476_v9 = vpop.f32.mrb[164].mxu1 }
 0x8d6   : > { %v10857_v29 = vpop.eup %10856  ;;  %v14455_v62 = vmax.f32 %v8649_v47, %v8711_v25  ;;  %10862 = vrsqrt.f32 %v8903_v10  ;;  %v9855_v20 = vadd.f32 %v14255_v58, %v8476_v9  ;;  %v8478_v63 = vpop.f32.mrb[165].mxu1  ;;  %v8782_v34 = vmul.f32 %v14448_v17, %v14448_v17 }
 0x8d7   : > { %v8972_v40 = vmul.f32 %v10857_v29, %v14264_v31  ;;  %v8801_v59 = vpop.xlane.xlu0 %8800  ;;  %v8479_v4 = vpop.f32.mrb[166].mxu1 }
 0x8d8   : > { %v10859_v48 = vpop.eup %10858  ;;  %v8654_v1 = vadd.f32 %v9855_v20, %v15006_v60  ;;  %v8868_v57 = vmul.f32 0.125, %v8801_v59  ;;  %v9856_v41 = vadd.f32 %v14255_v58, %v8479_v4  ;;  %v8481_v0 = vpop.f32.mrb[167].mxu1  ;;  %8844 = vadd.xlane.f32.xlu0 %v8782_v34  ;;  %v8783_v51 = vmul.f32 %v14455_v62, %v14455_v62  ;;  %v15008_v20 = vld [vmem:[#allocation45_spill] sm:$0xff] }
 0x8d9   : > { %9008 = vst [vmem:[%s14453_s26] sm:$0xff] %v8972_v40  ;;  %v8973_v61 = vmul.f32 %v10859_v48, %v14270_v44  ;;  %v8803_v50 = vpop.xlane.xlu1 %8802 }
 0x8da   : > { %v8712_v38 = vmul.f32 0.2, %v8654_v1  ;;  %v8904_v31 = vadd.f32 1e-08, %v8868_v57  ;;  %v8657_v54 = vadd.f32 %v9856_v41, %v15007_v2  ;;  %v8869_v36 = vmul.f32 0.125, %v8803_v50  ;;  %8846 = vadd.xlane.f32.xlu1 %v8783_v51  ;;  %v15009_v57 = vld [vmem:[#allocation59_spill] sm:$0xff] }
 0x8db   : > { %9009 = vst [vmem:[%s14453_s26 + $0x8] sm:$0xff] %v8973_v61 }
 0x8dc   : > { %v14469_v24 = vmax.f32 %v8654_v1, %v8712_v38  ;;  %10864 = vrsqrt.f32 %v8904_v31  ;;  %v8713_v16 = vmul.f32 0.2, %v8657_v54  ;;  %v8905_v35 = vadd.f32 1e-08, %v8869_v36 }
 0x8dd   : > { %v8484_v39 = vpop.f32.mrb[168].mxu1 }
 0x8de   : > { %v10861_v45 = vpop.eup %10860  ;;  %v14471_v8 = vmax.f32 %v8657_v54, %v8713_v16  ;;  %10866 = vrsqrt.f32 %v8905_v35  ;;  %v9857_v44 = vadd.f32 %v14255_v58, %v8484_v39  ;;  %v8486_v47 = vpop.f32.mrb[169].mxu1  ;;  %v8784_v37 = vmul.f32 %v14469_v24, %v14469_v24 }
 0x8df   : > { %v8974_v25 = vmul.f32 %v10861_v45, %v14278_v7  ;;  %v8805_v10 = vpop.xlane.xlu0 %8804  ;;  %v8487_v9 = vpop.f32.mrb[170].mxu1 }
 0x8e0   : > { %v10863_v29 = vpop.eup %10862  ;;  %v8662_v63 = vadd.f32 %v9857_v44, %v15008_v20  ;;  %v8870_v34 = vmul.f32 0.125, %v8805_v10  ;;  %v9858_v40 = vadd.f32 %v14255_v58, %v8487_v9  ;;  %v8489_v59 = vpop.f32.mrb[171].mxu1  ;;  %8848 = vadd.xlane.f32.xlu0 %v8784_v37  ;;  %v8785_v4 = vmul.f32 %v14471_v8, %v14471_v8 }
 0x8e1   : > { %9010 = vst [vmem:[%s14453_s26 + $0x10] sm:$0xff] %v8974_v25  ;;  %v8975_v48 = vmul.f32 %v10863_v29, %v14284_v32  ;;  %v8807_v60 = vpop.xlane.xlu1 %8806 }
 0x8e2   : > { %v8714_v1 = vmul.f32 0.2, %v8662_v63  ;;  %v8906_v7 = vadd.f32 1e-08, %v8870_v34  ;;  %v8665_v41 = vadd.f32 %v9858_v40, %v15009_v57  ;;  %v8871_v0 = vmul.f32 0.125, %v8807_v60  ;;  %8850 = vadd.xlane.f32.xlu1 %v8785_v4 }
 0x8e3   : > { %9011 = vst [vmem:[%s14453_s26 + $0x18] sm:$0xff] %v8975_v48 }
 0x8e4   : > { %v14485_v51 = vmax.f32 %v8662_v63, %v8714_v1  ;;  %10868 = vrsqrt.f32 %v8906_v7  ;;  %v8715_v61 = vmul.f32 0.2, %v8665_v41  ;;  %v8907_v50 = vadd.f32 1e-08, %v8871_v0 }
 0x8e5   : > { %v8492_v38 = vpop.f32.mrb[172].mxu1 }
 0x8e6   : > { %v10865_v31 = vpop.eup %10864  ;;  %v14487_v2 = vmax.f32 %v8665_v41, %v8715_v61  ;;  %10870 = vrsqrt.f32 %v8907_v50  ;;  %v9859_v32 = vadd.f32 %v14255_v58, %v8492_v38  ;;  %v8494_v54 = vpop.f32.mrb[173].mxu1  ;;  %v8786_v36 = vmul.f32 %v14485_v51, %v14485_v51 }
 0x8e7   : > { %v8976_v16 = vmul.f32 %v10865_v31, %v14292_v13  ;;  %v8809_v35 = vpop.xlane.xlu0 %8808  ;;  %v8495_v39 = vpop.f32.mrb[174].mxu1 }
 0x8e8   : > { %v10867_v45 = vpop.eup %10866  ;;  %v8670_v44 = vadd.f32 %v9859_v32, %v14362_v42  ;;  %v8872_v47 = vmul.f32 0.125, %v8809_v35  ;;  %v9860_v37 = vadd.f32 %v14255_v58, %v8495_v39  ;;  %v8497_v25 = vpop.f32.mrb[175].mxu1  ;;  %8852 = vadd.xlane.f32.xlu0 %v8786_v36  ;;  %v8787_v10 = vmul.f32 %v14487_v2, %v14487_v2 }
 0x8e9   : > { %9012 = vst [vmem:[%s14453_s26 + $0x20] sm:$0xff] %v8976_v16  ;;  %v8977_v9 = vmul.f32 %v10867_v45, %v14298_v12  ;;  %v8811_v29 = vpop.xlane.xlu1 %8810 }
 0x8ea   : > { %v8716_v20 = vmul.f32 0.2, %v8670_v44  ;;  %v8908_v13 = vadd.f32 1e-08, %v8872_v47  ;;  %v8673_v63 = vadd.f32 %v9860_v37, %v14367_v56  ;;  %v8873_v34 = vmul.f32 0.125, %v8811_v29  ;;  %8854 = vadd.xlane.f32.xlu1 %v8787_v10 }
 0x8eb   : > { %9013 = vst [vmem:[%s14453_s26 + $0x28] sm:$0xff] %v8977_v9 }
 0x8ec   : > { %v14501_v42 = vmax.f32 %v8670_v44, %v8716_v20  ;;  %10872 = vrsqrt.f32 %v8908_v13  ;;  %v8717_v40 = vmul.f32 0.2, %v8673_v63  ;;  %v8909_v59 = vadd.f32 1e-08, %v8873_v34 }
 0x8ed   : > { %v8500_v4 = vpop.f32.mrb[176].mxu1 }
 0x8ee   : > { %v10869_v48 = vpop.eup %10868  ;;  %v14503_v60 = vmax.f32 %v8673_v63, %v8717_v40  ;;  %10874 = vrsqrt.f32 %v8909_v59  ;;  %v9861_v12 = vadd.f32 %v14255_v58, %v8500_v4  ;;  %v8502_v1 = vpop.f32.mrb[177].mxu1  ;;  %v8788_v56 = vmul.f32 %v14501_v42, %v14501_v42 }
 0x8ef   : > { %v8978_v7 = vmul.f32 %v10869_v48, %v14306_v21  ;;  %v8813_v57 = vpop.xlane.xlu0 %8812  ;;  %v8503_v41 = vpop.f32.mrb[178].mxu1 }
 0x8f0   : > { %v10871_v0 = vpop.eup %10870  ;;  %v8678_v61 = vadd.f32 %v9861_v12, %v14360_v26  ;;  %v8874_v50 = vmul.f32 0.125, %v8813_v57  ;;  %v9862_v38 = vadd.f32 %v14255_v58, %v8503_v41  ;;  %v8505_v31 = vpop.f32.mrb[179].mxu1  ;;  %8856 = vadd.xlane.f32.xlu0 %v8788_v56  ;;  %v8789_v32 = vmul.f32 %v14503_v60, %v14503_v60 }
 0x8f1   : > { %9014 = vst [vmem:[%s14453_s26 + $0x30] sm:$0xff] %v8978_v7  ;;  %v8979_v54 = vmul.f32 %v10871_v0, %v14312_v22  ;;  %v8815_v36 = vpop.xlane.xlu1 %8814 }
 0x8f2   : > { %v8718_v16 = vmul.f32 0.2, %v8678_v61  ;;  %v8910_v21 = vadd.f32 1e-08, %v8874_v50  ;;  %v8681_v35 = vadd.f32 %v9862_v38, %v14365_v33  ;;  %v8875_v39 = vmul.f32 0.125, %v8815_v36  ;;  %8858 = vadd.xlane.f32.xlu1 %v8789_v32 }
 0x8f3   : > { %9015 = vst [vmem:[%s14453_s26 + $0x38] sm:$0xff] %v8979_v54 }
 0x8f4   : > { %v14517_v26 = vmax.f32 %v8678_v61, %v8718_v16  ;;  %10876 = vrsqrt.f32 %v8910_v21  ;;  %v8719_v58 = vmul.f32 0.2, %v8681_v35  ;;  %v8911_v45 = vadd.f32 1e-08, %v8875_v39 }
 0x8f6   : > { %v10873_v44 = vpop.eup %10872  ;;  %v14519_v47 = vmax.f32 %v8681_v35, %v8719_v58  ;;  %10878 = vrsqrt.f32 %v8911_v45  ;;  %v8790_v22 = vmul.f32 %v14517_v26, %v14517_v26 }
 0x8f7   : > { %v8980_v37 = vmul.f32 %v10873_v44, %v14320_v49  ;;  %v8817_v33 = vpop.xlane.xlu0 %8816 }
 0x8f8   : > { %v10875_v25 = vpop.eup %10874  ;;  %v8876_v10 = vmul.f32 0.125, %v8817_v33  ;;  %8860 = vadd.xlane.f32.xlu0 %v8790_v22  ;;  %v8791_v9 = vmul.f32 %v14519_v47, %v14519_v47 }
 0x8f9   : > { %9016 = vst [vmem:[%s14453_s26 + $0x40] sm:$0xff] %v8980_v37  ;;  %v8981_v29 = vmul.f32 %v10875_v25, %v14326_v27  ;;  %v8819_v20 = vpop.xlane.xlu1 %8818 }
 0x8fa   : > { %v8912_v13 = vadd.f32 1e-08, %v8876_v10  ;;  %v8877_v63 = vmul.f32 0.125, %v8819_v20  ;;  %8862 = vadd.xlane.f32.xlu1 %v8791_v9 }
 0x8fb   : > { %9017 = vst [vmem:[%s14453_s26 + $0x48] sm:$0xff] %v8981_v29 }
 0x8fc   : > { %10880 = vrsqrt.f32 %v8912_v13  ;;  %v8913_v34 = vadd.f32 1e-08, %v8877_v63 }
 0x8fe   : > { %v10877_v49 = vpop.eup %10876  ;;  %10882 = vrsqrt.f32 %v8913_v34 }
 0x8ff   : > { %v8982_v40 = vmul.f32 %v10877_v49, %v14334_v3  ;;  %v8821_v59 = vpop.xlane.xlu0 %8820 }
 0x900   : > { %v10879_v4 = vpop.eup %10878  ;;  %v8878_v48 = vmul.f32 0.125, %v8821_v59 }
 0x901   : > { %9018 = vst [vmem:[%s14453_s26 + $0x50] sm:$0xff] %v8982_v40  ;;  %v8983_v12 = vmul.f32 %v10879_v4, %v14340_v55  ;;  %v8823_v27 = vpop.xlane.xlu1 %8822 }
 0x902   : > { %v8914_v1 = vadd.f32 1e-08, %v8878_v48  ;;  %v8879_v56 = vmul.f32 0.125, %v8823_v27 }
 0x903   : > { %9019 = vst [vmem:[%s14453_s26 + $0x58] sm:$0xff] %v8983_v12 }
 0x904   : > { %10884 = vrsqrt.f32 %v8914_v1  ;;  %v8915_v7 = vadd.f32 1e-08, %v8879_v56 }
 0x906   : > { %v10881_v57 = vpop.eup %10880  ;;  %10886 = vrsqrt.f32 %v8915_v7 }
 0x907   : > { %v8984_v41 = vmul.f32 %v10881_v57, %v14348_v19  ;;  %v8825_v0 = vpop.xlane.xlu0 %8824 }
 0x908   : > { %v10883_v3 = vpop.eup %10882  ;;  %v8880_v61 = vmul.f32 0.125, %v8825_v0 }
 0x909   : > { %9020 = vst [vmem:[%s14453_s26 + $0x60] sm:$0xff] %v8984_v41  ;;  %v8985_v50 = vmul.f32 %v10883_v3, %v14354_v18  ;;  %v8827_v38 = vpop.xlane.xlu1 %8826 }
 0x90a   : > { %v8916_v55 = vadd.f32 1e-08, %v8880_v61  ;;  %v8881_v31 = vmul.f32 0.125, %v8827_v38 }
 0x90b   : > { %9021 = vst [vmem:[%s14453_s26 + $0x68] sm:$0xff] %v8985_v50 }
 0x90c   : > { %10888 = vrsqrt.f32 %v8916_v55  ;;  %v8917_v32 = vadd.f32 1e-08, %v8881_v31 }
 0x90e   : > { %v10885_v54 = vpop.eup %10884  ;;  %10890 = vrsqrt.f32 %v8917_v32 }
 0x90f   : > { %v8986_v36 = vmul.f32 %v10885_v54, %v14370_v6  ;;  %v8829_v16 = vpop.xlane.xlu0 %8828 }
 0x910   : > { %v10887_v19 = vpop.eup %10886  ;;  %v8882_v21 = vmul.f32 0.125, %v8829_v16 }
 0x911   : > { %9022 = vst [vmem:[%s14453_s26 + $0x70] sm:$0xff] %v8986_v36  ;;  %v8987_v35 = vmul.f32 %v10887_v19, %v14376_v14  ;;  %v8831_v39 = vpop.xlane.xlu1 %8830 }
 0x912   : > { %v8918_v18 = vadd.f32 1e-08, %v8882_v21  ;;  %v8883_v58 = vmul.f32 0.125, %v8831_v39 }
 0x913   : > { %9023 = vst [vmem:[%s14453_s26 + $0x78] sm:$0xff] %v8987_v35 }
 0x914   : > { %10892 = vrsqrt.f32 %v8918_v18  ;;  %v8919_v45 = vadd.f32 1e-08, %v8883_v58 }
 0x916   : > { %v10889_v44 = vpop.eup %10888  ;;  %10894 = vrsqrt.f32 %v8919_v45 }
 0x917   : > { %v8988_v22 = vmul.f32 %v10889_v44, %v14384_v52  ;;  %v8833_v6 = vpop.xlane.xlu0 %8832 }
 0x918   : > { %v10891_v37 = vpop.eup %10890  ;;  %v8884_v33 = vmul.f32 0.125, %v8833_v6 }
 0x919   : > { %9024 = vst [vmem:[%s14453_s26 + $0x80] sm:$0xff] %v8988_v22  ;;  %v8989_v25 = vmul.f32 %v10891_v37, %v14390_v15  ;;  %v8835_v14 = vpop.xlane.xlu1 %8834 }
 0x91a   : > { %v8920_v10 = vadd.f32 1e-08, %v8884_v33  ;;  %v8885_v9 = vmul.f32 0.125, %v8835_v14 }
 0x91b   : > { %9025 = vst [vmem:[%s14453_s26 + $0x88] sm:$0xff] %v8989_v25 }
 0x91c   : > { %10896 = vrsqrt.f32 %v8920_v10  ;;  %v8921_v29 = vadd.f32 1e-08, %v8885_v9 }
 0x91e   : > { %v10893_v20 = vpop.eup %10892  ;;  %10898 = vrsqrt.f32 %v8921_v29 }
 0x91f   : > { %v8990_v52 = vmul.f32 %v10893_v20, %v14398_v53 }
 0x920   : > { %v10895_v13 = vpop.eup %10894 }
 0x921   : > { %9026 = vst [vmem:[%s14453_s26 + $0x90] sm:$0xff] %v8990_v52  ;;  %v8991_v63 = vmul.f32 %v10895_v13, %v14404_v46 }
 0x923   : > { %9027 = vst [vmem:[%s14453_s26 + $0x98] sm:$0xff] %v8991_v63 }
 0x926   : > { %v10897_v34 = vpop.eup %10896 }
 0x927   : > { %v8992_v15 = vmul.f32 %v10897_v34, %v14411_v43 }
 0x928   : > { %v10899_v49 = vpop.eup %10898 }
 0x929   : > { %9028 = vst [vmem:[%s14453_s26 + $0xa0] sm:$0xff] %v8992_v15  ;;  %v8993_v40 = vmul.f32 %v10899_v49, %v14415_v23 }
 0x92b   : > { %9029 = vst [vmem:[%s14453_s26 + $0xa8] sm:$0xff] %v8993_v40 }
 0x955   : > { %v8837_v59 = vpop.xlane.xlu0 %8836 }
 0x956   : > { %v8886_v4 = vmul.f32 0.125, %v8837_v59 }
 0x957   : > { %v8839_v48 = vpop.xlane.xlu1 %8838 }
 0x958   : > { %v8922_v12 = vadd.f32 1e-08, %v8886_v4  ;;  %v8887_v27 = vmul.f32 0.125, %v8839_v48 }
 0x95a   : > { %10900 = vrsqrt.f32 %v8922_v12  ;;  %v8923_v53 = vadd.f32 1e-08, %v8887_v27 }
 0x95c   : > { %10902 = vrsqrt.f32 %v8923_v53 }
 0x95d   : > { %v8841_v1 = vpop.xlane.xlu0 %8840 }
 0x95e   : > { %v8888_v46 = vmul.f32 0.125, %v8841_v1 }
 0x95f   : > { %v8843_v56 = vpop.xlane.xlu1 %8842 }
 0x960   : > { %v8924_v7 = vadd.f32 1e-08, %v8888_v46  ;;  %v8889_v43 = vmul.f32 0.125, %v8843_v56 }
 0x962   : > { %10904 = vrsqrt.f32 %v8924_v7  ;;  %v8925_v57 = vadd.f32 1e-08, %v8889_v43 }
 0x964   : > { %v10901_v41 = vpop.eup %10900  ;;  %10906 = vrsqrt.f32 %v8925_v57 }
 0x965   : > { %v8994_v23 = vmul.f32 %v10901_v41, %v14423_v5  ;;  %v8845_v0 = vpop.xlane.xlu0 %8844 }
 0x966   : > { %v10903_v3 = vpop.eup %10902  ;;  %v8890_v61 = vmul.f32 0.125, %v8845_v0 }
 0x967   : > { %9030 = vst [vmem:[%s14453_s26 + $0xb0] sm:$0xff] %v8994_v23  ;;  %v8995_v50 = vmul.f32 %v10903_v3, %v14428_v11  ;;  %v8847_v38 = vpop.xlane.xlu1 %8846 }
 0x968   : > { %v8926_v55 = vadd.f32 1e-08, %v8890_v61  ;;  %v8891_v31 = vmul.f32 0.125, %v8847_v38 }
 0x969   : > { %9031 = vst [vmem:[%s14453_s26 + $0xb8] sm:$0xff] %v8995_v50 }
 0x96a   : > { %10908 = vrsqrt.f32 %v8926_v55  ;;  %v8927_v32 = vadd.f32 1e-08, %v8891_v31 }
 0x96c   : > { %v10905_v54 = vpop.eup %10904  ;;  %10910 = vrsqrt.f32 %v8927_v32 }
 0x96d   : > { %v8996_v36 = vmul.f32 %v10905_v54, %v14435_v30  ;;  %v8849_v16 = vpop.xlane.xlu0 %8848 }
 0x96e   : > { %v10907_v5 = vpop.eup %10906  ;;  %v8892_v19 = vmul.f32 0.125, %v8849_v16 }
 0x96f   : > { %9032 = vst [vmem:[%s14453_s26 + $0xc0] sm:$0xff] %v8996_v36  ;;  %v8997_v21 = vmul.f32 %v10907_v5, %v14440_v28  ;;  %v8851_v35 = vpop.xlane.xlu1 %8850 }
 0x970   : > { %v8928_v11 = vadd.f32 1e-08, %v8892_v19  ;;  %v8893_v39 = vmul.f32 0.125, %v8851_v35 }
 0x971   : > { %9033 = vst [vmem:[%s14453_s26 + $0xc8] sm:$0xff] %v8997_v21 }
 0x972   : > { %10912 = vrsqrt.f32 %v8928_v11  ;;  %v8929_v18 = vadd.f32 1e-08, %v8893_v39 }
 0x974   : > { %v10909_v58 = vpop.eup %10908  ;;  %10914 = vrsqrt.f32 %v8929_v18 }
 0x975   : > { %v8998_v45 = vmul.f32 %v10909_v58, %v14448_v17  ;;  %v8853_v44 = vpop.xlane.xlu0 %8852 }
 0x976   : > { %v10911_v30 = vpop.eup %10910  ;;  %v8894_v22 = vmul.f32 0.125, %v8853_v44 }
 0x977   : > { %9034 = vst [vmem:[%s14453_s26 + $0xd0] sm:$0xff] %v8998_v45  ;;  %v8999_v6 = vmul.f32 %v10911_v30, %v14455_v62  ;;  %v8855_v37 = vpop.xlane.xlu1 %8854 }
 0x978   : > { %v8930_v28 = vadd.f32 1e-08, %v8894_v22  ;;  %v8895_v33 = vmul.f32 0.125, %v8855_v37 }
 0x979   : > { %9035 = vst [vmem:[%s14453_s26 + $0xd8] sm:$0xff] %v8999_v6 }
 0x97a   : > { %10916 = vrsqrt.f32 %v8930_v28  ;;  %v8931_v25 = vadd.f32 1e-08, %v8895_v33 }
 0x97c   : > { %v10913_v14 = vpop.eup %10912  ;;  %10918 = vrsqrt.f32 %v8931_v25 }
 0x97d   : > { %v9000_v10 = vmul.f32 %v10913_v14, %v14469_v24  ;;  %v8857_v9 = vpop.xlane.xlu0 %8856 }
 0x97e   : > { %v10915_v17 = vpop.eup %10914  ;;  %v8896_v29 = vmul.f32 0.125, %v8857_v9 }
 0x97f   : > { %9036 = vst [vmem:[%s14453_s26 + $0xe0] sm:$0xff] %v9000_v10  ;;  %v9001_v20 = vmul.f32 %v10915_v17, %v14471_v8  ;;  %v8859_v52 = vpop.xlane.xlu1 %8858 }
 0x980   : > { %v8932_v62 = vadd.f32 1e-08, %v8896_v29  ;;  %v8897_v13 = vmul.f32 0.125, %v8859_v52 }
 0x981   : > { %9037 = vst [vmem:[%s14453_s26 + $0xe8] sm:$0xff] %v9001_v20 }
 0x982   : > { %10920 = vrsqrt.f32 %v8932_v62  ;;  %v8933_v63 = vadd.f32 1e-08, %v8897_v13 }
 0x984   : > { %v10917_v34 = vpop.eup %10916  ;;  %10922 = vrsqrt.f32 %v8933_v63 }
 0x985   : > { %v9002_v15 = vmul.f32 %v10917_v34, %v14485_v51  ;;  %v8861_v24 = vpop.xlane.xlu0 %8860 }
 0x986   : > { %v10919_v49 = vpop.eup %10918  ;;  %v8898_v40 = vmul.f32 0.125, %v8861_v24 }
 0x987   : > { %9038 = vst [vmem:[%s14453_s26 + $0xf0] sm:$0xff] %v9002_v15  ;;  %v9003_v59 = vmul.f32 %v10919_v49, %v14487_v2  ;;  %v8863_v8 = vpop.xlane.xlu1 %8862 }
 0x988   : > { %v8934_v4 = vadd.f32 1e-08, %v8898_v40  ;;  %v8899_v48 = vmul.f32 0.125, %v8863_v8 }
 0x989   : > { %9039 = vst [vmem:[%s14453_s26 + $0xf8] sm:$0xff] %v9003_v59 }
 0x98a   : > { %10924 = vrsqrt.f32 %v8934_v4  ;;  %v8935_v12 = vadd.f32 1e-08, %v8899_v48 }
 0x98c   : > { %v10921_v27 = vpop.eup %10920  ;;  %10926 = vrsqrt.f32 %v8935_v12 }
 0x98d   : > { %v9004_v51 = vmul.f32 %v10921_v27, %v14501_v42 }
 0x98e   : > { %v10923_v53 = vpop.eup %10922 }
 0x98f   : > { %9040 = vst [vmem:[%s14453_s26 + $0x100] sm:$0xff] %v9004_v51  ;;  %v9005_v1 = vmul.f32 %v10923_v53, %v14503_v60 }
 0x991   : > { %9041 = vst [vmem:[%s14453_s26 + $0x108] sm:$0xff] %v9005_v1 }
 0x994   : > { %v10925_v46 = vpop.eup %10924 }
 0x995   : > { %v9006_v2 = vmul.f32 %v10925_v46, %v14517_v26 }
 0x996   : > { %v10927_v56 = vpop.eup %10926 }
 0x997   : > { %9042 = vst [vmem:[%s14453_s26 + $0x110] sm:$0xff] %v9006_v2  ;;  %v9007_v7 = vmul.f32 %v10927_v56, %v14519_v47 }
 0x999   : > { %9043 = vst [vmem:[%s14453_s26 + $0x118] sm:$0xff] %v9007_v7 }
 0x99a PF: > { %s17_s24 = sadd.s32 1, %s10954_s24  }
 0x99b   : > { %p14_p4 = scmp.ge.s32.totalorder %s17_s24, 4  }
 0x99d   :  { %16 = sbr.rel (!%p14_p4) target bundleno = 1 (0x1), region = 78 }

</bundles_post_ra>
